<compile_context>
chip_gen: v7x
topology: tpu7x:2x2x1
jax: 0.10.0
libtpu: 0.0.40
codegen_flags: <defaults>
</compile_context>

<pallas_src>
import jax
import jax.numpy as jnp
from jax import lax
from jax.experimental import pallas as pl
from jax.experimental.pallas import tpu as pltpu

# ----------------------------------------------------------------------------
# constants (norse LIFParameters defaults / PyTorch BatchNorm eps)
# ----------------------------------------------------------------------------
BN_EPS = 1e-5
DT = 1e-3
TAU_SYN_INV = 200.0   # 1 / 5e-3
TAU_MEM_INV = 100.0   # 1 / 1e-2
V_LEAK = 0.0
V_TH = 1.0
V_RESET = 0.0

MATMUL_DTYPE = jnp.bfloat16   # MXU operand dtype (f32 accumulation)
SPIKE_DTYPE = jnp.bfloat16    # spike writeback dtype (exact 0/1)


# ----------------------------------------------------------------------------
# small helpers
# ----------------------------------------------------------------------------
def _round_up(x, m):
    return (x + m - 1) // m * m


def _fold(m, c):
    """Fold factor so the lane (minor) dim becomes >=128 wide (lane-dense)."""
    if c >= 128 or 128 % c != 0:
        return 1
    f = 128 // c
    return f if m % f == 0 else 1


def _row_tile(m, target=512):
    """Row-block size for elementwise kernels: multiple of 16 or full dim."""
    if m <= target:
        return m
    for t in (512, 256, 128, 64, 32, 16):
        if m % t == 0:
            return t
    return m


def _spike_dtype(mf):
    # bf16 stores only when the second-minor block dim is 16-aligned.
    return SPIKE_DTYPE if mf % 16 == 0 else jnp.float32


# ----------------------------------------------------------------------------
# Pallas kernels
# ----------------------------------------------------------------------------
def _matmul_kernel(a_ref, b_ref, o_ref, acc_ref):
    @pl.when(pl.program_id(2) == 0)
    def _():
        acc_ref[...] = jnp.zeros_like(acc_ref)

    acc_ref[...] += jnp.dot(a_ref[...], b_ref[...],
                            preferred_element_type=jnp.float32)

    @pl.when(pl.program_id(2) == pl.num_programs(2) - 1)
    def _():
        o_ref[...] = acc_ref[...]


def _bn_stats_kernel(y_ref, sum_ref, sq_ref):
    @pl.when(pl.program_id(0) == 0)
    def _():
        sum_ref[...] = jnp.zeros_like(sum_ref)
        sq_ref[...] = jnp.zeros_like(sq_ref)

    y = y_ref[...]
    sum_ref[...] += jnp.sum(y, axis=0, keepdims=True)
    sq_ref[...] += jnp.sum(y * y, axis=0, keepdims=True)


def _make_bn_lif_kernel(has_res, res_bn):
    """Fused BatchNorm-apply (+residual, optionally BN'ed) + LIF cell."""
    def kernel(*refs):
        it = iter(refs)
        y_ref = next(it)
        r_ref = next(it) if has_res else None
        mean_ref = next(it)
        scale_ref = next(it)
        if has_res and res_bn:
            rmean_ref = next(it)
            rscale_ref = next(it)
        v_ref = next(it)
        i_ref = next(it)
        z_ref = next(it)
        v_out_ref = next(it)
        i_out_ref = next(it)

        inp = (y_ref[...] - mean_ref[...]) * scale_ref[...]
        if has_res:
            r = r_ref[...].astype(jnp.float32)
            if res_bn:
                r = (r - rmean_ref[...]) * rscale_ref[...]
            inp = inp + r

        v = v_ref[...]
        cur = i_ref[...]
        v_dec = v + DT * TAU_MEM_INV * ((V_LEAK - v) + cur)
        i_dec = cur - DT * TAU_SYN_INV * cur
        z = (v_dec > V_TH).astype(jnp.float32)
        z_ref[...] = z.astype(z_ref.dtype)
        v_out_ref[...] = (1.0 - z) * v_dec + z * V_RESET
        i_out_ref[...] = i_dec + inp
    return kernel


def _sumpool_kernel(x_ref, o_ref):
    # x: (K*K, rows, C) shifted-window slabs -> sum over window taps
    o_ref[...] = jnp.sum(x_ref[...].astype(jnp.float32), axis=0).astype(o_ref.dtype)


def _avgpool_kernel(x_ref, o_ref):
    # x: (1, H*W, C) -> (1, 1, C) adaptive average pool to 1x1
    o_ref[...] = jnp.mean(x_ref[...].astype(jnp.float32), axis=1, keepdims=True)


# ----------------------------------------------------------------------------
# tiled MXU matmul (bf16 operands, f32 accumulation)
# ----------------------------------------------------------------------------
def pallas_matmul(a, b):
    """(M, K) @ (K, N) -> (M, N) float32."""
    M, K = a.shape
    K2, N = b.shape
    assert K == K2
    a = a.astype(MATMUL_DTYPE)
    b = b.astype(MATMUL_DTYPE)

    # 256-wide tiles match the v6e/v7x 256x256 MXU; still fine on v5e's 128.
    if M >= 256:
        tm = 256
        Mp = _round_up(M, tm)
    else:
        tm = Mp = _round_up(M, 16)
    tn = 256 if N > 256 else N
    Np = _round_up(N, tn)
    Kp = _round_up(K, 128)
    tk = 256 if Kp % 256 == 0 else 128

    if (Mp, Kp) != (M, K):
        a = jnp.pad(a, ((0, Mp - M), (0, Kp - K)))
    if (Kp, Np) != (K, N):
        b = jnp.pad(b, ((0, Kp - K), (0, Np - N)))

    out = pl.pallas_call(
        _matmul_kernel,
        grid=(Mp // tm, Np // tn, Kp // tk),
        in_specs=[pl.BlockSpec((tm, tk), lambda i, j, k: (i, k)),
                  pl.BlockSpec((tk, tn), lambda i, j, k: (k, j))],
        out_shape=jax.ShapeDtypeStruct((Mp, Np), jnp.float32),
        out_specs=pl.BlockSpec((tm, tn), lambda i, j, k: (i, j)),
        scratch_shapes=[pltpu.VMEM((tm, tn), jnp.float32)],
        compiler_params=pltpu.CompilerParams(
            dimension_semantics=("parallel", "parallel", "arbitrary")),
    )(a, b)
    if (Mp, Np) != (M, N):
        out = out[:M, :N]
    return out


# ----------------------------------------------------------------------------
# conv / BN-stats / fused BN+LIF / pooling wrappers
# ----------------------------------------------------------------------------
def conv2d(x_nhwc, w_oihw, stride, pad):
    """Conv2d (bias=False) via im2col + tiled Pallas matmul.

    Returns (flat_output (M, cout) f32, output NHWC shape).
    """
    cout, cin, kh, kw = w_oihw.shape
    n, h, w, c = x_nhwc.shape
    assert c == cin
    x_nhwc = x_nhwc.astype(MATMUL_DTYPE)
    xp = jnp.pad(x_nhwc, ((0, 0), (pad, pad), (pad, pad), (0, 0))) if pad else x_nhwc
    oh = (h + 2 * pad - kh) // stride + 1
    ow = (w + 2 * pad - kw) // stride + 1
    # TODO(synk): im2col still materializes kh*kw shifted copies in HBM; a
    # tap-reduction grid axis reading shifted windows of the padded NHWC tensor
    # directly would cut conv-input HBM traffic by ~kh*kw (flagged in review).
    cols = [xp[:, i:i + stride * oh:stride, j:j + stride * ow:stride, :]
            for i in range(kh) for j in range(kw)]
    patches = jnp.concatenate(cols, axis=-1).reshape(n * oh * ow, kh * kw * cin)
    wmat = jnp.transpose(w_oihw, (2, 3, 1, 0)).reshape(kh * kw * cin, cout)
    y = pallas_matmul(patches, wmat)
    return y, (n, oh, ow, cout)


def bn_stats(y):
    """Per-channel mean and 1/sqrt(var+eps) (training-mode batch statistics)."""
    M, C = y.shape
    fold = _fold(M, C)
    Mf, Cw = M // fold, C * fold
    yf = y.reshape(Mf, Cw)
    tr = _row_tile(Mf)
    row_spec = pl.BlockSpec((tr, Cw), lambda r: (r, 0))
    vec_spec = pl.BlockSpec((1, Cw), lambda r: (0, 0))
    s, sq = pl.pallas_call(
        _bn_stats_kernel,
        grid=(Mf // tr,),
        in_specs=[row_spec],
        out_shape=(jax.ShapeDtypeStruct((1, Cw), jnp.float32),
                   jax.ShapeDtypeStruct((1, Cw), jnp.float32)),
        out_specs=(vec_spec, vec_spec),
        compiler_params=pltpu.CompilerParams(dimension_semantics=("arbitrary",)),
    )(yf)
    csum = s.reshape(fold, C).sum(axis=0)
    csq = sq.reshape(fold, C).sum(axis=0)
    mean = csum / M
    var = csq / M - mean * mean            # biased variance (torch training mode)
    scale = lax.rsqrt(var + BN_EPS)
    return mean, scale


def fused_bn_lif(y, mean, scale, v, i, residual=None, res_stats=None):
    """Fused BN-apply (+ residual add, optionally BN'ed) + LIF step.

    y, v, i: (M, C) f32.  residual: (M, C).  Returns (z, v_new, i_new) flat.
    """
    M, C = y.shape
    fold = _fold(M, C)
    Mf, Cw = M // fold, C * fold
    zdtype = _spike_dtype(Mf)
    if residual is not None and residual.dtype != jnp.float32 and Mf % 16 != 0:
        residual = residual.astype(jnp.float32)

    def fold2d(t):
        return t.reshape(Mf, Cw)

    def foldvec(t):
        return jnp.tile(t.reshape(1, C), (1, fold))

    tr = _row_tile(Mf)
    row_spec = pl.BlockSpec((tr, Cw), lambda r: (r, 0))
    vec_spec = pl.BlockSpec((1, Cw), lambda r: (0, 0))

    inputs = [fold2d(y)]
    in_specs = [row_spec]
    if residual is not None:
        inputs.append(fold2d(residual))
        in_specs.append(row_spec)
    inputs += [foldvec(mean), foldvec(scale)]
    in_specs += [vec_spec, vec_spec]
    if res_stats is not None:
        rmean, rscale = res_stats
        inputs += [foldvec(rmean), foldvec(rscale)]
        in_specs += [vec_spec, vec_spec]
    inputs += [fold2d(v), fold2d(i)]
    in_specs += [row_spec, row_spec]
    n_in = len(inputs)

    kernel = _make_bn_lif_kernel(residual is not None, res_stats is not None)
    z, v2, i2 = pl.pallas_call(
        kernel,
        grid=(Mf // tr,),
        in_specs=in_specs,
        out_shape=(jax.ShapeDtypeStruct((Mf, Cw), zdtype),
                   jax.ShapeDtypeStruct((Mf, Cw), jnp.float32),
                   jax.ShapeDtypeStruct((Mf, Cw), jnp.float32)),
        out_specs=(row_spec, row_spec, row_spec),
        input_output_aliases={n_in - 2: 1, n_in - 1: 2},
        compiler_params=pltpu.CompilerParams(dimension_semantics=("parallel",)),
    )(*inputs)
    return z.reshape(M, C), v2.reshape(M, C), i2.reshape(M, C)


def sumpool2d(x_nhwc, k=3, stride=2, pad=1):
    n, h, w, c = x_nhwc.shape
    xp = jnp.pad(x_nhwc, ((0, 0), (pad, pad), (pad, pad), (0, 0)))
    oh = (h + 2 * pad - k) // stride + 1
    ow = (w + 2 * pad - k) // stride + 1
    # TODO(synk): the k*k shifted copies are still materialized in HBM; a
    # tap-reduction grid axis over the padded input would avoid the 9x blow-up.
    cols = [xp[:, i:i + stride * oh:stride, j:j + stride * ow:stride, :]
            for i in range(k) for j in range(k)]
    M = n * oh * ow
    fold = _fold(M, c)
    Mf, Cw = M // fold, c * fold
    stacked = jnp.stack(cols, axis=0).reshape(k * k, Mf, Cw)
    if Mf % 16 != 0 and stacked.dtype != jnp.float32:
        stacked = stacked.astype(jnp.float32)
    odtype = _spike_dtype(Mf)
    tr = _row_tile(Mf)
    y = pl.pallas_call(
        _sumpool_kernel,
        grid=(Mf // tr,),
        in_specs=[pl.BlockSpec((k * k, tr, Cw), lambda r: (0, r, 0))],
        out_shape=jax.ShapeDtypeStruct((Mf, Cw), odtype),
        out_specs=pl.BlockSpec((tr, Cw), lambda r: (r, 0)),
        compiler_params=pltpu.CompilerParams(dimension_semantics=("parallel",)),
    )(stacked)
    return y.reshape(n, oh, ow, c)


def adaptive_avgpool(x_nhwc):
    n, h, w, c = x_nhwc.shape
    x3 = x_nhwc.reshape(n, h * w, c)
    y = pl.pallas_call(
        _avgpool_kernel,
        grid=(n,),
        in_specs=[pl.BlockSpec((1, h * w, c), lambda b: (b, 0, 0))],
        out_shape=jax.ShapeDtypeStruct((n, 1, c), jnp.float32),
        out_specs=pl.BlockSpec((1, 1, c), lambda b: (b, 0, 0)),
        compiler_params=pltpu.CompilerParams(dimension_semantics=("parallel",)),
    )(x3)
    return y.reshape(n, 1, 1, c)


# ----------------------------------------------------------------------------
# BasicBlock / layers / backbone
# ----------------------------------------------------------------------------
def basic_block(x_nhwc, bp, state, stride):
    (v1, i1), (v2, i2) = state
    n, h, w, c = x_nhwc.shape

    y1, shp1 = conv2d(x_nhwc, bp["conv1"], stride, 1)
    m1, sc1 = bn_stats(y1)
    z1, v1n, i1n = fused_bn_lif(y1, m1, sc1, v1, i1)
    z1_nhwc = z1.reshape(shp1)

    y2, shp2 = conv2d(z1_nhwc, bp["conv2"], 1, 1)
    m2, sc2 = bn_stats(y2)

    if "downsample" in bp:
        yd, _ = conv2d(x_nhwc, bp["downsample"], stride, 0)
        md, scd = bn_stats(yd)
        z2, v2n, i2n = fused_bn_lif(y2, m2, sc2, v2, i2,
                                    residual=yd, res_stats=(md, scd))
    else:
        x_flat = x_nhwc.reshape(n * h * w, c)
        z2, v2n, i2n = fused_bn_lif(y2, m2, sc2, v2, i2, residual=x_flat)

    return z2.reshape(shp2), ((v1n, i1n), (v2n, i2n))


def process_layer(x_nhwc, layer_params, layer_state, first_stride):
    new_state = []
    out = x_nhwc
    for idx, bp in enumerate(layer_params):
        stride = first_stride if idx == 0 else 1
        out, ns = basic_block(out, bp, layer_state[idx], stride)
        new_state.append(ns)
    # TODO(synk): the reference returns torch.stack(per-block spikes) and feeds
    # the 5-D stack into the next Conv2d layer, which is not executable in
    # PyTorch; we forward the last block's output (standard ResNet flow).
    return out, tuple(new_state)


def _conv_out(h, k, s, p):
    return (h + 2 * p - k) // s + 1


def init_states(batch, H, W, layers=(2, 2, 2, 2), planes_list=(64, 128, 256, 512)):
    """Zero LIF states (norse default: v=v_leak=0, i=0), stored flat (M, C)."""
    h = _conv_out(H, 7, 2, 3)
    w = _conv_out(W, 7, 2, 3)
    s0 = (jnp.zeros((batch * h * w, 64), jnp.float32),
          jnp.zeros((batch * h * w, 64), jnp.float32))
    h = _conv_out(h, 3, 2, 1)
    w = _conv_out(w, 3, 2, 1)
    states = [s0]
    for li, (planes, nblocks) in enumerate(zip(planes_list, layers)):
        layer_stride = 1 if li == 0 else 2
        blocks = []
        for b in range(nblocks):
            bs = layer_stride if b == 0 else 1
            h = _conv_out(h, 3, bs, 1)
            w = _conv_out(w, 3, bs, 1)
            m = batch * h * w
            zz = lambda: jnp.zeros((m, planes), jnp.float32)
            blocks.append(((zz(), zz()), (zz(), zz())))
        states.append(tuple(blocks))
    return tuple(states)


def resnet_backbone_forward(params, X):
    """X: (T, B, 3, H, W) NCHW sequence -> (T, B, 512, 1, 1)."""
    T, B, _, H, W = X.shape
    states0 = init_states(B, H, W)

    def step(states, x_frame):
        s0, s1, s2, s3, s4 = states
        x = jnp.transpose(x_frame, (0, 2, 3, 1))           # NCHW -> NHWC
        y, shp = conv2d(x, params["conv1"], 2, 3)          # 7x7 s2 p3
        mean, scale = bn_stats(y)
        z, v0, i0 = fused_bn_lif(y, mean, scale, s0[0], s0[1])
        x = sumpool2d(z.reshape(shp), 3, 2, 1)
        x, s1n = process_layer(x, params["layer1"], s1, first_stride=1)
        x, s2n = process_layer(x, params["layer2"], s2, first_stride=2)
        x, s3n = process_layer(x, params["layer3"], s3, first_stride=2)
        x, s4n = process_layer(x, params["layer4"], s4, first_stride=2)
        out = adaptive_avgpool(x)                          # (B,1,1,512)
        out = jnp.transpose(out, (0, 3, 1, 2))             # back to NCHW
        return ((v0, i0), s1n, s2n, s3n, s4n), out

    _, outs = lax.scan(step, states0, X)
    # TODO(synk): self.fc is declared in __init__ but never used in forward().
    return outs


# ----------------------------------------------------------------------------
# deterministic parameter init (kaiming-normal fan_out, BN weight=1 bias=0)
# ----------------------------------------------------------------------------
def _kaiming(key, cout, cin, kh, kw):
    std = (2.0 / (cout * kh * kw)) ** 0.5
    return jax.random.normal(key, (cout, cin, kh, kw), jnp.float32) * std


def init_params(key, layers=(2, 2, 2, 2)):
    params = {}
    key, k = jax.random.split(key)
    params["conv1"] = _kaiming(k, 64, 3, 7, 7)
    inplanes = 64
    for li, (planes, nblocks) in enumerate(zip((64, 128, 256, 512), layers)):
        layer_stride = 1 if li == 0 else 2
        blocks = []
        for b in range(nblocks):
            bstride = layer_stride if b == 0 else 1
            bp = {}
            key, k1 = jax.random.split(key)
            bp["conv1"] = _kaiming(k1, planes, inplanes, 3, 3)
            key, k2 = jax.random.split(key)
            bp["conv2"] = _kaiming(k2, planes, planes, 3, 3)
            if bstride != 1 or inplanes != planes:
                key, k3 = jax.random.split(key)
                bp["downsample"] = _kaiming(k3, planes, inplanes, 1, 1)
            inplanes = planes
            blocks.append(bp)
        params[f"layer{li + 1}"] = blocks
    return params


# ----------------------------------------------------------------------------
if __name__ == "__main__":
    root_key = jax.random.PRNGKey(0)
    pkey, xkey = jax.random.split(root_key)

    params = init_params(pkey)                     # ResNet-18 ('18') config
    # sequence of T=2 frames, batch=2, 3 channels, 32x32 spatial
    X = jax.random.normal(xkey, (2, 2, 3, 32, 32), jnp.float32)

    fwd = jax.jit(resnet_backbone_forward)
    out = fwd(params, X)
    out = jax.block_until_ready(out)

    assert out.shape == (2, 2, 512, 1, 1), out.shape
    assert bool(jnp.all(jnp.isfinite(out)))
    print("KERNEL_OK")
</pallas_src>

<mosaic_0001>
module attributes {stable_mosaic.version = 11 : i64} {
  func.func @_matmul_kernel(%arg0: i32, %arg1: i32, %arg2: i32, %arg3: memref<256x256xbf16, #tpu.memory_space<vmem>>, %arg4: memref<256x64xbf16, #tpu.memory_space<vmem>>, %arg5: memref<256x64xf32, #tpu.memory_space<vmem>>, %arg6: memref<256x64xf32, #tpu.memory_space<vmem>>) attributes {dimension_semantics = [#tpu.dimension_semantics<parallel>, #tpu.dimension_semantics<parallel>, #tpu.dimension_semantics<arbitrary>], iteration_bounds = array<i64: 2, 1, 1>, scalar_prefetch = 0 : i64, scratch_operands = 1 : i64, tpu.core_type = #tpu.core_type<tc>, window_params = [{transform_indices = @transform_0, window_bounds = array<i64: 256, 256>}, {transform_indices = @transform_1, window_bounds = array<i64: 256, 64>}, {transform_indices = @transform_2, window_bounds = array<i64: 256, 64>}]} {
    %c0_i32 = arith.constant 0 : i32
    %0 = arith.cmpi eq, %arg2, %c0_i32 : i32
    %1 = arith.extui %0 : i1 to i32
    %c0_i32_0 = arith.constant 0 : i32
    %2 = arith.cmpi ne, %1, %c0_i32_0 : i32
    scf.if %2 {
      %cst_10 = arith.constant 0.000000e+00 : f32
      %12 = vector.broadcast %cst_10 : f32 to vector<256x64xf32>
      %c0_11 = arith.constant 0 : index
      %c0_12 = arith.constant 0 : index
      %13 = vector.load %arg6[%c0_11, %c0_12] : memref<256x64xf32, #tpu.memory_space<vmem>>, vector<256x64xf32>
      tpu.vector_store %arg6[%c0_11, %c0_12], %12 {strides = array<i32>} : memref<256x64xf32, #tpu.memory_space<vmem>>, vector<256x64xf32>,
    } else {
    }
    %c0 = arith.constant 0 : index
    %c0_1 = arith.constant 0 : index
    %3 = vector.load %arg6[%c0, %c0_1] : memref<256x64xf32, #tpu.memory_space<vmem>>, vector<256x64xf32>
    %c0_2 = arith.constant 0 : index
    %c0_3 = arith.constant 0 : index
    %4 = vector.load %arg3[%c0_2, %c0_3] : memref<256x256xbf16, #tpu.memory_space<vmem>>, vector<256x256xbf16>
    %c0_4 = arith.constant 0 : index
    %c0_5 = arith.constant 0 : index
    %5 = vector.load %arg4[%c0_4, %c0_5] : memref<256x64xbf16, #tpu.memory_space<vmem>>, vector<256x64xbf16>
    %cst = arith.constant dense<0.000000e+00> : vector<256x64xf32>
    %6 = tpu.matmul %4, %5, %cst {dimension_numbers = #tpu.dot_dimension_numbers<[1], [0], [0], [1], [0, 0, 1, 1], [], []>} : vector<256x256xbf16>, vector<256x64xbf16>, vector<256x64xf32> -> vector<256x64xf32>
    %7 = arith.addf %3, %6 : vector<256x64xf32>
    %c0_6 = arith.constant 0 : index
    %c0_7 = arith.constant 0 : index
    %8 = vector.load %arg6[%c0_6, %c0_7] : memref<256x64xf32, #tpu.memory_space<vmem>>, vector<256x64xf32>
    tpu.vector_store %arg6[%c0_6, %c0_7], %7 {strides = array<i32>} : memref<256x64xf32, #tpu.memory_space<vmem>>, vector<256x64xf32>,
    %c0_i32_8 = arith.constant 0 : i32
    %9 = arith.cmpi eq, %arg2, %c0_i32_8 : i32
    %10 = arith.extui %9 : i1 to i32
    %c0_i32_9 = arith.constant 0 : i32
    %11 = arith.cmpi ne, %10, %c0_i32_9 : i32
    scf.if %11 {
      %c0_10 = arith.constant 0 : index
      %c0_11 = arith.constant 0 : index
      %12 = vector.load %arg6[%c0_10, %c0_11] : memref<256x64xf32, #tpu.memory_space<vmem>>, vector<256x64xf32>
      %c0_12 = arith.constant 0 : index
      %c0_13 = arith.constant 0 : index
      %13 = vector.load %arg5[%c0_12, %c0_13] : memref<256x64xf32, #tpu.memory_space<vmem>>, vector<256x64xf32>
      tpu.vector_store %arg5[%c0_12, %c0_13], %12 {strides = array<i32>} : memref<256x64xf32, #tpu.memory_space<vmem>>, vector<256x64xf32>,
    } else {
    }
    return
  }
  func.func @transform_0(%arg0: i32, %arg1: i32, %arg2: i32) -> (i32, i32) {
    %c0_i32 = arith.constant 0 : i32
    return %arg0, %arg2 : i32, i32
  }
  func.func @transform_1(%arg0: i32, %arg1: i32, %arg2: i32) -> (i32, i32) {
    %c0_i32 = arith.constant 0 : i32
    return %arg2, %arg1 : i32, i32
  }
  func.func @transform_2(%arg0: i32, %arg1: i32, %arg2: i32) -> (i32, i32) {
    %c0_i32 = arith.constant 0 : i32
    return %arg0, %arg1 : i32, i32
  }
}

module attributes {stable_mosaic.version = 11 : i64} {
  func.func @_bn_stats_kernel(%arg0: i32, %arg1: memref<256x128xf32, #tpu.memory_space<vmem>>, %arg2: memref<1x128xf32, #tpu.memory_space<vmem>>, %arg3: memref<1x128xf32, #tpu.memory_space<vmem>>) attributes {dimension_semantics = [#tpu.dimension_semantics<arbitrary>], iteration_bounds = array<i64: 1>, scalar_prefetch = 0 : i64, scratch_operands = 0 : i64, tpu.core_type = #tpu.core_type<tc>, window_params = [{transform_indices = @transform_0, window_bounds = array<i64: 256, 128>}, {pipeline_mode = #tpu.pipeline_mode<synchronous>, transform_indices = @transform_1, window_bounds = array<i64: 1, 128>}, {pipeline_mode = #tpu.pipeline_mode<synchronous>, transform_indices = @transform_2, window_bounds = array<i64: 1, 128>}]} {
    %c0_i32 = arith.constant 0 : i32
    %0 = arith.cmpi eq, %arg0, %c0_i32 : i32
    %1 = arith.extui %0 : i1 to i32
    %c0_i32_0 = arith.constant 0 : i32
    %2 = arith.cmpi ne, %1, %c0_i32_0 : i32
    scf.if %2 {
      %cst_11 = arith.constant 0.000000e+00 : f32
      %15 = vector.broadcast %cst_11 : f32 to vector<1x128xf32>
      %c0_12 = arith.constant 0 : index
      %c0_13 = arith.constant 0 : index
      %16 = vector.load %arg2[%c0_12, %c0_13] : memref<1x128xf32, #tpu.memory_space<vmem>>, vector<1x128xf32>
      tpu.vector_store %arg2[%c0_12, %c0_13], %15 {strides = array<i32>} : memref<1x128xf32, #tpu.memory_space<vmem>>, vector<1x128xf32>,
      %cst_14 = arith.constant 0.000000e+00 : f32
      %17 = vector.broadcast %cst_14 : f32 to vector<1x128xf32>
      %c0_15 = arith.constant 0 : index
      %c0_16 = arith.constant 0 : index
      %18 = vector.load %arg3[%c0_15, %c0_16] : memref<1x128xf32, #tpu.memory_space<vmem>>, vector<1x128xf32>
      tpu.vector_store %arg3[%c0_15, %c0_16], %17 {strides = array<i32>} : memref<1x128xf32, #tpu.memory_space<vmem>>, vector<1x128xf32>,
    } else {
    }
    %c0 = arith.constant 0 : index
    %c0_1 = arith.constant 0 : index
    %3 = vector.load %arg1[%c0, %c0_1] : memref<256x128xf32, #tpu.memory_space<vmem>>, vector<256x128xf32>
    %c0_2 = arith.constant 0 : index
    %c0_3 = arith.constant 0 : index
    %4 = vector.load %arg2[%c0_2, %c0_3] : memref<1x128xf32, #tpu.memory_space<vmem>>, vector<1x128xf32>
    %cst = arith.constant dense<0.000000e+00> : vector<128xf32>
    %5 = vector.multi_reduction <add>, %3, %cst [0] : vector<256x128xf32> to vector<128xf32>
    %6 = vector.shape_cast %5 : vector<128xf32> to vector<1x128xf32>
    %7 = arith.addf %4, %6 : vector<1x128xf32>
    %c0_4 = arith.constant 0 : index
    %c0_5 = arith.constant 0 : index
    %8 = vector.load %arg2[%c0_4, %c0_5] : memref<1x128xf32, #tpu.memory_space<vmem>>, vector<1x128xf32>
    tpu.vector_store %arg2[%c0_4, %c0_5], %7 {strides = array<i32>} : memref<1x128xf32, #tpu.memory_space<vmem>>, vector<1x128xf32>,
    %c0_6 = arith.constant 0 : index
    %c0_7 = arith.constant 0 : index
    %9 = vector.load %arg3[%c0_6, %c0_7] : memref<1x128xf32, #tpu.memory_space<vmem>>, vector<1x128xf32>
    %10 = arith.mulf %3, %3 : vector<256x128xf32>
    %cst_8 = arith.constant dense<0.000000e+00> : vector<128xf32>
    %11 = vector.multi_reduction <add>, %10, %cst_8 [0] : vector<256x128xf32> to vector<128xf32>
    %12 = vector.shape_cast %11 : vector<128xf32> to vector<1x128xf32>
    %13 = arith.addf %9, %12 : vector<1x128xf32>
    %c0_9 = arith.constant 0 : index
    %c0_10 = arith.constant 0 : index
    %14 = vector.load %arg3[%c0_9, %c0_10] : memref<1x128xf32, #tpu.memory_space<vmem>>, vector<1x128xf32>
    tpu.vector_store %arg3[%c0_9, %c0_10], %13 {strides = array<i32>} : memref<1x128xf32, #tpu.memory_space<vmem>>, vector<1x128xf32>,
    return
  }
  func.func @transform_0(%arg0: i32) -> (i32, i32) {
    %c0_i32 = arith.constant 0 : i32
    %c0_i32_0 = arith.constant 0 : i32
    return %arg0, %c0_i32 : i32, i32
  }
  func.func @transform_1(%arg0: i32) -> (i32, i32) {
    %c0_i32 = arith.constant 0 : i32
    %c0_i32_0 = arith.constant 0 : i32
    %c0_i32_1 = arith.constant 0 : i32
    return %c0_i32, %c0_i32_0 : i32, i32
  }
  func.func @transform_2(%arg0: i32) -> (i32, i32) {
    %c0_i32 = arith.constant 0 : i32
    %c0_i32_0 = arith.constant 0 : i32
    %c0_i32_1 = arith.constant 0 : i32
    return %c0_i32, %c0_i32_0 : i32, i32
  }
}

module attributes {stable_mosaic.version = 11 : i64} {
  func.func @kernel(%arg0: i32, %arg1: memref<256x128xf32, #tpu.memory_space<vmem>>, %arg2: memref<1x128xf32, #tpu.memory_space<vmem>>, %arg3: memref<1x128xf32, #tpu.memory_space<vmem>>, %arg4: memref<256x128xf32, #tpu.memory_space<vmem>>, %arg5: memref<256x128xf32, #tpu.memory_space<vmem>>, %arg6: memref<256x128xbf16, #tpu.memory_space<vmem>>, %arg7: memref<256x128xf32, #tpu.memory_space<vmem>>, %arg8: memref<256x128xf32, #tpu.memory_space<vmem>>) attributes {dimension_semantics = [#tpu.dimension_semantics<parallel>], iteration_bounds = array<i64: 1>, scalar_prefetch = 0 : i64, scratch_operands = 0 : i64, tpu.core_type = #tpu.core_type<tc>, window_params = [{transform_indices = @transform_0, window_bounds = array<i64: 256, 128>}, {pipeline_mode = #tpu.pipeline_mode<synchronous>, transform_indices = @transform_1, window_bounds = array<i64: 1, 128>}, {pipeline_mode = #tpu.pipeline_mode<synchronous>, transform_indices = @transform_2, window_bounds = array<i64: 1, 128>}, {transform_indices = @transform_3, window_bounds = array<i64: 256, 128>}, {transform_indices = @transform_4, window_bounds = array<i64: 256, 128>}, {transform_indices = @transform_5, window_bounds = array<i64: 256, 128>}, {transform_indices = @transform_6, window_bounds = array<i64: 256, 128>}, {transform_indices = @transform_7, window_bounds = array<i64: 256, 128>}]} {
    %c0 = arith.constant 0 : index
    %c0_0 = arith.constant 0 : index
    %0 = vector.load %arg1[%c0, %c0_0] : memref<256x128xf32, #tpu.memory_space<vmem>>, vector<256x128xf32>
    %c0_1 = arith.constant 0 : index
    %c0_2 = arith.constant 0 : index
    %1 = vector.load %arg2[%c0_1, %c0_2] : memref<1x128xf32, #tpu.memory_space<vmem>>, vector<1x128xf32>
    %2 = vector.broadcast %1 : vector<1x128xf32> to vector<256x128xf32>
    %3 = arith.subf %0, %2 : vector<256x128xf32>
    %c0_3 = arith.constant 0 : index
    %c0_4 = arith.constant 0 : index
    %4 = vector.load %arg3[%c0_3, %c0_4] : memref<1x128xf32, #tpu.memory_space<vmem>>, vector<1x128xf32>
    %5 = vector.broadcast %4 : vector<1x128xf32> to vector<256x128xf32>
    %6 = arith.mulf %3, %5 : vector<256x128xf32>
    %c0_5 = arith.constant 0 : index
    %c0_6 = arith.constant 0 : index
    %7 = vector.load %arg4[%c0_5, %c0_6] : memref<256x128xf32, #tpu.memory_space<vmem>>, vector<256x128xf32>
    %c0_7 = arith.constant 0 : index
    %c0_8 = arith.constant 0 : index
    %8 = vector.load %arg5[%c0_7, %c0_8] : memref<256x128xf32, #tpu.memory_space<vmem>>, vector<256x128xf32>
    %cst = arith.constant 0.000000e+00 : f32
    %9 = vector.broadcast %cst : f32 to vector<256x128xf32>
    %10 = arith.subf %9, %7 : vector<256x128xf32>
    %11 = arith.addf %10, %8 : vector<256x128xf32>
    %cst_9 = arith.constant 1.000000e-01 : f32
    %12 = vector.broadcast %cst_9 : f32 to vector<256x128xf32>
    %13 = arith.mulf %12, %11 : vector<256x128xf32>
    %14 = arith.addf %7, %13 : vector<256x128xf32>
    %cst_10 = arith.constant 2.000000e-01 : f32
    %15 = vector.broadcast %cst_10 : f32 to vector<256x128xf32>
    %16 = arith.mulf %15, %8 : vector<256x128xf32>
    %17 = arith.subf %8, %16 : vector<256x128xf32>
    %cst_11 = arith.constant 1.000000e+00 : f32
    %18 = vector.broadcast %cst_11 : f32 to vector<256x128xf32>
    %19 = arith.cmpf ogt, %14, %18 : vector<256x128xf32>
    %20 = arith.extui %19 : vector<256x128xi1> to vector<256x128xi32>
    %21 = arith.sitofp %20 : vector<256x128xi32> to vector<256x128xf32>
    %22 = arith.truncf %21 : vector<256x128xf32> to vector<256x128xbf16>
    %c0_12 = arith.constant 0 : index
    %c0_13 = arith.constant 0 : index
    %23 = vector.load %arg6[%c0_12, %c0_13] : memref<256x128xbf16, #tpu.memory_space<vmem>>, vector<256x128xbf16>
    tpu.vector_store %arg6[%c0_12, %c0_13], %22 {strides = array<i32>} : memref<256x128xbf16, #tpu.memory_space<vmem>>, vector<256x128xbf16>,
    %cst_14 = arith.constant 1.000000e+00 : f32
    %24 = vector.broadcast %cst_14 : f32 to vector<256x128xf32>
    %25 = arith.subf %24, %21 : vector<256x128xf32>
    %26 = arith.mulf %25, %14 : vector<256x128xf32>
    %cst_15 = arith.constant 0.000000e+00 : f32
    %27 = vector.broadcast %cst_15 : f32 to vector<256x128xf32>
    %28 = arith.mulf %21, %27 : vector<256x128xf32>
    %29 = arith.addf %26, %28 : vector<256x128xf32>
    %c0_16 = arith.constant 0 : index
    %c0_17 = arith.constant 0 : index
    %30 = vector.load %arg7[%c0_16, %c0_17] : memref<256x128xf32, #tpu.memory_space<vmem>>, vector<256x128xf32>
    tpu.vector_store %arg7[%c0_16, %c0_17], %29 {strides = array<i32>} : memref<256x128xf32, #tpu.memory_space<vmem>>, vector<256x128xf32>,
    %31 = arith.addf %17, %6 : vector<256x128xf32>
    %c0_18 = arith.constant 0 : index
    %c0_19 = arith.constant 0 : index
    %32 = vector.load %arg8[%c0_18, %c0_19] : memref<256x128xf32, #tpu.memory_space<vmem>>, vector<256x128xf32>
    tpu.vector_store %arg8[%c0_18, %c0_19], %31 {strides = array<i32>} : memref<256x128xf32, #tpu.memory_space<vmem>>, vector<256x128xf32>,
    return
  }
  func.func @transform_0(%arg0: i32) -> (i32, i32) {
    %c0_i32 = arith.constant 0 : i32
    %c0_i32_0 = arith.constant 0 : i32
    return %arg0, %c0_i32 : i32, i32
  }
  func.func @transform_1(%arg0: i32) -> (i32, i32) {
    %c0_i32 = arith.constant 0 : i32
    %c0_i32_0 = arith.constant 0 : i32
    %c0_i32_1 = arith.constant 0 : i32
    return %c0_i32, %c0_i32_0 : i32, i32
  }
  func.func @transform_2(%arg0: i32) -> (i32, i32) {
    %c0_i32 = arith.constant 0 : i32
    %c0_i32_0 = arith.constant 0 : i32
    %c0_i32_1 = arith.constant 0 : i32
    return %c0_i32, %c0_i32_0 : i32, i32
  }
  func.func @transform_3(%arg0: i32) -> (i32, i32) {
    %c0_i32 = arith.constant 0 : i32
    %c0_i32_0 = arith.constant 0 : i32
    return %arg0, %c0_i32 : i32, i32
  }
  func.func @transform_4(%arg0: i32) -> (i32, i32) {
    %c0_i32 = arith.constant 0 : i32
    %c0_i32_0 = arith.constant 0 : i32
    return %arg0, %c0_i32 : i32, i32
  }
  func.func @transform_5(%arg0: i32) -> (i32, i32) {
    %c0_i32 = arith.constant 0 : i32
    %c0_i32_0 = arith.constant 0 : i32
    return %arg0, %c0_i32 : i32, i32
  }
  func.func @transform_6(%arg0: i32) -> (i32, i32) {
    %c0_i32 = arith.constant 0 : i32
    %c0_i32_0 = arith.constant 0 : i32
    return %arg0, %c0_i32 : i32, i32
  }
  func.func @transform_7(%arg0: i32) -> (i32, i32) {
    %c0_i32 = arith.constant 0 : i32
    %c0_i32_0 = arith.constant 0 : i32
    return %arg0, %c0_i32 : i32, i32
  }
}

module attributes {stable_mosaic.version = 11 : i64} {
  func.func @_sumpool_kernel(%arg0: i32, %arg1: memref<9x64x128xbf16, #tpu.memory_space<vmem>>, %arg2: memref<64x128xbf16, #tpu.memory_space<vmem>>) attributes {dimension_semantics = [#tpu.dimension_semantics<parallel>], iteration_bounds = array<i64: 1>, scalar_prefetch = 0 : i64, scratch_operands = 0 : i64, tpu.core_type = #tpu.core_type<tc>, window_params = [{transform_indices = @transform_0, window_bounds = array<i64: 9, 64, 128>}, {transform_indices = @transform_1, window_bounds = array<i64: 64, 128>}]} {
    %c0 = arith.constant 0 : index
    %c0_0 = arith.constant 0 : index
    %c0_1 = arith.constant 0 : index
    %0 = vector.load %arg1[%c0, %c0_0, %c0_1] : memref<9x64x128xbf16, #tpu.memory_space<vmem>>, vector<9x64x128xbf16>
    %1 = arith.extf %0 : vector<9x64x128xbf16> to vector<9x64x128xf32>
    %cst = arith.constant dense<0.000000e+00> : vector<64x128xf32>
    %2 = vector.multi_reduction <add>, %1, %cst [0] : vector<9x64x128xf32> to vector<64x128xf32>
    %3 = arith.truncf %2 : vector<64x128xf32> to vector<64x128xbf16>
    %c0_2 = arith.constant 0 : index
    %c0_3 = arith.constant 0 : index
    %4 = vector.load %arg2[%c0_2, %c0_3] : memref<64x128xbf16, #tpu.memory_space<vmem>>, vector<64x128xbf16>
    tpu.vector_store %arg2[%c0_2, %c0_3], %3 {strides = array<i32>} : memref<64x128xbf16, #tpu.memory_space<vmem>>, vector<64x128xbf16>,
    return
  }
  func.func @transform_0(%arg0: i32) -> (i32, i32, i32) {
    %c0_i32 = arith.constant 0 : i32
    %c0_i32_0 = arith.constant 0 : i32
    %c0_i32_1 = arith.constant 0 : i32
    return %c0_i32, %arg0, %c0_i32_0 : i32, i32, i32
  }
  func.func @transform_1(%arg0: i32) -> (i32, i32) {
    %c0_i32 = arith.constant 0 : i32
    %c0_i32_0 = arith.constant 0 : i32
    return %arg0, %c0_i32 : i32, i32
  }
}

module attributes {stable_mosaic.version = 11 : i64} {
  func.func @_matmul_kernel(%arg0: i32, %arg1: i32, %arg2: i32, %arg3: memref<128x128xbf16, #tpu.memory_space<vmem>>, %arg4: memref<128x64xbf16, #tpu.memory_space<vmem>>, %arg5: memref<128x64xf32, #tpu.memory_space<vmem>>, %arg6: memref<128x64xf32, #tpu.memory_space<vmem>>) attributes {dimension_semantics = [#tpu.dimension_semantics<parallel>, #tpu.dimension_semantics<parallel>, #tpu.dimension_semantics<arbitrary>], iteration_bounds = array<i64: 1, 1, 5>, scalar_prefetch = 0 : i64, scratch_operands = 1 : i64, tpu.core_type = #tpu.core_type<tc>, window_params = [{transform_indices = @transform_0, window_bounds = array<i64: 128, 128>}, {transform_indices = @transform_1, window_bounds = array<i64: 128, 64>}, {transform_indices = @transform_2, window_bounds = array<i64: 128, 64>}]} {
    %c0_i32 = arith.constant 0 : i32
    %0 = arith.cmpi eq, %arg2, %c0_i32 : i32
    %1 = arith.extui %0 : i1 to i32
    %c0_i32_0 = arith.constant 0 : i32
    %2 = arith.cmpi ne, %1, %c0_i32_0 : i32
    scf.if %2 {
      %cst_9 = arith.constant 0.000000e+00 : f32
      %12 = vector.broadcast %cst_9 : f32 to vector<128x64xf32>
      %c0_10 = arith.constant 0 : index
      %c0_11 = arith.constant 0 : index
      %13 = vector.load %arg6[%c0_10, %c0_11] : memref<128x64xf32, #tpu.memory_space<vmem>>, vector<128x64xf32>
      tpu.vector_store %arg6[%c0_10, %c0_11], %12 {strides = array<i32>} : memref<128x64xf32, #tpu.memory_space<vmem>>, vector<128x64xf32>,
    } else {
    }
    %c0 = arith.constant 0 : index
    %c0_1 = arith.constant 0 : index
    %3 = vector.load %arg6[%c0, %c0_1] : memref<128x64xf32, #tpu.memory_space<vmem>>, vector<128x64xf32>
    %c0_2 = arith.constant 0 : index
    %c0_3 = arith.constant 0 : index
    %4 = vector.load %arg3[%c0_2, %c0_3] : memref<128x128xbf16, #tpu.memory_space<vmem>>, vector<128x128xbf16>
    %c0_4 = arith.constant 0 : index
    %c0_5 = arith.constant 0 : index
    %5 = vector.load %arg4[%c0_4, %c0_5] : memref<128x64xbf16, #tpu.memory_space<vmem>>, vector<128x64xbf16>
    %cst = arith.constant dense<0.000000e+00> : vector<128x64xf32>
    %6 = tpu.matmul %4, %5, %cst {dimension_numbers = #tpu.dot_dimension_numbers<[1], [0], [0], [1], [0, 0, 1, 1], [], []>} : vector<128x128xbf16>, vector<128x64xbf16>, vector<128x64xf32> -> vector<128x64xf32>
    %7 = arith.addf %3, %6 : vector<128x64xf32>
    %c0_6 = arith.constant 0 : index
    %c0_7 = arith.constant 0 : index
    %8 = vector.load %arg6[%c0_6, %c0_7] : memref<128x64xf32, #tpu.memory_space<vmem>>, vector<128x64xf32>
    tpu.vector_store %arg6[%c0_6, %c0_7], %7 {strides = array<i32>} : memref<128x64xf32, #tpu.memory_space<vmem>>, vector<128x64xf32>,
    %c4_i32 = arith.constant 4 : i32
    %9 = arith.cmpi eq, %arg2, %c4_i32 : i32
    %10 = arith.extui %9 : i1 to i32
    %c0_i32_8 = arith.constant 0 : i32
    %11 = arith.cmpi ne, %10, %c0_i32_8 : i32
    scf.if %11 {
      %c0_9 = arith.constant 0 : index
      %c0_10 = arith.constant 0 : index
      %12 = vector.load %arg6[%c0_9, %c0_10] : memref<128x64xf32, #tpu.memory_space<vmem>>, vector<128x64xf32>
      %c0_11 = arith.constant 0 : index
      %c0_12 = arith.constant 0 : index
      %13 = vector.load %arg5[%c0_11, %c0_12] : memref<128x64xf32, #tpu.memory_space<vmem>>, vector<128x64xf32>
      tpu.vector_store %arg5[%c0_11, %c0_12], %12 {strides = array<i32>} : memref<128x64xf32, #tpu.memory_space<vmem>>, vector<128x64xf32>,
    } else {
    }
    return
  }
  func.func @transform_0(%arg0: i32, %arg1: i32, %arg2: i32) -> (i32, i32) {
    %c0_i32 = arith.constant 0 : i32
    return %arg0, %arg2 : i32, i32
  }
  func.func @transform_1(%arg0: i32, %arg1: i32, %arg2: i32) -> (i32, i32) {
    %c0_i32 = arith.constant 0 : i32
    return %arg2, %arg1 : i32, i32
  }
  func.func @transform_2(%arg0: i32, %arg1: i32, %arg2: i32) -> (i32, i32) {
    %c0_i32 = arith.constant 0 : i32
    return %arg0, %arg1 : i32, i32
  }
}

module attributes {stable_mosaic.version = 11 : i64} {
  func.func @_bn_stats_kernel(%arg0: i32, %arg1: memref<64x128xf32, #tpu.memory_space<vmem>>, %arg2: memref<1x128xf32, #tpu.memory_space<vmem>>, %arg3: memref<1x128xf32, #tpu.memory_space<vmem>>) attributes {dimension_semantics = [#tpu.dimension_semantics<arbitrary>], iteration_bounds = array<i64: 1>, scalar_prefetch = 0 : i64, scratch_operands = 0 : i64, tpu.core_type = #tpu.core_type<tc>, window_params = [{transform_indices = @transform_0, window_bounds = array<i64: 64, 128>}, {pipeline_mode = #tpu.pipeline_mode<synchronous>, transform_indices = @transform_1, window_bounds = array<i64: 1, 128>}, {pipeline_mode = #tpu.pipeline_mode<synchronous>, transform_indices = @transform_2, window_bounds = array<i64: 1, 128>}]} {
    %c0_i32 = arith.constant 0 : i32
    %0 = arith.cmpi eq, %arg0, %c0_i32 : i32
    %1 = arith.extui %0 : i1 to i32
    %c0_i32_0 = arith.constant 0 : i32
    %2 = arith.cmpi ne, %1, %c0_i32_0 : i32
    scf.if %2 {
      %cst_11 = arith.constant 0.000000e+00 : f32
      %15 = vector.broadcast %cst_11 : f32 to vector<1x128xf32>
      %c0_12 = arith.constant 0 : index
      %c0_13 = arith.constant 0 : index
      %16 = vector.load %arg2[%c0_12, %c0_13] : memref<1x128xf32, #tpu.memory_space<vmem>>, vector<1x128xf32>
      tpu.vector_store %arg2[%c0_12, %c0_13], %15 {strides = array<i32>} : memref<1x128xf32, #tpu.memory_space<vmem>>, vector<1x128xf32>,
      %cst_14 = arith.constant 0.000000e+00 : f32
      %17 = vector.broadcast %cst_14 : f32 to vector<1x128xf32>
      %c0_15 = arith.constant 0 : index
      %c0_16 = arith.constant 0 : index
      %18 = vector.load %arg3[%c0_15, %c0_16] : memref<1x128xf32, #tpu.memory_space<vmem>>, vector<1x128xf32>
      tpu.vector_store %arg3[%c0_15, %c0_16], %17 {strides = array<i32>} : memref<1x128xf32, #tpu.memory_space<vmem>>, vector<1x128xf32>,
    } else {
    }
    %c0 = arith.constant 0 : index
    %c0_1 = arith.constant 0 : index
    %3 = vector.load %arg1[%c0, %c0_1] : memref<64x128xf32, #tpu.memory_space<vmem>>, vector<64x128xf32>
    %c0_2 = arith.constant 0 : index
    %c0_3 = arith.constant 0 : index
    %4 = vector.load %arg2[%c0_2, %c0_3] : memref<1x128xf32, #tpu.memory_space<vmem>>, vector<1x128xf32>
    %cst = arith.constant dense<0.000000e+00> : vector<128xf32>
    %5 = vector.multi_reduction <add>, %3, %cst [0] : vector<64x128xf32> to vector<128xf32>
    %6 = vector.shape_cast %5 : vector<128xf32> to vector<1x128xf32>
    %7 = arith.addf %4, %6 : vector<1x128xf32>
    %c0_4 = arith.constant 0 : index
    %c0_5 = arith.constant 0 : index
    %8 = vector.load %arg2[%c0_4, %c0_5] : memref<1x128xf32, #tpu.memory_space<vmem>>, vector<1x128xf32>
    tpu.vector_store %arg2[%c0_4, %c0_5], %7 {strides = array<i32>} : memref<1x128xf32, #tpu.memory_space<vmem>>, vector<1x128xf32>,
    %c0_6 = arith.constant 0 : index
    %c0_7 = arith.constant 0 : index
    %9 = vector.load %arg3[%c0_6, %c0_7] : memref<1x128xf32, #tpu.memory_space<vmem>>, vector<1x128xf32>
    %10 = arith.mulf %3, %3 : vector<64x128xf32>
    %cst_8 = arith.constant dense<0.000000e+00> : vector<128xf32>
    %11 = vector.multi_reduction <add>, %10, %cst_8 [0] : vector<64x128xf32> to vector<128xf32>
    %12 = vector.shape_cast %11 : vector<128xf32> to vector<1x128xf32>
    %13 = arith.addf %9, %12 : vector<1x128xf32>
    %c0_9 = arith.constant 0 : index
    %c0_10 = arith.constant 0 : index
    %14 = vector.load %arg3[%c0_9, %c0_10] : memref<1x128xf32, #tpu.memory_space<vmem>>, vector<1x128xf32>
    tpu.vector_store %arg3[%c0_9, %c0_10], %13 {strides = array<i32>} : memref<1x128xf32, #tpu.memory_space<vmem>>, vector<1x128xf32>,
    return
  }
  func.func @transform_0(%arg0: i32) -> (i32, i32) {
    %c0_i32 = arith.constant 0 : i32
    %c0_i32_0 = arith.constant 0 : i32
    return %arg0, %c0_i32 : i32, i32
  }
  func.func @transform_1(%arg0: i32) -> (i32, i32) {
    %c0_i32 = arith.constant 0 : i32
    %c0_i32_0 = arith.constant 0 : i32
    %c0_i32_1 = arith.constant 0 : i32
    return %c0_i32, %c0_i32_0 : i32, i32
  }
  func.func @transform_2(%arg0: i32) -> (i32, i32) {
    %c0_i32 = arith.constant 0 : i32
    %c0_i32_0 = arith.constant 0 : i32
    %c0_i32_1 = arith.constant 0 : i32
    return %c0_i32, %c0_i32_0 : i32, i32
  }
}

module attributes {stable_mosaic.version = 11 : i64} {
  func.func @kernel(%arg0: i32, %arg1: memref<64x128xf32, #tpu.memory_space<vmem>>, %arg2: memref<1x128xf32, #tpu.memory_space<vmem>>, %arg3: memref<1x128xf32, #tpu.memory_space<vmem>>, %arg4: memref<64x128xf32, #tpu.memory_space<vmem>>, %arg5: memref<64x128xf32, #tpu.memory_space<vmem>>, %arg6: memref<64x128xbf16, #tpu.memory_space<vmem>>, %arg7: memref<64x128xf32, #tpu.memory_space<vmem>>, %arg8: memref<64x128xf32, #tpu.memory_space<vmem>>) attributes {dimension_semantics = [#tpu.dimension_semantics<parallel>], iteration_bounds = array<i64: 1>, scalar_prefetch = 0 : i64, scratch_operands = 0 : i64, tpu.core_type = #tpu.core_type<tc>, window_params = [{transform_indices = @transform_0, window_bounds = array<i64: 64, 128>}, {pipeline_mode = #tpu.pipeline_mode<synchronous>, transform_indices = @transform_1, window_bounds = array<i64: 1, 128>}, {pipeline_mode = #tpu.pipeline_mode<synchronous>, transform_indices = @transform_2, window_bounds = array<i64: 1, 128>}, {transform_indices = @transform_3, window_bounds = array<i64: 64, 128>}, {transform_indices = @transform_4, window_bounds = array<i64: 64, 128>}, {transform_indices = @transform_5, window_bounds = array<i64: 64, 128>}, {transform_indices = @transform_6, window_bounds = array<i64: 64, 128>}, {transform_indices = @transform_7, window_bounds = array<i64: 64, 128>}]} {
    %c0 = arith.constant 0 : index
    %c0_0 = arith.constant 0 : index
    %0 = vector.load %arg1[%c0, %c0_0] : memref<64x128xf32, #tpu.memory_space<vmem>>, vector<64x128xf32>
    %c0_1 = arith.constant 0 : index
    %c0_2 = arith.constant 0 : index
    %1 = vector.load %arg2[%c0_1, %c0_2] : memref<1x128xf32, #tpu.memory_space<vmem>>, vector<1x128xf32>
    %2 = vector.broadcast %1 : vector<1x128xf32> to vector<64x128xf32>
    %3 = arith.subf %0, %2 : vector<64x128xf32>
    %c0_3 = arith.constant 0 : index
    %c0_4 = arith.constant 0 : index
    %4 = vector.load %arg3[%c0_3, %c0_4] : memref<1x128xf32, #tpu.memory_space<vmem>>, vector<1x128xf32>
    %5 = vector.broadcast %4 : vector<1x128xf32> to vector<64x128xf32>
    %6 = arith.mulf %3, %5 : vector<64x128xf32>
    %c0_5 = arith.constant 0 : index
    %c0_6 = arith.constant 0 : index
    %7 = vector.load %arg4[%c0_5, %c0_6] : memref<64x128xf32, #tpu.memory_space<vmem>>, vector<64x128xf32>
    %c0_7 = arith.constant 0 : index
    %c0_8 = arith.constant 0 : index
    %8 = vector.load %arg5[%c0_7, %c0_8] : memref<64x128xf32, #tpu.memory_space<vmem>>, vector<64x128xf32>
    %cst = arith.constant 0.000000e+00 : f32
    %9 = vector.broadcast %cst : f32 to vector<64x128xf32>
    %10 = arith.subf %9, %7 : vector<64x128xf32>
    %11 = arith.addf %10, %8 : vector<64x128xf32>
    %cst_9 = arith.constant 1.000000e-01 : f32
    %12 = vector.broadcast %cst_9 : f32 to vector<64x128xf32>
    %13 = arith.mulf %12, %11 : vector<64x128xf32>
    %14 = arith.addf %7, %13 : vector<64x128xf32>
    %cst_10 = arith.constant 2.000000e-01 : f32
    %15 = vector.broadcast %cst_10 : f32 to vector<64x128xf32>
    %16 = arith.mulf %15, %8 : vector<64x128xf32>
    %17 = arith.subf %8, %16 : vector<64x128xf32>
    %cst_11 = arith.constant 1.000000e+00 : f32
    %18 = vector.broadcast %cst_11 : f32 to vector<64x128xf32>
    %19 = arith.cmpf ogt, %14, %18 : vector<64x128xf32>
    %20 = arith.extui %19 : vector<64x128xi1> to vector<64x128xi32>
    %21 = arith.sitofp %20 : vector<64x128xi32> to vector<64x128xf32>
    %22 = arith.truncf %21 : vector<64x128xf32> to vector<64x128xbf16>
    %c0_12 = arith.constant 0 : index
    %c0_13 = arith.constant 0 : index
    %23 = vector.load %arg6[%c0_12, %c0_13] : memref<64x128xbf16, #tpu.memory_space<vmem>>, vector<64x128xbf16>
    tpu.vector_store %arg6[%c0_12, %c0_13], %22 {strides = array<i32>} : memref<64x128xbf16, #tpu.memory_space<vmem>>, vector<64x128xbf16>,
    %cst_14 = arith.constant 1.000000e+00 : f32
    %24 = vector.broadcast %cst_14 : f32 to vector<64x128xf32>
    %25 = arith.subf %24, %21 : vector<64x128xf32>
    %26 = arith.mulf %25, %14 : vector<64x128xf32>
    %cst_15 = arith.constant 0.000000e+00 : f32
    %27 = vector.broadcast %cst_15 : f32 to vector<64x128xf32>
    %28 = arith.mulf %21, %27 : vector<64x128xf32>
    %29 = arith.addf %26, %28 : vector<64x128xf32>
    %c0_16 = arith.constant 0 : index
    %c0_17 = arith.constant 0 : index
    %30 = vector.load %arg7[%c0_16, %c0_17] : memref<64x128xf32, #tpu.memory_space<vmem>>, vector<64x128xf32>
    tpu.vector_store %arg7[%c0_16, %c0_17], %29 {strides = array<i32>} : memref<64x128xf32, #tpu.memory_space<vmem>>, vector<64x128xf32>,
    %31 = arith.addf %17, %6 : vector<64x128xf32>
    %c0_18 = arith.constant 0 : index
    %c0_19 = arith.constant 0 : index
    %32 = vector.load %arg8[%c0_18, %c0_19] : memref<64x128xf32, #tpu.memory_space<vmem>>, vector<64x128xf32>
    tpu.vector_store %arg8[%c0_18, %c0_19], %31 {strides = array<i32>} : memref<64x128xf32, #tpu.memory_space<vmem>>, vector<64x128xf32>,
    return
  }
  func.func @transform_0(%arg0: i32) -> (i32, i32) {
    %c0_i32 = arith.constant 0 : i32
    %c0_i32_0 = arith.constant 0 : i32
    return %arg0, %c0_i32 : i32, i32
  }
  func.func @transform_1(%arg0: i32) -> (i32, i32) {
    %c0_i32 = arith.constant 0 : i32
    %c0_i32_0 = arith.constant 0 : i32
    %c0_i32_1 = arith.constant 0 : i32
    return %c0_i32, %c0_i32_0 : i32, i32
  }
  func.func @transform_2(%arg0: i32) -> (i32, i32) {
    %c0_i32 = arith.constant 0 : i32
    %c0_i32_0 = arith.constant 0 : i32
    %c0_i32_1 = arith.constant 0 : i32
    return %c0_i32, %c0_i32_0 : i32, i32
  }
  func.func @transform_3(%arg0: i32) -> (i32, i32) {
    %c0_i32 = arith.constant 0 : i32
    %c0_i32_0 = arith.constant 0 : i32
    return %arg0, %c0_i32 : i32, i32
  }
  func.func @transform_4(%arg0: i32) -> (i32, i32) {
    %c0_i32 = arith.constant 0 : i32
    %c0_i32_0 = arith.constant 0 : i32
    return %arg0, %c0_i32 : i32, i32
  }
  func.func @transform_5(%arg0: i32) -> (i32, i32) {
    %c0_i32 = arith.constant 0 : i32
    %c0_i32_0 = arith.constant 0 : i32
    return %arg0, %c0_i32 : i32, i32
  }
  func.func @transform_6(%arg0: i32) -> (i32, i32) {
    %c0_i32 = arith.constant 0 : i32
    %c0_i32_0 = arith.constant 0 : i32
    return %arg0, %c0_i32 : i32, i32
  }
  func.func @transform_7(%arg0: i32) -> (i32, i32) {
    %c0_i32 = arith.constant 0 : i32
    %c0_i32_0 = arith.constant 0 : i32
    return %arg0, %c0_i32 : i32, i32
  }
}

module attributes {stable_mosaic.version = 11 : i64} {
  func.func @kernel(%arg0: i32, %arg1: memref<64x128xf32, #tpu.memory_space<vmem>>, %arg2: memref<64x128xbf16, #tpu.memory_space<vmem>>, %arg3: memref<1x128xf32, #tpu.memory_space<vmem>>, %arg4: memref<1x128xf32, #tpu.memory_space<vmem>>, %arg5: memref<64x128xf32, #tpu.memory_space<vmem>>, %arg6: memref<64x128xf32, #tpu.memory_space<vmem>>, %arg7: memref<64x128xbf16, #tpu.memory_space<vmem>>, %arg8: memref<64x128xf32, #tpu.memory_space<vmem>>, %arg9: memref<64x128xf32, #tpu.memory_space<vmem>>) attributes {dimension_semantics = [#tpu.dimension_semantics<parallel>], iteration_bounds = array<i64: 1>, scalar_prefetch = 0 : i64, scratch_operands = 0 : i64, tpu.core_type = #tpu.core_type<tc>, window_params = [{transform_indices = @transform_0, window_bounds = array<i64: 64, 128>}, {transform_indices = @transform_1, window_bounds = array<i64: 64, 128>}, {pipeline_mode = #tpu.pipeline_mode<synchronous>, transform_indices = @transform_2, window_bounds = array<i64: 1, 128>}, {pipeline_mode = #tpu.pipeline_mode<synchronous>, transform_indices = @transform_3, window_bounds = array<i64: 1, 128>}, {transform_indices = @transform_4, window_bounds = array<i64: 64, 128>}, {transform_indices = @transform_5, window_bounds = array<i64: 64, 128>}, {transform_indices = @transform_6, window_bounds = array<i64: 64, 128>}, {transform_indices = @transform_7, window_bounds = array<i64: 64, 128>}, {transform_indices = @transform_8, window_bounds = array<i64: 64, 128>}]} {
    %c0 = arith.constant 0 : index
    %c0_0 = arith.constant 0 : index
    %0 = vector.load %arg1[%c0, %c0_0] : memref<64x128xf32, #tpu.memory_space<vmem>>, vector<64x128xf32>
    %c0_1 = arith.constant 0 : index
    %c0_2 = arith.constant 0 : index
    %1 = vector.load %arg3[%c0_1, %c0_2] : memref<1x128xf32, #tpu.memory_space<vmem>>, vector<1x128xf32>
    %2 = vector.broadcast %1 : vector<1x128xf32> to vector<64x128xf32>
    %3 = arith.subf %0, %2 : vector<64x128xf32>
    %c0_3 = arith.constant 0 : index
    %c0_4 = arith.constant 0 : index
    %4 = vector.load %arg4[%c0_3, %c0_4] : memref<1x128xf32, #tpu.memory_space<vmem>>, vector<1x128xf32>
    %5 = vector.broadcast %4 : vector<1x128xf32> to vector<64x128xf32>
    %6 = arith.mulf %3, %5 : vector<64x128xf32>
    %c0_5 = arith.constant 0 : index
    %c0_6 = arith.constant 0 : index
    %7 = vector.load %arg2[%c0_5, %c0_6] : memref<64x128xbf16, #tpu.memory_space<vmem>>, vector<64x128xbf16>
    %8 = arith.extf %7 : vector<64x128xbf16> to vector<64x128xf32>
    %9 = arith.addf %6, %8 : vector<64x128xf32>
    %c0_7 = arith.constant 0 : index
    %c0_8 = arith.constant 0 : index
    %10 = vector.load %arg5[%c0_7, %c0_8] : memref<64x128xf32, #tpu.memory_space<vmem>>, vector<64x128xf32>
    %c0_9 = arith.constant 0 : index
    %c0_10 = arith.constant 0 : index
    %11 = vector.load %arg6[%c0_9, %c0_10] : memref<64x128xf32, #tpu.memory_space<vmem>>, vector<64x128xf32>
    %cst = arith.constant 0.000000e+00 : f32
    %12 = vector.broadcast %cst : f32 to vector<64x128xf32>
    %13 = arith.subf %12, %10 : vector<64x128xf32>
    %14 = arith.addf %13, %11 : vector<64x128xf32>
    %cst_11 = arith.constant 1.000000e-01 : f32
    %15 = vector.broadcast %cst_11 : f32 to vector<64x128xf32>
    %16 = arith.mulf %15, %14 : vector<64x128xf32>
    %17 = arith.addf %10, %16 : vector<64x128xf32>
    %cst_12 = arith.constant 2.000000e-01 : f32
    %18 = vector.broadcast %cst_12 : f32 to vector<64x128xf32>
    %19 = arith.mulf %18, %11 : vector<64x128xf32>
    %20 = arith.subf %11, %19 : vector<64x128xf32>
    %cst_13 = arith.constant 1.000000e+00 : f32
    %21 = vector.broadcast %cst_13 : f32 to vector<64x128xf32>
    %22 = arith.cmpf ogt, %17, %21 : vector<64x128xf32>
    %23 = arith.extui %22 : vector<64x128xi1> to vector<64x128xi32>
    %24 = arith.sitofp %23 : vector<64x128xi32> to vector<64x128xf32>
    %25 = arith.truncf %24 : vector<64x128xf32> to vector<64x128xbf16>
    %c0_14 = arith.constant 0 : index
    %c0_15 = arith.constant 0 : index
    %26 = vector.load %arg7[%c0_14, %c0_15] : memref<64x128xbf16, #tpu.memory_space<vmem>>, vector<64x128xbf16>
    tpu.vector_store %arg7[%c0_14, %c0_15], %25 {strides = array<i32>} : memref<64x128xbf16, #tpu.memory_space<vmem>>, vector<64x128xbf16>,
    %cst_16 = arith.constant 1.000000e+00 : f32
    %27 = vector.broadcast %cst_16 : f32 to vector<64x128xf32>
    %28 = arith.subf %27, %24 : vector<64x128xf32>
    %29 = arith.mulf %28, %17 : vector<64x128xf32>
    %cst_17 = arith.constant 0.000000e+00 : f32
    %30 = vector.broadcast %cst_17 : f32 to vector<64x128xf32>
    %31 = arith.mulf %24, %30 : vector<64x128xf32>
    %32 = arith.addf %29, %31 : vector<64x128xf32>
    %c0_18 = arith.constant 0 : index
    %c0_19 = arith.constant 0 : index
    %33 = vector.load %arg8[%c0_18, %c0_19] : memref<64x128xf32, #tpu.memory_space<vmem>>, vector<64x128xf32>
    tpu.vector_store %arg8[%c0_18, %c0_19], %32 {strides = array<i32>} : memref<64x128xf32, #tpu.memory_space<vmem>>, vector<64x128xf32>,
    %34 = arith.addf %20, %9 : vector<64x128xf32>
    %c0_20 = arith.constant 0 : index
    %c0_21 = arith.constant 0 : index
    %35 = vector.load %arg9[%c0_20, %c0_21] : memref<64x128xf32, #tpu.memory_space<vmem>>, vector<64x128xf32>
    tpu.vector_store %arg9[%c0_20, %c0_21], %34 {strides = array<i32>} : memref<64x128xf32, #tpu.memory_space<vmem>>, vector<64x128xf32>,
    return
  }
  func.func @transform_0(%arg0: i32) -> (i32, i32) {
    %c0_i32 = arith.constant 0 : i32
    %c0_i32_0 = arith.constant 0 : i32
    return %arg0, %c0_i32 : i32, i32
  }
  func.func @transform_1(%arg0: i32) -> (i32, i32) {
    %c0_i32 = arith.constant 0 : i32
    %c0_i32_0 = arith.constant 0 : i32
    return %arg0, %c0_i32 : i32, i32
  }
  func.func @transform_2(%arg0: i32) -> (i32, i32) {
    %c0_i32 = arith.constant 0 : i32
    %c0_i32_0 = arith.constant 0 : i32
    %c0_i32_1 = arith.constant 0 : i32
    return %c0_i32, %c0_i32_0 : i32, i32
  }
  func.func @transform_3(%arg0: i32) -> (i32, i32) {
    %c0_i32 = arith.constant 0 : i32
    %c0_i32_0 = arith.constant 0 : i32
    %c0_i32_1 = arith.constant 0 : i32
    return %c0_i32, %c0_i32_0 : i32, i32
  }
  func.func @transform_4(%arg0: i32) -> (i32, i32) {
    %c0_i32 = arith.constant 0 : i32
    %c0_i32_0 = arith.constant 0 : i32
    return %arg0, %c0_i32 : i32, i32
  }
  func.func @transform_5(%arg0: i32) -> (i32, i32) {
    %c0_i32 = arith.constant 0 : i32
    %c0_i32_0 = arith.constant 0 : i32
    return %arg0, %c0_i32 : i32, i32
  }
  func.func @transform_6(%arg0: i32) -> (i32, i32) {
    %c0_i32 = arith.constant 0 : i32
    %c0_i32_0 = arith.constant 0 : i32
    return %arg0, %c0_i32 : i32, i32
  }
  func.func @transform_7(%arg0: i32) -> (i32, i32) {
    %c0_i32 = arith.constant 0 : i32
    %c0_i32_0 = arith.constant 0 : i32
    return %arg0, %c0_i32 : i32, i32
  }
  func.func @transform_8(%arg0: i32) -> (i32, i32) {
    %c0_i32 = arith.constant 0 : i32
    %c0_i32_0 = arith.constant 0 : i32
    return %arg0, %c0_i32 : i32, i32
  }
}

module attributes {stable_mosaic.version = 11 : i64} {
  func.func @_matmul_kernel(%arg0: i32, %arg1: i32, %arg2: i32, %arg3: memref<32x128xbf16, #tpu.memory_space<vmem>>, %arg4: memref<128x128xbf16, #tpu.memory_space<vmem>>, %arg5: memref<32x128xf32, #tpu.memory_space<vmem>>, %arg6: memref<32x128xf32, #tpu.memory_space<vmem>>) attributes {dimension_semantics = [#tpu.dimension_semantics<parallel>, #tpu.dimension_semantics<parallel>, #tpu.dimension_semantics<arbitrary>], iteration_bounds = array<i64: 1, 1, 5>, scalar_prefetch = 0 : i64, scratch_operands = 1 : i64, tpu.core_type = #tpu.core_type<tc>, window_params = [{transform_indices = @transform_0, window_bounds = array<i64: 32, 128>}, {transform_indices = @transform_1, window_bounds = array<i64: 128, 128>}, {transform_indices = @transform_2, window_bounds = array<i64: 32, 128>}]} {
    %c0_i32 = arith.constant 0 : i32
    %0 = arith.cmpi eq, %arg2, %c0_i32 : i32
    %1 = arith.extui %0 : i1 to i32
    %c0_i32_0 = arith.constant 0 : i32
    %2 = arith.cmpi ne, %1, %c0_i32_0 : i32
    scf.if %2 {
      %cst_9 = arith.constant 0.000000e+00 : f32
      %12 = vector.broadcast %cst_9 : f32 to vector<32x128xf32>
      %c0_10 = arith.constant 0 : index
      %c0_11 = arith.constant 0 : index
      %13 = vector.load %arg6[%c0_10, %c0_11] : memref<32x128xf32, #tpu.memory_space<vmem>>, vector<32x128xf32>
      tpu.vector_store %arg6[%c0_10, %c0_11], %12 {strides = array<i32>} : memref<32x128xf32, #tpu.memory_space<vmem>>, vector<32x128xf32>,
    } else {
    }
    %c0 = arith.constant 0 : index
    %c0_1 = arith.constant 0 : index
    %3 = vector.load %arg6[%c0, %c0_1] : memref<32x128xf32, #tpu.memory_space<vmem>>, vector<32x128xf32>
    %c0_2 = arith.constant 0 : index
    %c0_3 = arith.constant 0 : index
    %4 = vector.load %arg3[%c0_2, %c0_3] : memref<32x128xbf16, #tpu.memory_space<vmem>>, vector<32x128xbf16>
    %c0_4 = arith.constant 0 : index
    %c0_5 = arith.constant 0 : index
    %5 = vector.load %arg4[%c0_4, %c0_5] : memref<128x128xbf16, #tpu.memory_space<vmem>>, vector<128x128xbf16>
    %cst = arith.constant dense<0.000000e+00> : vector<32x128xf32>
    %6 = tpu.matmul %4, %5, %cst {dimension_numbers = #tpu.dot_dimension_numbers<[1], [0], [0], [1], [0, 0, 1, 1], [], []>} : vector<32x128xbf16>, vector<128x128xbf16>, vector<32x128xf32> -> vector<32x128xf32>
    %7 = arith.addf %3, %6 : vector<32x128xf32>
    %c0_6 = arith.constant 0 : index
    %c0_7 = arith.constant 0 : index
    %8 = vector.load %arg6[%c0_6, %c0_7] : memref<32x128xf32, #tpu.memory_space<vmem>>, vector<32x128xf32>
    tpu.vector_store %arg6[%c0_6, %c0_7], %7 {strides = array<i32>} : memref<32x128xf32, #tpu.memory_space<vmem>>, vector<32x128xf32>,
    %c4_i32 = arith.constant 4 : i32
    %9 = arith.cmpi eq, %arg2, %c4_i32 : i32
    %10 = arith.extui %9 : i1 to i32
    %c0_i32_8 = arith.constant 0 : i32
    %11 = arith.cmpi ne, %10, %c0_i32_8 : i32
    scf.if %11 {
      %c0_9 = arith.constant 0 : index
      %c0_10 = arith.constant 0 : index
      %12 = vector.load %arg6[%c0_9, %c0_10] : memref<32x128xf32, #tpu.memory_space<vmem>>, vector<32x128xf32>
      %c0_11 = arith.constant 0 : index
      %c0_12 = arith.constant 0 : index
      %13 = vector.load %arg5[%c0_11, %c0_12] : memref<32x128xf32, #tpu.memory_space<vmem>>, vector<32x128xf32>
      tpu.vector_store %arg5[%c0_11, %c0_12], %12 {strides = array<i32>} : memref<32x128xf32, #tpu.memory_space<vmem>>, vector<32x128xf32>,
    } else {
    }
    return
  }
  func.func @transform_0(%arg0: i32, %arg1: i32, %arg2: i32) -> (i32, i32) {
    %c0_i32 = arith.constant 0 : i32
    return %arg0, %arg2 : i32, i32
  }
  func.func @transform_1(%arg0: i32, %arg1: i32, %arg2: i32) -> (i32, i32) {
    %c0_i32 = arith.constant 0 : i32
    return %arg2, %arg1 : i32, i32
  }
  func.func @transform_2(%arg0: i32, %arg1: i32, %arg2: i32) -> (i32, i32) {
    %c0_i32 = arith.constant 0 : i32
    return %arg0, %arg1 : i32, i32
  }
}

module attributes {stable_mosaic.version = 11 : i64} {
  func.func @_bn_stats_kernel(%arg0: i32, %arg1: memref<32x128xf32, #tpu.memory_space<vmem>>, %arg2: memref<1x128xf32, #tpu.memory_space<vmem>>, %arg3: memref<1x128xf32, #tpu.memory_space<vmem>>) attributes {dimension_semantics = [#tpu.dimension_semantics<arbitrary>], iteration_bounds = array<i64: 1>, scalar_prefetch = 0 : i64, scratch_operands = 0 : i64, tpu.core_type = #tpu.core_type<tc>, window_params = [{transform_indices = @transform_0, window_bounds = array<i64: 32, 128>}, {pipeline_mode = #tpu.pipeline_mode<synchronous>, transform_indices = @transform_1, window_bounds = array<i64: 1, 128>}, {pipeline_mode = #tpu.pipeline_mode<synchronous>, transform_indices = @transform_2, window_bounds = array<i64: 1, 128>}]} {
    %c0_i32 = arith.constant 0 : i32
    %0 = arith.cmpi eq, %arg0, %c0_i32 : i32
    %1 = arith.extui %0 : i1 to i32
    %c0_i32_0 = arith.constant 0 : i32
    %2 = arith.cmpi ne, %1, %c0_i32_0 : i32
    scf.if %2 {
      %cst_11 = arith.constant 0.000000e+00 : f32
      %15 = vector.broadcast %cst_11 : f32 to vector<1x128xf32>
      %c0_12 = arith.constant 0 : index
      %c0_13 = arith.constant 0 : index
      %16 = vector.load %arg2[%c0_12, %c0_13] : memref<1x128xf32, #tpu.memory_space<vmem>>, vector<1x128xf32>
      tpu.vector_store %arg2[%c0_12, %c0_13], %15 {strides = array<i32>} : memref<1x128xf32, #tpu.memory_space<vmem>>, vector<1x128xf32>,
      %cst_14 = arith.constant 0.000000e+00 : f32
      %17 = vector.broadcast %cst_14 : f32 to vector<1x128xf32>
      %c0_15 = arith.constant 0 : index
      %c0_16 = arith.constant 0 : index
      %18 = vector.load %arg3[%c0_15, %c0_16] : memref<1x128xf32, #tpu.memory_space<vmem>>, vector<1x128xf32>
      tpu.vector_store %arg3[%c0_15, %c0_16], %17 {strides = array<i32>} : memref<1x128xf32, #tpu.memory_space<vmem>>, vector<1x128xf32>,
    } else {
    }
    %c0 = arith.constant 0 : index
    %c0_1 = arith.constant 0 : index
    %3 = vector.load %arg1[%c0, %c0_1] : memref<32x128xf32, #tpu.memory_space<vmem>>, vector<32x128xf32>
    %c0_2 = arith.constant 0 : index
    %c0_3 = arith.constant 0 : index
    %4 = vector.load %arg2[%c0_2, %c0_3] : memref<1x128xf32, #tpu.memory_space<vmem>>, vector<1x128xf32>
    %cst = arith.constant dense<0.000000e+00> : vector<128xf32>
    %5 = vector.multi_reduction <add>, %3, %cst [0] : vector<32x128xf32> to vector<128xf32>
    %6 = vector.shape_cast %5 : vector<128xf32> to vector<1x128xf32>
    %7 = arith.addf %4, %6 : vector<1x128xf32>
    %c0_4 = arith.constant 0 : index
    %c0_5 = arith.constant 0 : index
    %8 = vector.load %arg2[%c0_4, %c0_5] : memref<1x128xf32, #tpu.memory_space<vmem>>, vector<1x128xf32>
    tpu.vector_store %arg2[%c0_4, %c0_5], %7 {strides = array<i32>} : memref<1x128xf32, #tpu.memory_space<vmem>>, vector<1x128xf32>,
    %c0_6 = arith.constant 0 : index
    %c0_7 = arith.constant 0 : index
    %9 = vector.load %arg3[%c0_6, %c0_7] : memref<1x128xf32, #tpu.memory_space<vmem>>, vector<1x128xf32>
    %10 = arith.mulf %3, %3 : vector<32x128xf32>
    %cst_8 = arith.constant dense<0.000000e+00> : vector<128xf32>
    %11 = vector.multi_reduction <add>, %10, %cst_8 [0] : vector<32x128xf32> to vector<128xf32>
    %12 = vector.shape_cast %11 : vector<128xf32> to vector<1x128xf32>
    %13 = arith.addf %9, %12 : vector<1x128xf32>
    %c0_9 = arith.constant 0 : index
    %c0_10 = arith.constant 0 : index
    %14 = vector.load %arg3[%c0_9, %c0_10] : memref<1x128xf32, #tpu.memory_space<vmem>>, vector<1x128xf32>
    tpu.vector_store %arg3[%c0_9, %c0_10], %13 {strides = array<i32>} : memref<1x128xf32, #tpu.memory_space<vmem>>, vector<1x128xf32>,
    return
  }
  func.func @transform_0(%arg0: i32) -> (i32, i32) {
    %c0_i32 = arith.constant 0 : i32
    %c0_i32_0 = arith.constant 0 : i32
    return %arg0, %c0_i32 : i32, i32
  }
  func.func @transform_1(%arg0: i32) -> (i32, i32) {
    %c0_i32 = arith.constant 0 : i32
    %c0_i32_0 = arith.constant 0 : i32
    %c0_i32_1 = arith.constant 0 : i32
    return %c0_i32, %c0_i32_0 : i32, i32
  }
  func.func @transform_2(%arg0: i32) -> (i32, i32) {
    %c0_i32 = arith.constant 0 : i32
    %c0_i32_0 = arith.constant 0 : i32
    %c0_i32_1 = arith.constant 0 : i32
    return %c0_i32, %c0_i32_0 : i32, i32
  }
}

module attributes {stable_mosaic.version = 11 : i64} {
  func.func @kernel(%arg0: i32, %arg1: memref<32x128xf32, #tpu.memory_space<vmem>>, %arg2: memref<1x128xf32, #tpu.memory_space<vmem>>, %arg3: memref<1x128xf32, #tpu.memory_space<vmem>>, %arg4: memref<32x128xf32, #tpu.memory_space<vmem>>, %arg5: memref<32x128xf32, #tpu.memory_space<vmem>>, %arg6: memref<32x128xbf16, #tpu.memory_space<vmem>>, %arg7: memref<32x128xf32, #tpu.memory_space<vmem>>, %arg8: memref<32x128xf32, #tpu.memory_space<vmem>>) attributes {dimension_semantics = [#tpu.dimension_semantics<parallel>], iteration_bounds = array<i64: 1>, scalar_prefetch = 0 : i64, scratch_operands = 0 : i64, tpu.core_type = #tpu.core_type<tc>, window_params = [{transform_indices = @transform_0, window_bounds = array<i64: 32, 128>}, {pipeline_mode = #tpu.pipeline_mode<synchronous>, transform_indices = @transform_1, window_bounds = array<i64: 1, 128>}, {pipeline_mode = #tpu.pipeline_mode<synchronous>, transform_indices = @transform_2, window_bounds = array<i64: 1, 128>}, {transform_indices = @transform_3, window_bounds = array<i64: 32, 128>}, {transform_indices = @transform_4, window_bounds = array<i64: 32, 128>}, {transform_indices = @transform_5, window_bounds = array<i64: 32, 128>}, {transform_indices = @transform_6, window_bounds = array<i64: 32, 128>}, {transform_indices = @transform_7, window_bounds = array<i64: 32, 128>}]} {
    %c0 = arith.constant 0 : index
    %c0_0 = arith.constant 0 : index
    %0 = vector.load %arg1[%c0, %c0_0] : memref<32x128xf32, #tpu.memory_space<vmem>>, vector<32x128xf32>
    %c0_1 = arith.constant 0 : index
    %c0_2 = arith.constant 0 : index
    %1 = vector.load %arg2[%c0_1, %c0_2] : memref<1x128xf32, #tpu.memory_space<vmem>>, vector<1x128xf32>
    %2 = vector.broadcast %1 : vector<1x128xf32> to vector<32x128xf32>
    %3 = arith.subf %0, %2 : vector<32x128xf32>
    %c0_3 = arith.constant 0 : index
    %c0_4 = arith.constant 0 : index
    %4 = vector.load %arg3[%c0_3, %c0_4] : memref<1x128xf32, #tpu.memory_space<vmem>>, vector<1x128xf32>
    %5 = vector.broadcast %4 : vector<1x128xf32> to vector<32x128xf32>
    %6 = arith.mulf %3, %5 : vector<32x128xf32>
    %c0_5 = arith.constant 0 : index
    %c0_6 = arith.constant 0 : index
    %7 = vector.load %arg4[%c0_5, %c0_6] : memref<32x128xf32, #tpu.memory_space<vmem>>, vector<32x128xf32>
    %c0_7 = arith.constant 0 : index
    %c0_8 = arith.constant 0 : index
    %8 = vector.load %arg5[%c0_7, %c0_8] : memref<32x128xf32, #tpu.memory_space<vmem>>, vector<32x128xf32>
    %cst = arith.constant 0.000000e+00 : f32
    %9 = vector.broadcast %cst : f32 to vector<32x128xf32>
    %10 = arith.subf %9, %7 : vector<32x128xf32>
    %11 = arith.addf %10, %8 : vector<32x128xf32>
    %cst_9 = arith.constant 1.000000e-01 : f32
    %12 = vector.broadcast %cst_9 : f32 to vector<32x128xf32>
    %13 = arith.mulf %12, %11 : vector<32x128xf32>
    %14 = arith.addf %7, %13 : vector<32x128xf32>
    %cst_10 = arith.constant 2.000000e-01 : f32
    %15 = vector.broadcast %cst_10 : f32 to vector<32x128xf32>
    %16 = arith.mulf %15, %8 : vector<32x128xf32>
    %17 = arith.subf %8, %16 : vector<32x128xf32>
    %cst_11 = arith.constant 1.000000e+00 : f32
    %18 = vector.broadcast %cst_11 : f32 to vector<32x128xf32>
    %19 = arith.cmpf ogt, %14, %18 : vector<32x128xf32>
    %20 = arith.extui %19 : vector<32x128xi1> to vector<32x128xi32>
    %21 = arith.sitofp %20 : vector<32x128xi32> to vector<32x128xf32>
    %22 = arith.truncf %21 : vector<32x128xf32> to vector<32x128xbf16>
    %c0_12 = arith.constant 0 : index
    %c0_13 = arith.constant 0 : index
    %23 = vector.load %arg6[%c0_12, %c0_13] : memref<32x128xbf16, #tpu.memory_space<vmem>>, vector<32x128xbf16>
    tpu.vector_store %arg6[%c0_12, %c0_13], %22 {strides = array<i32>} : memref<32x128xbf16, #tpu.memory_space<vmem>>, vector<32x128xbf16>,
    %cst_14 = arith.constant 1.000000e+00 : f32
    %24 = vector.broadcast %cst_14 : f32 to vector<32x128xf32>
    %25 = arith.subf %24, %21 : vector<32x128xf32>
    %26 = arith.mulf %25, %14 : vector<32x128xf32>
    %cst_15 = arith.constant 0.000000e+00 : f32
    %27 = vector.broadcast %cst_15 : f32 to vector<32x128xf32>
    %28 = arith.mulf %21, %27 : vector<32x128xf32>
    %29 = arith.addf %26, %28 : vector<32x128xf32>
    %c0_16 = arith.constant 0 : index
    %c0_17 = arith.constant 0 : index
    %30 = vector.load %arg7[%c0_16, %c0_17] : memref<32x128xf32, #tpu.memory_space<vmem>>, vector<32x128xf32>
    tpu.vector_store %arg7[%c0_16, %c0_17], %29 {strides = array<i32>} : memref<32x128xf32, #tpu.memory_space<vmem>>, vector<32x128xf32>,
    %31 = arith.addf %17, %6 : vector<32x128xf32>
    %c0_18 = arith.constant 0 : index
    %c0_19 = arith.constant 0 : index
    %32 = vector.load %arg8[%c0_18, %c0_19] : memref<32x128xf32, #tpu.memory_space<vmem>>, vector<32x128xf32>
    tpu.vector_store %arg8[%c0_18, %c0_19], %31 {strides = array<i32>} : memref<32x128xf32, #tpu.memory_space<vmem>>, vector<32x128xf32>,
    return
  }
  func.func @transform_0(%arg0: i32) -> (i32, i32) {
    %c0_i32 = arith.constant 0 : i32
    %c0_i32_0 = arith.constant 0 : i32
    return %arg0, %c0_i32 : i32, i32
  }
  func.func @transform_1(%arg0: i32) -> (i32, i32) {
    %c0_i32 = arith.constant 0 : i32
    %c0_i32_0 = arith.constant 0 : i32
    %c0_i32_1 = arith.constant 0 : i32
    return %c0_i32, %c0_i32_0 : i32, i32
  }
  func.func @transform_2(%arg0: i32) -> (i32, i32) {
    %c0_i32 = arith.constant 0 : i32
    %c0_i32_0 = arith.constant 0 : i32
    %c0_i32_1 = arith.constant 0 : i32
    return %c0_i32, %c0_i32_0 : i32, i32
  }
  func.func @transform_3(%arg0: i32) -> (i32, i32) {
    %c0_i32 = arith.constant 0 : i32
    %c0_i32_0 = arith.constant 0 : i32
    return %arg0, %c0_i32 : i32, i32
  }
  func.func @transform_4(%arg0: i32) -> (i32, i32) {
    %c0_i32 = arith.constant 0 : i32
    %c0_i32_0 = arith.constant 0 : i32
    return %arg0, %c0_i32 : i32, i32
  }
  func.func @transform_5(%arg0: i32) -> (i32, i32) {
    %c0_i32 = arith.constant 0 : i32
    %c0_i32_0 = arith.constant 0 : i32
    return %arg0, %c0_i32 : i32, i32
  }
  func.func @transform_6(%arg0: i32) -> (i32, i32) {
    %c0_i32 = arith.constant 0 : i32
    %c0_i32_0 = arith.constant 0 : i32
    return %arg0, %c0_i32 : i32, i32
  }
  func.func @transform_7(%arg0: i32) -> (i32, i32) {
    %c0_i32 = arith.constant 0 : i32
    %c0_i32_0 = arith.constant 0 : i32
    return %arg0, %c0_i32 : i32, i32
  }
}

module attributes {stable_mosaic.version = 11 : i64} {
  func.func @_matmul_kernel(%arg0: i32, %arg1: i32, %arg2: i32, %arg3: memref<32x128xbf16, #tpu.memory_space<vmem>>, %arg4: memref<128x128xbf16, #tpu.memory_space<vmem>>, %arg5: memref<32x128xf32, #tpu.memory_space<vmem>>, %arg6: memref<32x128xf32, #tpu.memory_space<vmem>>) attributes {dimension_semantics = [#tpu.dimension_semantics<parallel>, #tpu.dimension_semantics<parallel>, #tpu.dimension_semantics<arbitrary>], iteration_bounds = array<i64: 1, 1, 9>, scalar_prefetch = 0 : i64, scratch_operands = 1 : i64, tpu.core_type = #tpu.core_type<tc>, window_params = [{transform_indices = @transform_0, window_bounds = array<i64: 32, 128>}, {transform_indices = @transform_1, window_bounds = array<i64: 128, 128>}, {transform_indices = @transform_2, window_bounds = array<i64: 32, 128>}]} {
    %c0_i32 = arith.constant 0 : i32
    %0 = arith.cmpi eq, %arg2, %c0_i32 : i32
    %1 = arith.extui %0 : i1 to i32
    %c0_i32_0 = arith.constant 0 : i32
    %2 = arith.cmpi ne, %1, %c0_i32_0 : i32
    scf.if %2 {
      %cst_9 = arith.constant 0.000000e+00 : f32
      %12 = vector.broadcast %cst_9 : f32 to vector<32x128xf32>
      %c0_10 = arith.constant 0 : index
      %c0_11 = arith.constant 0 : index
      %13 = vector.load %arg6[%c0_10, %c0_11] : memref<32x128xf32, #tpu.memory_space<vmem>>, vector<32x128xf32>
      tpu.vector_store %arg6[%c0_10, %c0_11], %12 {strides = array<i32>} : memref<32x128xf32, #tpu.memory_space<vmem>>, vector<32x128xf32>,
    } else {
    }
    %c0 = arith.constant 0 : index
    %c0_1 = arith.constant 0 : index
    %3 = vector.load %arg6[%c0, %c0_1] : memref<32x128xf32, #tpu.memory_space<vmem>>, vector<32x128xf32>
    %c0_2 = arith.constant 0 : index
    %c0_3 = arith.constant 0 : index
    %4 = vector.load %arg3[%c0_2, %c0_3] : memref<32x128xbf16, #tpu.memory_space<vmem>>, vector<32x128xbf16>
    %c0_4 = arith.constant 0 : index
    %c0_5 = arith.constant 0 : index
    %5 = vector.load %arg4[%c0_4, %c0_5] : memref<128x128xbf16, #tpu.memory_space<vmem>>, vector<128x128xbf16>
    %cst = arith.constant dense<0.000000e+00> : vector<32x128xf32>
    %6 = tpu.matmul %4, %5, %cst {dimension_numbers = #tpu.dot_dimension_numbers<[1], [0], [0], [1], [0, 0, 1, 1], [], []>} : vector<32x128xbf16>, vector<128x128xbf16>, vector<32x128xf32> -> vector<32x128xf32>
    %7 = arith.addf %3, %6 : vector<32x128xf32>
    %c0_6 = arith.constant 0 : index
    %c0_7 = arith.constant 0 : index
    %8 = vector.load %arg6[%c0_6, %c0_7] : memref<32x128xf32, #tpu.memory_space<vmem>>, vector<32x128xf32>
    tpu.vector_store %arg6[%c0_6, %c0_7], %7 {strides = array<i32>} : memref<32x128xf32, #tpu.memory_space<vmem>>, vector<32x128xf32>,
    %c8_i32 = arith.constant 8 : i32
    %9 = arith.cmpi eq, %arg2, %c8_i32 : i32
    %10 = arith.extui %9 : i1 to i32
    %c0_i32_8 = arith.constant 0 : i32
    %11 = arith.cmpi ne, %10, %c0_i32_8 : i32
    scf.if %11 {
      %c0_9 = arith.constant 0 : index
      %c0_10 = arith.constant 0 : index
      %12 = vector.load %arg6[%c0_9, %c0_10] : memref<32x128xf32, #tpu.memory_space<vmem>>, vector<32x128xf32>
      %c0_11 = arith.constant 0 : index
      %c0_12 = arith.constant 0 : index
      %13 = vector.load %arg5[%c0_11, %c0_12] : memref<32x128xf32, #tpu.memory_space<vmem>>, vector<32x128xf32>
      tpu.vector_store %arg5[%c0_11, %c0_12], %12 {strides = array<i32>} : memref<32x128xf32, #tpu.memory_space<vmem>>, vector<32x128xf32>,
    } else {
    }
    return
  }
  func.func @transform_0(%arg0: i32, %arg1: i32, %arg2: i32) -> (i32, i32) {
    %c0_i32 = arith.constant 0 : i32
    return %arg0, %arg2 : i32, i32
  }
  func.func @transform_1(%arg0: i32, %arg1: i32, %arg2: i32) -> (i32, i32) {
    %c0_i32 = arith.constant 0 : i32
    return %arg2, %arg1 : i32, i32
  }
  func.func @transform_2(%arg0: i32, %arg1: i32, %arg2: i32) -> (i32, i32) {
    %c0_i32 = arith.constant 0 : i32
    return %arg0, %arg1 : i32, i32
  }
}

module attributes {stable_mosaic.version = 11 : i64} {
  func.func @kernel(%arg0: i32, %arg1: memref<32x128xf32, #tpu.memory_space<vmem>>, %arg2: memref<32x128xf32, #tpu.memory_space<vmem>>, %arg3: memref<1x128xf32, #tpu.memory_space<vmem>>, %arg4: memref<1x128xf32, #tpu.memory_space<vmem>>, %arg5: memref<1x128xf32, #tpu.memory_space<vmem>>, %arg6: memref<1x128xf32, #tpu.memory_space<vmem>>, %arg7: memref<32x128xf32, #tpu.memory_space<vmem>>, %arg8: memref<32x128xf32, #tpu.memory_space<vmem>>, %arg9: memref<32x128xbf16, #tpu.memory_space<vmem>>, %arg10: memref<32x128xf32, #tpu.memory_space<vmem>>, %arg11: memref<32x128xf32, #tpu.memory_space<vmem>>) attributes {dimension_semantics = [#tpu.dimension_semantics<parallel>], iteration_bounds = array<i64: 1>, scalar_prefetch = 0 : i64, scratch_operands = 0 : i64, tpu.core_type = #tpu.core_type<tc>, window_params = [{transform_indices = @transform_0, window_bounds = array<i64: 32, 128>}, {transform_indices = @transform_1, window_bounds = array<i64: 32, 128>}, {pipeline_mode = #tpu.pipeline_mode<synchronous>, transform_indices = @transform_2, window_bounds = array<i64: 1, 128>}, {pipeline_mode = #tpu.pipeline_mode<synchronous>, transform_indices = @transform_3, window_bounds = array<i64: 1, 128>}, {pipeline_mode = #tpu.pipeline_mode<synchronous>, transform_indices = @transform_4, window_bounds = array<i64: 1, 128>}, {pipeline_mode = #tpu.pipeline_mode<synchronous>, transform_indices = @transform_5, window_bounds = array<i64: 1, 128>}, {transform_indices = @transform_6, window_bounds = array<i64: 32, 128>}, {transform_indices = @transform_7, window_bounds = array<i64: 32, 128>}, {transform_indices = @transform_8, window_bounds = array<i64: 32, 128>}, {transform_indices = @transform_9, window_bounds = array<i64: 32, 128>}, {transform_indices = @transform_10, window_bounds = array<i64: 32, 128>}]} {
    %c0 = arith.constant 0 : index
    %c0_0 = arith.constant 0 : index
    %0 = vector.load %arg1[%c0, %c0_0] : memref<32x128xf32, #tpu.memory_space<vmem>>, vector<32x128xf32>
    %c0_1 = arith.constant 0 : index
    %c0_2 = arith.constant 0 : index
    %1 = vector.load %arg3[%c0_1, %c0_2] : memref<1x128xf32, #tpu.memory_space<vmem>>, vector<1x128xf32>
    %2 = vector.broadcast %1 : vector<1x128xf32> to vector<32x128xf32>
    %3 = arith.subf %0, %2 : vector<32x128xf32>
    %c0_3 = arith.constant 0 : index
    %c0_4 = arith.constant 0 : index
    %4 = vector.load %arg4[%c0_3, %c0_4] : memref<1x128xf32, #tpu.memory_space<vmem>>, vector<1x128xf32>
    %5 = vector.broadcast %4 : vector<1x128xf32> to vector<32x128xf32>
    %6 = arith.mulf %3, %5 : vector<32x128xf32>
    %c0_5 = arith.constant 0 : index
    %c0_6 = arith.constant 0 : index
    %7 = vector.load %arg2[%c0_5, %c0_6] : memref<32x128xf32, #tpu.memory_space<vmem>>, vector<32x128xf32>
    %c0_7 = arith.constant 0 : index
    %c0_8 = arith.constant 0 : index
    %8 = vector.load %arg5[%c0_7, %c0_8] : memref<1x128xf32, #tpu.memory_space<vmem>>, vector<1x128xf32>
    %9 = vector.broadcast %8 : vector<1x128xf32> to vector<32x128xf32>
    %10 = arith.subf %7, %9 : vector<32x128xf32>
    %c0_9 = arith.constant 0 : index
    %c0_10 = arith.constant 0 : index
    %11 = vector.load %arg6[%c0_9, %c0_10] : memref<1x128xf32, #tpu.memory_space<vmem>>, vector<1x128xf32>
    %12 = vector.broadcast %11 : vector<1x128xf32> to vector<32x128xf32>
    %13 = arith.mulf %10, %12 : vector<32x128xf32>
    %14 = arith.addf %6, %13 : vector<32x128xf32>
    %c0_11 = arith.constant 0 : index
    %c0_12 = arith.constant 0 : index
    %15 = vector.load %arg7[%c0_11, %c0_12] : memref<32x128xf32, #tpu.memory_space<vmem>>, vector<32x128xf32>
    %c0_13 = arith.constant 0 : index
    %c0_14 = arith.constant 0 : index
    %16 = vector.load %arg8[%c0_13, %c0_14] : memref<32x128xf32, #tpu.memory_space<vmem>>, vector<32x128xf32>
    %cst = arith.constant 0.000000e+00 : f32
    %17 = vector.broadcast %cst : f32 to vector<32x128xf32>
    %18 = arith.subf %17, %15 : vector<32x128xf32>
    %19 = arith.addf %18, %16 : vector<32x128xf32>
    %cst_15 = arith.constant 1.000000e-01 : f32
    %20 = vector.broadcast %cst_15 : f32 to vector<32x128xf32>
    %21 = arith.mulf %20, %19 : vector<32x128xf32>
    %22 = arith.addf %15, %21 : vector<32x128xf32>
    %cst_16 = arith.constant 2.000000e-01 : f32
    %23 = vector.broadcast %cst_16 : f32 to vector<32x128xf32>
    %24 = arith.mulf %23, %16 : vector<32x128xf32>
    %25 = arith.subf %16, %24 : vector<32x128xf32>
    %cst_17 = arith.constant 1.000000e+00 : f32
    %26 = vector.broadcast %cst_17 : f32 to vector<32x128xf32>
    %27 = arith.cmpf ogt, %22, %26 : vector<32x128xf32>
    %28 = arith.extui %27 : vector<32x128xi1> to vector<32x128xi32>
    %29 = arith.sitofp %28 : vector<32x128xi32> to vector<32x128xf32>
    %30 = arith.truncf %29 : vector<32x128xf32> to vector<32x128xbf16>
    %c0_18 = arith.constant 0 : index
    %c0_19 = arith.constant 0 : index
    %31 = vector.load %arg9[%c0_18, %c0_19] : memref<32x128xbf16, #tpu.memory_space<vmem>>, vector<32x128xbf16>
    tpu.vector_store %arg9[%c0_18, %c0_19], %30 {strides = array<i32>} : memref<32x128xbf16, #tpu.memory_space<vmem>>, vector<32x128xbf16>,
    %cst_20 = arith.constant 1.000000e+00 : f32
    %32 = vector.broadcast %cst_20 : f32 to vector<32x128xf32>
    %33 = arith.subf %32, %29 : vector<32x128xf32>
    %34 = arith.mulf %33, %22 : vector<32x128xf32>
    %cst_21 = arith.constant 0.000000e+00 : f32
    %35 = vector.broadcast %cst_21 : f32 to vector<32x128xf32>
    %36 = arith.mulf %29, %35 : vector<32x128xf32>
    %37 = arith.addf %34, %36 : vector<32x128xf32>
    %c0_22 = arith.constant 0 : index
    %c0_23 = arith.constant 0 : index
    %38 = vector.load %arg10[%c0_22, %c0_23] : memref<32x128xf32, #tpu.memory_space<vmem>>, vector<32x128xf32>
    tpu.vector_store %arg10[%c0_22, %c0_23], %37 {strides = array<i32>} : memref<32x128xf32, #tpu.memory_space<vmem>>, vector<32x128xf32>,
    %39 = arith.addf %25, %14 : vector<32x128xf32>
    %c0_24 = arith.constant 0 : index
    %c0_25 = arith.constant 0 : index
    %40 = vector.load %arg11[%c0_24, %c0_25] : memref<32x128xf32, #tpu.memory_space<vmem>>, vector<32x128xf32>
    tpu.vector_store %arg11[%c0_24, %c0_25], %39 {strides = array<i32>} : memref<32x128xf32, #tpu.memory_space<vmem>>, vector<32x128xf32>,
    return
  }
  func.func @transform_0(%arg0: i32) -> (i32, i32) {
    %c0_i32 = arith.constant 0 : i32
    %c0_i32_0 = arith.constant 0 : i32
    return %arg0, %c0_i32 : i32, i32
  }
  func.func @transform_1(%arg0: i32) -> (i32, i32) {
    %c0_i32 = arith.constant 0 : i32
    %c0_i32_0 = arith.constant 0 : i32
    return %arg0, %c0_i32 : i32, i32
  }
  func.func @transform_2(%arg0: i32) -> (i32, i32) {
    %c0_i32 = arith.constant 0 : i32
    %c0_i32_0 = arith.constant 0 : i32
    %c0_i32_1 = arith.constant 0 : i32
    return %c0_i32, %c0_i32_0 : i32, i32
  }
  func.func @transform_3(%arg0: i32) -> (i32, i32) {
    %c0_i32 = arith.constant 0 : i32
    %c0_i32_0 = arith.constant 0 : i32
    %c0_i32_1 = arith.constant 0 : i32
    return %c0_i32, %c0_i32_0 : i32, i32
  }
  func.func @transform_4(%arg0: i32) -> (i32, i32) {
    %c0_i32 = arith.constant 0 : i32
    %c0_i32_0 = arith.constant 0 : i32
    %c0_i32_1 = arith.constant 0 : i32
    return %c0_i32, %c0_i32_0 : i32, i32
  }
  func.func @transform_5(%arg0: i32) -> (i32, i32) {
    %c0_i32 = arith.constant 0 : i32
    %c0_i32_0 = arith.constant 0 : i32
    %c0_i32_1 = arith.constant 0 : i32
    return %c0_i32, %c0_i32_0 : i32, i32
  }
  func.func @transform_6(%arg0: i32) -> (i32, i32) {
    %c0_i32 = arith.constant 0 : i32
    %c0_i32_0 = arith.constant 0 : i32
    return %arg0, %c0_i32 : i32, i32
  }
  func.func @transform_7(%arg0: i32) -> (i32, i32) {
    %c0_i32 = arith.constant 0 : i32
    %c0_i32_0 = arith.constant 0 : i32
    return %arg0, %c0_i32 : i32, i32
  }
  func.func @transform_8(%arg0: i32) -> (i32, i32) {
    %c0_i32 = arith.constant 0 : i32
    %c0_i32_0 = arith.constant 0 : i32
    return %arg0, %c0_i32 : i32, i32
  }
  func.func @transform_9(%arg0: i32) -> (i32, i32) {
    %c0_i32 = arith.constant 0 : i32
    %c0_i32_0 = arith.constant 0 : i32
    return %arg0, %c0_i32 : i32, i32
  }
  func.func @transform_10(%arg0: i32) -> (i32, i32) {
    %c0_i32 = arith.constant 0 : i32
    %c0_i32_0 = arith.constant 0 : i32
    return %arg0, %c0_i32 : i32, i32
  }
}

module attributes {stable_mosaic.version = 11 : i64} {
  func.func @kernel(%arg0: i32, %arg1: memref<32x128xf32, #tpu.memory_space<vmem>>, %arg2: memref<32x128xbf16, #tpu.memory_space<vmem>>, %arg3: memref<1x128xf32, #tpu.memory_space<vmem>>, %arg4: memref<1x128xf32, #tpu.memory_space<vmem>>, %arg5: memref<32x128xf32, #tpu.memory_space<vmem>>, %arg6: memref<32x128xf32, #tpu.memory_space<vmem>>, %arg7: memref<32x128xbf16, #tpu.memory_space<vmem>>, %arg8: memref<32x128xf32, #tpu.memory_space<vmem>>, %arg9: memref<32x128xf32, #tpu.memory_space<vmem>>) attributes {dimension_semantics = [#tpu.dimension_semantics<parallel>], iteration_bounds = array<i64: 1>, scalar_prefetch = 0 : i64, scratch_operands = 0 : i64, tpu.core_type = #tpu.core_type<tc>, window_params = [{transform_indices = @transform_0, window_bounds = array<i64: 32, 128>}, {transform_indices = @transform_1, window_bounds = array<i64: 32, 128>}, {pipeline_mode = #tpu.pipeline_mode<synchronous>, transform_indices = @transform_2, window_bounds = array<i64: 1, 128>}, {pipeline_mode = #tpu.pipeline_mode<synchronous>, transform_indices = @transform_3, window_bounds = array<i64: 1, 128>}, {transform_indices = @transform_4, window_bounds = array<i64: 32, 128>}, {transform_indices = @transform_5, window_bounds = array<i64: 32, 128>}, {transform_indices = @transform_6, window_bounds = array<i64: 32, 128>}, {transform_indices = @transform_7, window_bounds = array<i64: 32, 128>}, {transform_indices = @transform_8, window_bounds = array<i64: 32, 128>}]} {
    %c0 = arith.constant 0 : index
    %c0_0 = arith.constant 0 : index
    %0 = vector.load %arg1[%c0, %c0_0] : memref<32x128xf32, #tpu.memory_space<vmem>>, vector<32x128xf32>
    %c0_1 = arith.constant 0 : index
    %c0_2 = arith.constant 0 : index
    %1 = vector.load %arg3[%c0_1, %c0_2] : memref<1x128xf32, #tpu.memory_space<vmem>>, vector<1x128xf32>
    %2 = vector.broadcast %1 : vector<1x128xf32> to vector<32x128xf32>
    %3 = arith.subf %0, %2 : vector<32x128xf32>
    %c0_3 = arith.constant 0 : index
    %c0_4 = arith.constant 0 : index
    %4 = vector.load %arg4[%c0_3, %c0_4] : memref<1x128xf32, #tpu.memory_space<vmem>>, vector<1x128xf32>
    %5 = vector.broadcast %4 : vector<1x128xf32> to vector<32x128xf32>
    %6 = arith.mulf %3, %5 : vector<32x128xf32>
    %c0_5 = arith.constant 0 : index
    %c0_6 = arith.constant 0 : index
    %7 = vector.load %arg2[%c0_5, %c0_6] : memref<32x128xbf16, #tpu.memory_space<vmem>>, vector<32x128xbf16>
    %8 = arith.extf %7 : vector<32x128xbf16> to vector<32x128xf32>
    %9 = arith.addf %6, %8 : vector<32x128xf32>
    %c0_7 = arith.constant 0 : index
    %c0_8 = arith.constant 0 : index
    %10 = vector.load %arg5[%c0_7, %c0_8] : memref<32x128xf32, #tpu.memory_space<vmem>>, vector<32x128xf32>
    %c0_9 = arith.constant 0 : index
    %c0_10 = arith.constant 0 : index
    %11 = vector.load %arg6[%c0_9, %c0_10] : memref<32x128xf32, #tpu.memory_space<vmem>>, vector<32x128xf32>
    %cst = arith.constant 0.000000e+00 : f32
    %12 = vector.broadcast %cst : f32 to vector<32x128xf32>
    %13 = arith.subf %12, %10 : vector<32x128xf32>
    %14 = arith.addf %13, %11 : vector<32x128xf32>
    %cst_11 = arith.constant 1.000000e-01 : f32
    %15 = vector.broadcast %cst_11 : f32 to vector<32x128xf32>
    %16 = arith.mulf %15, %14 : vector<32x128xf32>
    %17 = arith.addf %10, %16 : vector<32x128xf32>
    %cst_12 = arith.constant 2.000000e-01 : f32
    %18 = vector.broadcast %cst_12 : f32 to vector<32x128xf32>
    %19 = arith.mulf %18, %11 : vector<32x128xf32>
    %20 = arith.subf %11, %19 : vector<32x128xf32>
    %cst_13 = arith.constant 1.000000e+00 : f32
    %21 = vector.broadcast %cst_13 : f32 to vector<32x128xf32>
    %22 = arith.cmpf ogt, %17, %21 : vector<32x128xf32>
    %23 = arith.extui %22 : vector<32x128xi1> to vector<32x128xi32>
    %24 = arith.sitofp %23 : vector<32x128xi32> to vector<32x128xf32>
    %25 = arith.truncf %24 : vector<32x128xf32> to vector<32x128xbf16>
    %c0_14 = arith.constant 0 : index
    %c0_15 = arith.constant 0 : index
    %26 = vector.load %arg7[%c0_14, %c0_15] : memref<32x128xbf16, #tpu.memory_space<vmem>>, vector<32x128xbf16>
    tpu.vector_store %arg7[%c0_14, %c0_15], %25 {strides = array<i32>} : memref<32x128xbf16, #tpu.memory_space<vmem>>, vector<32x128xbf16>,
    %cst_16 = arith.constant 1.000000e+00 : f32
    %27 = vector.broadcast %cst_16 : f32 to vector<32x128xf32>
    %28 = arith.subf %27, %24 : vector<32x128xf32>
    %29 = arith.mulf %28, %17 : vector<32x128xf32>
    %cst_17 = arith.constant 0.000000e+00 : f32
    %30 = vector.broadcast %cst_17 : f32 to vector<32x128xf32>
    %31 = arith.mulf %24, %30 : vector<32x128xf32>
    %32 = arith.addf %29, %31 : vector<32x128xf32>
    %c0_18 = arith.constant 0 : index
    %c0_19 = arith.constant 0 : index
    %33 = vector.load %arg8[%c0_18, %c0_19] : memref<32x128xf32, #tpu.memory_space<vmem>>, vector<32x128xf32>
    tpu.vector_store %arg8[%c0_18, %c0_19], %32 {strides = array<i32>} : memref<32x128xf32, #tpu.memory_space<vmem>>, vector<32x128xf32>,
    %34 = arith.addf %20, %9 : vector<32x128xf32>
    %c0_20 = arith.constant 0 : index
    %c0_21 = arith.constant 0 : index
    %35 = vector.load %arg9[%c0_20, %c0_21] : memref<32x128xf32, #tpu.memory_space<vmem>>, vector<32x128xf32>
    tpu.vector_store %arg9[%c0_20, %c0_21], %34 {strides = array<i32>} : memref<32x128xf32, #tpu.memory_space<vmem>>, vector<32x128xf32>,
    return
  }
  func.func @transform_0(%arg0: i32) -> (i32, i32) {
    %c0_i32 = arith.constant 0 : i32
    %c0_i32_0 = arith.constant 0 : i32
    return %arg0, %c0_i32 : i32, i32
  }
  func.func @transform_1(%arg0: i32) -> (i32, i32) {
    %c0_i32 = arith.constant 0 : i32
    %c0_i32_0 = arith.constant 0 : i32
    return %arg0, %c0_i32 : i32, i32
  }
  func.func @transform_2(%arg0: i32) -> (i32, i32) {
    %c0_i32 = arith.constant 0 : i32
    %c0_i32_0 = arith.constant 0 : i32
    %c0_i32_1 = arith.constant 0 : i32
    return %c0_i32, %c0_i32_0 : i32, i32
  }
  func.func @transform_3(%arg0: i32) -> (i32, i32) {
    %c0_i32 = arith.constant 0 : i32
    %c0_i32_0 = arith.constant 0 : i32
    %c0_i32_1 = arith.constant 0 : i32
    return %c0_i32, %c0_i32_0 : i32, i32
  }
  func.func @transform_4(%arg0: i32) -> (i32, i32) {
    %c0_i32 = arith.constant 0 : i32
    %c0_i32_0 = arith.constant 0 : i32
    return %arg0, %c0_i32 : i32, i32
  }
  func.func @transform_5(%arg0: i32) -> (i32, i32) {
    %c0_i32 = arith.constant 0 : i32
    %c0_i32_0 = arith.constant 0 : i32
    return %arg0, %c0_i32 : i32, i32
  }
  func.func @transform_6(%arg0: i32) -> (i32, i32) {
    %c0_i32 = arith.constant 0 : i32
    %c0_i32_0 = arith.constant 0 : i32
    return %arg0, %c0_i32 : i32, i32
  }
  func.func @transform_7(%arg0: i32) -> (i32, i32) {
    %c0_i32 = arith.constant 0 : i32
    %c0_i32_0 = arith.constant 0 : i32
    return %arg0, %c0_i32 : i32, i32
  }
  func.func @transform_8(%arg0: i32) -> (i32, i32) {
    %c0_i32 = arith.constant 0 : i32
    %c0_i32_0 = arith.constant 0 : i32
    return %arg0, %c0_i32 : i32, i32
  }
}

module attributes {stable_mosaic.version = 11 : i64} {
  func.func @_matmul_kernel(%arg0: i32, %arg1: i32, %arg2: i32, %arg3: memref<32x128xbf16, #tpu.memory_space<vmem>>, %arg4: memref<128x128xbf16, #tpu.memory_space<vmem>>, %arg5: memref<32x128xf32, #tpu.memory_space<vmem>>, %arg6: memref<32x128xf32, #tpu.memory_space<vmem>>) attributes {dimension_semantics = [#tpu.dimension_semantics<parallel>, #tpu.dimension_semantics<parallel>, #tpu.dimension_semantics<arbitrary>], iteration_bounds = array<i64: 1, 1, 1>, scalar_prefetch = 0 : i64, scratch_operands = 1 : i64, tpu.core_type = #tpu.core_type<tc>, window_params = [{transform_indices = @transform_0, window_bounds = array<i64: 32, 128>}, {transform_indices = @transform_1, window_bounds = array<i64: 128, 128>}, {transform_indices = @transform_2, window_bounds = array<i64: 32, 128>}]} {
    %c0_i32 = arith.constant 0 : i32
    %0 = arith.cmpi eq, %arg2, %c0_i32 : i32
    %1 = arith.extui %0 : i1 to i32
    %c0_i32_0 = arith.constant 0 : i32
    %2 = arith.cmpi ne, %1, %c0_i32_0 : i32
    scf.if %2 {
      %cst_10 = arith.constant 0.000000e+00 : f32
      %12 = vector.broadcast %cst_10 : f32 to vector<32x128xf32>
      %c0_11 = arith.constant 0 : index
      %c0_12 = arith.constant 0 : index
      %13 = vector.load %arg6[%c0_11, %c0_12] : memref<32x128xf32, #tpu.memory_space<vmem>>, vector<32x128xf32>
      tpu.vector_store %arg6[%c0_11, %c0_12], %12 {strides = array<i32>} : memref<32x128xf32, #tpu.memory_space<vmem>>, vector<32x128xf32>,
    } else {
    }
    %c0 = arith.constant 0 : index
    %c0_1 = arith.constant 0 : index
    %3 = vector.load %arg6[%c0, %c0_1] : memref<32x128xf32, #tpu.memory_space<vmem>>, vector<32x128xf32>
    %c0_2 = arith.constant 0 : index
    %c0_3 = arith.constant 0 : index
    %4 = vector.load %arg3[%c0_2, %c0_3] : memref<32x128xbf16, #tpu.memory_space<vmem>>, vector<32x128xbf16>
    %c0_4 = arith.constant 0 : index
    %c0_5 = arith.constant 0 : index
    %5 = vector.load %arg4[%c0_4, %c0_5] : memref<128x128xbf16, #tpu.memory_space<vmem>>, vector<128x128xbf16>
    %cst = arith.constant dense<0.000000e+00> : vector<32x128xf32>
    %6 = tpu.matmul %4, %5, %cst {dimension_numbers = #tpu.dot_dimension_numbers<[1], [0], [0], [1], [0, 0, 1, 1], [], []>} : vector<32x128xbf16>, vector<128x128xbf16>, vector<32x128xf32> -> vector<32x128xf32>
    %7 = arith.addf %3, %6 : vector<32x128xf32>
    %c0_6 = arith.constant 0 : index
    %c0_7 = arith.constant 0 : index
    %8 = vector.load %arg6[%c0_6, %c0_7] : memref<32x128xf32, #tpu.memory_space<vmem>>, vector<32x128xf32>
    tpu.vector_store %arg6[%c0_6, %c0_7], %7 {strides = array<i32>} : memref<32x128xf32, #tpu.memory_space<vmem>>, vector<32x128xf32>,
    %c0_i32_8 = arith.constant 0 : i32
    %9 = arith.cmpi eq, %arg2, %c0_i32_8 : i32
    %10 = arith.extui %9 : i1 to i32
    %c0_i32_9 = arith.constant 0 : i32
    %11 = arith.cmpi ne, %10, %c0_i32_9 : i32
    scf.if %11 {
      %c0_10 = arith.constant 0 : index
      %c0_11 = arith.constant 0 : index
      %12 = vector.load %arg6[%c0_10, %c0_11] : memref<32x128xf32, #tpu.memory_space<vmem>>, vector<32x128xf32>
      %c0_12 = arith.constant 0 : index
      %c0_13 = arith.constant 0 : index
      %13 = vector.load %arg5[%c0_12, %c0_13] : memref<32x128xf32, #tpu.memory_space<vmem>>, vector<32x128xf32>
      tpu.vector_store %arg5[%c0_12, %c0_13], %12 {strides = array<i32>} : memref<32x128xf32, #tpu.memory_space<vmem>>, vector<32x128xf32>,
    } else {
    }
    return
  }
  func.func @transform_0(%arg0: i32, %arg1: i32, %arg2: i32) -> (i32, i32) {
    %c0_i32 = arith.constant 0 : i32
    return %arg0, %arg2 : i32, i32
  }
  func.func @transform_1(%arg0: i32, %arg1: i32, %arg2: i32) -> (i32, i32) {
    %c0_i32 = arith.constant 0 : i32
    return %arg2, %arg1 : i32, i32
  }
  func.func @transform_2(%arg0: i32, %arg1: i32, %arg2: i32) -> (i32, i32) {
    %c0_i32 = arith.constant 0 : i32
    return %arg0, %arg1 : i32, i32
  }
}

module attributes {stable_mosaic.version = 11 : i64} {
  func.func @_matmul_kernel(%arg0: i32, %arg1: i32, %arg2: i32, %arg3: memref<16x128xbf16, #tpu.memory_space<vmem>>, %arg4: memref<128x256xbf16, #tpu.memory_space<vmem>>, %arg5: memref<16x256xf32, #tpu.memory_space<vmem>>, %arg6: memref<16x256xf32, #tpu.memory_space<vmem>>) attributes {dimension_semantics = [#tpu.dimension_semantics<parallel>, #tpu.dimension_semantics<parallel>, #tpu.dimension_semantics<arbitrary>], iteration_bounds = array<i64: 1, 1, 1>, scalar_prefetch = 0 : i64, scratch_operands = 1 : i64, tpu.core_type = #tpu.core_type<tc>, window_params = [{transform_indices = @transform_0, window_bounds = array<i64: 16, 128>}, {transform_indices = @transform_1, window_bounds = array<i64: 128, 256>}, {transform_indices = @transform_2, window_bounds = array<i64: 16, 256>}]} {
    %c0_i32 = arith.constant 0 : i32
    %0 = arith.cmpi eq, %arg2, %c0_i32 : i32
    %1 = arith.extui %0 : i1 to i32
    %c0_i32_0 = arith.constant 0 : i32
    %2 = arith.cmpi ne, %1, %c0_i32_0 : i32
    scf.if %2 {
      %cst_10 = arith.constant 0.000000e+00 : f32
      %12 = vector.broadcast %cst_10 : f32 to vector<16x256xf32>
      %c0_11 = arith.constant 0 : index
      %c0_12 = arith.constant 0 : index
      %13 = vector.load %arg6[%c0_11, %c0_12] : memref<16x256xf32, #tpu.memory_space<vmem>>, vector<16x256xf32>
      tpu.vector_store %arg6[%c0_11, %c0_12], %12 {strides = array<i32>} : memref<16x256xf32, #tpu.memory_space<vmem>>, vector<16x256xf32>,
    } else {
    }
    %c0 = arith.constant 0 : index
    %c0_1 = arith.constant 0 : index
    %3 = vector.load %arg6[%c0, %c0_1] : memref<16x256xf32, #tpu.memory_space<vmem>>, vector<16x256xf32>
    %c0_2 = arith.constant 0 : index
    %c0_3 = arith.constant 0 : index
    %4 = vector.load %arg3[%c0_2, %c0_3] : memref<16x128xbf16, #tpu.memory_space<vmem>>, vector<16x128xbf16>
    %c0_4 = arith.constant 0 : index
    %c0_5 = arith.constant 0 : index
    %5 = vector.load %arg4[%c0_4, %c0_5] : memref<128x256xbf16, #tpu.memory_space<vmem>>, vector<128x256xbf16>
    %cst = arith.constant dense<0.000000e+00> : vector<16x256xf32>
    %6 = tpu.matmul %4, %5, %cst {dimension_numbers = #tpu.dot_dimension_numbers<[1], [0], [0], [1], [0, 0, 1, 1], [], []>} : vector<16x128xbf16>, vector<128x256xbf16>, vector<16x256xf32> -> vector<16x256xf32>
    %7 = arith.addf %3, %6 : vector<16x256xf32>
    %c0_6 = arith.constant 0 : index
    %c0_7 = arith.constant 0 : index
    %8 = vector.load %arg6[%c0_6, %c0_7] : memref<16x256xf32, #tpu.memory_space<vmem>>, vector<16x256xf32>
    tpu.vector_store %arg6[%c0_6, %c0_7], %7 {strides = array<i32>} : memref<16x256xf32, #tpu.memory_space<vmem>>, vector<16x256xf32>,
    %c0_i32_8 = arith.constant 0 : i32
    %9 = arith.cmpi eq, %arg2, %c0_i32_8 : i32
    %10 = arith.extui %9 : i1 to i32
    %c0_i32_9 = arith.constant 0 : i32
    %11 = arith.cmpi ne, %10, %c0_i32_9 : i32
    scf.if %11 {
      %c0_10 = arith.constant 0 : index
      %c0_11 = arith.constant 0 : index
      %12 = vector.load %arg6[%c0_10, %c0_11] : memref<16x256xf32, #tpu.memory_space<vmem>>, vector<16x256xf32>
      %c0_12 = arith.constant 0 : index
      %c0_13 = arith.constant 0 : index
      %13 = vector.load %arg5[%c0_12, %c0_13] : memref<16x256xf32, #tpu.memory_space<vmem>>, vector<16x256xf32>
      tpu.vector_store %arg5[%c0_12, %c0_13], %12 {strides = array<i32>} : memref<16x256xf32, #tpu.memory_space<vmem>>, vector<16x256xf32>,
    } else {
    }
    return
  }
  func.func @transform_0(%arg0: i32, %arg1: i32, %arg2: i32) -> (i32, i32) {
    %c0_i32 = arith.constant 0 : i32
    return %arg0, %arg2 : i32, i32
  }
  func.func @transform_1(%arg0: i32, %arg1: i32, %arg2: i32) -> (i32, i32) {
    %c0_i32 = arith.constant 0 : i32
    return %arg2, %arg1 : i32, i32
  }
  func.func @transform_2(%arg0: i32, %arg1: i32, %arg2: i32) -> (i32, i32) {
    %c0_i32 = arith.constant 0 : i32
    return %arg0, %arg1 : i32, i32
  }
}

module attributes {stable_mosaic.version = 11 : i64} {
  func.func @_bn_stats_kernel(%arg0: i32, %arg1: memref<8x256xf32, #tpu.memory_space<vmem>>, %arg2: memref<1x256xf32, #tpu.memory_space<vmem>>, %arg3: memref<1x256xf32, #tpu.memory_space<vmem>>) attributes {dimension_semantics = [#tpu.dimension_semantics<arbitrary>], iteration_bounds = array<i64: 1>, scalar_prefetch = 0 : i64, scratch_operands = 0 : i64, tpu.core_type = #tpu.core_type<tc>, window_params = [{transform_indices = @transform_0, window_bounds = array<i64: 8, 256>}, {pipeline_mode = #tpu.pipeline_mode<synchronous>, transform_indices = @transform_1, window_bounds = array<i64: 1, 256>}, {pipeline_mode = #tpu.pipeline_mode<synchronous>, transform_indices = @transform_2, window_bounds = array<i64: 1, 256>}]} {
    %c0_i32 = arith.constant 0 : i32
    %0 = arith.cmpi eq, %arg0, %c0_i32 : i32
    %1 = arith.extui %0 : i1 to i32
    %c0_i32_0 = arith.constant 0 : i32
    %2 = arith.cmpi ne, %1, %c0_i32_0 : i32
    scf.if %2 {
      %cst_11 = arith.constant 0.000000e+00 : f32
      %15 = vector.broadcast %cst_11 : f32 to vector<1x256xf32>
      %c0_12 = arith.constant 0 : index
      %c0_13 = arith.constant 0 : index
      %16 = vector.load %arg2[%c0_12, %c0_13] : memref<1x256xf32, #tpu.memory_space<vmem>>, vector<1x256xf32>
      tpu.vector_store %arg2[%c0_12, %c0_13], %15 {strides = array<i32>} : memref<1x256xf32, #tpu.memory_space<vmem>>, vector<1x256xf32>,
      %cst_14 = arith.constant 0.000000e+00 : f32
      %17 = vector.broadcast %cst_14 : f32 to vector<1x256xf32>
      %c0_15 = arith.constant 0 : index
      %c0_16 = arith.constant 0 : index
      %18 = vector.load %arg3[%c0_15, %c0_16] : memref<1x256xf32, #tpu.memory_space<vmem>>, vector<1x256xf32>
      tpu.vector_store %arg3[%c0_15, %c0_16], %17 {strides = array<i32>} : memref<1x256xf32, #tpu.memory_space<vmem>>, vector<1x256xf32>,
    } else {
    }
    %c0 = arith.constant 0 : index
    %c0_1 = arith.constant 0 : index
    %3 = vector.load %arg1[%c0, %c0_1] : memref<8x256xf32, #tpu.memory_space<vmem>>, vector<8x256xf32>
    %c0_2 = arith.constant 0 : index
    %c0_3 = arith.constant 0 : index
    %4 = vector.load %arg2[%c0_2, %c0_3] : memref<1x256xf32, #tpu.memory_space<vmem>>, vector<1x256xf32>
    %cst = arith.constant dense<0.000000e+00> : vector<256xf32>
    %5 = vector.multi_reduction <add>, %3, %cst [0] : vector<8x256xf32> to vector<256xf32>
    %6 = vector.shape_cast %5 : vector<256xf32> to vector<1x256xf32>
    %7 = arith.addf %4, %6 : vector<1x256xf32>
    %c0_4 = arith.constant 0 : index
    %c0_5 = arith.constant 0 : index
    %8 = vector.load %arg2[%c0_4, %c0_5] : memref<1x256xf32, #tpu.memory_space<vmem>>, vector<1x256xf32>
    tpu.vector_store %arg2[%c0_4, %c0_5], %7 {strides = array<i32>} : memref<1x256xf32, #tpu.memory_space<vmem>>, vector<1x256xf32>,
    %c0_6 = arith.constant 0 : index
    %c0_7 = arith.constant 0 : index
    %9 = vector.load %arg3[%c0_6, %c0_7] : memref<1x256xf32, #tpu.memory_space<vmem>>, vector<1x256xf32>
    %10 = arith.mulf %3, %3 : vector<8x256xf32>
    %cst_8 = arith.constant dense<0.000000e+00> : vector<256xf32>
    %11 = vector.multi_reduction <add>, %10, %cst_8 [0] : vector<8x256xf32> to vector<256xf32>
    %12 = vector.shape_cast %11 : vector<256xf32> to vector<1x256xf32>
    %13 = arith.addf %9, %12 : vector<1x256xf32>
    %c0_9 = arith.constant 0 : index
    %c0_10 = arith.constant 0 : index
    %14 = vector.load %arg3[%c0_9, %c0_10] : memref<1x256xf32, #tpu.memory_space<vmem>>, vector<1x256xf32>
    tpu.vector_store %arg3[%c0_9, %c0_10], %13 {strides = array<i32>} : memref<1x256xf32, #tpu.memory_space<vmem>>, vector<1x256xf32>,
    return
  }
  func.func @transform_0(%arg0: i32) -> (i32, i32) {
    %c0_i32 = arith.constant 0 : i32
    %c0_i32_0 = arith.constant 0 : i32
    return %arg0, %c0_i32 : i32, i32
  }
  func.func @transform_1(%arg0: i32) -> (i32, i32) {
    %c0_i32 = arith.constant 0 : i32
    %c0_i32_0 = arith.constant 0 : i32
    %c0_i32_1 = arith.constant 0 : i32
    return %c0_i32, %c0_i32_0 : i32, i32
  }
  func.func @transform_2(%arg0: i32) -> (i32, i32) {
    %c0_i32 = arith.constant 0 : i32
    %c0_i32_0 = arith.constant 0 : i32
    %c0_i32_1 = arith.constant 0 : i32
    return %c0_i32, %c0_i32_0 : i32, i32
  }
}

module attributes {stable_mosaic.version = 11 : i64} {
  func.func @_matmul_kernel(%arg0: i32, %arg1: i32, %arg2: i32, %arg3: memref<16x128xbf16, #tpu.memory_space<vmem>>, %arg4: memref<128x256xbf16, #tpu.memory_space<vmem>>, %arg5: memref<16x256xf32, #tpu.memory_space<vmem>>, %arg6: memref<16x256xf32, #tpu.memory_space<vmem>>) attributes {dimension_semantics = [#tpu.dimension_semantics<parallel>, #tpu.dimension_semantics<parallel>, #tpu.dimension_semantics<arbitrary>], iteration_bounds = array<i64: 1, 1, 9>, scalar_prefetch = 0 : i64, scratch_operands = 1 : i64, tpu.core_type = #tpu.core_type<tc>, window_params = [{transform_indices = @transform_0, window_bounds = array<i64: 16, 128>}, {transform_indices = @transform_1, window_bounds = array<i64: 128, 256>}, {transform_indices = @transform_2, window_bounds = array<i64: 16, 256>}]} {
    %c0_i32 = arith.constant 0 : i32
    %0 = arith.cmpi eq, %arg2, %c0_i32 : i32
    %1 = arith.extui %0 : i1 to i32
    %c0_i32_0 = arith.constant 0 : i32
    %2 = arith.cmpi ne, %1, %c0_i32_0 : i32
    scf.if %2 {
      %cst_9 = arith.constant 0.000000e+00 : f32
      %12 = vector.broadcast %cst_9 : f32 to vector<16x256xf32>
      %c0_10 = arith.constant 0 : index
      %c0_11 = arith.constant 0 : index
      %13 = vector.load %arg6[%c0_10, %c0_11] : memref<16x256xf32, #tpu.memory_space<vmem>>, vector<16x256xf32>
      tpu.vector_store %arg6[%c0_10, %c0_11], %12 {strides = array<i32>} : memref<16x256xf32, #tpu.memory_space<vmem>>, vector<16x256xf32>,
    } else {
    }
    %c0 = arith.constant 0 : index
    %c0_1 = arith.constant 0 : index
    %3 = vector.load %arg6[%c0, %c0_1] : memref<16x256xf32, #tpu.memory_space<vmem>>, vector<16x256xf32>
    %c0_2 = arith.constant 0 : index
    %c0_3 = arith.constant 0 : index
    %4 = vector.load %arg3[%c0_2, %c0_3] : memref<16x128xbf16, #tpu.memory_space<vmem>>, vector<16x128xbf16>
    %c0_4 = arith.constant 0 : index
    %c0_5 = arith.constant 0 : index
    %5 = vector.load %arg4[%c0_4, %c0_5] : memref<128x256xbf16, #tpu.memory_space<vmem>>, vector<128x256xbf16>
    %cst = arith.constant dense<0.000000e+00> : vector<16x256xf32>
    %6 = tpu.matmul %4, %5, %cst {dimension_numbers = #tpu.dot_dimension_numbers<[1], [0], [0], [1], [0, 0, 1, 1], [], []>} : vector<16x128xbf16>, vector<128x256xbf16>, vector<16x256xf32> -> vector<16x256xf32>
    %7 = arith.addf %3, %6 : vector<16x256xf32>
    %c0_6 = arith.constant 0 : index
    %c0_7 = arith.constant 0 : index
    %8 = vector.load %arg6[%c0_6, %c0_7] : memref<16x256xf32, #tpu.memory_space<vmem>>, vector<16x256xf32>
    tpu.vector_store %arg6[%c0_6, %c0_7], %7 {strides = array<i32>} : memref<16x256xf32, #tpu.memory_space<vmem>>, vector<16x256xf32>,
    %c8_i32 = arith.constant 8 : i32
    %9 = arith.cmpi eq, %arg2, %c8_i32 : i32
    %10 = arith.extui %9 : i1 to i32
    %c0_i32_8 = arith.constant 0 : i32
    %11 = arith.cmpi ne, %10, %c0_i32_8 : i32
    scf.if %11 {
      %c0_9 = arith.constant 0 : index
      %c0_10 = arith.constant 0 : index
      %12 = vector.load %arg6[%c0_9, %c0_10] : memref<16x256xf32, #tpu.memory_space<vmem>>, vector<16x256xf32>
      %c0_11 = arith.constant 0 : index
      %c0_12 = arith.constant 0 : index
      %13 = vector.load %arg5[%c0_11, %c0_12] : memref<16x256xf32, #tpu.memory_space<vmem>>, vector<16x256xf32>
      tpu.vector_store %arg5[%c0_11, %c0_12], %12 {strides = array<i32>} : memref<16x256xf32, #tpu.memory_space<vmem>>, vector<16x256xf32>,
    } else {
    }
    return
  }
  func.func @transform_0(%arg0: i32, %arg1: i32, %arg2: i32) -> (i32, i32) {
    %c0_i32 = arith.constant 0 : i32
    return %arg0, %arg2 : i32, i32
  }
  func.func @transform_1(%arg0: i32, %arg1: i32, %arg2: i32) -> (i32, i32) {
    %c0_i32 = arith.constant 0 : i32
    return %arg2, %arg1 : i32, i32
  }
  func.func @transform_2(%arg0: i32, %arg1: i32, %arg2: i32) -> (i32, i32) {
    %c0_i32 = arith.constant 0 : i32
    return %arg0, %arg1 : i32, i32
  }
}

module attributes {stable_mosaic.version = 11 : i64} {
  func.func @kernel(%arg0: i32, %arg1: memref<8x256xf32, #tpu.memory_space<vmem>>, %arg2: memref<1x256xf32, #tpu.memory_space<vmem>>, %arg3: memref<1x256xf32, #tpu.memory_space<vmem>>, %arg4: memref<8x256xf32, #tpu.memory_space<vmem>>, %arg5: memref<8x256xf32, #tpu.memory_space<vmem>>, %arg6: memref<8x256xf32, #tpu.memory_space<vmem>>, %arg7: memref<8x256xf32, #tpu.memory_space<vmem>>, %arg8: memref<8x256xf32, #tpu.memory_space<vmem>>) attributes {dimension_semantics = [#tpu.dimension_semantics<parallel>], iteration_bounds = array<i64: 1>, scalar_prefetch = 0 : i64, scratch_operands = 0 : i64, tpu.core_type = #tpu.core_type<tc>, window_params = [{transform_indices = @transform_0, window_bounds = array<i64: 8, 256>}, {pipeline_mode = #tpu.pipeline_mode<synchronous>, transform_indices = @transform_1, window_bounds = array<i64: 1, 256>}, {pipeline_mode = #tpu.pipeline_mode<synchronous>, transform_indices = @transform_2, window_bounds = array<i64: 1, 256>}, {transform_indices = @transform_3, window_bounds = array<i64: 8, 256>}, {transform_indices = @transform_4, window_bounds = array<i64: 8, 256>}, {transform_indices = @transform_5, window_bounds = array<i64: 8, 256>}, {transform_indices = @transform_6, window_bounds = array<i64: 8, 256>}, {transform_indices = @transform_7, window_bounds = array<i64: 8, 256>}]} {
    %c0 = arith.constant 0 : index
    %c0_0 = arith.constant 0 : index
    %0 = vector.load %arg1[%c0, %c0_0] : memref<8x256xf32, #tpu.memory_space<vmem>>, vector<8x256xf32>
    %c0_1 = arith.constant 0 : index
    %c0_2 = arith.constant 0 : index
    %1 = vector.load %arg2[%c0_1, %c0_2] : memref<1x256xf32, #tpu.memory_space<vmem>>, vector<1x256xf32>
    %2 = vector.broadcast %1 : vector<1x256xf32> to vector<8x256xf32>
    %3 = arith.subf %0, %2 : vector<8x256xf32>
    %c0_3 = arith.constant 0 : index
    %c0_4 = arith.constant 0 : index
    %4 = vector.load %arg3[%c0_3, %c0_4] : memref<1x256xf32, #tpu.memory_space<vmem>>, vector<1x256xf32>
    %5 = vector.broadcast %4 : vector<1x256xf32> to vector<8x256xf32>
    %6 = arith.mulf %3, %5 : vector<8x256xf32>
    %c0_5 = arith.constant 0 : index
    %c0_6 = arith.constant 0 : index
    %7 = vector.load %arg4[%c0_5, %c0_6] : memref<8x256xf32, #tpu.memory_space<vmem>>, vector<8x256xf32>
    %c0_7 = arith.constant 0 : index
    %c0_8 = arith.constant 0 : index
    %8 = vector.load %arg5[%c0_7, %c0_8] : memref<8x256xf32, #tpu.memory_space<vmem>>, vector<8x256xf32>
    %cst = arith.constant 0.000000e+00 : f32
    %9 = vector.broadcast %cst : f32 to vector<8x256xf32>
    %10 = arith.subf %9, %7 : vector<8x256xf32>
    %11 = arith.addf %10, %8 : vector<8x256xf32>
    %cst_9 = arith.constant 1.000000e-01 : f32
    %12 = vector.broadcast %cst_9 : f32 to vector<8x256xf32>
    %13 = arith.mulf %12, %11 : vector<8x256xf32>
    %14 = arith.addf %7, %13 : vector<8x256xf32>
    %cst_10 = arith.constant 2.000000e-01 : f32
    %15 = vector.broadcast %cst_10 : f32 to vector<8x256xf32>
    %16 = arith.mulf %15, %8 : vector<8x256xf32>
    %17 = arith.subf %8, %16 : vector<8x256xf32>
    %cst_11 = arith.constant 1.000000e+00 : f32
    %18 = vector.broadcast %cst_11 : f32 to vector<8x256xf32>
    %19 = arith.cmpf ogt, %14, %18 : vector<8x256xf32>
    %20 = arith.extui %19 : vector<8x256xi1> to vector<8x256xi32>
    %21 = arith.sitofp %20 : vector<8x256xi32> to vector<8x256xf32>
    %c0_12 = arith.constant 0 : index
    %c0_13 = arith.constant 0 : index
    %22 = vector.load %arg6[%c0_12, %c0_13] : memref<8x256xf32, #tpu.memory_space<vmem>>, vector<8x256xf32>
    tpu.vector_store %arg6[%c0_12, %c0_13], %21 {strides = array<i32>} : memref<8x256xf32, #tpu.memory_space<vmem>>, vector<8x256xf32>,
    %cst_14 = arith.constant 1.000000e+00 : f32
    %23 = vector.broadcast %cst_14 : f32 to vector<8x256xf32>
    %24 = arith.subf %23, %21 : vector<8x256xf32>
    %25 = arith.mulf %24, %14 : vector<8x256xf32>
    %cst_15 = arith.constant 0.000000e+00 : f32
    %26 = vector.broadcast %cst_15 : f32 to vector<8x256xf32>
    %27 = arith.mulf %21, %26 : vector<8x256xf32>
    %28 = arith.addf %25, %27 : vector<8x256xf32>
    %c0_16 = arith.constant 0 : index
    %c0_17 = arith.constant 0 : index
    %29 = vector.load %arg7[%c0_16, %c0_17] : memref<8x256xf32, #tpu.memory_space<vmem>>, vector<8x256xf32>
    tpu.vector_store %arg7[%c0_16, %c0_17], %28 {strides = array<i32>} : memref<8x256xf32, #tpu.memory_space<vmem>>, vector<8x256xf32>,
    %30 = arith.addf %17, %6 : vector<8x256xf32>
    %c0_18 = arith.constant 0 : index
    %c0_19 = arith.constant 0 : index
    %31 = vector.load %arg8[%c0_18, %c0_19] : memref<8x256xf32, #tpu.memory_space<vmem>>, vector<8x256xf32>
    tpu.vector_store %arg8[%c0_18, %c0_19], %30 {strides = array<i32>} : memref<8x256xf32, #tpu.memory_space<vmem>>, vector<8x256xf32>,
    return
  }
  func.func @transform_0(%arg0: i32) -> (i32, i32) {
    %c0_i32 = arith.constant 0 : i32
    %c0_i32_0 = arith.constant 0 : i32
    return %arg0, %c0_i32 : i32, i32
  }
  func.func @transform_1(%arg0: i32) -> (i32, i32) {
    %c0_i32 = arith.constant 0 : i32
    %c0_i32_0 = arith.constant 0 : i32
    %c0_i32_1 = arith.constant 0 : i32
    return %c0_i32, %c0_i32_0 : i32, i32
  }
  func.func @transform_2(%arg0: i32) -> (i32, i32) {
    %c0_i32 = arith.constant 0 : i32
    %c0_i32_0 = arith.constant 0 : i32
    %c0_i32_1 = arith.constant 0 : i32
    return %c0_i32, %c0_i32_0 : i32, i32
  }
  func.func @transform_3(%arg0: i32) -> (i32, i32) {
    %c0_i32 = arith.constant 0 : i32
    %c0_i32_0 = arith.constant 0 : i32
    return %arg0, %c0_i32 : i32, i32
  }
  func.func @transform_4(%arg0: i32) -> (i32, i32) {
    %c0_i32 = arith.constant 0 : i32
    %c0_i32_0 = arith.constant 0 : i32
    return %arg0, %c0_i32 : i32, i32
  }
  func.func @transform_5(%arg0: i32) -> (i32, i32) {
    %c0_i32 = arith.constant 0 : i32
    %c0_i32_0 = arith.constant 0 : i32
    return %arg0, %c0_i32 : i32, i32
  }
  func.func @transform_6(%arg0: i32) -> (i32, i32) {
    %c0_i32 = arith.constant 0 : i32
    %c0_i32_0 = arith.constant 0 : i32
    return %arg0, %c0_i32 : i32, i32
  }
  func.func @transform_7(%arg0: i32) -> (i32, i32) {
    %c0_i32 = arith.constant 0 : i32
    %c0_i32_0 = arith.constant 0 : i32
    return %arg0, %c0_i32 : i32, i32
  }
}

module attributes {stable_mosaic.version = 11 : i64} {
  func.func @_matmul_kernel(%arg0: i32, %arg1: i32, %arg2: i32, %arg3: memref<16x256xbf16, #tpu.memory_space<vmem>>, %arg4: memref<256x256xbf16, #tpu.memory_space<vmem>>, %arg5: memref<16x256xf32, #tpu.memory_space<vmem>>, %arg6: memref<16x256xf32, #tpu.memory_space<vmem>>) attributes {dimension_semantics = [#tpu.dimension_semantics<parallel>, #tpu.dimension_semantics<parallel>, #tpu.dimension_semantics<arbitrary>], iteration_bounds = array<i64: 1, 1, 9>, scalar_prefetch = 0 : i64, scratch_operands = 1 : i64, tpu.core_type = #tpu.core_type<tc>, window_params = [{transform_indices = @transform_0, window_bounds = array<i64: 16, 256>}, {transform_indices = @transform_1, window_bounds = array<i64: 256, 256>}, {transform_indices = @transform_2, window_bounds = array<i64: 16, 256>}]} {
    %c0_i32 = arith.constant 0 : i32
    %0 = arith.cmpi eq, %arg2, %c0_i32 : i32
    %1 = arith.extui %0 : i1 to i32
    %c0_i32_0 = arith.constant 0 : i32
    %2 = arith.cmpi ne, %1, %c0_i32_0 : i32
    scf.if %2 {
      %cst_9 = arith.constant 0.000000e+00 : f32
      %12 = vector.broadcast %cst_9 : f32 to vector<16x256xf32>
      %c0_10 = arith.constant 0 : index
      %c0_11 = arith.constant 0 : index
      %13 = vector.load %arg6[%c0_10, %c0_11] : memref<16x256xf32, #tpu.memory_space<vmem>>, vector<16x256xf32>
      tpu.vector_store %arg6[%c0_10, %c0_11], %12 {strides = array<i32>} : memref<16x256xf32, #tpu.memory_space<vmem>>, vector<16x256xf32>,
    } else {
    }
    %c0 = arith.constant 0 : index
    %c0_1 = arith.constant 0 : index
    %3 = vector.load %arg6[%c0, %c0_1] : memref<16x256xf32, #tpu.memory_space<vmem>>, vector<16x256xf32>
    %c0_2 = arith.constant 0 : index
    %c0_3 = arith.constant 0 : index
    %4 = vector.load %arg3[%c0_2, %c0_3] : memref<16x256xbf16, #tpu.memory_space<vmem>>, vector<16x256xbf16>
    %c0_4 = arith.constant 0 : index
    %c0_5 = arith.constant 0 : index
    %5 = vector.load %arg4[%c0_4, %c0_5] : memref<256x256xbf16, #tpu.memory_space<vmem>>, vector<256x256xbf16>
    %cst = arith.constant dense<0.000000e+00> : vector<16x256xf32>
    %6 = tpu.matmul %4, %5, %cst {dimension_numbers = #tpu.dot_dimension_numbers<[1], [0], [0], [1], [0, 0, 1, 1], [], []>} : vector<16x256xbf16>, vector<256x256xbf16>, vector<16x256xf32> -> vector<16x256xf32>
    %7 = arith.addf %3, %6 : vector<16x256xf32>
    %c0_6 = arith.constant 0 : index
    %c0_7 = arith.constant 0 : index
    %8 = vector.load %arg6[%c0_6, %c0_7] : memref<16x256xf32, #tpu.memory_space<vmem>>, vector<16x256xf32>
    tpu.vector_store %arg6[%c0_6, %c0_7], %7 {strides = array<i32>} : memref<16x256xf32, #tpu.memory_space<vmem>>, vector<16x256xf32>,
    %c8_i32 = arith.constant 8 : i32
    %9 = arith.cmpi eq, %arg2, %c8_i32 : i32
    %10 = arith.extui %9 : i1 to i32
    %c0_i32_8 = arith.constant 0 : i32
    %11 = arith.cmpi ne, %10, %c0_i32_8 : i32
    scf.if %11 {
      %c0_9 = arith.constant 0 : index
      %c0_10 = arith.constant 0 : index
      %12 = vector.load %arg6[%c0_9, %c0_10] : memref<16x256xf32, #tpu.memory_space<vmem>>, vector<16x256xf32>
      %c0_11 = arith.constant 0 : index
      %c0_12 = arith.constant 0 : index
      %13 = vector.load %arg5[%c0_11, %c0_12] : memref<16x256xf32, #tpu.memory_space<vmem>>, vector<16x256xf32>
      tpu.vector_store %arg5[%c0_11, %c0_12], %12 {strides = array<i32>} : memref<16x256xf32, #tpu.memory_space<vmem>>, vector<16x256xf32>,
    } else {
    }
    return
  }
  func.func @transform_0(%arg0: i32, %arg1: i32, %arg2: i32) -> (i32, i32) {
    %c0_i32 = arith.constant 0 : i32
    return %arg0, %arg2 : i32, i32
  }
  func.func @transform_1(%arg0: i32, %arg1: i32, %arg2: i32) -> (i32, i32) {
    %c0_i32 = arith.constant 0 : i32
    return %arg2, %arg1 : i32, i32
  }
  func.func @transform_2(%arg0: i32, %arg1: i32, %arg2: i32) -> (i32, i32) {
    %c0_i32 = arith.constant 0 : i32
    return %arg0, %arg1 : i32, i32
  }
}

module attributes {stable_mosaic.version = 11 : i64} {
  func.func @kernel(%arg0: i32, %arg1: memref<8x256xf32, #tpu.memory_space<vmem>>, %arg2: memref<8x256xf32, #tpu.memory_space<vmem>>, %arg3: memref<1x256xf32, #tpu.memory_space<vmem>>, %arg4: memref<1x256xf32, #tpu.memory_space<vmem>>, %arg5: memref<1x256xf32, #tpu.memory_space<vmem>>, %arg6: memref<1x256xf32, #tpu.memory_space<vmem>>, %arg7: memref<8x256xf32, #tpu.memory_space<vmem>>, %arg8: memref<8x256xf32, #tpu.memory_space<vmem>>, %arg9: memref<8x256xf32, #tpu.memory_space<vmem>>, %arg10: memref<8x256xf32, #tpu.memory_space<vmem>>, %arg11: memref<8x256xf32, #tpu.memory_space<vmem>>) attributes {dimension_semantics = [#tpu.dimension_semantics<parallel>], iteration_bounds = array<i64: 1>, scalar_prefetch = 0 : i64, scratch_operands = 0 : i64, tpu.core_type = #tpu.core_type<tc>, window_params = [{transform_indices = @transform_0, window_bounds = array<i64: 8, 256>}, {transform_indices = @transform_1, window_bounds = array<i64: 8, 256>}, {pipeline_mode = #tpu.pipeline_mode<synchronous>, transform_indices = @transform_2, window_bounds = array<i64: 1, 256>}, {pipeline_mode = #tpu.pipeline_mode<synchronous>, transform_indices = @transform_3, window_bounds = array<i64: 1, 256>}, {pipeline_mode = #tpu.pipeline_mode<synchronous>, transform_indices = @transform_4, window_bounds = array<i64: 1, 256>}, {pipeline_mode = #tpu.pipeline_mode<synchronous>, transform_indices = @transform_5, window_bounds = array<i64: 1, 256>}, {transform_indices = @transform_6, window_bounds = array<i64: 8, 256>}, {transform_indices = @transform_7, window_bounds = array<i64: 8, 256>}, {transform_indices = @transform_8, window_bounds = array<i64: 8, 256>}, {transform_indices = @transform_9, window_bounds = array<i64: 8, 256>}, {transform_indices = @transform_10, window_bounds = array<i64: 8, 256>}]} {
    %c0 = arith.constant 0 : index
    %c0_0 = arith.constant 0 : index
    %0 = vector.load %arg1[%c0, %c0_0] : memref<8x256xf32, #tpu.memory_space<vmem>>, vector<8x256xf32>
    %c0_1 = arith.constant 0 : index
    %c0_2 = arith.constant 0 : index
    %1 = vector.load %arg3[%c0_1, %c0_2] : memref<1x256xf32, #tpu.memory_space<vmem>>, vector<1x256xf32>
    %2 = vector.broadcast %1 : vector<1x256xf32> to vector<8x256xf32>
    %3 = arith.subf %0, %2 : vector<8x256xf32>
    %c0_3 = arith.constant 0 : index
    %c0_4 = arith.constant 0 : index
    %4 = vector.load %arg4[%c0_3, %c0_4] : memref<1x256xf32, #tpu.memory_space<vmem>>, vector<1x256xf32>
    %5 = vector.broadcast %4 : vector<1x256xf32> to vector<8x256xf32>
    %6 = arith.mulf %3, %5 : vector<8x256xf32>
    %c0_5 = arith.constant 0 : index
    %c0_6 = arith.constant 0 : index
    %7 = vector.load %arg2[%c0_5, %c0_6] : memref<8x256xf32, #tpu.memory_space<vmem>>, vector<8x256xf32>
    %c0_7 = arith.constant 0 : index
    %c0_8 = arith.constant 0 : index
    %8 = vector.load %arg5[%c0_7, %c0_8] : memref<1x256xf32, #tpu.memory_space<vmem>>, vector<1x256xf32>
    %9 = vector.broadcast %8 : vector<1x256xf32> to vector<8x256xf32>
    %10 = arith.subf %7, %9 : vector<8x256xf32>
    %c0_9 = arith.constant 0 : index
    %c0_10 = arith.constant 0 : index
    %11 = vector.load %arg6[%c0_9, %c0_10] : memref<1x256xf32, #tpu.memory_space<vmem>>, vector<1x256xf32>
    %12 = vector.broadcast %11 : vector<1x256xf32> to vector<8x256xf32>
    %13 = arith.mulf %10, %12 : vector<8x256xf32>
    %14 = arith.addf %6, %13 : vector<8x256xf32>
    %c0_11 = arith.constant 0 : index
    %c0_12 = arith.constant 0 : index
    %15 = vector.load %arg7[%c0_11, %c0_12] : memref<8x256xf32, #tpu.memory_space<vmem>>, vector<8x256xf32>
    %c0_13 = arith.constant 0 : index
    %c0_14 = arith.constant 0 : index
    %16 = vector.load %arg8[%c0_13, %c0_14] : memref<8x256xf32, #tpu.memory_space<vmem>>, vector<8x256xf32>
    %cst = arith.constant 0.000000e+00 : f32
    %17 = vector.broadcast %cst : f32 to vector<8x256xf32>
    %18 = arith.subf %17, %15 : vector<8x256xf32>
    %19 = arith.addf %18, %16 : vector<8x256xf32>
    %cst_15 = arith.constant 1.000000e-01 : f32
    %20 = vector.broadcast %cst_15 : f32 to vector<8x256xf32>
    %21 = arith.mulf %20, %19 : vector<8x256xf32>
    %22 = arith.addf %15, %21 : vector<8x256xf32>
    %cst_16 = arith.constant 2.000000e-01 : f32
    %23 = vector.broadcast %cst_16 : f32 to vector<8x256xf32>
    %24 = arith.mulf %23, %16 : vector<8x256xf32>
    %25 = arith.subf %16, %24 : vector<8x256xf32>
    %cst_17 = arith.constant 1.000000e+00 : f32
    %26 = vector.broadcast %cst_17 : f32 to vector<8x256xf32>
    %27 = arith.cmpf ogt, %22, %26 : vector<8x256xf32>
    %28 = arith.extui %27 : vector<8x256xi1> to vector<8x256xi32>
    %29 = arith.sitofp %28 : vector<8x256xi32> to vector<8x256xf32>
    %c0_18 = arith.constant 0 : index
    %c0_19 = arith.constant 0 : index
    %30 = vector.load %arg9[%c0_18, %c0_19] : memref<8x256xf32, #tpu.memory_space<vmem>>, vector<8x256xf32>
    tpu.vector_store %arg9[%c0_18, %c0_19], %29 {strides = array<i32>} : memref<8x256xf32, #tpu.memory_space<vmem>>, vector<8x256xf32>,
    %cst_20 = arith.constant 1.000000e+00 : f32
    %31 = vector.broadcast %cst_20 : f32 to vector<8x256xf32>
    %32 = arith.subf %31, %29 : vector<8x256xf32>
    %33 = arith.mulf %32, %22 : vector<8x256xf32>
    %cst_21 = arith.constant 0.000000e+00 : f32
    %34 = vector.broadcast %cst_21 : f32 to vector<8x256xf32>
    %35 = arith.mulf %29, %34 : vector<8x256xf32>
    %36 = arith.addf %33, %35 : vector<8x256xf32>
    %c0_22 = arith.constant 0 : index
    %c0_23 = arith.constant 0 : index
    %37 = vector.load %arg10[%c0_22, %c0_23] : memref<8x256xf32, #tpu.memory_space<vmem>>, vector<8x256xf32>
    tpu.vector_store %arg10[%c0_22, %c0_23], %36 {strides = array<i32>} : memref<8x256xf32, #tpu.memory_space<vmem>>, vector<8x256xf32>,
    %38 = arith.addf %25, %14 : vector<8x256xf32>
    %c0_24 = arith.constant 0 : index
    %c0_25 = arith.constant 0 : index
    %39 = vector.load %arg11[%c0_24, %c0_25] : memref<8x256xf32, #tpu.memory_space<vmem>>, vector<8x256xf32>
    tpu.vector_store %arg11[%c0_24, %c0_25], %38 {strides = array<i32>} : memref<8x256xf32, #tpu.memory_space<vmem>>, vector<8x256xf32>,
    return
  }
  func.func @transform_0(%arg0: i32) -> (i32, i32) {
    %c0_i32 = arith.constant 0 : i32
    %c0_i32_0 = arith.constant 0 : i32
    return %arg0, %c0_i32 : i32, i32
  }
  func.func @transform_1(%arg0: i32) -> (i32, i32) {
    %c0_i32 = arith.constant 0 : i32
    %c0_i32_0 = arith.constant 0 : i32
    return %arg0, %c0_i32 : i32, i32
  }
  func.func @transform_2(%arg0: i32) -> (i32, i32) {
    %c0_i32 = arith.constant 0 : i32
    %c0_i32_0 = arith.constant 0 : i32
    %c0_i32_1 = arith.constant 0 : i32
    return %c0_i32, %c0_i32_0 : i32, i32
  }
  func.func @transform_3(%arg0: i32) -> (i32, i32) {
    %c0_i32 = arith.constant 0 : i32
    %c0_i32_0 = arith.constant 0 : i32
    %c0_i32_1 = arith.constant 0 : i32
    return %c0_i32, %c0_i32_0 : i32, i32
  }
  func.func @transform_4(%arg0: i32) -> (i32, i32) {
    %c0_i32 = arith.constant 0 : i32
    %c0_i32_0 = arith.constant 0 : i32
    %c0_i32_1 = arith.constant 0 : i32
    return %c0_i32, %c0_i32_0 : i32, i32
  }
  func.func @transform_5(%arg0: i32) -> (i32, i32) {
    %c0_i32 = arith.constant 0 : i32
    %c0_i32_0 = arith.constant 0 : i32
    %c0_i32_1 = arith.constant 0 : i32
    return %c0_i32, %c0_i32_0 : i32, i32
  }
  func.func @transform_6(%arg0: i32) -> (i32, i32) {
    %c0_i32 = arith.constant 0 : i32
    %c0_i32_0 = arith.constant 0 : i32
    return %arg0, %c0_i32 : i32, i32
  }
  func.func @transform_7(%arg0: i32) -> (i32, i32) {
    %c0_i32 = arith.constant 0 : i32
    %c0_i32_0 = arith.constant 0 : i32
    return %arg0, %c0_i32 : i32, i32
  }
  func.func @transform_8(%arg0: i32) -> (i32, i32) {
    %c0_i32 = arith.constant 0 : i32
    %c0_i32_0 = arith.constant 0 : i32
    return %arg0, %c0_i32 : i32, i32
  }
  func.func @transform_9(%arg0: i32) -> (i32, i32) {
    %c0_i32 = arith.constant 0 : i32
    %c0_i32_0 = arith.constant 0 : i32
    return %arg0, %c0_i32 : i32, i32
  }
  func.func @transform_10(%arg0: i32) -> (i32, i32) {
    %c0_i32 = arith.constant 0 : i32
    %c0_i32_0 = arith.constant 0 : i32
    return %arg0, %c0_i32 : i32, i32
  }
}

module attributes {stable_mosaic.version = 11 : i64} {
  func.func @kernel(%arg0: i32, %arg1: memref<8x256xf32, #tpu.memory_space<vmem>>, %arg2: memref<8x256xf32, #tpu.memory_space<vmem>>, %arg3: memref<1x256xf32, #tpu.memory_space<vmem>>, %arg4: memref<1x256xf32, #tpu.memory_space<vmem>>, %arg5: memref<8x256xf32, #tpu.memory_space<vmem>>, %arg6: memref<8x256xf32, #tpu.memory_space<vmem>>, %arg7: memref<8x256xf32, #tpu.memory_space<vmem>>, %arg8: memref<8x256xf32, #tpu.memory_space<vmem>>, %arg9: memref<8x256xf32, #tpu.memory_space<vmem>>) attributes {dimension_semantics = [#tpu.dimension_semantics<parallel>], iteration_bounds = array<i64: 1>, scalar_prefetch = 0 : i64, scratch_operands = 0 : i64, tpu.core_type = #tpu.core_type<tc>, window_params = [{transform_indices = @transform_0, window_bounds = array<i64: 8, 256>}, {transform_indices = @transform_1, window_bounds = array<i64: 8, 256>}, {pipeline_mode = #tpu.pipeline_mode<synchronous>, transform_indices = @transform_2, window_bounds = array<i64: 1, 256>}, {pipeline_mode = #tpu.pipeline_mode<synchronous>, transform_indices = @transform_3, window_bounds = array<i64: 1, 256>}, {transform_indices = @transform_4, window_bounds = array<i64: 8, 256>}, {transform_indices = @transform_5, window_bounds = array<i64: 8, 256>}, {transform_indices = @transform_6, window_bounds = array<i64: 8, 256>}, {transform_indices = @transform_7, window_bounds = array<i64: 8, 256>}, {transform_indices = @transform_8, window_bounds = array<i64: 8, 256>}]} {
    %c0 = arith.constant 0 : index
    %c0_0 = arith.constant 0 : index
    %0 = vector.load %arg1[%c0, %c0_0] : memref<8x256xf32, #tpu.memory_space<vmem>>, vector<8x256xf32>
    %c0_1 = arith.constant 0 : index
    %c0_2 = arith.constant 0 : index
    %1 = vector.load %arg3[%c0_1, %c0_2] : memref<1x256xf32, #tpu.memory_space<vmem>>, vector<1x256xf32>
    %2 = vector.broadcast %1 : vector<1x256xf32> to vector<8x256xf32>
    %3 = arith.subf %0, %2 : vector<8x256xf32>
    %c0_3 = arith.constant 0 : index
    %c0_4 = arith.constant 0 : index
    %4 = vector.load %arg4[%c0_3, %c0_4] : memref<1x256xf32, #tpu.memory_space<vmem>>, vector<1x256xf32>
    %5 = vector.broadcast %4 : vector<1x256xf32> to vector<8x256xf32>
    %6 = arith.mulf %3, %5 : vector<8x256xf32>
    %c0_5 = arith.constant 0 : index
    %c0_6 = arith.constant 0 : index
    %7 = vector.load %arg2[%c0_5, %c0_6] : memref<8x256xf32, #tpu.memory_space<vmem>>, vector<8x256xf32>
    %8 = arith.addf %6, %7 : vector<8x256xf32>
    %c0_7 = arith.constant 0 : index
    %c0_8 = arith.constant 0 : index
    %9 = vector.load %arg5[%c0_7, %c0_8] : memref<8x256xf32, #tpu.memory_space<vmem>>, vector<8x256xf32>
    %c0_9 = arith.constant 0 : index
    %c0_10 = arith.constant 0 : index
    %10 = vector.load %arg6[%c0_9, %c0_10] : memref<8x256xf32, #tpu.memory_space<vmem>>, vector<8x256xf32>
    %cst = arith.constant 0.000000e+00 : f32
    %11 = vector.broadcast %cst : f32 to vector<8x256xf32>
    %12 = arith.subf %11, %9 : vector<8x256xf32>
    %13 = arith.addf %12, %10 : vector<8x256xf32>
    %cst_11 = arith.constant 1.000000e-01 : f32
    %14 = vector.broadcast %cst_11 : f32 to vector<8x256xf32>
    %15 = arith.mulf %14, %13 : vector<8x256xf32>
    %16 = arith.addf %9, %15 : vector<8x256xf32>
    %cst_12 = arith.constant 2.000000e-01 : f32
    %17 = vector.broadcast %cst_12 : f32 to vector<8x256xf32>
    %18 = arith.mulf %17, %10 : vector<8x256xf32>
    %19 = arith.subf %10, %18 : vector<8x256xf32>
    %cst_13 = arith.constant 1.000000e+00 : f32
    %20 = vector.broadcast %cst_13 : f32 to vector<8x256xf32>
    %21 = arith.cmpf ogt, %16, %20 : vector<8x256xf32>
    %22 = arith.extui %21 : vector<8x256xi1> to vector<8x256xi32>
    %23 = arith.sitofp %22 : vector<8x256xi32> to vector<8x256xf32>
    %c0_14 = arith.constant 0 : index
    %c0_15 = arith.constant 0 : index
    %24 = vector.load %arg7[%c0_14, %c0_15] : memref<8x256xf32, #tpu.memory_space<vmem>>, vector<8x256xf32>
    tpu.vector_store %arg7[%c0_14, %c0_15], %23 {strides = array<i32>} : memref<8x256xf32, #tpu.memory_space<vmem>>, vector<8x256xf32>,
    %cst_16 = arith.constant 1.000000e+00 : f32
    %25 = vector.broadcast %cst_16 : f32 to vector<8x256xf32>
    %26 = arith.subf %25, %23 : vector<8x256xf32>
    %27 = arith.mulf %26, %16 : vector<8x256xf32>
    %cst_17 = arith.constant 0.000000e+00 : f32
    %28 = vector.broadcast %cst_17 : f32 to vector<8x256xf32>
    %29 = arith.mulf %23, %28 : vector<8x256xf32>
    %30 = arith.addf %27, %29 : vector<8x256xf32>
    %c0_18 = arith.constant 0 : index
    %c0_19 = arith.constant 0 : index
    %31 = vector.load %arg8[%c0_18, %c0_19] : memref<8x256xf32, #tpu.memory_space<vmem>>, vector<8x256xf32>
    tpu.vector_store %arg8[%c0_18, %c0_19], %30 {strides = array<i32>} : memref<8x256xf32, #tpu.memory_space<vmem>>, vector<8x256xf32>,
    %32 = arith.addf %19, %8 : vector<8x256xf32>
    %c0_20 = arith.constant 0 : index
    %c0_21 = arith.constant 0 : index
    %33 = vector.load %arg9[%c0_20, %c0_21] : memref<8x256xf32, #tpu.memory_space<vmem>>, vector<8x256xf32>
    tpu.vector_store %arg9[%c0_20, %c0_21], %32 {strides = array<i32>} : memref<8x256xf32, #tpu.memory_space<vmem>>, vector<8x256xf32>,
    return
  }
  func.func @transform_0(%arg0: i32) -> (i32, i32) {
    %c0_i32 = arith.constant 0 : i32
    %c0_i32_0 = arith.constant 0 : i32
    return %arg0, %c0_i32 : i32, i32
  }
  func.func @transform_1(%arg0: i32) -> (i32, i32) {
    %c0_i32 = arith.constant 0 : i32
    %c0_i32_0 = arith.constant 0 : i32
    return %arg0, %c0_i32 : i32, i32
  }
  func.func @transform_2(%arg0: i32) -> (i32, i32) {
    %c0_i32 = arith.constant 0 : i32
    %c0_i32_0 = arith.constant 0 : i32
    %c0_i32_1 = arith.constant 0 : i32
    return %c0_i32, %c0_i32_0 : i32, i32
  }
  func.func @transform_3(%arg0: i32) -> (i32, i32) {
    %c0_i32 = arith.constant 0 : i32
    %c0_i32_0 = arith.constant 0 : i32
    %c0_i32_1 = arith.constant 0 : i32
    return %c0_i32, %c0_i32_0 : i32, i32
  }
  func.func @transform_4(%arg0: i32) -> (i32, i32) {
    %c0_i32 = arith.constant 0 : i32
    %c0_i32_0 = arith.constant 0 : i32
    return %arg0, %c0_i32 : i32, i32
  }
  func.func @transform_5(%arg0: i32) -> (i32, i32) {
    %c0_i32 = arith.constant 0 : i32
    %c0_i32_0 = arith.constant 0 : i32
    return %arg0, %c0_i32 : i32, i32
  }
  func.func @transform_6(%arg0: i32) -> (i32, i32) {
    %c0_i32 = arith.constant 0 : i32
    %c0_i32_0 = arith.constant 0 : i32
    return %arg0, %c0_i32 : i32, i32
  }
  func.func @transform_7(%arg0: i32) -> (i32, i32) {
    %c0_i32 = arith.constant 0 : i32
    %c0_i32_0 = arith.constant 0 : i32
    return %arg0, %c0_i32 : i32, i32
  }
  func.func @transform_8(%arg0: i32) -> (i32, i32) {
    %c0_i32 = arith.constant 0 : i32
    %c0_i32_0 = arith.constant 0 : i32
    return %arg0, %c0_i32 : i32, i32
  }
}

module attributes {stable_mosaic.version = 11 : i64} {
  func.func @_matmul_kernel(%arg0: i32, %arg1: i32, %arg2: i32, %arg3: memref<16x256xbf16, #tpu.memory_space<vmem>>, %arg4: memref<256x256xbf16, #tpu.memory_space<vmem>>, %arg5: memref<16x256xf32, #tpu.memory_space<vmem>>, %arg6: memref<16x256xf32, #tpu.memory_space<vmem>>) attributes {dimension_semantics = [#tpu.dimension_semantics<parallel>, #tpu.dimension_semantics<parallel>, #tpu.dimension_semantics<arbitrary>], iteration_bounds = array<i64: 1, 2, 1>, scalar_prefetch = 0 : i64, scratch_operands = 1 : i64, tpu.core_type = #tpu.core_type<tc>, window_params = [{transform_indices = @transform_0, window_bounds = array<i64: 16, 256>}, {transform_indices = @transform_1, window_bounds = array<i64: 256, 256>}, {transform_indices = @transform_2, window_bounds = array<i64: 16, 256>}]} {
    %c0_i32 = arith.constant 0 : i32
    %0 = arith.cmpi eq, %arg2, %c0_i32 : i32
    %1 = arith.extui %0 : i1 to i32
    %c0_i32_0 = arith.constant 0 : i32
    %2 = arith.cmpi ne, %1, %c0_i32_0 : i32
    scf.if %2 {
      %cst_10 = arith.constant 0.000000e+00 : f32
      %12 = vector.broadcast %cst_10 : f32 to vector<16x256xf32>
      %c0_11 = arith.constant 0 : index
      %c0_12 = arith.constant 0 : index
      %13 = vector.load %arg6[%c0_11, %c0_12] : memref<16x256xf32, #tpu.memory_space<vmem>>, vector<16x256xf32>
      tpu.vector_store %arg6[%c0_11, %c0_12], %12 {strides = array<i32>} : memref<16x256xf32, #tpu.memory_space<vmem>>, vector<16x256xf32>,
    } else {
    }
    %c0 = arith.constant 0 : index
    %c0_1 = arith.constant 0 : index
    %3 = vector.load %arg6[%c0, %c0_1] : memref<16x256xf32, #tpu.memory_space<vmem>>, vector<16x256xf32>
    %c0_2 = arith.constant 0 : index
    %c0_3 = arith.constant 0 : index
    %4 = vector.load %arg3[%c0_2, %c0_3] : memref<16x256xbf16, #tpu.memory_space<vmem>>, vector<16x256xbf16>
    %c0_4 = arith.constant 0 : index
    %c0_5 = arith.constant 0 : index
    %5 = vector.load %arg4[%c0_4, %c0_5] : memref<256x256xbf16, #tpu.memory_space<vmem>>, vector<256x256xbf16>
    %cst = arith.constant dense<0.000000e+00> : vector<16x256xf32>
    %6 = tpu.matmul %4, %5, %cst {dimension_numbers = #tpu.dot_dimension_numbers<[1], [0], [0], [1], [0, 0, 1, 1], [], []>} : vector<16x256xbf16>, vector<256x256xbf16>, vector<16x256xf32> -> vector<16x256xf32>
    %7 = arith.addf %3, %6 : vector<16x256xf32>
    %c0_6 = arith.constant 0 : index
    %c0_7 = arith.constant 0 : index
    %8 = vector.load %arg6[%c0_6, %c0_7] : memref<16x256xf32, #tpu.memory_space<vmem>>, vector<16x256xf32>
    tpu.vector_store %arg6[%c0_6, %c0_7], %7 {strides = array<i32>} : memref<16x256xf32, #tpu.memory_space<vmem>>, vector<16x256xf32>,
    %c0_i32_8 = arith.constant 0 : i32
    %9 = arith.cmpi eq, %arg2, %c0_i32_8 : i32
    %10 = arith.extui %9 : i1 to i32
    %c0_i32_9 = arith.constant 0 : i32
    %11 = arith.cmpi ne, %10, %c0_i32_9 : i32
    scf.if %11 {
      %c0_10 = arith.constant 0 : index
      %c0_11 = arith.constant 0 : index
      %12 = vector.load %arg6[%c0_10, %c0_11] : memref<16x256xf32, #tpu.memory_space<vmem>>, vector<16x256xf32>
      %c0_12 = arith.constant 0 : index
      %c0_13 = arith.constant 0 : index
      %13 = vector.load %arg5[%c0_12, %c0_13] : memref<16x256xf32, #tpu.memory_space<vmem>>, vector<16x256xf32>
      tpu.vector_store %arg5[%c0_12, %c0_13], %12 {strides = array<i32>} : memref<16x256xf32, #tpu.memory_space<vmem>>, vector<16x256xf32>,
    } else {
    }
    return
  }
  func.func @transform_0(%arg0: i32, %arg1: i32, %arg2: i32) -> (i32, i32) {
    %c0_i32 = arith.constant 0 : i32
    return %arg0, %arg2 : i32, i32
  }
  func.func @transform_1(%arg0: i32, %arg1: i32, %arg2: i32) -> (i32, i32) {
    %c0_i32 = arith.constant 0 : i32
    return %arg2, %arg1 : i32, i32
  }
  func.func @transform_2(%arg0: i32, %arg1: i32, %arg2: i32) -> (i32, i32) {
    %c0_i32 = arith.constant 0 : i32
    return %arg0, %arg1 : i32, i32
  }
}

module attributes {stable_mosaic.version = 11 : i64} {
  func.func @_bn_stats_kernel(%arg0: i32, %arg1: memref<2x512xf32, #tpu.memory_space<vmem>>, %arg2: memref<1x512xf32, #tpu.memory_space<vmem>>, %arg3: memref<1x512xf32, #tpu.memory_space<vmem>>) attributes {dimension_semantics = [#tpu.dimension_semantics<arbitrary>], iteration_bounds = array<i64: 1>, scalar_prefetch = 0 : i64, scratch_operands = 0 : i64, tpu.core_type = #tpu.core_type<tc>, window_params = [{transform_indices = @transform_0, window_bounds = array<i64: 2, 512>}, {pipeline_mode = #tpu.pipeline_mode<synchronous>, transform_indices = @transform_1, window_bounds = array<i64: 1, 512>}, {pipeline_mode = #tpu.pipeline_mode<synchronous>, transform_indices = @transform_2, window_bounds = array<i64: 1, 512>}]} {
    %c0_i32 = arith.constant 0 : i32
    %0 = arith.cmpi eq, %arg0, %c0_i32 : i32
    %1 = arith.extui %0 : i1 to i32
    %c0_i32_0 = arith.constant 0 : i32
    %2 = arith.cmpi ne, %1, %c0_i32_0 : i32
    scf.if %2 {
      %cst_11 = arith.constant 0.000000e+00 : f32
      %15 = vector.broadcast %cst_11 : f32 to vector<1x512xf32>
      %c0_12 = arith.constant 0 : index
      %c0_13 = arith.constant 0 : index
      %16 = vector.load %arg2[%c0_12, %c0_13] : memref<1x512xf32, #tpu.memory_space<vmem>>, vector<1x512xf32>
      tpu.vector_store %arg2[%c0_12, %c0_13], %15 {strides = array<i32>} : memref<1x512xf32, #tpu.memory_space<vmem>>, vector<1x512xf32>,
      %cst_14 = arith.constant 0.000000e+00 : f32
      %17 = vector.broadcast %cst_14 : f32 to vector<1x512xf32>
      %c0_15 = arith.constant 0 : index
      %c0_16 = arith.constant 0 : index
      %18 = vector.load %arg3[%c0_15, %c0_16] : memref<1x512xf32, #tpu.memory_space<vmem>>, vector<1x512xf32>
      tpu.vector_store %arg3[%c0_15, %c0_16], %17 {strides = array<i32>} : memref<1x512xf32, #tpu.memory_space<vmem>>, vector<1x512xf32>,
    } else {
    }
    %c0 = arith.constant 0 : index
    %c0_1 = arith.constant 0 : index
    %3 = vector.load %arg1[%c0, %c0_1] : memref<2x512xf32, #tpu.memory_space<vmem>>, vector<2x512xf32>
    %c0_2 = arith.constant 0 : index
    %c0_3 = arith.constant 0 : index
    %4 = vector.load %arg2[%c0_2, %c0_3] : memref<1x512xf32, #tpu.memory_space<vmem>>, vector<1x512xf32>
    %cst = arith.constant dense<0.000000e+00> : vector<512xf32>
    %5 = vector.multi_reduction <add>, %3, %cst [0] : vector<2x512xf32> to vector<512xf32>
    %6 = vector.shape_cast %5 : vector<512xf32> to vector<1x512xf32>
    %7 = arith.addf %4, %6 : vector<1x512xf32>
    %c0_4 = arith.constant 0 : index
    %c0_5 = arith.constant 0 : index
    %8 = vector.load %arg2[%c0_4, %c0_5] : memref<1x512xf32, #tpu.memory_space<vmem>>, vector<1x512xf32>
    tpu.vector_store %arg2[%c0_4, %c0_5], %7 {strides = array<i32>} : memref<1x512xf32, #tpu.memory_space<vmem>>, vector<1x512xf32>,
    %c0_6 = arith.constant 0 : index
    %c0_7 = arith.constant 0 : index
    %9 = vector.load %arg3[%c0_6, %c0_7] : memref<1x512xf32, #tpu.memory_space<vmem>>, vector<1x512xf32>
    %10 = arith.mulf %3, %3 : vector<2x512xf32>
    %cst_8 = arith.constant dense<0.000000e+00> : vector<512xf32>
    %11 = vector.multi_reduction <add>, %10, %cst_8 [0] : vector<2x512xf32> to vector<512xf32>
    %12 = vector.shape_cast %11 : vector<512xf32> to vector<1x512xf32>
    %13 = arith.addf %9, %12 : vector<1x512xf32>
    %c0_9 = arith.constant 0 : index
    %c0_10 = arith.constant 0 : index
    %14 = vector.load %arg3[%c0_9, %c0_10] : memref<1x512xf32, #tpu.memory_space<vmem>>, vector<1x512xf32>
    tpu.vector_store %arg3[%c0_9, %c0_10], %13 {strides = array<i32>} : memref<1x512xf32, #tpu.memory_space<vmem>>, vector<1x512xf32>,
    return
  }
  func.func @transform_0(%arg0: i32) -> (i32, i32) {
    %c0_i32 = arith.constant 0 : i32
    %c0_i32_0 = arith.constant 0 : i32
    return %arg0, %c0_i32 : i32, i32
  }
  func.func @transform_1(%arg0: i32) -> (i32, i32) {
    %c0_i32 = arith.constant 0 : i32
    %c0_i32_0 = arith.constant 0 : i32
    %c0_i32_1 = arith.constant 0 : i32
    return %c0_i32, %c0_i32_0 : i32, i32
  }
  func.func @transform_2(%arg0: i32) -> (i32, i32) {
    %c0_i32 = arith.constant 0 : i32
    %c0_i32_0 = arith.constant 0 : i32
    %c0_i32_1 = arith.constant 0 : i32
    return %c0_i32, %c0_i32_0 : i32, i32
  }
}

module attributes {stable_mosaic.version = 11 : i64} {
  func.func @kernel(%arg0: i32, %arg1: memref<2x512xf32, #tpu.memory_space<vmem>>, %arg2: memref<1x512xf32, #tpu.memory_space<vmem>>, %arg3: memref<1x512xf32, #tpu.memory_space<vmem>>, %arg4: memref<2x512xf32, #tpu.memory_space<vmem>>, %arg5: memref<2x512xf32, #tpu.memory_space<vmem>>, %arg6: memref<2x512xf32, #tpu.memory_space<vmem>>, %arg7: memref<2x512xf32, #tpu.memory_space<vmem>>, %arg8: memref<2x512xf32, #tpu.memory_space<vmem>>) attributes {dimension_semantics = [#tpu.dimension_semantics<parallel>], iteration_bounds = array<i64: 1>, scalar_prefetch = 0 : i64, scratch_operands = 0 : i64, tpu.core_type = #tpu.core_type<tc>, window_params = [{transform_indices = @transform_0, window_bounds = array<i64: 2, 512>}, {pipeline_mode = #tpu.pipeline_mode<synchronous>, transform_indices = @transform_1, window_bounds = array<i64: 1, 512>}, {pipeline_mode = #tpu.pipeline_mode<synchronous>, transform_indices = @transform_2, window_bounds = array<i64: 1, 512>}, {transform_indices = @transform_3, window_bounds = array<i64: 2, 512>}, {transform_indices = @transform_4, window_bounds = array<i64: 2, 512>}, {transform_indices = @transform_5, window_bounds = array<i64: 2, 512>}, {transform_indices = @transform_6, window_bounds = array<i64: 2, 512>}, {transform_indices = @transform_7, window_bounds = array<i64: 2, 512>}]} {
    %c0 = arith.constant 0 : index
    %c0_0 = arith.constant 0 : index
    %0 = vector.load %arg1[%c0, %c0_0] : memref<2x512xf32, #tpu.memory_space<vmem>>, vector<2x512xf32>
    %c0_1 = arith.constant 0 : index
    %c0_2 = arith.constant 0 : index
    %1 = vector.load %arg2[%c0_1, %c0_2] : memref<1x512xf32, #tpu.memory_space<vmem>>, vector<1x512xf32>
    %2 = vector.broadcast %1 : vector<1x512xf32> to vector<2x512xf32>
    %3 = arith.subf %0, %2 : vector<2x512xf32>
    %c0_3 = arith.constant 0 : index
    %c0_4 = arith.constant 0 : index
    %4 = vector.load %arg3[%c0_3, %c0_4] : memref<1x512xf32, #tpu.memory_space<vmem>>, vector<1x512xf32>
    %5 = vector.broadcast %4 : vector<1x512xf32> to vector<2x512xf32>
    %6 = arith.mulf %3, %5 : vector<2x512xf32>
    %c0_5 = arith.constant 0 : index
    %c0_6 = arith.constant 0 : index
    %7 = vector.load %arg4[%c0_5, %c0_6] : memref<2x512xf32, #tpu.memory_space<vmem>>, vector<2x512xf32>
    %c0_7 = arith.constant 0 : index
    %c0_8 = arith.constant 0 : index
    %8 = vector.load %arg5[%c0_7, %c0_8] : memref<2x512xf32, #tpu.memory_space<vmem>>, vector<2x512xf32>
    %cst = arith.constant 0.000000e+00 : f32
    %9 = vector.broadcast %cst : f32 to vector<2x512xf32>
    %10 = arith.subf %9, %7 : vector<2x512xf32>
    %11 = arith.addf %10, %8 : vector<2x512xf32>
    %cst_9 = arith.constant 1.000000e-01 : f32
    %12 = vector.broadcast %cst_9 : f32 to vector<2x512xf32>
    %13 = arith.mulf %12, %11 : vector<2x512xf32>
    %14 = arith.addf %7, %13 : vector<2x512xf32>
    %cst_10 = arith.constant 2.000000e-01 : f32
    %15 = vector.broadcast %cst_10 : f32 to vector<2x512xf32>
    %16 = arith.mulf %15, %8 : vector<2x512xf32>
    %17 = arith.subf %8, %16 : vector<2x512xf32>
    %cst_11 = arith.constant 1.000000e+00 : f32
    %18 = vector.broadcast %cst_11 : f32 to vector<2x512xf32>
    %19 = arith.cmpf ogt, %14, %18 : vector<2x512xf32>
    %20 = arith.extui %19 : vector<2x512xi1> to vector<2x512xi32>
    %21 = arith.sitofp %20 : vector<2x512xi32> to vector<2x512xf32>
    %c0_12 = arith.constant 0 : index
    %c0_13 = arith.constant 0 : index
    %22 = vector.load %arg6[%c0_12, %c0_13] : memref<2x512xf32, #tpu.memory_space<vmem>>, vector<2x512xf32>
    tpu.vector_store %arg6[%c0_12, %c0_13], %21 {strides = array<i32>} : memref<2x512xf32, #tpu.memory_space<vmem>>, vector<2x512xf32>,
    %cst_14 = arith.constant 1.000000e+00 : f32
    %23 = vector.broadcast %cst_14 : f32 to vector<2x512xf32>
    %24 = arith.subf %23, %21 : vector<2x512xf32>
    %25 = arith.mulf %24, %14 : vector<2x512xf32>
    %cst_15 = arith.constant 0.000000e+00 : f32
    %26 = vector.broadcast %cst_15 : f32 to vector<2x512xf32>
    %27 = arith.mulf %21, %26 : vector<2x512xf32>
    %28 = arith.addf %25, %27 : vector<2x512xf32>
    %c0_16 = arith.constant 0 : index
    %c0_17 = arith.constant 0 : index
    %29 = vector.load %arg7[%c0_16, %c0_17] : memref<2x512xf32, #tpu.memory_space<vmem>>, vector<2x512xf32>
    tpu.vector_store %arg7[%c0_16, %c0_17], %28 {strides = array<i32>} : memref<2x512xf32, #tpu.memory_space<vmem>>, vector<2x512xf32>,
    %30 = arith.addf %17, %6 : vector<2x512xf32>
    %c0_18 = arith.constant 0 : index
    %c0_19 = arith.constant 0 : index
    %31 = vector.load %arg8[%c0_18, %c0_19] : memref<2x512xf32, #tpu.memory_space<vmem>>, vector<2x512xf32>
    tpu.vector_store %arg8[%c0_18, %c0_19], %30 {strides = array<i32>} : memref<2x512xf32, #tpu.memory_space<vmem>>, vector<2x512xf32>,
    return
  }
  func.func @transform_0(%arg0: i32) -> (i32, i32) {
    %c0_i32 = arith.constant 0 : i32
    %c0_i32_0 = arith.constant 0 : i32
    return %arg0, %c0_i32 : i32, i32
  }
  func.func @transform_1(%arg0: i32) -> (i32, i32) {
    %c0_i32 = arith.constant 0 : i32
    %c0_i32_0 = arith.constant 0 : i32
    %c0_i32_1 = arith.constant 0 : i32
    return %c0_i32, %c0_i32_0 : i32, i32
  }
  func.func @transform_2(%arg0: i32) -> (i32, i32) {
    %c0_i32 = arith.constant 0 : i32
    %c0_i32_0 = arith.constant 0 : i32
    %c0_i32_1 = arith.constant 0 : i32
    return %c0_i32, %c0_i32_0 : i32, i32
  }
  func.func @transform_3(%arg0: i32) -> (i32, i32) {
    %c0_i32 = arith.constant 0 : i32
    %c0_i32_0 = arith.constant 0 : i32
    return %arg0, %c0_i32 : i32, i32
  }
  func.func @transform_4(%arg0: i32) -> (i32, i32) {
    %c0_i32 = arith.constant 0 : i32
    %c0_i32_0 = arith.constant 0 : i32
    return %arg0, %c0_i32 : i32, i32
  }
  func.func @transform_5(%arg0: i32) -> (i32, i32) {
    %c0_i32 = arith.constant 0 : i32
    %c0_i32_0 = arith.constant 0 : i32
    return %arg0, %c0_i32 : i32, i32
  }
  func.func @transform_6(%arg0: i32) -> (i32, i32) {
    %c0_i32 = arith.constant 0 : i32
    %c0_i32_0 = arith.constant 0 : i32
    return %arg0, %c0_i32 : i32, i32
  }
  func.func @transform_7(%arg0: i32) -> (i32, i32) {
    %c0_i32 = arith.constant 0 : i32
    %c0_i32_0 = arith.constant 0 : i32
    return %arg0, %c0_i32 : i32, i32
  }
}

module attributes {stable_mosaic.version = 11 : i64} {
  func.func @_matmul_kernel(%arg0: i32, %arg1: i32, %arg2: i32, %arg3: memref<16x256xbf16, #tpu.memory_space<vmem>>, %arg4: memref<256x256xbf16, #tpu.memory_space<vmem>>, %arg5: memref<16x256xf32, #tpu.memory_space<vmem>>, %arg6: memref<16x256xf32, #tpu.memory_space<vmem>>) attributes {dimension_semantics = [#tpu.dimension_semantics<parallel>, #tpu.dimension_semantics<parallel>, #tpu.dimension_semantics<arbitrary>], iteration_bounds = array<i64: 1, 2, 9>, scalar_prefetch = 0 : i64, scratch_operands = 1 : i64, tpu.core_type = #tpu.core_type<tc>, window_params = [{transform_indices = @transform_0, window_bounds = array<i64: 16, 256>}, {transform_indices = @transform_1, window_bounds = array<i64: 256, 256>}, {transform_indices = @transform_2, window_bounds = array<i64: 16, 256>}]} {
    %c0_i32 = arith.constant 0 : i32
    %0 = arith.cmpi eq, %arg2, %c0_i32 : i32
    %1 = arith.extui %0 : i1 to i32
    %c0_i32_0 = arith.constant 0 : i32
    %2 = arith.cmpi ne, %1, %c0_i32_0 : i32
    scf.if %2 {
      %cst_9 = arith.constant 0.000000e+00 : f32
      %12 = vector.broadcast %cst_9 : f32 to vector<16x256xf32>
      %c0_10 = arith.constant 0 : index
      %c0_11 = arith.constant 0 : index
      %13 = vector.load %arg6[%c0_10, %c0_11] : memref<16x256xf32, #tpu.memory_space<vmem>>, vector<16x256xf32>
      tpu.vector_store %arg6[%c0_10, %c0_11], %12 {strides = array<i32>} : memref<16x256xf32, #tpu.memory_space<vmem>>, vector<16x256xf32>,
    } else {
    }
    %c0 = arith.constant 0 : index
    %c0_1 = arith.constant 0 : index
    %3 = vector.load %arg6[%c0, %c0_1] : memref<16x256xf32, #tpu.memory_space<vmem>>, vector<16x256xf32>
    %c0_2 = arith.constant 0 : index
    %c0_3 = arith.constant 0 : index
    %4 = vector.load %arg3[%c0_2, %c0_3] : memref<16x256xbf16, #tpu.memory_space<vmem>>, vector<16x256xbf16>
    %c0_4 = arith.constant 0 : index
    %c0_5 = arith.constant 0 : index
    %5 = vector.load %arg4[%c0_4, %c0_5] : memref<256x256xbf16, #tpu.memory_space<vmem>>, vector<256x256xbf16>
    %cst = arith.constant dense<0.000000e+00> : vector<16x256xf32>
    %6 = tpu.matmul %4, %5, %cst {dimension_numbers = #tpu.dot_dimension_numbers<[1], [0], [0], [1], [0, 0, 1, 1], [], []>} : vector<16x256xbf16>, vector<256x256xbf16>, vector<16x256xf32> -> vector<16x256xf32>
    %7 = arith.addf %3, %6 : vector<16x256xf32>
    %c0_6 = arith.constant 0 : index
    %c0_7 = arith.constant 0 : index
    %8 = vector.load %arg6[%c0_6, %c0_7] : memref<16x256xf32, #tpu.memory_space<vmem>>, vector<16x256xf32>
    tpu.vector_store %arg6[%c0_6, %c0_7], %7 {strides = array<i32>} : memref<16x256xf32, #tpu.memory_space<vmem>>, vector<16x256xf32>,
    %c8_i32 = arith.constant 8 : i32
    %9 = arith.cmpi eq, %arg2, %c8_i32 : i32
    %10 = arith.extui %9 : i1 to i32
    %c0_i32_8 = arith.constant 0 : i32
    %11 = arith.cmpi ne, %10, %c0_i32_8 : i32
    scf.if %11 {
      %c0_9 = arith.constant 0 : index
      %c0_10 = arith.constant 0 : index
      %12 = vector.load %arg6[%c0_9, %c0_10] : memref<16x256xf32, #tpu.memory_space<vmem>>, vector<16x256xf32>
      %c0_11 = arith.constant 0 : index
      %c0_12 = arith.constant 0 : index
      %13 = vector.load %arg5[%c0_11, %c0_12] : memref<16x256xf32, #tpu.memory_space<vmem>>, vector<16x256xf32>
      tpu.vector_store %arg5[%c0_11, %c0_12], %12 {strides = array<i32>} : memref<16x256xf32, #tpu.memory_space<vmem>>, vector<16x256xf32>,
    } else {
    }
    return
  }
  func.func @transform_0(%arg0: i32, %arg1: i32, %arg2: i32) -> (i32, i32) {
    %c0_i32 = arith.constant 0 : i32
    return %arg0, %arg2 : i32, i32
  }
  func.func @transform_1(%arg0: i32, %arg1: i32, %arg2: i32) -> (i32, i32) {
    %c0_i32 = arith.constant 0 : i32
    return %arg2, %arg1 : i32, i32
  }
  func.func @transform_2(%arg0: i32, %arg1: i32, %arg2: i32) -> (i32, i32) {
    %c0_i32 = arith.constant 0 : i32
    return %arg0, %arg1 : i32, i32
  }
}

module attributes {stable_mosaic.version = 11 : i64} {
  func.func @_matmul_kernel(%arg0: i32, %arg1: i32, %arg2: i32, %arg3: memref<16x256xbf16, #tpu.memory_space<vmem>>, %arg4: memref<256x256xbf16, #tpu.memory_space<vmem>>, %arg5: memref<16x256xf32, #tpu.memory_space<vmem>>, %arg6: memref<16x256xf32, #tpu.memory_space<vmem>>) attributes {dimension_semantics = [#tpu.dimension_semantics<parallel>, #tpu.dimension_semantics<parallel>, #tpu.dimension_semantics<arbitrary>], iteration_bounds = array<i64: 1, 2, 18>, scalar_prefetch = 0 : i64, scratch_operands = 1 : i64, tpu.core_type = #tpu.core_type<tc>, window_params = [{transform_indices = @transform_0, window_bounds = array<i64: 16, 256>}, {transform_indices = @transform_1, window_bounds = array<i64: 256, 256>}, {transform_indices = @transform_2, window_bounds = array<i64: 16, 256>}]} {
    %c0_i32 = arith.constant 0 : i32
    %0 = arith.cmpi eq, %arg2, %c0_i32 : i32
    %1 = arith.extui %0 : i1 to i32
    %c0_i32_0 = arith.constant 0 : i32
    %2 = arith.cmpi ne, %1, %c0_i32_0 : i32
    scf.if %2 {
      %cst_9 = arith.constant 0.000000e+00 : f32
      %12 = vector.broadcast %cst_9 : f32 to vector<16x256xf32>
      %c0_10 = arith.constant 0 : index
      %c0_11 = arith.constant 0 : index
      %13 = vector.load %arg6[%c0_10, %c0_11] : memref<16x256xf32, #tpu.memory_space<vmem>>, vector<16x256xf32>
      tpu.vector_store %arg6[%c0_10, %c0_11], %12 {strides = array<i32>} : memref<16x256xf32, #tpu.memory_space<vmem>>, vector<16x256xf32>,
    } else {
    }
    %c0 = arith.constant 0 : index
    %c0_1 = arith.constant 0 : index
    %3 = vector.load %arg6[%c0, %c0_1] : memref<16x256xf32, #tpu.memory_space<vmem>>, vector<16x256xf32>
    %c0_2 = arith.constant 0 : index
    %c0_3 = arith.constant 0 : index
    %4 = vector.load %arg3[%c0_2, %c0_3] : memref<16x256xbf16, #tpu.memory_space<vmem>>, vector<16x256xbf16>
    %c0_4 = arith.constant 0 : index
    %c0_5 = arith.constant 0 : index
    %5 = vector.load %arg4[%c0_4, %c0_5] : memref<256x256xbf16, #tpu.memory_space<vmem>>, vector<256x256xbf16>
    %cst = arith.constant dense<0.000000e+00> : vector<16x256xf32>
    %6 = tpu.matmul %4, %5, %cst {dimension_numbers = #tpu.dot_dimension_numbers<[1], [0], [0], [1], [0, 0, 1, 1], [], []>} : vector<16x256xbf16>, vector<256x256xbf16>, vector<16x256xf32> -> vector<16x256xf32>
    %7 = arith.addf %3, %6 : vector<16x256xf32>
    %c0_6 = arith.constant 0 : index
    %c0_7 = arith.constant 0 : index
    %8 = vector.load %arg6[%c0_6, %c0_7] : memref<16x256xf32, #tpu.memory_space<vmem>>, vector<16x256xf32>
    tpu.vector_store %arg6[%c0_6, %c0_7], %7 {strides = array<i32>} : memref<16x256xf32, #tpu.memory_space<vmem>>, vector<16x256xf32>,
    %c17_i32 = arith.constant 17 : i32
    %9 = arith.cmpi eq, %arg2, %c17_i32 : i32
    %10 = arith.extui %9 : i1 to i32
    %c0_i32_8 = arith.constant 0 : i32
    %11 = arith.cmpi ne, %10, %c0_i32_8 : i32
    scf.if %11 {
      %c0_9 = arith.constant 0 : index
      %c0_10 = arith.constant 0 : index
      %12 = vector.load %arg6[%c0_9, %c0_10] : memref<16x256xf32, #tpu.memory_space<vmem>>, vector<16x256xf32>
      %c0_11 = arith.constant 0 : index
      %c0_12 = arith.constant 0 : index
      %13 = vector.load %arg5[%c0_11, %c0_12] : memref<16x256xf32, #tpu.memory_space<vmem>>, vector<16x256xf32>
      tpu.vector_store %arg5[%c0_11, %c0_12], %12 {strides = array<i32>} : memref<16x256xf32, #tpu.memory_space<vmem>>, vector<16x256xf32>,
    } else {
    }
    return
  }
  func.func @transform_0(%arg0: i32, %arg1: i32, %arg2: i32) -> (i32, i32) {
    %c0_i32 = arith.constant 0 : i32
    return %arg0, %arg2 : i32, i32
  }
  func.func @transform_1(%arg0: i32, %arg1: i32, %arg2: i32) -> (i32, i32) {
    %c0_i32 = arith.constant 0 : i32
    return %arg2, %arg1 : i32, i32
  }
  func.func @transform_2(%arg0: i32, %arg1: i32, %arg2: i32) -> (i32, i32) {
    %c0_i32 = arith.constant 0 : i32
    return %arg0, %arg1 : i32, i32
  }
}

module attributes {stable_mosaic.version = 11 : i64} {
  func.func @kernel(%arg0: i32, %arg1: memref<2x512xf32, #tpu.memory_space<vmem>>, %arg2: memref<2x512xf32, #tpu.memory_space<vmem>>, %arg3: memref<1x512xf32, #tpu.memory_space<vmem>>, %arg4: memref<1x512xf32, #tpu.memory_space<vmem>>, %arg5: memref<1x512xf32, #tpu.memory_space<vmem>>, %arg6: memref<1x512xf32, #tpu.memory_space<vmem>>, %arg7: memref<2x512xf32, #tpu.memory_space<vmem>>, %arg8: memref<2x512xf32, #tpu.memory_space<vmem>>, %arg9: memref<2x512xf32, #tpu.memory_space<vmem>>, %arg10: memref<2x512xf32, #tpu.memory_space<vmem>>, %arg11: memref<2x512xf32, #tpu.memory_space<vmem>>) attributes {dimension_semantics = [#tpu.dimension_semantics<parallel>], iteration_bounds = array<i64: 1>, scalar_prefetch = 0 : i64, scratch_operands = 0 : i64, tpu.core_type = #tpu.core_type<tc>, window_params = [{transform_indices = @transform_0, window_bounds = array<i64: 2, 512>}, {transform_indices = @transform_1, window_bounds = array<i64: 2, 512>}, {pipeline_mode = #tpu.pipeline_mode<synchronous>, transform_indices = @transform_2, window_bounds = array<i64: 1, 512>}, {pipeline_mode = #tpu.pipeline_mode<synchronous>, transform_indices = @transform_3, window_bounds = array<i64: 1, 512>}, {pipeline_mode = #tpu.pipeline_mode<synchronous>, transform_indices = @transform_4, window_bounds = array<i64: 1, 512>}, {pipeline_mode = #tpu.pipeline_mode<synchronous>, transform_indices = @transform_5, window_bounds = array<i64: 1, 512>}, {transform_indices = @transform_6, window_bounds = array<i64: 2, 512>}, {transform_indices = @transform_7, window_bounds = array<i64: 2, 512>}, {transform_indices = @transform_8, window_bounds = array<i64: 2, 512>}, {transform_indices = @transform_9, window_bounds = array<i64: 2, 512>}, {transform_indices = @transform_10, window_bounds = array<i64: 2, 512>}]} {
    %c0 = arith.constant 0 : index
    %c0_0 = arith.constant 0 : index
    %0 = vector.load %arg1[%c0, %c0_0] : memref<2x512xf32, #tpu.memory_space<vmem>>, vector<2x512xf32>
    %c0_1 = arith.constant 0 : index
    %c0_2 = arith.constant 0 : index
    %1 = vector.load %arg3[%c0_1, %c0_2] : memref<1x512xf32, #tpu.memory_space<vmem>>, vector<1x512xf32>
    %2 = vector.broadcast %1 : vector<1x512xf32> to vector<2x512xf32>
    %3 = arith.subf %0, %2 : vector<2x512xf32>
    %c0_3 = arith.constant 0 : index
    %c0_4 = arith.constant 0 : index
    %4 = vector.load %arg4[%c0_3, %c0_4] : memref<1x512xf32, #tpu.memory_space<vmem>>, vector<1x512xf32>
    %5 = vector.broadcast %4 : vector<1x512xf32> to vector<2x512xf32>
    %6 = arith.mulf %3, %5 : vector<2x512xf32>
    %c0_5 = arith.constant 0 : index
    %c0_6 = arith.constant 0 : index
    %7 = vector.load %arg2[%c0_5, %c0_6] : memref<2x512xf32, #tpu.memory_space<vmem>>, vector<2x512xf32>
    %c0_7 = arith.constant 0 : index
    %c0_8 = arith.constant 0 : index
    %8 = vector.load %arg5[%c0_7, %c0_8] : memref<1x512xf32, #tpu.memory_space<vmem>>, vector<1x512xf32>
    %9 = vector.broadcast %8 : vector<1x512xf32> to vector<2x512xf32>
    %10 = arith.subf %7, %9 : vector<2x512xf32>
    %c0_9 = arith.constant 0 : index
    %c0_10 = arith.constant 0 : index
    %11 = vector.load %arg6[%c0_9, %c0_10] : memref<1x512xf32, #tpu.memory_space<vmem>>, vector<1x512xf32>
    %12 = vector.broadcast %11 : vector<1x512xf32> to vector<2x512xf32>
    %13 = arith.mulf %10, %12 : vector<2x512xf32>
    %14 = arith.addf %6, %13 : vector<2x512xf32>
    %c0_11 = arith.constant 0 : index
    %c0_12 = arith.constant 0 : index
    %15 = vector.load %arg7[%c0_11, %c0_12] : memref<2x512xf32, #tpu.memory_space<vmem>>, vector<2x512xf32>
    %c0_13 = arith.constant 0 : index
    %c0_14 = arith.constant 0 : index
    %16 = vector.load %arg8[%c0_13, %c0_14] : memref<2x512xf32, #tpu.memory_space<vmem>>, vector<2x512xf32>
    %cst = arith.constant 0.000000e+00 : f32
    %17 = vector.broadcast %cst : f32 to vector<2x512xf32>
    %18 = arith.subf %17, %15 : vector<2x512xf32>
    %19 = arith.addf %18, %16 : vector<2x512xf32>
    %cst_15 = arith.constant 1.000000e-01 : f32
    %20 = vector.broadcast %cst_15 : f32 to vector<2x512xf32>
    %21 = arith.mulf %20, %19 : vector<2x512xf32>
    %22 = arith.addf %15, %21 : vector<2x512xf32>
    %cst_16 = arith.constant 2.000000e-01 : f32
    %23 = vector.broadcast %cst_16 : f32 to vector<2x512xf32>
    %24 = arith.mulf %23, %16 : vector<2x512xf32>
    %25 = arith.subf %16, %24 : vector<2x512xf32>
    %cst_17 = arith.constant 1.000000e+00 : f32
    %26 = vector.broadcast %cst_17 : f32 to vector<2x512xf32>
    %27 = arith.cmpf ogt, %22, %26 : vector<2x512xf32>
    %28 = arith.extui %27 : vector<2x512xi1> to vector<2x512xi32>
    %29 = arith.sitofp %28 : vector<2x512xi32> to vector<2x512xf32>
    %c0_18 = arith.constant 0 : index
    %c0_19 = arith.constant 0 : index
    %30 = vector.load %arg9[%c0_18, %c0_19] : memref<2x512xf32, #tpu.memory_space<vmem>>, vector<2x512xf32>
    tpu.vector_store %arg9[%c0_18, %c0_19], %29 {strides = array<i32>} : memref<2x512xf32, #tpu.memory_space<vmem>>, vector<2x512xf32>,
    %cst_20 = arith.constant 1.000000e+00 : f32
    %31 = vector.broadcast %cst_20 : f32 to vector<2x512xf32>
    %32 = arith.subf %31, %29 : vector<2x512xf32>
    %33 = arith.mulf %32, %22 : vector<2x512xf32>
    %cst_21 = arith.constant 0.000000e+00 : f32
    %34 = vector.broadcast %cst_21 : f32 to vector<2x512xf32>
    %35 = arith.mulf %29, %34 : vector<2x512xf32>
    %36 = arith.addf %33, %35 : vector<2x512xf32>
    %c0_22 = arith.constant 0 : index
    %c0_23 = arith.constant 0 : index
    %37 = vector.load %arg10[%c0_22, %c0_23] : memref<2x512xf32, #tpu.memory_space<vmem>>, vector<2x512xf32>
    tpu.vector_store %arg10[%c0_22, %c0_23], %36 {strides = array<i32>} : memref<2x512xf32, #tpu.memory_space<vmem>>, vector<2x512xf32>,
    %38 = arith.addf %25, %14 : vector<2x512xf32>
    %c0_24 = arith.constant 0 : index
    %c0_25 = arith.constant 0 : index
    %39 = vector.load %arg11[%c0_24, %c0_25] : memref<2x512xf32, #tpu.memory_space<vmem>>, vector<2x512xf32>
    tpu.vector_store %arg11[%c0_24, %c0_25], %38 {strides = array<i32>} : memref<2x512xf32, #tpu.memory_space<vmem>>, vector<2x512xf32>,
    return
  }
  func.func @transform_0(%arg0: i32) -> (i32, i32) {
    %c0_i32 = arith.constant 0 : i32
    %c0_i32_0 = arith.constant 0 : i32
    return %arg0, %c0_i32 : i32, i32
  }
  func.func @transform_1(%arg0: i32) -> (i32, i32) {
    %c0_i32 = arith.constant 0 : i32
    %c0_i32_0 = arith.constant 0 : i32
    return %arg0, %c0_i32 : i32, i32
  }
  func.func @transform_2(%arg0: i32) -> (i32, i32) {
    %c0_i32 = arith.constant 0 : i32
    %c0_i32_0 = arith.constant 0 : i32
    %c0_i32_1 = arith.constant 0 : i32
    return %c0_i32, %c0_i32_0 : i32, i32
  }
  func.func @transform_3(%arg0: i32) -> (i32, i32) {
    %c0_i32 = arith.constant 0 : i32
    %c0_i32_0 = arith.constant 0 : i32
    %c0_i32_1 = arith.constant 0 : i32
    return %c0_i32, %c0_i32_0 : i32, i32
  }
  func.func @transform_4(%arg0: i32) -> (i32, i32) {
    %c0_i32 = arith.constant 0 : i32
    %c0_i32_0 = arith.constant 0 : i32
    %c0_i32_1 = arith.constant 0 : i32
    return %c0_i32, %c0_i32_0 : i32, i32
  }
  func.func @transform_5(%arg0: i32) -> (i32, i32) {
    %c0_i32 = arith.constant 0 : i32
    %c0_i32_0 = arith.constant 0 : i32
    %c0_i32_1 = arith.constant 0 : i32
    return %c0_i32, %c0_i32_0 : i32, i32
  }
  func.func @transform_6(%arg0: i32) -> (i32, i32) {
    %c0_i32 = arith.constant 0 : i32
    %c0_i32_0 = arith.constant 0 : i32
    return %arg0, %c0_i32 : i32, i32
  }
  func.func @transform_7(%arg0: i32) -> (i32, i32) {
    %c0_i32 = arith.constant 0 : i32
    %c0_i32_0 = arith.constant 0 : i32
    return %arg0, %c0_i32 : i32, i32
  }
  func.func @transform_8(%arg0: i32) -> (i32, i32) {
    %c0_i32 = arith.constant 0 : i32
    %c0_i32_0 = arith.constant 0 : i32
    return %arg0, %c0_i32 : i32, i32
  }
  func.func @transform_9(%arg0: i32) -> (i32, i32) {
    %c0_i32 = arith.constant 0 : i32
    %c0_i32_0 = arith.constant 0 : i32
    return %arg0, %c0_i32 : i32, i32
  }
  func.func @transform_10(%arg0: i32) -> (i32, i32) {
    %c0_i32 = arith.constant 0 : i32
    %c0_i32_0 = arith.constant 0 : i32
    return %arg0, %c0_i32 : i32, i32
  }
}

module attributes {stable_mosaic.version = 11 : i64} {
  func.func @kernel(%arg0: i32, %arg1: memref<2x512xf32, #tpu.memory_space<vmem>>, %arg2: memref<2x512xf32, #tpu.memory_space<vmem>>, %arg3: memref<1x512xf32, #tpu.memory_space<vmem>>, %arg4: memref<1x512xf32, #tpu.memory_space<vmem>>, %arg5: memref<2x512xf32, #tpu.memory_space<vmem>>, %arg6: memref<2x512xf32, #tpu.memory_space<vmem>>, %arg7: memref<2x512xf32, #tpu.memory_space<vmem>>, %arg8: memref<2x512xf32, #tpu.memory_space<vmem>>, %arg9: memref<2x512xf32, #tpu.memory_space<vmem>>) attributes {dimension_semantics = [#tpu.dimension_semantics<parallel>], iteration_bounds = array<i64: 1>, scalar_prefetch = 0 : i64, scratch_operands = 0 : i64, tpu.core_type = #tpu.core_type<tc>, window_params = [{transform_indices = @transform_0, window_bounds = array<i64: 2, 512>}, {transform_indices = @transform_1, window_bounds = array<i64: 2, 512>}, {pipeline_mode = #tpu.pipeline_mode<synchronous>, transform_indices = @transform_2, window_bounds = array<i64: 1, 512>}, {pipeline_mode = #tpu.pipeline_mode<synchronous>, transform_indices = @transform_3, window_bounds = array<i64: 1, 512>}, {transform_indices = @transform_4, window_bounds = array<i64: 2, 512>}, {transform_indices = @transform_5, window_bounds = array<i64: 2, 512>}, {transform_indices = @transform_6, window_bounds = array<i64: 2, 512>}, {transform_indices = @transform_7, window_bounds = array<i64: 2, 512>}, {transform_indices = @transform_8, window_bounds = array<i64: 2, 512>}]} {
    %c0 = arith.constant 0 : index
    %c0_0 = arith.constant 0 : index
    %0 = vector.load %arg1[%c0, %c0_0] : memref<2x512xf32, #tpu.memory_space<vmem>>, vector<2x512xf32>
    %c0_1 = arith.constant 0 : index
    %c0_2 = arith.constant 0 : index
    %1 = vector.load %arg3[%c0_1, %c0_2] : memref<1x512xf32, #tpu.memory_space<vmem>>, vector<1x512xf32>
    %2 = vector.broadcast %1 : vector<1x512xf32> to vector<2x512xf32>
    %3 = arith.subf %0, %2 : vector<2x512xf32>
    %c0_3 = arith.constant 0 : index
    %c0_4 = arith.constant 0 : index
    %4 = vector.load %arg4[%c0_3, %c0_4] : memref<1x512xf32, #tpu.memory_space<vmem>>, vector<1x512xf32>
    %5 = vector.broadcast %4 : vector<1x512xf32> to vector<2x512xf32>
    %6 = arith.mulf %3, %5 : vector<2x512xf32>
    %c0_5 = arith.constant 0 : index
    %c0_6 = arith.constant 0 : index
    %7 = vector.load %arg2[%c0_5, %c0_6] : memref<2x512xf32, #tpu.memory_space<vmem>>, vector<2x512xf32>
    %8 = arith.addf %6, %7 : vector<2x512xf32>
    %c0_7 = arith.constant 0 : index
    %c0_8 = arith.constant 0 : index
    %9 = vector.load %arg5[%c0_7, %c0_8] : memref<2x512xf32, #tpu.memory_space<vmem>>, vector<2x512xf32>
    %c0_9 = arith.constant 0 : index
    %c0_10 = arith.constant 0 : index
    %10 = vector.load %arg6[%c0_9, %c0_10] : memref<2x512xf32, #tpu.memory_space<vmem>>, vector<2x512xf32>
    %cst = arith.constant 0.000000e+00 : f32
    %11 = vector.broadcast %cst : f32 to vector<2x512xf32>
    %12 = arith.subf %11, %9 : vector<2x512xf32>
    %13 = arith.addf %12, %10 : vector<2x512xf32>
    %cst_11 = arith.constant 1.000000e-01 : f32
    %14 = vector.broadcast %cst_11 : f32 to vector<2x512xf32>
    %15 = arith.mulf %14, %13 : vector<2x512xf32>
    %16 = arith.addf %9, %15 : vector<2x512xf32>
    %cst_12 = arith.constant 2.000000e-01 : f32
    %17 = vector.broadcast %cst_12 : f32 to vector<2x512xf32>
    %18 = arith.mulf %17, %10 : vector<2x512xf32>
    %19 = arith.subf %10, %18 : vector<2x512xf32>
    %cst_13 = arith.constant 1.000000e+00 : f32
    %20 = vector.broadcast %cst_13 : f32 to vector<2x512xf32>
    %21 = arith.cmpf ogt, %16, %20 : vector<2x512xf32>
    %22 = arith.extui %21 : vector<2x512xi1> to vector<2x512xi32>
    %23 = arith.sitofp %22 : vector<2x512xi32> to vector<2x512xf32>
    %c0_14 = arith.constant 0 : index
    %c0_15 = arith.constant 0 : index
    %24 = vector.load %arg7[%c0_14, %c0_15] : memref<2x512xf32, #tpu.memory_space<vmem>>, vector<2x512xf32>
    tpu.vector_store %arg7[%c0_14, %c0_15], %23 {strides = array<i32>} : memref<2x512xf32, #tpu.memory_space<vmem>>, vector<2x512xf32>,
    %cst_16 = arith.constant 1.000000e+00 : f32
    %25 = vector.broadcast %cst_16 : f32 to vector<2x512xf32>
    %26 = arith.subf %25, %23 : vector<2x512xf32>
    %27 = arith.mulf %26, %16 : vector<2x512xf32>
    %cst_17 = arith.constant 0.000000e+00 : f32
    %28 = vector.broadcast %cst_17 : f32 to vector<2x512xf32>
    %29 = arith.mulf %23, %28 : vector<2x512xf32>
    %30 = arith.addf %27, %29 : vector<2x512xf32>
    %c0_18 = arith.constant 0 : index
    %c0_19 = arith.constant 0 : index
    %31 = vector.load %arg8[%c0_18, %c0_19] : memref<2x512xf32, #tpu.memory_space<vmem>>, vector<2x512xf32>
    tpu.vector_store %arg8[%c0_18, %c0_19], %30 {strides = array<i32>} : memref<2x512xf32, #tpu.memory_space<vmem>>, vector<2x512xf32>,
    %32 = arith.addf %19, %8 : vector<2x512xf32>
    %c0_20 = arith.constant 0 : index
    %c0_21 = arith.constant 0 : index
    %33 = vector.load %arg9[%c0_20, %c0_21] : memref<2x512xf32, #tpu.memory_space<vmem>>, vector<2x512xf32>
    tpu.vector_store %arg9[%c0_20, %c0_21], %32 {strides = array<i32>} : memref<2x512xf32, #tpu.memory_space<vmem>>, vector<2x512xf32>,
    return
  }
  func.func @transform_0(%arg0: i32) -> (i32, i32) {
    %c0_i32 = arith.constant 0 : i32
    %c0_i32_0 = arith.constant 0 : i32
    return %arg0, %c0_i32 : i32, i32
  }
  func.func @transform_1(%arg0: i32) -> (i32, i32) {
    %c0_i32 = arith.constant 0 : i32
    %c0_i32_0 = arith.constant 0 : i32
    return %arg0, %c0_i32 : i32, i32
  }
  func.func @transform_2(%arg0: i32) -> (i32, i32) {
    %c0_i32 = arith.constant 0 : i32
    %c0_i32_0 = arith.constant 0 : i32
    %c0_i32_1 = arith.constant 0 : i32
    return %c0_i32, %c0_i32_0 : i32, i32
  }
  func.func @transform_3(%arg0: i32) -> (i32, i32) {
    %c0_i32 = arith.constant 0 : i32
    %c0_i32_0 = arith.constant 0 : i32
    %c0_i32_1 = arith.constant 0 : i32
    return %c0_i32, %c0_i32_0 : i32, i32
  }
  func.func @transform_4(%arg0: i32) -> (i32, i32) {
    %c0_i32 = arith.constant 0 : i32
    %c0_i32_0 = arith.constant 0 : i32
    return %arg0, %c0_i32 : i32, i32
  }
  func.func @transform_5(%arg0: i32) -> (i32, i32) {
    %c0_i32 = arith.constant 0 : i32
    %c0_i32_0 = arith.constant 0 : i32
    return %arg0, %c0_i32 : i32, i32
  }
  func.func @transform_6(%arg0: i32) -> (i32, i32) {
    %c0_i32 = arith.constant 0 : i32
    %c0_i32_0 = arith.constant 0 : i32
    return %arg0, %c0_i32 : i32, i32
  }
  func.func @transform_7(%arg0: i32) -> (i32, i32) {
    %c0_i32 = arith.constant 0 : i32
    %c0_i32_0 = arith.constant 0 : i32
    return %arg0, %c0_i32 : i32, i32
  }
  func.func @transform_8(%arg0: i32) -> (i32, i32) {
    %c0_i32 = arith.constant 0 : i32
    %c0_i32_0 = arith.constant 0 : i32
    return %arg0, %c0_i32 : i32, i32
  }
}

module attributes {stable_mosaic.version = 11 : i64} {
  func.func @_avgpool_kernel(%arg0: i32, %arg1: memref<1x1x512xf32, #tpu.memory_space<vmem>>, %arg2: memref<1x1x512xf32, #tpu.memory_space<vmem>>) attributes {dimension_semantics = [#tpu.dimension_semantics<parallel>], iteration_bounds = array<i64: 2>, scalar_prefetch = 0 : i64, scratch_operands = 0 : i64, tpu.core_type = #tpu.core_type<tc>, window_params = [{transform_indices = @transform_0, window_bounds = array<i64: 1, 1, 512>}, {transform_indices = @transform_1, window_bounds = array<i64: 1, 1, 512>}]} {
    %c0 = arith.constant 0 : index
    %c0_0 = arith.constant 0 : index
    %c0_1 = arith.constant 0 : index
    %0 = vector.load %arg1[%c0, %c0_0, %c0_1] : memref<1x1x512xf32, #tpu.memory_space<vmem>>, vector<1x1x512xf32>
    %cst = arith.constant dense<0.000000e+00> : vector<1x512xf32>
    %1 = vector.multi_reduction <add>, %0, %cst [1] : vector<1x1x512xf32> to vector<1x512xf32>
    %2 = vector.shape_cast %1 : vector<1x512xf32> to vector<1x1x512xf32>
    %cst_2 = arith.constant 1.000000e+00 : f32
    %3 = vector.broadcast %cst_2 : f32 to vector<1x1x512xf32>
    %4 = arith.divf %2, %3 : vector<1x1x512xf32>
    %c0_3 = arith.constant 0 : index
    %c0_4 = arith.constant 0 : index
    %c0_5 = arith.constant 0 : index
    %5 = vector.load %arg2[%c0_3, %c0_4, %c0_5] : memref<1x1x512xf32, #tpu.memory_space<vmem>>, vector<1x1x512xf32>
    tpu.vector_store %arg2[%c0_3, %c0_4, %c0_5], %4 {strides = array<i32>} : memref<1x1x512xf32, #tpu.memory_space<vmem>>, vector<1x1x512xf32>,
    return
  }
  func.func @transform_0(%arg0: i32) -> (i32, i32, i32) {
    %c0_i32 = arith.constant 0 : i32
    %c0_i32_0 = arith.constant 0 : i32
    %c0_i32_1 = arith.constant 0 : i32
    return %arg0, %c0_i32, %c0_i32_0 : i32, i32, i32
  }
  func.func @transform_1(%arg0: i32) -> (i32, i32, i32) {
    %c0_i32 = arith.constant 0 : i32
    %c0_i32_0 = arith.constant 0 : i32
    %c0_i32_1 = arith.constant 0 : i32
    return %arg0, %c0_i32, %c0_i32_0 : i32, i32, i32
  }
}

</mosaic_0001>

<bundles_post_ra>
// kernel: custom-call.12
= control target key start
LH: loop header
LB: loop body
LE: loop exit
PB: predicated region body
PF: predicated region fallthrough
CT: control target
= control target key end

     0   :  { %s6_s0 = inlined_call_operand.vmem [shape: f32[2,2,512,1,1], index: 0, kind: output, shape index: {}]  }

// kernel: closed_call.415
= control target key start
LH: loop header
LB: loop body
LE: loop exit
PB: predicated region body
PF: predicated region fallthrough
CT: control target
= control target key end

     0   :  { %v169_v0 = vmov 0.0   ;;  %s299_s1 = inlined_call_operand.vmem [shape: f32[1,128], index: 1, kind: output, shape index: {0}]   ;;  %s300_s2 = inlined_call_operand.vmem [shape: f32[1,128], index: 2, kind: output, shape index: {1}]   ;;  %s301_s0 = inlined_call_operand.vmem [shape: f32[256,128], index: 0, kind: input, shape index: {}]  }
   0x1   :  { %14 = vst [vmem:[%s299_s1] sm:$0x1] %v169_v0  ;;  %15 = vst [vmem:[%s300_s2] sm:$0x1] %v169_v0  ;;  %v16_v1 = vld [vmem:[%s301_s0] sm:$0xff]  ;;  %v17_v2 = vld [vmem:[%s301_s0 + $0x8] sm:$0xff] }
   0x2   :  { %v18_v3 = vld [vmem:[%s301_s0 + $0x10] sm:$0xff]  ;;  %v19_v4 = vld [vmem:[%s301_s0 + $0x18] sm:$0xff]  ;;  %v49_v5 = vadd.f32 %v17_v2, %v16_v1  ;;  %v89_v6 = vmul.f32 %v16_v1, %v16_v1  ;;  %v90_v7 = vmul.f32 %v17_v2, %v17_v2  ;;  %v20_v9 = vld [vmem:[%s301_s0 + $0x20] sm:$0xff] }
   0x3   :  { %v91_v8 = vmul.f32 %v18_v3, %v18_v3  ;;  %v92_v11 = vmul.f32 %v19_v4, %v19_v4  ;;  %v21_v13 = vld [vmem:[%s301_s0 + $0x28] sm:$0xff]  ;;  %v93_v15 = vmul.f32 %v20_v9, %v20_v9  ;;  %v22_v17 = vld [vmem:[%s301_s0 + $0x30] sm:$0xff]  ;;  %v23_v21 = vld [vmem:[%s301_s0 + $0x38] sm:$0xff] }
   0x4   :  { %v50_v10 = vadd.f32 %v49_v5, %v18_v3  ;;  %v121_v12 = vadd.f32 %v90_v7, %v89_v6  ;;  %v94_v19 = vmul.f32 %v21_v13, %v21_v13  ;;  %v95_v23 = vmul.f32 %v22_v17, %v22_v17  ;;  %v24_v25 = vld [vmem:[%s301_s0 + $0x40] sm:$0xff]  ;;  %v25_v29 = vld [vmem:[%s301_s0 + $0x48] sm:$0xff]  ;;  %v26_v33 = vld [vmem:[%s301_s0 + $0x50] sm:$0xff] }
   0x5   :  { %v96_v27 = vmul.f32 %v23_v21, %v23_v21  ;;  %v97_v31 = vmul.f32 %v24_v25, %v24_v25  ;;  %v98_v35 = vmul.f32 %v25_v29, %v25_v29  ;;  %v27_v37 = vld [vmem:[%s301_s0 + $0x58] sm:$0xff]  ;;  %v99_v39 = vmul.f32 %v26_v33, %v26_v33  ;;  %v28_v41 = vld [vmem:[%s301_s0 + $0x60] sm:$0xff]  ;;  %v29_v45 = vld [vmem:[%s301_s0 + $0x68] sm:$0xff] }
   0x6   :  { %v51_v14 = vadd.f32 %v50_v10, %v19_v4  ;;  %v122_v16 = vadd.f32 %v121_v12, %v91_v8  ;;  %v100_v43 = vmul.f32 %v27_v37, %v27_v37  ;;  %v101_v47 = vmul.f32 %v28_v41, %v28_v41  ;;  %v30_v49 = vld [vmem:[%s301_s0 + $0x70] sm:$0xff]  ;;  %v31_v53 = vld [vmem:[%s301_s0 + $0x78] sm:$0xff]  ;;  %v32_v57 = vld [vmem:[%s301_s0 + $0x80] sm:$0xff] }
   0x7   :  { %v102_v51 = vmul.f32 %v29_v45, %v29_v45  ;;  %v103_v55 = vmul.f32 %v30_v49, %v30_v49  ;;  %v104_v59 = vmul.f32 %v31_v53, %v31_v53  ;;  %v33_v61 = vld [vmem:[%s301_s0 + $0x88] sm:$0xff]  ;;  %v105_v63 = vmul.f32 %v32_v57, %v32_v57  ;;  %v34_v1 = vld [vmem:[%s301_s0 + $0x90] sm:$0xff]  ;;  %v35_v5 = vld [vmem:[%s301_s0 + $0x98] sm:$0xff] }
   0x8   :  { %v52_v18 = vadd.f32 %v51_v14, %v20_v9  ;;  %v123_v20 = vadd.f32 %v122_v16, %v92_v11  ;;  %v106_v3 = vmul.f32 %v33_v61, %v33_v61  ;;  %v107_v7 = vmul.f32 %v34_v1, %v34_v1  ;;  %v36_v9 = vld [vmem:[%s301_s0 + $0xa0] sm:$0xff] }
   0x9   :  { %v108_v11 = vmul.f32 %v35_v5, %v35_v5 }
   0xa   :  { %v53_v22 = vadd.f32 %v52_v18, %v21_v13  ;;  %v124_v24 = vadd.f32 %v123_v20, %v93_v15  ;;  %v37_v13 = vld [vmem:[%s301_s0 + $0xa8] sm:$0xff]  ;;  %v109_v15 = vmul.f32 %v36_v9, %v36_v9 }
   0xc   :  { %v54_v26 = vadd.f32 %v53_v22, %v22_v17  ;;  %v125_v28 = vadd.f32 %v124_v24, %v94_v19  ;;  %v38_v17 = vld [vmem:[%s301_s0 + $0xb0] sm:$0xff]  ;;  %v110_v19 = vmul.f32 %v37_v13, %v37_v13 }
   0xe   :  { %v55_v30 = vadd.f32 %v54_v26, %v23_v21  ;;  %v126_v32 = vadd.f32 %v125_v28, %v95_v23  ;;  %v39_v21 = vld [vmem:[%s301_s0 + $0xb8] sm:$0xff]  ;;  %v111_v23 = vmul.f32 %v38_v17, %v38_v17 }
  0x10   :  { %v56_v34 = vadd.f32 %v55_v30, %v24_v25  ;;  %v127_v36 = vadd.f32 %v126_v32, %v96_v27  ;;  %v40_v25 = vld [vmem:[%s301_s0 + $0xc0] sm:$0xff]  ;;  %v112_v27 = vmul.f32 %v39_v21, %v39_v21 }
  0x12   :  { %v57_v38 = vadd.f32 %v56_v34, %v25_v29  ;;  %v128_v40 = vadd.f32 %v127_v36, %v97_v31  ;;  %v41_v29 = vld [vmem:[%s301_s0 + $0xc8] sm:$0xff]  ;;  %v113_v31 = vmul.f32 %v40_v25, %v40_v25 }
  0x14   :  { %v58_v42 = vadd.f32 %v57_v38, %v26_v33  ;;  %v129_v44 = vadd.f32 %v128_v40, %v98_v35  ;;  %v42_v33 = vld [vmem:[%s301_s0 + $0xd0] sm:$0xff]  ;;  %v114_v35 = vmul.f32 %v41_v29, %v41_v29 }
  0x16   :  { %v59_v46 = vadd.f32 %v58_v42, %v27_v37  ;;  %v130_v48 = vadd.f32 %v129_v44, %v99_v39  ;;  %v43_v37 = vld [vmem:[%s301_s0 + $0xd8] sm:$0xff]  ;;  %v115_v39 = vmul.f32 %v42_v33, %v42_v33 }
  0x18   :  { %v60_v50 = vadd.f32 %v59_v46, %v28_v41  ;;  %v131_v52 = vadd.f32 %v130_v48, %v100_v43  ;;  %v44_v41 = vld [vmem:[%s301_s0 + $0xe0] sm:$0xff]  ;;  %v116_v43 = vmul.f32 %v43_v37, %v43_v37 }
  0x1a   :  { %v61_v54 = vadd.f32 %v60_v50, %v29_v45  ;;  %v132_v56 = vadd.f32 %v131_v52, %v101_v47  ;;  %v45_v45 = vld [vmem:[%s301_s0 + $0xe8] sm:$0xff]  ;;  %v117_v47 = vmul.f32 %v44_v41, %v44_v41 }
  0x1c   :  { %v62_v58 = vadd.f32 %v61_v54, %v30_v49  ;;  %v133_v60 = vadd.f32 %v132_v56, %v102_v51  ;;  %v46_v49 = vld [vmem:[%s301_s0 + $0xf0] sm:$0xff]  ;;  %v118_v51 = vmul.f32 %v45_v45, %v45_v45 }
  0x1e   :  { %v63_v62 = vadd.f32 %v62_v58, %v31_v53  ;;  %v134_v0 = vadd.f32 %v133_v60, %v103_v55  ;;  %v47_v53 = vld [vmem:[%s301_s0 + $0xf8] sm:$0xff]  ;;  %v119_v55 = vmul.f32 %v46_v49, %v46_v49 }
  0x1f   :  { %v120_v58 = vmul.f32 %v47_v53, %v47_v53 }
  0x20   :  { %v64_v2 = vadd.f32 %v63_v62, %v32_v57  ;;  %v135_v4 = vadd.f32 %v134_v0, %v104_v59 }
  0x22   :  { %v65_v6 = vadd.f32 %v64_v2, %v33_v61  ;;  %v136_v8 = vadd.f32 %v135_v4, %v105_v63 }
  0x24   :  { %v66_v10 = vadd.f32 %v65_v6, %v34_v1  ;;  %v137_v12 = vadd.f32 %v136_v8, %v106_v3 }
  0x26   :  { %v67_v14 = vadd.f32 %v66_v10, %v35_v5  ;;  %v138_v16 = vadd.f32 %v137_v12, %v107_v7  ;;  %v48_v7 = vld [vmem:[%s299_s1] sm:$0x1] }
  0x27   :  { %v88_v12 = vld [vmem:[%s300_s2] sm:$0x1] }
  0x28   :  { %v68_v18 = vadd.f32 %v67_v14, %v36_v9  ;;  %v139_v20 = vadd.f32 %v138_v16, %v108_v11 }
  0x2a   :  { %v69_v22 = vadd.f32 %v68_v18, %v37_v13  ;;  %v140_v24 = vadd.f32 %v139_v20, %v109_v15 }
  0x2c   :  { %v70_v26 = vadd.f32 %v69_v22, %v38_v17  ;;  %v141_v28 = vadd.f32 %v140_v24, %v110_v19 }
  0x2e   :  { %v71_v30 = vadd.f32 %v70_v26, %v39_v21  ;;  %v142_v32 = vadd.f32 %v141_v28, %v111_v23 }
  0x30   :  { %v72_v34 = vadd.f32 %v71_v30, %v40_v25  ;;  %v143_v36 = vadd.f32 %v142_v32, %v112_v27 }
  0x32   :  { %v73_v38 = vadd.f32 %v72_v34, %v41_v29  ;;  %v144_v40 = vadd.f32 %v143_v36, %v113_v31 }
  0x34   :  { %v74_v42 = vadd.f32 %v73_v38, %v42_v33  ;;  %v145_v44 = vadd.f32 %v144_v40, %v114_v35 }
  0x36   :  { %v75_v46 = vadd.f32 %v74_v42, %v43_v37  ;;  %v146_v48 = vadd.f32 %v145_v44, %v115_v39 }
  0x38   :  { %v76_v50 = vadd.f32 %v75_v46, %v44_v41  ;;  %v147_v52 = vadd.f32 %v146_v48, %v116_v43 }
  0x3a   :  { %v77_v54 = vadd.f32 %v76_v50, %v45_v45  ;;  %v148_v56 = vadd.f32 %v147_v52, %v117_v47 }
  0x3c   :  { %v78_v57 = vadd.f32 %v77_v54, %v46_v49  ;;  %v149_v59 = vadd.f32 %v148_v56, %v118_v51 }
  0x3e   :  { %v79_v60 = vadd.f32 %v78_v57, %v47_v53  ;;  %v150_v61 = vadd.f32 %v149_v59, %v119_v55 }
  0x40   :  { %v80_v62 = vrot.slane %v79_v60, 4  ;;  %v151_v63 = vadd.f32 %v150_v61, %v120_v58 }
  0x42   :  { %v81_v0 = vadd.f32 %v80_v62, %v79_v60  ;;  %v152_v1 = vrot.slane %v151_v63, 4 }
  0x44   :  { %v82_v2 = vrot.slane %v81_v0, 2  ;;  %v153_v3 = vadd.f32 %v152_v1, %v151_v63 }
  0x46   :  { %v83_v4 = vadd.f32 %v82_v2, %v81_v0  ;;  %v154_v5 = vrot.slane %v153_v3, 2 }
  0x48   :  { %v84_v6 = vrot.slane %v83_v4, 1  ;;  %v155_v8 = vadd.f32 %v154_v5, %v153_v3 }
  0x4a   :  { %v85_v9 = vadd.f32 %v84_v6, %v83_v4  ;;  %v156_v10 = vrot.slane %v155_v8, 1 }
  0x4c   :  { %v86_v11 = vadd.f32 %v85_v9, %v48_v7  ;;  %v157_v13 = vadd.f32 %v156_v10, %v155_v8 }
  0x4e   :  { %87 = vst [vmem:[%s299_s1] sm:$0x1] %v86_v11  ;;  %v158_v14 = vadd.f32 %v157_v13, %v88_v12 }
  0x50   :  { %159 = vst [vmem:[%s300_s2] sm:$0x1] %v158_v14 }

// kernel: closed_call.414
= control target key start
LH: loop header
LB: loop body
LE: loop exit
PB: predicated region body
PF: predicated region fallthrough
CT: control target
= control target key end

     0   :  { %s1330_s9 = smov 0   ;;  %s1332_s10 = smov 0   ;;  %s1582_s0 = inlined_call_operand.vmem [shape: bf16[512,256], index: 0, kind: input, shape index: {}]   ;;  %s1583_s1 = inlined_call_operand.vmem [shape: bf16[256,64], index: 1, kind: input, shape index: {}]   ;;  %s1584_s2 = inlined_call_operand.vmem [shape: f32[512,64], index: 2, kind: output, shape index: {}]  }
   0x1   :  { %s1334_s11 = smov 0  }
   0x2 LB: > { %s31_s12 = sadd.s32 1, %s1308_s10  ;;  %p1016_p0 = scmp.ge.s32.totalorder %s1312_s11, 1  ;;  %s1312_s11 = sphi %s1334_s11, %s12_s11   ;;  %s1308_s10 = sphi %s1332_s10, %s1586_s10   ;;  %s1304_s9 = sphi %s1330_s9, %s1585_s9  }
   0x3   : > { %p33_p1 = scmp.ge.s32.totalorder %s31_s12, 2  ;;  %p158_p2 = scmp.lt.s32.totalorder %s1312_s11, 3 }
   0x5   : > { %s1588_s12 = smov (%p33_p1, %s31_s12), 0  ;;  %p159_p3 = pnand %p1016_p0, %p158_p2 }
   0x6   : > { %v1226_v0 = vld [vmem:[%s1583_s1 + $0x40] sm:$0xff] (!%p159_p3)   ;;  %s1017_s15 = sshll.u32 (!%p159_p3), %s1304_s9, 5  ;;  %v1228_v2 = vld [vmem:[%s1583_s1 + $0x48] sm:$0xff] (!%p159_p3)   ;;  %v1230_v4 = vld [vmem:[%s1583_s1 + $0x50] sm:$0xff] (!%p159_p3)   ;;  %vm231_vm0 = vcmask (!%p159_p3), 523264   ;;  %v1314_v48 = vmov (!%p159_p3), 0.0  }
   0x7   : > { %162 = sbr.rel (%p159_p3) target bundleno = 324 (0x144), region = 28  ;;  %v1227_v1 = vld [vmem:[%s1583_s1] sm:$0xff] (!%p159_p3)   ;;  %1073 = vmatprep.subr.bf16.mxu0 (!%p159_p3), %v1226_v0  ;;  %1185 = vmatprep.subr.bf16.mxu1 (!%p159_p3), %v1226_v0  ;;  %v1229_v3 = vld [vmem:[%s1583_s1 + $0x8] sm:$0xff] (!%p159_p3)   ;;  %p198_p4 = scmp.lt.s32.totalorder (!%p159_p3), %s1017_s15, 63  ;;  %v1231_v5 = vld [vmem:[%s1583_s1 + $0x10] sm:$0xff] (!%p159_p3)   ;;  %232 = vst.msk [vmem:[#allocation2] sm:$0xff] (!%p159_p3), %vm231_vm0, %v1314_v48 }
   0x8   : > { %1074 = vmatpush3.bf16.msra.mxu0 (!%p159_p3), %v1227_v1  ;;  %1193 = vmatpush3.bf16.msra.mxu1 (!%p159_p3), %v1227_v1  ;;  %v1232_v6 = vld [vmem:[%s1583_s1 + $0x58] sm:$0xff] (!%p159_p3)   ;;  %v1234_v8 = vld [vmem:[%s1583_s1 + $0x60] sm:$0xff] (!%p159_p3)   ;;  %v1236_v10 = vld [vmem:[%s1583_s1 + $0x68] sm:$0xff] (!%p159_p3)   ;;  %233 = vst.msk [vmem:[#allocation2 + $0x8] sm:$0xff] (!%p159_p3), %vm231_vm0, %v1314_v48 }
   0x9   : > { %1075 = vmatprep.subr.bf16.mxu0 (!%p159_p3), %v1228_v2  ;;  %1186 = vmatprep.subr.bf16.mxu1 (!%p159_p3), %v1228_v2  ;;  %v1233_v7 = vld [vmem:[%s1583_s1 + $0x18] sm:$0xff] (!%p159_p3)   ;;  %v1235_v9 = vld [vmem:[%s1583_s1 + $0x20] sm:$0xff] (!%p159_p3)   ;;  %v1237_v13 = vld [vmem:[%s1583_s1 + $0x28] sm:$0xff] (!%p159_p3)   ;;  %234 = vst.msk [vmem:[#allocation2 + $0x10] sm:$0xff] (!%p159_p3), %vm231_vm0, %v1314_v48 }
   0xa   : > { %v1238_v14 = vld [vmem:[%s1583_s1 + $0x70] sm:$0xff] (!%p159_p3)   ;;  %v1240_v16 = vld [vmem:[%s1583_s1 + $0x78] sm:$0xff] (!%p159_p3)   ;;  %235 = vst.msk [vmem:[#allocation2 + $0x18] sm:$0xff] (!%p159_p3), %vm231_vm0, %v1314_v48  ;;  %236 = vst.msk [vmem:[#allocation2 + $0x20] sm:$0xff] (!%p159_p3), %vm231_vm0, %v1314_v48 }
   0xb   : > { %v1239_v15 = vld [vmem:[%s1583_s1 + $0x30] sm:$0xff] (!%p159_p3)   ;;  %v1241_v17 = vld [vmem:[%s1583_s1 + $0x38] sm:$0xff] (!%p159_p3)   ;;  %237 = vst.msk [vmem:[#allocation2 + $0x28] sm:$0xff] (!%p159_p3), %vm231_vm0, %v1314_v48  ;;  %238 = vst.msk [vmem:[#allocation2 + $0x30] sm:$0xff] (!%p159_p3), %vm231_vm0, %v1314_v48 }
   0xc   : > { %1076 = vmatpush3.bf16.msra.mxu0 (!%p159_p3), %v1229_v3  ;;  %1194 = vmatpush3.bf16.msra.mxu1 (!%p159_p3), %v1229_v3  ;;  %239 = vst.msk [vmem:[#allocation2 + $0x38] sm:$0xff] (!%p159_p3), %vm231_vm0, %v1314_v48  ;;  %240 = vst.msk [vmem:[#allocation2 + $0x40] sm:$0xff] (!%p159_p3), %vm231_vm0, %v1314_v48 }
   0xd   : > { %1077 = vmatprep.subr.bf16.mxu0 (!%p159_p3), %v1230_v4  ;;  %1187 = vmatprep.subr.bf16.mxu1 (!%p159_p3), %v1230_v4  ;;  %241 = vst.msk [vmem:[#allocation2 + $0x48] sm:$0xff] (!%p159_p3), %vm231_vm0, %v1314_v48  ;;  %242 = vst.msk [vmem:[#allocation2 + $0x50] sm:$0xff] (!%p159_p3), %vm231_vm0, %v1314_v48 }
   0xe   : > { %s1590_s15 = smov (!%p198_p4, %s1017_s15), 63  ;;  %243 = vst.msk [vmem:[#allocation2 + $0x58] sm:$0xff] %vm231_vm0, %v1314_v48  ;;  %244 = vst.msk [vmem:[#allocation2 + $0x60] sm:$0xff] %vm231_vm0, %v1314_v48  ;;  %v264_v51 = vld [vmem:[#allocation2] sm:$0xff] }
   0xf   : > { %s1072_s30 = sshll.u32 %s1590_s15, 3  ;;  %245 = vst.msk [vmem:[#allocation2 + $0x68] sm:$0xff] %vm231_vm0, %v1314_v48  ;;  %246 = vst.msk [vmem:[#allocation2 + $0x70] sm:$0xff] %vm231_vm0, %v1314_v48  ;;  %v265_v59 = vld [vmem:[#allocation2 + $0x8] sm:$0xff] }
  0x10   : > { %1078 = vmatpush3.bf16.msra.mxu0 %v1231_v5  ;;  %1195 = vmatpush3.bf16.msra.mxu1 %v1231_v5  ;;  %s1383_s7 = scalar_lea.vmem %s1582_s0, %s1072_s30  ;;  %247 = vst.msk [vmem:[#allocation2 + $0x78] sm:$0xff] %vm231_vm0, %v1314_v48  ;;  %248 = vst.msk [vmem:[#allocation2 + $0x80] sm:$0xff] %vm231_vm0, %v1314_v48  ;;  %s1479_s28 = scalar_lea.vmem %s1584_s2, %s1072_s30 }
  0x11   : > { %1079 = vmatprep.subr.bf16.mxu0 %v1232_v6  ;;  %1188 = vmatprep.subr.bf16.mxu1 %v1232_v6  ;;  %v1244_v11 = vld [vmem:[%s1383_s7 + $0x4] ss:$8 sps:$4 sm:$0xff]   ;;  %v1242_v18 = vld [vmem:[%s1383_s7] ss:$8 sps:$4 sm:$0xff]   ;;  %v1248_v20 = vld [vmem:[%s1383_s7 + $0x14] ss:$8 sps:$4 sm:$0xff]  }
  0x12   : > { %v1247_v12 = vld [vmem:[%s1383_s7 + $0x84] ss:$8 sps:$4 sm:$0xff]   ;;  %648 = vmatprep.mubr.bf16.mxu0 %v1244_v11  ;;  %v1245_v19 = vld [vmem:[%s1383_s7 + $0x80] ss:$8 sps:$4 sm:$0xff]   ;;  %v1250_v21 = vld [vmem:[%s1383_s7 + $0x94] ss:$8 sps:$4 sm:$0xff]  }
  0x13   : > { %712 = vmatprep.mubr.bf16.mxu1 %v1247_v12  ;;  %v1252_v22 = vld [vmem:[%s1383_s7 + $0x10] ss:$8 sps:$4 sm:$0xff]   ;;  %v1254_v24 = vld [vmem:[%s1383_s7 + $0x24] ss:$8 sps:$4 sm:$0xff]   ;;  %v1258_v26 = vld [vmem:[%s1383_s7 + $0x20] ss:$8 sps:$4 sm:$0xff]  }
  0x14   : > { %1080 = vmatpush3.bf16.msra.mxu0 %v1233_v7  ;;  %1196 = vmatpush3.bf16.msra.mxu1 %v1233_v7  ;;  %v1253_v23 = vld [vmem:[%s1383_s7 + $0x90] ss:$8 sps:$4 sm:$0xff]   ;;  %v1256_v25 = vld [vmem:[%s1383_s7 + $0xa4] ss:$8 sps:$4 sm:$0xff]   ;;  %v1259_v27 = vld [vmem:[%s1383_s7 + $0xa0] ss:$8 sps:$4 sm:$0xff]  }
  0x15   : > { %1081 = vmatprep.subr.bf16.mxu0 %v1234_v8  ;;  %1189 = vmatprep.subr.bf16.mxu1 %v1234_v8  ;;  %v1260_v28 = vld [vmem:[%s1383_s7 + $0x34] ss:$8 sps:$4 sm:$0xff]   ;;  %v1264_v30 = vld [vmem:[%s1383_s7 + $0x30] ss:$8 sps:$4 sm:$0xff]   ;;  %v1266_v32 = vld [vmem:[%s1383_s7 + $0x44] ss:$8 sps:$4 sm:$0xff]  }
  0x16   : > { %v1262_v29 = vld [vmem:[%s1383_s7 + $0xb4] ss:$8 sps:$4 sm:$0xff]   ;;  %v1265_v31 = vld [vmem:[%s1383_s7 + $0xb0] ss:$8 sps:$4 sm:$0xff]   ;;  %v1268_v33 = vld [vmem:[%s1383_s7 + $0xc4] ss:$8 sps:$4 sm:$0xff]  }
  0x17   : > { %v1270_v34 = vld [vmem:[%s1383_s7 + $0x40] ss:$8 sps:$4 sm:$0xff]   ;;  %v1272_v36 = vld [vmem:[%s1383_s7 + $0x54] ss:$8 sps:$4 sm:$0xff]   ;;  %v1276_v38 = vld [vmem:[%s1383_s7 + $0x50] ss:$8 sps:$4 sm:$0xff]  }
  0x18   : > { %1082 = vmatpush3.bf16.msra.mxu0 %v1235_v9  ;;  %1197 = vmatpush3.bf16.msra.mxu1 %v1235_v9  ;;  %v1271_v35 = vld [vmem:[%s1383_s7 + $0xc0] ss:$8 sps:$4 sm:$0xff]   ;;  %v1274_v37 = vld [vmem:[%s1383_s7 + $0xd4] ss:$8 sps:$4 sm:$0xff]   ;;  %v1277_v39 = vld [vmem:[%s1383_s7 + $0xd0] ss:$8 sps:$4 sm:$0xff]  }
  0x19   : > { %1083 = vmatprep.subr.bf16.mxu0 %v1236_v10  ;;  %1190 = vmatprep.subr.bf16.mxu1 %v1236_v10  ;;  %v1278_v40 = vld [vmem:[%s1383_s7 + $0x64] ss:$8 sps:$4 sm:$0xff]   ;;  %v1282_v42 = vld [vmem:[%s1383_s7 + $0x60] ss:$8 sps:$4 sm:$0xff]   ;;  %v1284_v44 = vld [vmem:[%s1383_s7 + $0x74] ss:$8 sps:$4 sm:$0xff]  }
  0x1a   : > { %v1280_v41 = vld [vmem:[%s1383_s7 + $0xe4] ss:$8 sps:$4 sm:$0xff]   ;;  %v1283_v43 = vld [vmem:[%s1383_s7 + $0xe0] ss:$8 sps:$4 sm:$0xff]   ;;  %v1286_v45 = vld [vmem:[%s1383_s7 + $0xf4] ss:$8 sps:$4 sm:$0xff]  }
  0x1b   : > { %v1288_v46 = vld [vmem:[%s1383_s7 + $0x70] ss:$8 sps:$4 sm:$0xff]   ;;  %249 = vst.msk [vmem:[#allocation2 + $0x88] sm:$0xff] %vm231_vm0, %v1314_v48  ;;  %250 = vst.msk [vmem:[#allocation2 + $0x90] sm:$0xff] %vm231_vm0, %v1314_v48  ;;  %v280_v53 = vld [vmem:[#allocation2 + $0x80] sm:$0xff] }
  0x1c   : > { %1084 = vmatpush3.bf16.msra.mxu0 %v1237_v13  ;;  %1198 = vmatpush3.bf16.msra.mxu1 %v1237_v13  ;;  %v1289_v47 = vld [vmem:[%s1383_s7 + $0xf0] ss:$8 sps:$4 sm:$0xff]   ;;  %251 = vst.msk [vmem:[#allocation2 + $0x98] sm:$0xff] %vm231_vm0, %v1314_v48  ;;  %252 = vst.msk [vmem:[#allocation2 + $0xa0] sm:$0xff] %vm231_vm0, %v1314_v48 }
  0x1d   : > { %1085 = vmatprep.subr.bf16.mxu0 %v1238_v14  ;;  %1191 = vmatprep.subr.bf16.mxu1 %v1238_v14  ;;  %253 = vst.msk [vmem:[#allocation2 + $0xa8] sm:$0xff] %vm231_vm0, %v1314_v48  ;;  %254 = vst.msk [vmem:[#allocation2 + $0xb0] sm:$0xff] %vm231_vm0, %v1314_v48  ;;  %v266_v7 = vld [vmem:[#allocation2 + $0x10] sm:$0xff] }
  0x1e   : > { %255 = vst.msk [vmem:[#allocation2 + $0xb8] sm:$0xff] %vm231_vm0, %v1314_v48  ;;  %256 = vst.msk [vmem:[#allocation2 + $0xc0] sm:$0xff] %vm231_vm0, %v1314_v48 }
  0x1f   : > { %257 = vst.msk [vmem:[#allocation2 + $0xc8] sm:$0xff] %vm231_vm0, %v1314_v48  ;;  %258 = vst.msk [vmem:[#allocation2 + $0xd0] sm:$0xff] %vm231_vm0, %v1314_v48 }
  0x20   : > { %1086 = vmatpush3.bf16.msra.mxu0 %v1239_v15  ;;  %1199 = vmatpush3.bf16.msra.mxu1 %v1239_v15  ;;  %259 = vst.msk [vmem:[#allocation2 + $0xd8] sm:$0xff] %vm231_vm0, %v1314_v48  ;;  %260 = vst.msk [vmem:[#allocation2 + $0xe0] sm:$0xff] %vm231_vm0, %v1314_v48  ;;  %v267_v15 = vld [vmem:[#allocation2 + $0x18] sm:$0xff] }
  0x21   : > { %1087 = vmatprep.subr.bf16.mxu0 %v1240_v16  ;;  %1192 = vmatprep.subr.bf16.mxu1 %v1240_v16  ;;  %261 = vst.msk [vmem:[#allocation2 + $0xe8] sm:$0xff] %vm231_vm0, %v1314_v48  ;;  %262 = vst.msk [vmem:[#allocation2 + $0xf0] sm:$0xff] %vm231_vm0, %v1314_v48 }
  0x22   : > { %263 = vst.msk [vmem:[#allocation2 + $0xf8] sm:$0xff] %vm231_vm0, %v1314_v48  ;;  %v281_v61 = vld [vmem:[#allocation2 + $0x88] sm:$0xff]  ;;  %v282_v9 = vld [vmem:[#allocation2 + $0x90] sm:$0xff] }
  0x24   : > { %1088 = vmatpush3.bf16.msra.mxu0 %v1241_v17  ;;  %1200 = vmatpush3.bf16.msra.mxu1 %v1241_v17  ;;  %v283_v17 = vld [vmem:[#allocation2 + $0x98] sm:$0xff] }
  0x27   : > { %649 = vmatmul.mubr.bf16.vlgmr.msra.gmra.mrb[0].mxu0 %v1242_v18  ;;  %713 = vmatmul.mubr.bf16.vlgmr.msra.gmra.mrb[0].mxu1 %v1245_v19 }
  0x28   : > { %656 = vmatprep.mubr.bf16.mxu0 %v1248_v20  ;;  %720 = vmatprep.mubr.bf16.mxu1 %v1250_v21 }
  0x2f   : > { %657 = vmatmul.mubr.bf16.gmra.mrb[4].mxu0 %v1252_v22  ;;  %721 = vmatmul.mubr.bf16.gmra.mrb[4].mxu1 %v1253_v23 }
  0x30   : > { %664 = vmatprep.mubr.bf16.mxu0 %v1254_v24  ;;  %728 = vmatprep.mubr.bf16.mxu1 %v1256_v25 }
  0x37   : > { %665 = vmatmul.mubr.bf16.gmra.mrb[8].mxu0 %v1258_v26  ;;  %729 = vmatmul.mubr.bf16.gmra.mrb[8].mxu1 %v1259_v27 }
  0x38   : > { %672 = vmatprep.mubr.bf16.mxu0 %v1260_v28  ;;  %736 = vmatprep.mubr.bf16.mxu1 %v1262_v29 }
  0x3f   : > { %673 = vmatmul.mubr.bf16.gmra.mrb[12].mxu0 %v1264_v30  ;;  %737 = vmatmul.mubr.bf16.gmra.mrb[12].mxu1 %v1265_v31  ;;  %v268_v31 = vld [vmem:[#allocation2 + $0x20] sm:$0xff] }
  0x40   : > { %680 = vmatprep.mubr.bf16.mxu0 %v1266_v32  ;;  %744 = vmatprep.mubr.bf16.mxu1 %v1268_v33  ;;  %v284_v33 = vld [vmem:[#allocation2 + $0xa0] sm:$0xff] }
  0x47   : > { %681 = vmatmul.mubr.bf16.gmra.mrb[16].mxu0 %v1270_v34  ;;  %745 = vmatmul.mubr.bf16.gmra.mrb[16].mxu1 %v1271_v35 }
  0x48   : > { %688 = vmatprep.mubr.bf16.mxu0 %v1272_v36  ;;  %752 = vmatprep.mubr.bf16.mxu1 %v1274_v37 }
  0x4f   : > { %689 = vmatmul.mubr.bf16.gmra.mrb[20].mxu0 %v1276_v38  ;;  %753 = vmatmul.mubr.bf16.gmra.mrb[20].mxu1 %v1277_v39  ;;  %v269_v39 = vld [vmem:[#allocation2 + $0x28] sm:$0xff] }
  0x50   : > { %696 = vmatprep.mubr.bf16.mxu0 %v1278_v40  ;;  %760 = vmatprep.mubr.bf16.mxu1 %v1280_v41  ;;  %v285_v41 = vld [vmem:[#allocation2 + $0xa8] sm:$0xff] }
  0x57   : > { %697 = vmatmul.mubr.bf16.gmra.mrb[24].mxu0 %v1282_v42  ;;  %761 = vmatmul.mubr.bf16.gmra.mrb[24].mxu1 %v1283_v43 }
  0x58   : > { %704 = vmatprep.mubr.bf16.mxu0 %v1284_v44  ;;  %768 = vmatprep.mubr.bf16.mxu1 %v1286_v45 }
  0x5f   : > { %705 = vmatmul.mubr.bf16.gmra.mrb[28].mxu0 %v1288_v46  ;;  %769 = vmatmul.mubr.bf16.gmra.mrb[28].mxu1 %v1289_v47 }
  0xfa   : > { %v1089_v49 = vpop.f32.mrb[0].mxu0  ;;  %v1137_v50 = vpop.f32.mrb[0].mxu1 }
  0xfb   : > { %v1090_v52 = vpop.f32.mrb[1].mxu0  ;;  %v1138_v54 = vpop.f32.mrb[1].mxu1 }
  0xfc   : > { %v1091_v55 = vadd.f32 %v1090_v52, %v1089_v49  ;;  %v1139_v56 = vadd.f32 %v1138_v54, %v1137_v50  ;;  %v1092_v57 = vpop.f32.mrb[2].mxu0  ;;  %v1140_v58 = vpop.f32.mrb[2].mxu1 }
  0xfd   : > { %v1093_v60 = vpop.f32.mrb[3].mxu0  ;;  %v1141_v62 = vpop.f32.mrb[3].mxu1 }
  0xfe   : > { %v777_v63 = vadd.f32 %v1091_v55, %v264_v51  ;;  %v793_v0 = vadd.f32 %v1139_v56, %v280_v53  ;;  %v1094_v1 = vadd.f32 %v1093_v60, %v1092_v57  ;;  %v1142_v2 = vadd.f32 %v1141_v62, %v1140_v58  ;;  %v270_v55 = vld [vmem:[#allocation2 + $0x30] sm:$0xff] }
  0xff   : > { %v286_v57 = vld [vmem:[#allocation2 + $0xb0] sm:$0xff] }
 0x100   : > { %810 = vst.msk [vmem:[#allocation2] sm:$0xff] %vm231_vm0, %v777_v63  ;;  %826 = vst.msk [vmem:[#allocation2 + $0x80] sm:$0xff] %vm231_vm0, %v793_v0  ;;  %v778_v3 = vadd.f32 %v1094_v1, %v265_v59  ;;  %v794_v4 = vadd.f32 %v1142_v2, %v281_v61  ;;  %v271_v63 = vld [vmem:[#allocation2 + $0x38] sm:$0xff] }
 0x101   : > { %v287_v1 = vld [vmem:[#allocation2 + $0xb8] sm:$0xff] }
 0x102   : > { %811 = vst.msk [vmem:[#allocation2 + $0x8] sm:$0xff] %vm231_vm0, %v778_v3  ;;  %827 = vst.msk [vmem:[#allocation2 + $0x88] sm:$0xff] %vm231_vm0, %v794_v4  ;;  %v1095_v5 = vpop.f32.mrb[4].mxu0  ;;  %v1143_v6 = vpop.f32.mrb[4].mxu1 }
 0x103   : > { %v1096_v8 = vpop.f32.mrb[5].mxu0  ;;  %v1144_v10 = vpop.f32.mrb[5].mxu1 }
 0x104   : > { %v1097_v11 = vadd.f32 %v1096_v8, %v1095_v5  ;;  %v1145_v12 = vadd.f32 %v1144_v10, %v1143_v6  ;;  %v1098_v13 = vpop.f32.mrb[6].mxu0  ;;  %v1146_v14 = vpop.f32.mrb[6].mxu1 }
 0x105   : > { %v1099_v16 = vpop.f32.mrb[7].mxu0  ;;  %v1147_v18 = vpop.f32.mrb[7].mxu1 }
 0x106   : > { %v779_v19 = vadd.f32 %v1097_v11, %v266_v7  ;;  %v795_v20 = vadd.f32 %v1145_v12, %v282_v9  ;;  %v1100_v21 = vadd.f32 %v1099_v16, %v1098_v13  ;;  %v1148_v22 = vadd.f32 %v1147_v18, %v1146_v14 }
 0x107   : > { %v845_v23 = vld [vmem:[#allocation2] sm:$0xff] }
 0x108   : > { %v861_v24 = vld [vmem:[#allocation2 + $0x80] sm:$0xff]  ;;  %877 = vst.msk [vmem:[%s1479_s28] sm:$0xff] %vm231_vm0, %v845_v23  ;;  %812 = vst.msk [vmem:[#allocation2 + $0x10] sm:$0xff] %vm231_vm0, %v779_v19  ;;  %v780_v25 = vadd.f32 %v1100_v21, %v267_v15  ;;  %v796_v26 = vadd.f32 %v1148_v22, %v283_v17  ;;  %v273_v23 = vld [vmem:[#allocation2 + $0x48] sm:$0xff] }
 0x109   : > { %893 = vst.msk [vmem:[%s1479_s28 + $0x80] sm:$0xff] %vm231_vm0, %v861_v24  ;;  %828 = vst.msk [vmem:[#allocation2 + $0x90] sm:$0xff] %vm231_vm0, %v795_v20  ;;  %v846_v27 = vld [vmem:[#allocation2 + $0x8] sm:$0xff]  ;;  %v272_v15 = vld [vmem:[#allocation2 + $0x40] sm:$0xff] }
 0x10a   : > { %v862_v28 = vld [vmem:[#allocation2 + $0x88] sm:$0xff]  ;;  %878 = vst.msk [vmem:[%s1479_s28 + $0x8] sm:$0xff] %vm231_vm0, %v846_v27  ;;  %813 = vst.msk [vmem:[#allocation2 + $0x18] sm:$0xff] %vm231_vm0, %v780_v25  ;;  %v1101_v29 = vpop.f32.mrb[8].mxu0  ;;  %v1149_v30 = vpop.f32.mrb[8].mxu1  ;;  %v288_v17 = vld [vmem:[#allocation2 + $0xc0] sm:$0xff] }
 0x10b   : > { %894 = vst.msk [vmem:[%s1479_s28 + $0x88] sm:$0xff] %vm231_vm0, %v862_v28  ;;  %829 = vst.msk [vmem:[#allocation2 + $0x98] sm:$0xff] %vm231_vm0, %v796_v26  ;;  %v1102_v32 = vpop.f32.mrb[9].mxu0  ;;  %v1150_v34 = vpop.f32.mrb[9].mxu1  ;;  %v289_v25 = vld [vmem:[#allocation2 + $0xc8] sm:$0xff] }
 0x10c   : > { %v1103_v35 = vadd.f32 %v1102_v32, %v1101_v29  ;;  %v1151_v36 = vadd.f32 %v1150_v34, %v1149_v30  ;;  %v1104_v37 = vpop.f32.mrb[10].mxu0  ;;  %v1152_v38 = vpop.f32.mrb[10].mxu1 }
 0x10d   : > { %v1105_v40 = vpop.f32.mrb[11].mxu0  ;;  %v1153_v42 = vpop.f32.mrb[11].mxu1 }
 0x10e   : > { %v781_v43 = vadd.f32 %v1103_v35, %v268_v31  ;;  %v797_v44 = vadd.f32 %v1151_v36, %v284_v33  ;;  %v1106_v45 = vadd.f32 %v1105_v40, %v1104_v37  ;;  %v1154_v46 = vadd.f32 %v1153_v42, %v1152_v38 }
 0x10f   : > { %v847_v47 = vld [vmem:[#allocation2 + $0x10] sm:$0xff] }
 0x110   : > { %v863_v48 = vld [vmem:[#allocation2 + $0x90] sm:$0xff]  ;;  %879 = vst.msk [vmem:[%s1479_s28 + $0x10] sm:$0xff] %vm231_vm0, %v847_v47  ;;  %814 = vst.msk [vmem:[#allocation2 + $0x20] sm:$0xff] %vm231_vm0, %v781_v43  ;;  %v782_v49 = vadd.f32 %v1106_v45, %v269_v39  ;;  %v798_v50 = vadd.f32 %v1154_v46, %v285_v41  ;;  %v275_v47 = vld [vmem:[#allocation2 + $0x58] sm:$0xff] }
 0x111   : > { %895 = vst.msk [vmem:[%s1479_s28 + $0x90] sm:$0xff] %vm231_vm0, %v863_v48  ;;  %830 = vst.msk [vmem:[#allocation2 + $0xa0] sm:$0xff] %vm231_vm0, %v797_v44  ;;  %v848_v51 = vld [vmem:[#allocation2 + $0x18] sm:$0xff]  ;;  %v274_v39 = vld [vmem:[#allocation2 + $0x50] sm:$0xff] }
 0x112   : > { %v864_v52 = vld [vmem:[#allocation2 + $0x98] sm:$0xff]  ;;  %880 = vst.msk [vmem:[%s1479_s28 + $0x18] sm:$0xff] %vm231_vm0, %v848_v51  ;;  %815 = vst.msk [vmem:[#allocation2 + $0x28] sm:$0xff] %vm231_vm0, %v782_v49  ;;  %v1107_v53 = vpop.f32.mrb[12].mxu0  ;;  %v1155_v54 = vpop.f32.mrb[12].mxu1  ;;  %v290_v41 = vld [vmem:[#allocation2 + $0xd0] sm:$0xff] }
 0x113   : > { %896 = vst.msk [vmem:[%s1479_s28 + $0x98] sm:$0xff] %vm231_vm0, %v864_v52  ;;  %831 = vst.msk [vmem:[#allocation2 + $0xa8] sm:$0xff] %vm231_vm0, %v798_v50  ;;  %v1108_v56 = vpop.f32.mrb[13].mxu0  ;;  %v1156_v58 = vpop.f32.mrb[13].mxu1  ;;  %v291_v49 = vld [vmem:[#allocation2 + $0xd8] sm:$0xff] }
 0x114   : > { %v1109_v59 = vadd.f32 %v1108_v56, %v1107_v53  ;;  %v1157_v60 = vadd.f32 %v1156_v58, %v1155_v54  ;;  %v1110_v61 = vpop.f32.mrb[14].mxu0  ;;  %v1158_v62 = vpop.f32.mrb[14].mxu1 }
 0x115   : > { %v1111_v0 = vpop.f32.mrb[15].mxu0  ;;  %v1159_v2 = vpop.f32.mrb[15].mxu1 }
 0x116   : > { %v783_v3 = vadd.f32 %v1109_v59, %v270_v55  ;;  %v799_v4 = vadd.f32 %v1157_v60, %v286_v57  ;;  %v1112_v5 = vadd.f32 %v1111_v0, %v1110_v61  ;;  %v1160_v6 = vadd.f32 %v1159_v2, %v1158_v62 }
 0x117   : > { %v849_v7 = vld [vmem:[#allocation2 + $0x20] sm:$0xff] }
 0x118   : > { %v865_v8 = vld [vmem:[#allocation2 + $0xa0] sm:$0xff]  ;;  %881 = vst.msk [vmem:[%s1479_s28 + $0x20] sm:$0xff] %vm231_vm0, %v849_v7  ;;  %816 = vst.msk [vmem:[#allocation2 + $0x30] sm:$0xff] %vm231_vm0, %v783_v3  ;;  %v784_v9 = vadd.f32 %v1112_v5, %v271_v63  ;;  %v800_v10 = vadd.f32 %v1160_v6, %v287_v1  ;;  %v277_v7 = vld [vmem:[#allocation2 + $0x68] sm:$0xff] }
 0x119   : > { %897 = vst.msk [vmem:[%s1479_s28 + $0xa0] sm:$0xff] %vm231_vm0, %v865_v8  ;;  %832 = vst.msk [vmem:[#allocation2 + $0xb0] sm:$0xff] %vm231_vm0, %v799_v4  ;;  %v850_v11 = vld [vmem:[#allocation2 + $0x28] sm:$0xff]  ;;  %v276_v63 = vld [vmem:[#allocation2 + $0x60] sm:$0xff] }
 0x11a   : > { %v866_v12 = vld [vmem:[#allocation2 + $0xa8] sm:$0xff]  ;;  %882 = vst.msk [vmem:[%s1479_s28 + $0x28] sm:$0xff] %vm231_vm0, %v850_v11  ;;  %817 = vst.msk [vmem:[#allocation2 + $0x38] sm:$0xff] %vm231_vm0, %v784_v9  ;;  %v1113_v13 = vpop.f32.mrb[16].mxu0  ;;  %v1161_v14 = vpop.f32.mrb[16].mxu1  ;;  %v292_v1 = vld [vmem:[#allocation2 + $0xe0] sm:$0xff] }
 0x11b   : > { %898 = vst.msk [vmem:[%s1479_s28 + $0xa8] sm:$0xff] %vm231_vm0, %v866_v12  ;;  %833 = vst.msk [vmem:[#allocation2 + $0xb8] sm:$0xff] %vm231_vm0, %v800_v10  ;;  %v1114_v16 = vpop.f32.mrb[17].mxu0  ;;  %v1162_v18 = vpop.f32.mrb[17].mxu1  ;;  %v293_v9 = vld [vmem:[#allocation2 + $0xe8] sm:$0xff] }
 0x11c   : > { %v1115_v19 = vadd.f32 %v1114_v16, %v1113_v13  ;;  %v1163_v20 = vadd.f32 %v1162_v18, %v1161_v14  ;;  %v1116_v21 = vpop.f32.mrb[18].mxu0  ;;  %v1164_v22 = vpop.f32.mrb[18].mxu1 }
 0x11d   : > { %v1117_v24 = vpop.f32.mrb[19].mxu0  ;;  %v1165_v26 = vpop.f32.mrb[19].mxu1 }
 0x11e   : > { %v785_v27 = vadd.f32 %v1115_v19, %v272_v15  ;;  %v801_v28 = vadd.f32 %v1163_v20, %v288_v17  ;;  %v1118_v29 = vadd.f32 %v1117_v24, %v1116_v21  ;;  %v1166_v30 = vadd.f32 %v1165_v26, %v1164_v22 }
 0x11f   : > { %v851_v31 = vld [vmem:[#allocation2 + $0x30] sm:$0xff] }
 0x120   : > { %v867_v32 = vld [vmem:[#allocation2 + $0xb0] sm:$0xff]  ;;  %883 = vst.msk [vmem:[%s1479_s28 + $0x30] sm:$0xff] %vm231_vm0, %v851_v31  ;;  %818 = vst.msk [vmem:[#allocation2 + $0x40] sm:$0xff] %vm231_vm0, %v785_v27  ;;  %v786_v33 = vadd.f32 %v1118_v29, %v273_v23  ;;  %v802_v34 = vadd.f32 %v1166_v30, %v289_v25  ;;  %v279_v31 = vld [vmem:[#allocation2 + $0x78] sm:$0xff] }
 0x121   : > { %899 = vst.msk [vmem:[%s1479_s28 + $0xb0] sm:$0xff] %vm231_vm0, %v867_v32  ;;  %834 = vst.msk [vmem:[#allocation2 + $0xc0] sm:$0xff] %vm231_vm0, %v801_v28  ;;  %v852_v35 = vld [vmem:[#allocation2 + $0x38] sm:$0xff]  ;;  %v278_v23 = vld [vmem:[#allocation2 + $0x70] sm:$0xff] }
 0x122   : > { %v868_v36 = vld [vmem:[#allocation2 + $0xb8] sm:$0xff]  ;;  %884 = vst.msk [vmem:[%s1479_s28 + $0x38] sm:$0xff] %vm231_vm0, %v852_v35  ;;  %819 = vst.msk [vmem:[#allocation2 + $0x48] sm:$0xff] %vm231_vm0, %v786_v33  ;;  %v1119_v37 = vpop.f32.mrb[20].mxu0  ;;  %v1167_v38 = vpop.f32.mrb[20].mxu1  ;;  %v294_v25 = vld [vmem:[#allocation2 + $0xf0] sm:$0xff] }
 0x123   : > { %900 = vst.msk [vmem:[%s1479_s28 + $0xb8] sm:$0xff] %vm231_vm0, %v868_v36  ;;  %835 = vst.msk [vmem:[#allocation2 + $0xc8] sm:$0xff] %vm231_vm0, %v802_v34  ;;  %v1120_v40 = vpop.f32.mrb[21].mxu0  ;;  %v1168_v42 = vpop.f32.mrb[21].mxu1  ;;  %v295_v33 = vld [vmem:[#allocation2 + $0xf8] sm:$0xff] }
 0x124   : > { %v1121_v43 = vadd.f32 %v1120_v40, %v1119_v37  ;;  %v1169_v44 = vadd.f32 %v1168_v42, %v1167_v38  ;;  %v1122_v45 = vpop.f32.mrb[22].mxu0  ;;  %v1170_v46 = vpop.f32.mrb[22].mxu1 }
 0x125   : > { %v1123_v48 = vpop.f32.mrb[23].mxu0  ;;  %v1171_v50 = vpop.f32.mrb[23].mxu1 }
 0x126   : > { %v787_v51 = vadd.f32 %v1121_v43, %v274_v39  ;;  %v803_v52 = vadd.f32 %v1169_v44, %v290_v41  ;;  %v1124_v53 = vadd.f32 %v1123_v48, %v1122_v45  ;;  %v1172_v54 = vadd.f32 %v1171_v50, %v1170_v46 }
 0x127   : > { %v853_v55 = vld [vmem:[#allocation2 + $0x40] sm:$0xff] }
 0x128   : > { %v869_v56 = vld [vmem:[#allocation2 + $0xc0] sm:$0xff]  ;;  %885 = vst.msk [vmem:[%s1479_s28 + $0x40] sm:$0xff] %vm231_vm0, %v853_v55  ;;  %820 = vst.msk [vmem:[#allocation2 + $0x50] sm:$0xff] %vm231_vm0, %v787_v51  ;;  %v788_v57 = vadd.f32 %v1124_v53, %v275_v47  ;;  %v804_v58 = vadd.f32 %v1172_v54, %v291_v49 }
 0x129   : > { %901 = vst.msk [vmem:[%s1479_s28 + $0xc0] sm:$0xff] %vm231_vm0, %v869_v56  ;;  %836 = vst.msk [vmem:[#allocation2 + $0xd0] sm:$0xff] %vm231_vm0, %v803_v52  ;;  %v854_v59 = vld [vmem:[#allocation2 + $0x48] sm:$0xff] }
 0x12a   : > { %v870_v60 = vld [vmem:[#allocation2 + $0xc8] sm:$0xff]  ;;  %886 = vst.msk [vmem:[%s1479_s28 + $0x48] sm:$0xff] %vm231_vm0, %v854_v59  ;;  %821 = vst.msk [vmem:[#allocation2 + $0x58] sm:$0xff] %vm231_vm0, %v788_v57  ;;  %v1125_v61 = vpop.f32.mrb[24].mxu0  ;;  %v1173_v62 = vpop.f32.mrb[24].mxu1 }
 0x12b   : > { %902 = vst.msk [vmem:[%s1479_s28 + $0xc8] sm:$0xff] %vm231_vm0, %v870_v60  ;;  %837 = vst.msk [vmem:[#allocation2 + $0xd8] sm:$0xff] %vm231_vm0, %v804_v58  ;;  %v1126_v0 = vpop.f32.mrb[25].mxu0  ;;  %v1174_v2 = vpop.f32.mrb[25].mxu1 }
 0x12c   : > { %v1127_v3 = vadd.f32 %v1126_v0, %v1125_v61  ;;  %v1175_v4 = vadd.f32 %v1174_v2, %v1173_v62  ;;  %v1128_v5 = vpop.f32.mrb[26].mxu0  ;;  %v1176_v6 = vpop.f32.mrb[26].mxu1 }
 0x12d   : > { %v1129_v8 = vpop.f32.mrb[27].mxu0  ;;  %v1177_v10 = vpop.f32.mrb[27].mxu1 }
 0x12e   : > { %v789_v11 = vadd.f32 %v1127_v3, %v276_v63  ;;  %v805_v12 = vadd.f32 %v1175_v4, %v292_v1  ;;  %v1130_v13 = vadd.f32 %v1129_v8, %v1128_v5  ;;  %v1178_v14 = vadd.f32 %v1177_v10, %v1176_v6 }
 0x12f   : > { %v855_v15 = vld [vmem:[#allocation2 + $0x50] sm:$0xff] }
 0x130   : > { %v871_v16 = vld [vmem:[#allocation2 + $0xd0] sm:$0xff]  ;;  %887 = vst.msk [vmem:[%s1479_s28 + $0x50] sm:$0xff] %vm231_vm0, %v855_v15  ;;  %822 = vst.msk [vmem:[#allocation2 + $0x60] sm:$0xff] %vm231_vm0, %v789_v11  ;;  %v790_v17 = vadd.f32 %v1130_v13, %v277_v7  ;;  %v806_v18 = vadd.f32 %v1178_v14, %v293_v9 }
 0x131   : > { %903 = vst.msk [vmem:[%s1479_s28 + $0xd0] sm:$0xff] %vm231_vm0, %v871_v16  ;;  %838 = vst.msk [vmem:[#allocation2 + $0xe0] sm:$0xff] %vm231_vm0, %v805_v12  ;;  %v856_v19 = vld [vmem:[#allocation2 + $0x58] sm:$0xff] }
 0x132   : > { %v872_v20 = vld [vmem:[#allocation2 + $0xd8] sm:$0xff]  ;;  %888 = vst.msk [vmem:[%s1479_s28 + $0x58] sm:$0xff] %vm231_vm0, %v856_v19  ;;  %823 = vst.msk [vmem:[#allocation2 + $0x68] sm:$0xff] %vm231_vm0, %v790_v17  ;;  %v1131_v21 = vpop.f32.mrb[28].mxu0  ;;  %v1179_v22 = vpop.f32.mrb[28].mxu1 }
 0x133   : > { %904 = vst.msk [vmem:[%s1479_s28 + $0xd8] sm:$0xff] %vm231_vm0, %v872_v20  ;;  %839 = vst.msk [vmem:[#allocation2 + $0xe8] sm:$0xff] %vm231_vm0, %v806_v18  ;;  %v1132_v24 = vpop.f32.mrb[29].mxu0  ;;  %v1180_v26 = vpop.f32.mrb[29].mxu1 }
 0x134   : > { %v1133_v27 = vadd.f32 %v1132_v24, %v1131_v21  ;;  %v1181_v28 = vadd.f32 %v1180_v26, %v1179_v22  ;;  %v1134_v29 = vpop.f32.mrb[30].mxu0  ;;  %v1182_v30 = vpop.f32.mrb[30].mxu1 }
 0x135   : > { %v1135_v32 = vpop.f32.mrb[31].mxu0  ;;  %v1183_v34 = vpop.f32.mrb[31].mxu1 }
 0x136   : > { %v791_v35 = vadd.f32 %v1133_v27, %v278_v23  ;;  %v807_v36 = vadd.f32 %v1181_v28, %v294_v25  ;;  %v1136_v37 = vadd.f32 %v1135_v32, %v1134_v29  ;;  %v1184_v38 = vadd.f32 %v1183_v34, %v1182_v30 }
 0x137   : > { %v857_v39 = vld [vmem:[#allocation2 + $0x60] sm:$0xff] }
 0x138   : > { %v873_v40 = vld [vmem:[#allocation2 + $0xe0] sm:$0xff]  ;;  %889 = vst.msk [vmem:[%s1479_s28 + $0x60] sm:$0xff] %vm231_vm0, %v857_v39  ;;  %824 = vst.msk [vmem:[#allocation2 + $0x70] sm:$0xff] %vm231_vm0, %v791_v35  ;;  %v792_v41 = vadd.f32 %v1136_v37, %v279_v31  ;;  %v808_v42 = vadd.f32 %v1184_v38, %v295_v33 }
 0x139   : > { %905 = vst.msk [vmem:[%s1479_s28 + $0xe0] sm:$0xff] %vm231_vm0, %v873_v40  ;;  %840 = vst.msk [vmem:[#allocation2 + $0xf0] sm:$0xff] %vm231_vm0, %v807_v36  ;;  %v858_v43 = vld [vmem:[#allocation2 + $0x68] sm:$0xff] }
 0x13a   : > { %v874_v44 = vld [vmem:[#allocation2 + $0xe8] sm:$0xff]  ;;  %890 = vst.msk [vmem:[%s1479_s28 + $0x68] sm:$0xff] %vm231_vm0, %v858_v43  ;;  %825 = vst.msk [vmem:[#allocation2 + $0x78] sm:$0xff] %vm231_vm0, %v792_v41 }
 0x13b   : > { %906 = vst.msk [vmem:[%s1479_s28 + $0xe8] sm:$0xff] %vm231_vm0, %v874_v44  ;;  %841 = vst.msk [vmem:[#allocation2 + $0xf8] sm:$0xff] %vm231_vm0, %v808_v42 }
 0x13f   : > { %v859_v45 = vld [vmem:[#allocation2 + $0x70] sm:$0xff] }
 0x140   : > { %v875_v46 = vld [vmem:[#allocation2 + $0xf0] sm:$0xff]  ;;  %891 = vst.msk [vmem:[%s1479_s28 + $0x70] sm:$0xff] %vm231_vm0, %v859_v45 }
 0x141   : > { %907 = vst.msk [vmem:[%s1479_s28 + $0xf0] sm:$0xff] %vm231_vm0, %v875_v46  ;;  %v860_v47 = vld [vmem:[#allocation2 + $0x78] sm:$0xff] }
 0x142   : > { %v876_v48 = vld [vmem:[#allocation2 + $0xf8] sm:$0xff]  ;;  %892 = vst.msk [vmem:[%s1479_s28 + $0x78] sm:$0xff] %vm231_vm0, %v860_v47 }
 0x143   : > { %908 = vst.msk [vmem:[%s1479_s28 + $0xf8] sm:$0xff] %vm231_vm0, %v876_v48 }
 0x144 PF: > { %s12_s11 = sadd.s32 1, %s1312_s11   ;;  %s1585_s9 = smov %s1308_s10 }
 0x145   : > { %p9_p5 = scmp.ge.s32.totalorder %s12_s11, 4   ;;  %s1586_s10 = smov %s1588_s12 }
 0x147   :  { %11 = sbr.rel (!%p9_p5) target bundleno = 2 (0x2), region = 69 }

// kernel: closed_call.416
= control target key start
LH: loop header
LB: loop body
LE: loop exit
PB: predicated region body
PF: predicated region fallthrough
CT: control target
= control target key end

     0   :  { %v2268_v46 = vmov 0.0   ;;  %s2240_s3 = inlined_call_operand.vmem [shape: f32[256,128], index: 3, kind: input, shape index: {}, may-alias: {3,6}]   ;;  %s2241_s4 = inlined_call_operand.vmem [shape: f32[256,128], index: 4, kind: input, shape index: {}, may-alias: {4,7}]   ;;  %s2242_s5 = inlined_call_operand.vmem [shape: bf16[256,128], index: 5, kind: output, shape index: {0}]   ;;  %s2243_s6 = inlined_call_operand.vmem [shape: f32[256,128], index: 6, kind: output, shape index: {1}, may-alias: {3,6}]   ;;  %s2244_s0 = inlined_call_operand.vmem [shape: f32[256,128], index: 0, kind: input, shape index: {}]   ;;  %s2245_s1 = inlined_call_operand.vmem [shape: f32[1,128], index: 1, kind: input, shape index: {}]   ;;  %s2246_s2 = inlined_call_operand.vmem [shape: f32[1,128], index: 2, kind: input, shape index: {}]   ;;  %s2247_s7 = inlined_call_operand.vmem [shape: f32[256,128], index: 7, kind: output, shape index: {2}, may-alias: {4,7}]  }
   0x1   :  { %v133_v0 = vld [vmem:[%s2240_s3] sm:$0xff]  ;;  %v134_v1 = vld [vmem:[%s2240_s3 + $0x8] sm:$0xff]  ;;  %v135_v6 = vld [vmem:[%s2240_s3 + $0x10] sm:$0xff] }
   0x2   :  { %v1093_v2 = vld [vmem:[%s2241_s4] sm:$0xff]  ;;  %v1098_v3 = vld [vmem:[%s2241_s4 + $0x8] sm:$0xff]  ;;  %v197_v4 = vsub.f32 0.0, %v133_v0  ;;  %v198_v5 = vsub.f32 0.0, %v134_v1  ;;  %v136_v7 = vld [vmem:[%s2240_s3 + $0x18] sm:$0xff]  ;;  %v199_v10 = vsub.f32 0.0, %v135_v6 }
   0x3   :  { %2324 = vst [vmem:[#allocation2_spill] sm:$0xff] %v1093_v2  ;;  %2325 = vst [vmem:[#allocation3_spill] sm:$0xff] %v1098_v3  ;;  %v1109_v8 = vld [vmem:[%s2241_s4 + $0x10] sm:$0xff]  ;;  %v1114_v9 = vld [vmem:[%s2241_s4 + $0x18] sm:$0xff]  ;;  %v200_v11 = vsub.f32 0.0, %v136_v7 }
   0x4   :  { %2326 = vst [vmem:[#allocation4_spill] sm:$0xff] %v1109_v8  ;;  %2327 = vst [vmem:[#allocation5_spill] sm:$0xff] %v1114_v9  ;;  %v137_v12 = vld [vmem:[%s2240_s3 + $0x20] sm:$0xff]  ;;  %v229_v13 = vadd.f32 %v197_v4, %v1093_v2  ;;  %v230_v14 = vadd.f32 %v198_v5, %v1098_v3  ;;  %v138_v15 = vld [vmem:[%s2240_s3 + $0x28] sm:$0xff]  ;;  %v1135_v19 = vmul.f32 0.2, %v1093_v2  ;;  %v231_v20 = vadd.f32 %v199_v10, %v1109_v8 }
   0x5   :  { %v1127_v16 = vld [vmem:[%s2241_s4 + $0x20] sm:$0xff]  ;;  %v1132_v17 = vld [vmem:[%s2241_s4 + $0x28] sm:$0xff]  ;;  %v201_v18 = vsub.f32 0.0, %v137_v12  ;;  %v232_v21 = vadd.f32 %v200_v11, %v1114_v9  ;;  %v202_v22 = vsub.f32 0.0, %v138_v15  ;;  %v139_v23 = vld [vmem:[%s2240_s3 + $0x30] sm:$0xff] }
   0x6   :  { %2328 = vst [vmem:[#allocation6_spill] sm:$0xff] %v1127_v16  ;;  %2329 = vst [vmem:[#allocation7_spill] sm:$0xff] %v1132_v17  ;;  %v140_v24 = vld [vmem:[%s2240_s3 + $0x38] sm:$0xff]  ;;  %v1148_v25 = vld [vmem:[%s2241_s4 + $0x30] sm:$0xff]  ;;  %v1151_v26 = vmul.f32 0.2, %v1098_v3 }
   0x7   :  { %2330 = vst [vmem:[#allocation8_spill] sm:$0xff] %v1135_v19  ;;  %2331 = vst [vmem:[#allocation9_spill] sm:$0xff] %v1148_v25  ;;  %v261_v27 = vmul.f32 0.1, %v229_v13  ;;  %v262_v28 = vmul.f32 0.1, %v230_v14  ;;  %v233_v29 = vadd.f32 %v201_v18, %v1127_v16  ;;  %v234_v34 = vadd.f32 %v202_v22, %v1132_v17 }
   0x8   :  { %2332 = vst [vmem:[#allocation10_spill] sm:$0xff] %v1151_v26  ;;  %v1157_v30 = vld [vmem:[%s2241_s4 + $0x38] sm:$0xff]  ;;  %v203_v31 = vsub.f32 0.0, %v139_v23  ;;  %v263_v32 = vmul.f32 0.1, %v231_v20  ;;  %v204_v35 = vsub.f32 0.0, %v140_v24 }
   0x9   :  { %2333 = vst [vmem:[#allocation11_spill] sm:$0xff] %v1157_v30  ;;  %v264_v33 = vmul.f32 0.1, %v232_v21  ;;  %v1160_v36 = vadd.f32 %v261_v27, %v133_v0  ;;  %v1162_v37 = vadd.f32 %v262_v28, %v134_v1  ;;  %v265_v38 = vmul.f32 0.1, %v233_v29  ;;  %v141_v53 = vld [vmem:[%s2240_s3 + $0x40] sm:$0xff] }
   0xa   :  { %v235_v39 = vadd.f32 %v203_v31, %v1148_v25  ;;  %v1165_v40 = vadd.f32 %v263_v32, %v135_v6  ;;  %v266_v42 = vmul.f32 0.1, %v234_v34  ;;  %v236_v43 = vadd.f32 %v204_v35, %v1157_v30  ;;  %v142_v57 = vld [vmem:[%s2240_s3 + $0x48] sm:$0xff]  ;;  %v143_v58 = vld [vmem:[%s2240_s3 + $0x50] sm:$0xff]  ;;  %v1217_v63 = vld [vmem:[%s2241_s4 + $0x40] sm:$0xff] }
   0xb   :  { %v1167_v41 = vadd.f32 %v264_v33, %v136_v7  ;;  %vm389_vm0 = vcmp.gt.f32.partialorder %v1160_v36, 1.0  ;;  %vm390_vm1 = vcmp.gt.f32.partialorder %v1162_v37, 1.0  ;;  %v1172_v44 = vadd.f32 %v265_v38, %v137_v12  ;;  %2334 = vst [vmem:[#allocation12_spill] sm:$0xff] %v1217_v63  ;;  %v1226_v4 = vld [vmem:[%s2241_s4 + $0x48] sm:$0xff]  ;;  %v144_v6 = vld [vmem:[%s2240_s3 + $0x58] sm:$0xff]  ;;  %v1242_v12 = vld [vmem:[%s2241_s4 + $0x50] sm:$0xff] }
   0xc   :  { %v267_v45 = vmul.f32 0.1, %v235_v39  ;;  %v1175_v47 = vsel %vm389_vm0, 1.0, %v2268_v46  ;;  %v1178_v48 = vsel %vm390_vm1, 1.0, %v2268_v46  ;;  %vm391_vm2 = vcmp.gt.f32.partialorder %v1165_v40, 1.0  ;;  %2335 = vst [vmem:[#allocation13_spill] sm:$0xff] %v1226_v4 }
   0xd   :  { %vm392_vm3 = vcmp.gt.f32.partialorder %v1167_v41, 1.0  ;;  %v980_v49 = vpack.c.bf16 %v1178_v48, %v1175_v47  ;;  %v1187_v52 = vsel %vm391_vm2, 1.0, %v2268_v46  ;;  %v1196_v56 = vadd.f32 %v266_v42, %v138_v15  ;;  %2336 = vst [vmem:[#allocation14_spill] sm:$0xff] %v1242_v12  ;;  %v1252_v20 = vld [vmem:[%s2241_s4 + $0x58] sm:$0xff]  ;;  %v146_v27 = vld [vmem:[%s2240_s3 + $0x68] sm:$0xff]  ;;  %v147_v33 = vld [vmem:[%s2240_s3 + $0x70] sm:$0xff] }
   0xe   :  { %v1193_v54 = vsel %vm392_vm3, 1.0, %v2268_v46  ;;  %vm393_vm4 = vcmp.gt.f32.partialorder %v1172_v44, 1.0  ;;  %v268_v62 = vmul.f32 0.1, %v236_v43  ;;  %v1221_v1 = vadd.f32 %v267_v45, %v139_v23  ;;  %2337 = vst [vmem:[#allocation15_spill] sm:$0xff] %v1252_v20  ;;  %v1279_v34 = vld [vmem:[%s2240_s3 + $0x78] sm:$0xff] }
   0xf   :  { %981 = vst [vmem:[%s2242_s5] sm:$0xff] %v980_v49   ;;  %v983_v59 = vpack.c.bf16 %v1193_v54, %v1187_v52  ;;  %v1212_v61 = vsel %vm393_vm4, 1.0, %v2268_v46  ;;  %vm394_vm5 = vcmp.gt.f32.partialorder %v1196_v56, 1.0  ;;  %v205_v5 = vsub.f32 0.0, %v141_v53  ;;  %v1288_v43 = vld [vmem:[%s2241_s4 + $0x60] sm:$0xff]  ;;  %v1293_v45 = vld [vmem:[%s2241_s4 + $0x68] sm:$0xff]  ;;  %v151_v29 = vld [vmem:[%s2240_s3 + $0x90] sm:$0xff] }
  0x10   :  { %v1235_v7 = vsel %vm394_vm5, 1.0, %v2268_v46  ;;  %v1237_v10 = vadd.f32 %v268_v62, %v140_v24  ;;  %v206_v11 = vsub.f32 0.0, %v142_v57  ;;  %v207_v13 = vsub.f32 0.0, %v143_v58  ;;  %v145_v24 = vld [vmem:[%s2240_s3 + $0x60] sm:$0xff]  ;;  %2338 = vst [vmem:[#allocation16_spill] sm:$0xff] %v1288_v43  ;;  %2339 = vst [vmem:[#allocation17_spill] sm:$0xff] %v1293_v45 }
  0x11   :  { %1027 = vst [vmem:[%s2242_s5 + $0x8] sm:$0xff] %v983_v59   ;;  %v986_v14 = vpack.c.bf16 %v1235_v7, %v1212_v61  ;;  %vm395_vm6 = vcmp.gt.f32.partialorder %v1221_v1, 1.0  ;;  %v237_v18 = vadd.f32 %v205_v5, %v1217_v63  ;;  %v208_v23 = vsub.f32 0.0, %v144_v6  ;;  %v1470_v63 = vld [vmem:[%s2241_s4 + $0xb0] sm:$0xff]  ;;  %v161_v19 = vld [vmem:[%s2240_s3 + $0xe0] sm:$0xff] }
  0x12   :  { %vm396_vm7 = vcmp.gt.f32.partialorder %v1237_v10, 1.0  ;;  %v1256_v21 = vsel %vm395_vm6, 1.0, %v2268_v46  ;;  %v238_v22 = vadd.f32 %v206_v11, %v1226_v4  ;;  %v239_v32 = vadd.f32 %v207_v13, %v1242_v12  ;;  %v1300_v11 = vld [vmem:[%s2241_s4 + $0x70] sm:$0xff]  ;;  %v156_v12 = vld [vmem:[%s2240_s3 + $0xb8] sm:$0xff]  ;;  %2349 = vst [vmem:[#allocation26_spill] sm:$0xff] %v1470_v63 }
  0x13   :  { %1028 = vst [vmem:[%s2242_s5 + $0x10] sm:$0xff] %v986_v14   ;;  %v1269_v28 = vsel %vm396_vm7, 1.0, %v2268_v46  ;;  %v269_v31 = vmul.f32 0.1, %v237_v18  ;;  %v240_v42 = vadd.f32 %v208_v23, %v1252_v20  ;;  %v209_v62 = vsub.f32 0.0, %v145_v24  ;;  %2340 = vst [vmem:[#allocation18_spill] sm:$0xff] %v1300_v11 }
  0x14   :  { %v989_v35 = vpack.c.bf16 %v1269_v28, %v1256_v21  ;;  %v270_v39 = vmul.f32 0.1, %v238_v22  ;;  %v271_v59 = vmul.f32 0.1, %v239_v32  ;;  %v210_v5 = vsub.f32 0.0, %v146_v27  ;;  %v1422_v20 = vld [vmem:[%s2241_s4 + $0xa0] sm:$0xff] }
  0x15   :  { %v1295_v49 = vadd.f32 %v269_v31, %v141_v53  ;;  %v272_v14 = vmul.f32 0.1, %v240_v42  ;;  %v211_v18 = vsub.f32 0.0, %v147_v33  ;;  %v212_v22 = vsub.f32 0.0, %v1279_v34  ;;  %2346 = vst [vmem:[#allocation24_spill] sm:$0xff] %v1422_v20 }
  0x16   :  { %1029 = vst [vmem:[%s2242_s5 + $0x18] sm:$0xff] %v989_v35   ;;  %v1305_v13 = vadd.f32 %v270_v39, %v142_v57  ;;  %v1309_v53 = vadd.f32 %v271_v59, %v143_v58  ;;  %v241_v23 = vadd.f32 %v209_v62, %v1288_v43  ;;  %v242_v31 = vadd.f32 %v210_v5, %v1293_v45  ;;  %v1328_v59 = vld [vmem:[%s2241_s4 + $0x78] sm:$0xff]  ;;  %v154_v43 = vld [vmem:[%s2240_s3 + $0xa8] sm:$0xff] }
  0x17   :  { %vm397_vm8 = vcmp.gt.f32.partialorder %v1295_v49, 1.0  ;;  %v1317_v35 = vadd.f32 %v272_v14, %v144_v6  ;;  %v243_v57 = vadd.f32 %v211_v18, %v1300_v11  ;;  %2341 = vst [vmem:[#allocation19_spill] sm:$0xff] %v1328_v59  ;;  %v149_v14 = vld [vmem:[%s2240_s3 + $0x80] sm:$0xff]  ;;  %v150_v18 = vld [vmem:[%s2240_s3 + $0x88] sm:$0xff]  ;;  %v244_v60 = vadd.f32 %v212_v22, %v1328_v59  ;;  %v152_v22 = vld [vmem:[%s2240_s3 + $0x98] sm:$0xff] }
  0x18   :  { %vm398_vm9 = vcmp.gt.f32.partialorder %v1305_v13, 1.0  ;;  %v1315_v32 = vsel %vm397_vm8, 1.0, %v2268_v46  ;;  %vm399_vm10 = vcmp.gt.f32.partialorder %v1309_v53, 1.0  ;;  %v273_v58 = vmul.f32 0.1, %v241_v23  ;;  %v1390_v11 = vld [vmem:[%s2241_s4 + $0x90] sm:$0xff] }
  0x19   :  { %v1321_v39 = vsel %vm398_vm9, 1.0, %v2268_v46  ;;  %vm400_vm11 = vcmp.gt.f32.partialorder %v1317_v35, 1.0  ;;  %v1335_v5 = vsel %vm399_vm10, 1.0, %v2268_v46  ;;  %v274_v38 = vmul.f32 0.1, %v242_v31  ;;  %v1367_v31 = vld [vmem:[%s2241_s4 + $0x88] sm:$0xff] }
  0x1a   :  { %v992_v62 = vpack.c.bf16 %v1321_v39, %v1315_v32  ;;  %v1344_v23 = vsel %vm400_vm11, 1.0, %v2268_v46  ;;  %v1347_v6 = vadd.f32 %v273_v58, %v145_v24  ;;  %v275_v55 = vmul.f32 0.1, %v243_v57  ;;  %v1362_v24 = vld [vmem:[%s2241_s4 + $0x80] sm:$0xff]  ;;  %2343 = vst [vmem:[#allocation21_spill] sm:$0xff] %v1367_v31  ;;  %2344 = vst [vmem:[#allocation22_spill] sm:$0xff] %v1390_v11 }
  0x1b   :  { %v995_v15 = vpack.c.bf16 %v1344_v23, %v1335_v5  ;;  %2342 = vst [vmem:[#allocation20_spill] sm:$0xff] %v1362_v24  ;;  %v1369_v58 = vadd.f32 %v274_v38, %v146_v27  ;;  %v214_v42 = vsub.f32 0.0, %v150_v18  ;;  %v276_v0 = vmul.f32 0.1, %v244_v60  ;;  %v1402_v60 = vld [vmem:[%s2241_s4 + $0x98] sm:$0xff]  ;;  %v155_v38 = vld [vmem:[%s2240_s3 + $0xb0] sm:$0xff] }
  0x1c   :  { %1030 = vst [vmem:[%s2242_s5 + $0x20] sm:$0xff] %v992_v62   ;;  %vm401_vm12 = vcmp.gt.f32.partialorder %v1347_v6, 1.0  ;;  %v213_v62 = vsub.f32 0.0, %v149_v14  ;;  %v1381_v51 = vadd.f32 %v275_v55, %v147_v33  ;;  %v215_v27 = vsub.f32 0.0, %v151_v29  ;;  %2345 = vst [vmem:[#allocation23_spill] sm:$0xff] %v1402_v60 }
  0x1d   :  { %1031 = vst [vmem:[%s2242_s5 + $0x28] sm:$0xff] %v995_v15   ;;  %v1379_v57 = vsel %vm401_vm12, 1.0, %v2268_v46  ;;  %vm402_vm13 = vcmp.gt.f32.partialorder %v1369_v58, 1.0  ;;  %v246_v59 = vadd.f32 %v214_v42, %v1367_v31  ;;  %v1396_v55 = vadd.f32 %v276_v0, %v1279_v34  ;;  %v153_v42 = vld [vmem:[%s2240_s3 + $0xa0] sm:$0xff] }
  0x1e   :  { %v245_v50 = vadd.f32 %v213_v62, %v1362_v24  ;;  %v1393_v15 = vsel %vm402_vm13, 1.0, %v2268_v46  ;;  %vm403_vm14 = vcmp.gt.f32.partialorder %v1381_v51, 1.0  ;;  %v216_v33 = vsub.f32 0.0, %v152_v22 }
  0x1f   :  { %v998_v62 = vpack.c.bf16 %v1393_v15, %v1379_v57  ;;  %v1411_v0 = vsel %vm403_vm14, 1.0, %v2268_v46  ;;  %vm404_vm15 = vcmp.gt.f32.partialorder %v1396_v55, 1.0  ;;  %v278_v24 = vmul.f32 0.1, %v246_v59 }
  0x20   :  { %v277_v34 = vmul.f32 0.1, %v245_v50  ;;  %v247_v45 = vadd.f32 %v215_v27, %v1390_v11  ;;  %v1428_v50 = vsel %vm404_vm15, 1.0, %v2268_v46  ;;  %v248_v59 = vadd.f32 %v216_v33, %v1402_v60 }
  0x21   :  { %1032 = vst [vmem:[%s2242_s5 + $0x30] sm:$0xff] %v998_v62   ;;  %v217_v27 = vsub.f32 0.0, %v153_v42  ;;  %v1001_v11 = vpack.c.bf16 %v1428_v50, %v1411_v0  ;;  %v1439_v4 = vadd.f32 %v278_v24, %v150_v18  ;;  %v2348_v18 = vmov 0.0  }
  0x22   :  { %v1430_v31 = vadd.f32 %v277_v34, %v149_v14  ;;  %v279_v62 = vmul.f32 0.1, %v247_v45  ;;  %v1444_v14 = vld [vmem:[%s2241_s4 + $0xa8] sm:$0xff]  ;;  %v280_v33 = vmul.f32 0.1, %v248_v59  ;;  %v218_v34 = vsub.f32 0.0, %v154_v43 }
  0x23   :  { %2347 = vst [vmem:[#allocation25_spill] sm:$0xff] %v1444_v14  ;;  %v249_v46 = vadd.f32 %v217_v27, %v1422_v20  ;;  %1033 = vst [vmem:[%s2242_s5 + $0x38] sm:$0xff] %v1001_v11   ;;  %vm406_vm1 = vcmp.gt.f32.partialorder %v1439_v4, 1.0  ;;  %v219_v60 = vsub.f32 0.0, %v155_v38 }
  0x24   :  { %vm405_vm0 = vcmp.gt.f32.partialorder %v1430_v31, 1.0  ;;  %v1455_v45 = vadd.f32 %v279_v62, %v151_v29  ;;  %v1461_v59 = vsel %vm406_vm1, 1.0, %v2348_v18  ;;  %v1464_v20 = vadd.f32 %v280_v33, %v152_v22  ;;  %v1479_v22 = vld [vmem:[%s2241_s4 + $0xb8] sm:$0xff]  ;;  %v157_v33 = vld [vmem:[%s2240_s3 + $0xc0] sm:$0xff] }
  0x25   :  { %v1453_v24 = vsel %vm405_vm0, 1.0, %v2348_v18  ;;  %v250_v11 = vadd.f32 %v218_v34, %v1444_v14  ;;  %v281_v30 = vmul.f32 0.1, %v249_v46  ;;  %2350 = vst [vmem:[#allocation27_spill] sm:$0xff] %v1479_v22  ;;  %v220_v14 = vsub.f32 0.0, %v156_v12  ;;  %v158_v46 = vld [vmem:[%s2240_s3 + $0xc8] sm:$0xff] }
  0x26   :  { %v1004_v29 = vpack.c.bf16 %v1461_v59, %v1453_v24  ;;  %vm407_vm2 = vcmp.gt.f32.partialorder %v1455_v45, 1.0  ;;  %vm408_vm3 = vcmp.gt.f32.partialorder %v1464_v20, 1.0  ;;  %v251_v16 = vadd.f32 %v219_v60, %v1470_v63  ;;  %v1518_v60 = vld [vmem:[%s2241_s4 + $0xc8] sm:$0xff] }
  0x27   :  { %v1486_v34 = vsel %vm407_vm2, 1.0, %v2348_v18  ;;  %v282_v27 = vmul.f32 0.1, %v250_v11  ;;  %v1495_v62 = vsel %vm408_vm3, 1.0, %v2348_v18  ;;  %v1498_v17 = vadd.f32 %v281_v30, %v153_v42  ;;  %v159_v11 = vld [vmem:[%s2240_s3 + $0xd0] sm:$0xff]  ;;  %v1513_v30 = vld [vmem:[%s2241_s4 + $0xc0] sm:$0xff] }
  0x28   :  { %1034 = vst [vmem:[%s2242_s5 + $0x40] sm:$0xff] %v1004_v29   ;;  %2351 = vst [vmem:[#allocation28_spill] sm:$0xff] %v1495_v62  ;;  %v1007_v9 = vpack.c.bf16 %v1495_v62, %v1486_v34  ;;  %v252_v29 = vadd.f32 %v220_v14, %v1479_v22  ;;  %v283_v42 = vmul.f32 0.1, %v251_v16  ;;  %v221_v25 = vsub.f32 0.0, %v157_v33  ;;  %v1534_v16 = vld [vmem:[%s2241_s4 + $0xd0] sm:$0xff] }
  0x29   :  { %2352 = vst [vmem:[#allocation29_spill] sm:$0xff] %v1498_v17  ;;  %v1507_v3 = vadd.f32 %v282_v27, %v154_v43  ;;  %2354 = vst [vmem:[#allocation31_spill] sm:$0xff] %v1513_v30  ;;  %vm409_vm4 = vcmp.gt.f32.partialorder %v1498_v17, 1.0  ;;  %v222_v63 = vsub.f32 0.0, %v158_v46  ;;  %v160_v43 = vld [vmem:[%s2240_s3 + $0xd8] sm:$0xff]  ;;  %v223_v8 = vsub.f32 0.0, %v159_v11 }
  0x2a   :  { %2355 = vst [vmem:[#allocation32_spill] sm:$0xff] %v1518_v60  ;;  %1035 = vst [vmem:[%s2242_s5 + $0x48] sm:$0xff] %v1007_v9   ;;  %v1529_v14 = vsel %vm409_vm4, 1.0, %v2348_v18  ;;  %v284_v27 = vmul.f32 0.1, %v252_v29  ;;  %v1540_v2 = vadd.f32 %v283_v42, %v155_v38  ;;  %v253_v9 = vadd.f32 %v221_v25, %v1513_v30  ;;  %v1555_v38 = vld [vmem:[%s2241_s4 + $0xd8] sm:$0xff] }
  0x2b   :  { %2353 = vst [vmem:[#allocation30_spill] sm:$0xff] %v1507_v3  ;;  %vm410_vm5 = vcmp.gt.f32.partialorder %v1507_v3, 1.0  ;;  %2356 = vst [vmem:[#allocation33_spill] sm:$0xff] %v1534_v16  ;;  %v254_v62 = vadd.f32 %v222_v63, %v1518_v60  ;;  %v224_v42 = vsub.f32 0.0, %v160_v43  ;;  %v255_v26 = vadd.f32 %v223_v8, %v1534_v16  ;;  %v162_v30 = vld [vmem:[%s2240_s3 + $0xe8] sm:$0xff]  ;;  %v163_v60 = vld [vmem:[%s2240_s3 + $0xf0] sm:$0xff] }
  0x2c   :  { %v1537_v22 = vsel %vm410_vm5, 1.0, %v2348_v18  ;;  %2358 = vst [vmem:[#allocation35_spill] sm:$0xff] %v1540_v2  ;;  %v1549_v17 = vadd.f32 %v284_v27, %v156_v12  ;;  %2360 = vst [vmem:[#allocation37_spill] sm:$0xff] %v1555_v38  ;;  %vm411_vm6 = vcmp.gt.f32.partialorder %v1540_v2, 1.0  ;;  %v285_v25 = vmul.f32 0.1, %v253_v9 }
  0x2d   :  { %2357 = vst [vmem:[#allocation34_spill] sm:$0xff] %v1537_v22  ;;  %v1010_v29 = vpack.c.bf16 %v1537_v22, %v1529_v14  ;;  %v1567_v63 = vsel %vm411_vm6, 1.0, %v2348_v18  ;;  %v286_v12 = vmul.f32 0.1, %v254_v62  ;;  %v1572_v27 = vld [vmem:[%s2241_s4 + $0xe0] sm:$0xff]  ;;  %v225_v8 = vsub.f32 0.0, %v161_v19 }
  0x2e   :  { %2359 = vst [vmem:[#allocation36_spill] sm:$0xff] %v1549_v17  ;;  %vm412_vm7 = vcmp.gt.f32.partialorder %v1549_v17, 1.0  ;;  %2361 = vst [vmem:[#allocation38_spill] sm:$0xff] %v1572_v27  ;;  %v1578_v16 = vadd.f32 %v285_v25, %v157_v33  ;;  %v287_v22 = vmul.f32 0.1, %v255_v26  ;;  %v1592_v3 = vld [vmem:[%s2241_s4 + $0xe8] sm:$0xff] }
  0x2f   :  { %1036 = vst [vmem:[%s2242_s5 + $0x50] sm:$0xff] %v1010_v29   ;;  %v1575_v9 = vsel %vm412_vm7, 1.0, %v2348_v18  ;;  %v256_v29 = vadd.f32 %v224_v42, %v1555_v38  ;;  %v1587_v2 = vadd.f32 %v286_v12, %v158_v46  ;;  %2364 = vst [vmem:[#allocation41_spill] sm:$0xff] %v1592_v3  ;;  %v226_v25 = vsub.f32 0.0, %v162_v30  ;;  %v164_v12 = vld [vmem:[%s2240_s3 + $0xf8] sm:$0xff]  ;;  %v1618_v38 = vld [vmem:[%s2241_s4 + $0xf0] sm:$0xff] }
  0x30   :  { %2362 = vst [vmem:[#allocation39_spill] sm:$0xff] %v1578_v16  ;;  %v1013_v62 = vpack.c.bf16 %v1575_v9, %v1567_v63  ;;  %vm413_vm8 = vcmp.gt.f32.partialorder %v1578_v16, 1.0  ;;  %v257_v42 = vadd.f32 %v225_v8, %v1572_v27  ;;  %v1603_v26 = vadd.f32 %v287_v22, %v159_v11 }
  0x31   :  { %2363 = vst [vmem:[#allocation40_spill] sm:$0xff] %v1587_v2  ;;  %v288_v33 = vmul.f32 0.1, %v256_v29  ;;  %vm414_vm9 = vcmp.gt.f32.partialorder %v1587_v2, 1.0  ;;  %v1601_v46 = vsel %vm413_vm8, 1.0, %v2348_v18  ;;  %v227_v17 = vsub.f32 0.0, %v163_v60 }
  0x32   :  { %1037 = vst [vmem:[%s2242_s5 + $0x58] sm:$0xff] %v1013_v62   ;;  %2365 = vst [vmem:[#allocation42_spill] sm:$0xff] %v1601_v46  ;;  %v1609_v29 = vsel %vm414_vm9, 1.0, %v2348_v18  ;;  %v258_v62 = vadd.f32 %v226_v25, %v1592_v3  ;;  %vm415_vm10 = vcmp.gt.f32.partialorder %v1603_v26, 1.0  ;;  %v289_v2 = vmul.f32 0.1, %v257_v42 }
  0x33   :  { %2366 = vst [vmem:[#allocation43_spill] sm:$0xff] %v1603_v26  ;;  %2367 = vst [vmem:[#allocation44_spill] sm:$0xff] %v1609_v29  ;;  %v1612_v27 = vadd.f32 %v288_v33, %v160_v43  ;;  %v1016_v22 = vpack.c.bf16 %v1609_v29, %v1601_v46  ;;  %v1627_v43 = vld [vmem:[%s2241_s4 + $0xf8] sm:$0xff]  ;;  %v1631_v33 = vsel %vm415_vm10, 1.0, %v2348_v18  ;;  %v228_v8 = vsub.f32 0.0, %v164_v12 }
  0x34   :  { %v290_v25 = vmul.f32 0.1, %v258_v62  ;;  %v1640_v3 = vadd.f32 %v289_v2, %v161_v19  ;;  %v259_v26 = vadd.f32 %v227_v17, %v1618_v38  ;;  %v2369_v16 = vsub.f32 1.0, %v1175_v47 }
  0x35   :  { %2368 = vst [vmem:[#allocation45_spill] sm:$0xff] %v1612_v27  ;;  %vm416_vm11 = vcmp.gt.f32.partialorder %v1612_v27, 1.0  ;;  %1038 = vst [vmem:[%s2242_s5 + $0x60] sm:$0xff] %v1016_v22   ;;  %v260_v46 = vadd.f32 %v228_v8, %v1627_v43  ;;  %v709_v2 = vmul.f32 0.0, %v1175_v47 }
  0x36   :  { %v1637_v11 = vsel %vm416_vm11, 1.0, %v2348_v18  ;;  %v1646_v62 = vadd.f32 %v290_v25, %v162_v30  ;;  %vm417_vm12 = vcmp.gt.f32.partialorder %v1640_v3, 1.0  ;;  %v291_v22 = vmul.f32 0.1, %v259_v26 }
  0x37   :  { %v1019_v27 = vpack.c.bf16 %v1637_v11, %v1631_v33  ;;  %v677_v42 = vmul.f32 %v2369_v16, %v1160_v36  ;;  %v1659_v17 = vsel %vm417_vm12, 1.0, %v2348_v18  ;;  %v292_v19 = vmul.f32 0.1, %v260_v46 }
  0x38   :  { %vm418_vm13 = vcmp.gt.f32.partialorder %v1646_v62, 1.0  ;;  %v2370_v30 = vsub.f32 1.0, %v1178_v48  ;;  %v673_v36 = vsub.f32 1.0, %v1659_v17  ;;  %v1668_v47 = vadd.f32 %v291_v22, %v163_v60 }
  0x39   :  { %1039 = vst [vmem:[%s2242_s5 + $0x68] sm:$0xff] %v1019_v27   ;;  %v1665_v8 = vsel %vm418_vm13, 1.0, %v2348_v18  ;;  %v741_v16 = vadd.f32 %v709_v2, %v677_v42  ;;  %v1673_v29 = vadd.f32 %v292_v19, %v164_v12  ;;  %v710_v46 = vmul.f32 0.0, %v1178_v48 }
  0x3a   :  { %v678_v26 = vmul.f32 %v2370_v30, %v1162_v37  ;;  %v1022_v27 = vpack.c.bf16 %v1665_v8, %v1659_v17  ;;  %v674_v25 = vsub.f32 1.0, %v1665_v8  ;;  %vm419_vm14 = vcmp.gt.f32.partialorder %v1668_v47, 1.0 }
  0x3b   :  { %773 = vst [vmem:[%s2243_s6] sm:$0xff] %v741_v16  ;;  %v2371_v37 = vsub.f32 1.0, %v1187_v52  ;;  %v711_v42 = vmul.f32 0.0, %v1187_v52  ;;  %v2372_v22 = vsub.f32 1.0, %v1193_v54  ;;  %vm420_vm15 = vcmp.gt.f32.partialorder %v1673_v29, 1.0 }
  0x3c   :  { %1040 = vst [vmem:[%s2242_s5 + $0x70] sm:$0xff] %v1022_v27   ;;  %v1692_v48 = vsel %vm419_vm14, 1.0, %v2348_v18  ;;  %v742_v12 = vadd.f32 %v710_v46, %v678_v26  ;;  %v712_v19 = vmul.f32 0.0, %v1193_v54  ;;  %v2374_v26 = vsub.f32 1.0, %v1235_v7 }
  0x3d   :  { %v679_v60 = vmul.f32 %v2371_v37, %v1165_v40  ;;  %v680_v2 = vmul.f32 %v2372_v22, %v1167_v41  ;;  %v1696_v40 = vsel %vm420_vm15, 1.0, %v2348_v18  ;;  %v675_v52 = vsub.f32 1.0, %v1692_v48 }
  0x3e   :  { %v2373_v41 = vsub.f32 1.0, %v1212_v61  ;;  %v1025_v27 = vpack.c.bf16 %v1696_v40, %v1692_v48  ;;  %v676_v37 = vsub.f32 1.0, %v1696_v40  ;;  %774 = vst [vmem:[%s2243_s6 + $0x8] sm:$0xff] %v742_v12  ;;  %v713_v18 = vmul.f32 0.0, %v1212_v61 }
  0x3f   :  { %v743_v30 = vadd.f32 %v711_v42, %v679_v60  ;;  %v744_v54 = vadd.f32 %v712_v19, %v680_v2  ;;  %v714_v46 = vmul.f32 0.0, %v1235_v7  ;;  %v2375_v60 = vsub.f32 1.0, %v1256_v21 }
  0x40   :  { %v681_v16 = vmul.f32 %v2373_v41, %v1172_v44  ;;  %v682_v44 = vmul.f32 %v2374_v26, %v1196_v56  ;;  %v715_v22 = vmul.f32 0.0, %v1256_v21  ;;  %1041 = vst [vmem:[%s2242_s5 + $0x78] sm:$0xff] %v1025_v27   ;;  %v2376_v56 = vsub.f32 1.0, %v1269_v28 }
  0x41   :  { %775 = vst [vmem:[%s2243_s6 + $0x10] sm:$0xff] %v743_v30  ;;  %v683_v42 = vmul.f32 %v2375_v60, %v1221_v1  ;;  %776 = vst [vmem:[%s2243_s6 + $0x18] sm:$0xff] %v744_v54  ;;  %v716_v7 = vmul.f32 0.0, %v1269_v28  ;;  %v2377_v1 = vsub.f32 1.0, %v1315_v32  ;;  %v717_v30 = vmul.f32 0.0, %v1315_v32 }
  0x42   :  { %v745_v61 = vadd.f32 %v713_v18, %v681_v16  ;;  %v684_v2 = vmul.f32 %v2376_v56, %v1237_v10  ;;  %v746_v21 = vadd.f32 %v714_v46, %v682_v44  ;;  %v2378_v41 = vsub.f32 1.0, %v1321_v39 }
  0x43   :  { %v685_v12 = vmul.f32 %v2377_v1, %v1295_v49  ;;  %v747_v19 = vadd.f32 %v715_v22, %v683_v42  ;;  %v718_v10 = vmul.f32 0.0, %v1321_v39  ;;  %v2379_v28 = vsub.f32 1.0, %v1335_v5 }
  0x44   :  { %v686_v27 = vmul.f32 %v2378_v41, %v1305_v13  ;;  %777 = vst [vmem:[%s2243_s6 + $0x20] sm:$0xff] %v745_v61  ;;  %v748_v16 = vadd.f32 %v716_v7, %v684_v2  ;;  %v719_v49 = vmul.f32 0.0, %v1335_v5  ;;  %778 = vst [vmem:[%s2243_s6 + $0x28] sm:$0xff] %v746_v21  ;;  %v2380_v32 = vsub.f32 1.0, %v1344_v23 }
  0x45   :  { %v687_v54 = vmul.f32 %v2379_v28, %v1309_v53  ;;  %779 = vst [vmem:[%s2243_s6 + $0x30] sm:$0xff] %v747_v19  ;;  %v749_v13 = vadd.f32 %v717_v30, %v685_v12  ;;  %v720_v39 = vmul.f32 0.0, %v1344_v23  ;;  %v2381_v53 = vsub.f32 1.0, %v1379_v57 }
  0x46   :  { %v688_v18 = vmul.f32 %v2380_v32, %v1317_v35  ;;  %780 = vst [vmem:[%s2243_s6 + $0x38] sm:$0xff] %v748_v16  ;;  %v750_v5 = vadd.f32 %v718_v10, %v686_v27  ;;  %v721_v46 = vmul.f32 0.0, %v1379_v57  ;;  %v2382_v60 = vsub.f32 1.0, %v1393_v15  ;;  %v2390_v16 = vld [vmem:[#allocation29_spill] sm:$0xff] }
  0x47   :  { %v689_v26 = vmul.f32 %v2381_v53, %v1347_v6  ;;  %v751_v44 = vadd.f32 %v719_v49, %v687_v54  ;;  %781 = vst [vmem:[%s2243_s6 + $0x40] sm:$0xff] %v749_v13  ;;  %v722_v23 = vmul.f32 0.0, %v1393_v15  ;;  %v2383_v6 = vsub.f32 1.0, %v1411_v0  ;;  %v2392_v49 = vld [vmem:[#allocation30_spill] sm:$0xff]  ;;  %v2395_v53 = vld [vmem:[#allocation35_spill] sm:$0xff] }
  0x48   :  { %v690_v42 = vmul.f32 %v2382_v60, %v1369_v58  ;;  %v752_v35 = vadd.f32 %v720_v39, %v688_v18  ;;  %v723_v61 = vmul.f32 0.0, %v1411_v0  ;;  %782 = vst [vmem:[%s2243_s6 + $0x48] sm:$0xff] %v750_v5  ;;  %v2384_v57 = vsub.f32 1.0, %v1428_v50  ;;  %v2393_v13 = vld [vmem:[#allocation34_spill] sm:$0xff] }
  0x49   :  { %v691_v22 = vmul.f32 %v2383_v6, %v1381_v51  ;;  %783 = vst [vmem:[%s2243_s6 + $0x50] sm:$0xff] %v751_v44  ;;  %v753_v58 = vadd.f32 %v721_v46, %v689_v26  ;;  %v724_v15 = vmul.f32 0.0, %v1428_v50  ;;  %v2385_v51 = vsub.f32 1.0, %v1453_v24  ;;  %v2397_v46 = vld [vmem:[#allocation36_spill] sm:$0xff]  ;;  %v2400_v6 = vld [vmem:[#allocation42_spill] sm:$0xff] }
  0x4a   :  { %v692_v56 = vmul.f32 %v2384_v57, %v1396_v55  ;;  %784 = vst [vmem:[%s2243_s6 + $0x58] sm:$0xff] %v752_v35  ;;  %v754_v0 = vadd.f32 %v722_v23, %v690_v42  ;;  %v725_v1 = vmul.f32 0.0, %v1453_v24  ;;  %v2386_v12 = vsub.f32 1.0, %v1461_v59  ;;  %v2388_v24 = vld [vmem:[#allocation28_spill] sm:$0xff]  ;;  %v2399_v23 = vld [vmem:[#allocation39_spill] sm:$0xff] }
  0x4b   :  { %v693_v2 = vmul.f32 %v2385_v51, %v1430_v31  ;;  %v755_v7 = vadd.f32 %v723_v61, %v691_v22  ;;  %785 = vst [vmem:[%s2243_s6 + $0x60] sm:$0xff] %v753_v58  ;;  %v726_v50 = vmul.f32 0.0, %v1461_v59  ;;  %v2387_v31 = vsub.f32 1.0, %v1486_v34 }
  0x4c   :  { %v694_v21 = vmul.f32 %v2386_v12, %v1439_v4  ;;  %v756_v55 = vadd.f32 %v724_v15, %v692_v56  ;;  %v727_v30 = vmul.f32 0.0, %v1486_v34  ;;  %786 = vst [vmem:[%s2243_s6 + $0x68] sm:$0xff] %v754_v0  ;;  %v2389_v41 = vsub.f32 1.0, %v2388_v24  ;;  %v2402_v56 = vld [vmem:[#allocation40_spill] sm:$0xff] }
  0x4d   :  { %v695_v19 = vmul.f32 %v2387_v31, %v1455_v45  ;;  %787 = vst [vmem:[%s2243_s6 + $0x70] sm:$0xff] %v755_v7  ;;  %v757_v4 = vadd.f32 %v725_v1, %v693_v2  ;;  %v728_v59 = vmul.f32 0.0, %v2388_v24  ;;  %v2391_v45 = vsub.f32 1.0, %v1529_v14  ;;  %v2403_v15 = vld [vmem:[#allocation44_spill] sm:$0xff]  ;;  %v2405_v7 = vld [vmem:[#allocation43_spill] sm:$0xff] }
  0x4e   :  { %v696_v27 = vmul.f32 %v2389_v41, %v1464_v20  ;;  %788 = vst [vmem:[%s2243_s6 + $0x78] sm:$0xff] %v756_v55  ;;  %v758_v34 = vadd.f32 %v726_v50, %v694_v21  ;;  %v729_v54 = vmul.f32 0.0, %v1529_v14  ;;  %v2394_v32 = vsub.f32 1.0, %v2393_v13  ;;  %v2407_v50 = vld [vmem:[#allocation45_spill] sm:$0xff]  ;;  %v1876_v24 = vld [vmem:[%s2245_s1] ss:$0 sm:$0xff] }
  0x4f   :  { %v697_v10 = vmul.f32 %v2391_v45, %v2390_v16  ;;  %v759_v28 = vadd.f32 %v727_v30, %v695_v19  ;;  %789 = vst [vmem:[%s2243_s6 + $0x80] sm:$0xff] %v757_v4  ;;  %v730_v39 = vmul.f32 0.0, %v2393_v13  ;;  %v2396_v26 = vsub.f32 1.0, %v1567_v63 }
  0x50   :  { %v698_v18 = vmul.f32 %v2394_v32, %v2392_v49  ;;  %v760_v20 = vadd.f32 %v728_v59, %v696_v27  ;;  %v731_v44 = vmul.f32 0.0, %v1567_v63  ;;  %790 = vst [vmem:[%s2243_s6 + $0x88] sm:$0xff] %v758_v34  ;;  %v2398_v60 = vsub.f32 1.0, %v1575_v9  ;;  %v2410_v49 = vld [vmem:[#allocation2_spill] sm:$0xff] }
  0x51   :  { %v699_v5 = vmul.f32 %v2396_v26, %v2395_v53  ;;  %791 = vst [vmem:[%s2243_s6 + $0x90] sm:$0xff] %v759_v28  ;;  %v761_v14 = vadd.f32 %v729_v54, %v697_v10  ;;  %v732_v35 = vmul.f32 0.0, %v1575_v9  ;;  %v2401_v22 = vsub.f32 1.0, %v2400_v6  ;;  %v26_v10 = vld [vmem:[%s2244_s0 + $0x18] sm:$0xff]  ;;  %v2409_v54 = vld [vmem:[#allocation8_spill] sm:$0xff] }
  0x52   :  { %v700_v42 = vmul.f32 %v2398_v60, %v2397_v46  ;;  %792 = vst [vmem:[%s2243_s6 + $0x98] sm:$0xff] %v760_v20  ;;  %v762_v63 = vadd.f32 %v730_v39, %v698_v18  ;;  %v733_v57 = vmul.f32 0.0, %v2400_v6  ;;  %v2404_v51 = vsub.f32 1.0, %v2403_v15  ;;  %v2411_v18 = vld [vmem:[#allocation10_spill] sm:$0xff]  ;;  %v2412_v20 = vld [vmem:[#allocation3_spill] sm:$0xff]  ;;  %v2414_v46 = vld [vmem:[#allocation5_spill] sm:$0xff] }
  0x53   :  { %v701_v61 = vmul.f32 %v2401_v22, %v2399_v23  ;;  %v763_v58 = vadd.f32 %v731_v44, %v699_v5  ;;  %793 = vst [vmem:[%s2243_s6 + $0xa0] sm:$0xff] %v761_v14  ;;  %v734_v0 = vmul.f32 0.0, %v2403_v15  ;;  %v2406_v1 = vsub.f32 1.0, %v1631_v33  ;;  %v2413_v5 = vld [vmem:[#allocation4_spill] sm:$0xff]  ;;  %v2415_v22 = vld [vmem:[#allocation6_spill] sm:$0xff] }
  0x54   :  { %v702_v2 = vmul.f32 %v2404_v51, %v2402_v56  ;;  %v764_v9 = vadd.f32 %v732_v35, %v700_v42  ;;  %v735_v21 = vmul.f32 0.0, %v1631_v33  ;;  %794 = vst [vmem:[%s2243_s6 + $0xa8] sm:$0xff] %v762_v63  ;;  %v2408_v31 = vsub.f32 1.0, %v1637_v11  ;;  %v23_v33 = vld [vmem:[%s2244_s0] sm:$0xff]  ;;  %v28_v42 = vld [vmem:[%s2244_s0 + $0x28] sm:$0xff]  ;;  %v29_v63 = vld [vmem:[%s2244_s0 + $0x30] sm:$0xff] }
  0x55   :  { %v703_v12 = vmul.f32 %v2406_v1, %v2405_v7  ;;  %795 = vst [vmem:[%s2243_s6 + $0xb0] sm:$0xff] %v763_v58  ;;  %v765_v55 = vadd.f32 %v733_v57, %v701_v61  ;;  %v736_v30 = vmul.f32 0.0, %v1637_v11  ;;  %v705_v4 = vmul.f32 %v673_v36, %v1640_v3  ;;  %v24_v36 = vld [vmem:[%s2244_s0 + $0x8] sm:$0xff]  ;;  %v30_v51 = vld [vmem:[%s2244_s0 + $0x38] sm:$0xff] }
  0x56   :  { %v704_v19 = vmul.f32 %v2408_v31, %v2407_v50  ;;  %796 = vst [vmem:[%s2243_s6 + $0xb8] sm:$0xff] %v764_v9  ;;  %v766_v41 = vadd.f32 %v734_v0, %v702_v2  ;;  %v737_v11 = vmul.f32 0.0, %v1659_v17  ;;  %v706_v3 = vmul.f32 %v674_v25, %v1646_v62  ;;  %v1899_v62 = vld [vmem:[%s2246_s2] ss:$0 sm:$0xff]  ;;  %v25_v25 = vld [vmem:[%s2244_s0 + $0x10] sm:$0xff]  ;;  %v2416_v7 = vld [vmem:[#allocation7_spill] sm:$0xff] }
  0x57   :  { %v767_v27 = vadd.f32 %v735_v21, %v703_v12  ;;  %797 = vst [vmem:[%s2243_s6 + $0xc0] sm:$0xff] %v765_v55  ;;  %v738_v16 = vmul.f32 0.0, %v1665_v8  ;;  %v707_v45 = vmul.f32 %v675_v52, %v1668_v47  ;;  %v739_v17 = vmul.f32 0.0, %v1692_v48  ;;  %v31_v12 = vld [vmem:[%s2244_s0 + $0x40] sm:$0xff]  ;;  %v2417_v31 = vld [vmem:[#allocation9_spill] sm:$0xff] }
  0x58   :  { %v768_v59 = vadd.f32 %v736_v30, %v704_v19  ;;  %798 = vst [vmem:[%s2243_s6 + $0xc8] sm:$0xff] %v766_v41  ;;  %v769_v8 = vadd.f32 %v737_v11, %v705_v4  ;;  %v708_v47 = vmul.f32 %v676_v37, %v1673_v29  ;;  %v740_v48 = vmul.f32 0.0, %v1696_v40  ;;  %v27_v29 = vld [vmem:[%s2244_s0 + $0x20] sm:$0xff]  ;;  %v32_v30 = vld [vmem:[%s2244_s0 + $0x48] sm:$0xff] }
  0x59   :  { %799 = vst [vmem:[%s2243_s6 + $0xd0] sm:$0xff] %v767_v27  ;;  %v62_v52 = vsub.f32 %v23_v33, %v1876_v24  ;;  %v770_v34 = vadd.f32 %v738_v16, %v706_v3  ;;  %v771_v28 = vadd.f32 %v739_v17, %v707_v45  ;;  %v357_v13 = vsub.f32 %v2410_v49, %v2409_v54  ;;  %v33_v45 = vld [vmem:[%s2244_s0 + $0x50] sm:$0xff]  ;;  %v2420_v54 = vld [vmem:[#allocation13_spill] sm:$0xff] }
  0x5a   :  { %800 = vst [vmem:[%s2243_s6 + $0xd8] sm:$0xff] %v768_v59  ;;  %v63_v32 = vsub.f32 %v24_v36, %v1876_v24  ;;  %801 = vst [vmem:[%s2243_s6 + $0xe0] sm:$0xff] %v769_v8  ;;  %v772_v40 = vadd.f32 %v740_v48, %v708_v47  ;;  %v358_v39 = vsub.f32 %v2412_v20, %v2411_v18  ;;  %v327_v44 = vmul.f32 0.2, %v2413_v5  ;;  %v2418_v36 = vld [vmem:[#allocation11_spill] sm:$0xff]  ;;  %v2419_v8 = vld [vmem:[#allocation12_spill] sm:$0xff] }
  0x5b   :  { %v101_v37 = vmul.f32 %v1899_v62, %v62_v52  ;;  %v64_v53 = vsub.f32 %v25_v25, %v1876_v24  ;;  %802 = vst [vmem:[%s2243_s6 + $0xe8] sm:$0xff] %v770_v34  ;;  %803 = vst [vmem:[%s2243_s6 + $0xf0] sm:$0xff] %v771_v28  ;;  %v65_v14 = vsub.f32 %v26_v10, %v1876_v24  ;;  %v328_v60 = vmul.f32 0.2, %v2414_v46  ;;  %v34_v52 = vld [vmem:[%s2244_s0 + $0x58] sm:$0xff] }
  0x5c   :  { %v102_v26 = vmul.f32 %v1899_v62, %v63_v32  ;;  %804 = vst [vmem:[%s2243_s6 + $0xf8] sm:$0xff] %v772_v40  ;;  %v66_v6 = vsub.f32 %v27_v29, %v1876_v24  ;;  %v329_v61 = vmul.f32 0.2, %v2415_v22  ;;  %v359_v57 = vsub.f32 %v2413_v5, %v327_v44  ;;  %v36_v44 = vld [vmem:[%s2244_s0 + $0x68] sm:$0xff] }
  0x5d   :  { %v805_v35 = vadd.f32 %v357_v13, %v101_v37  ;;  %v103_v23 = vmul.f32 %v1899_v62, %v64_v53  ;;  %v104_v56 = vmul.f32 %v1899_v62, %v65_v14  ;;  %v360_v15 = vsub.f32 %v2414_v46, %v328_v60  ;;  %v35_v13 = vld [vmem:[%s2244_s0 + $0x60] sm:$0xff] }
  0x5e   :  { %v806_v58 = vadd.f32 %v358_v39, %v102_v26  ;;  %v105_v2 = vmul.f32 %v1899_v62, %v66_v6  ;;  %v361_v9 = vsub.f32 %v2415_v22, %v329_v61  ;;  %v67_v0 = vsub.f32 %v28_v42, %v1876_v24  ;;  %v2421_v37 = vld [vmem:[#allocation14_spill] sm:$0xff]  ;;  %v2422_v26 = vld [vmem:[#allocation15_spill] sm:$0xff]  ;;  %v2423_v61 = vld [vmem:[#allocation16_spill] sm:$0xff] }
  0x5f   :  { %837 = vst [vmem:[%s2247_s7] sm:$0xff] %v805_v35  ;;  %v330_v1 = vmul.f32 0.2, %v2416_v7  ;;  %v807_v21 = vadd.f32 %v359_v57, %v103_v23  ;;  %v808_v55 = vadd.f32 %v360_v15, %v104_v56  ;;  %v68_v50 = vsub.f32 %v29_v63, %v1876_v24  ;;  %v37_v35 = vld [vmem:[%s2244_s0 + $0x70] sm:$0xff] }
  0x60   :  { %838 = vst [vmem:[%s2247_s7 + $0x8] sm:$0xff] %v806_v58  ;;  %v331_v19 = vmul.f32 0.2, %v2417_v31  ;;  %v809_v4 = vadd.f32 %v361_v9, %v105_v2  ;;  %v106_v33 = vmul.f32 %v1899_v62, %v67_v0  ;;  %v69_v27 = vsub.f32 %v30_v51, %v1876_v24  ;;  %v38_v58 = vld [vmem:[%s2244_s0 + $0x78] sm:$0xff]  ;;  %v39_v9 = vld [vmem:[%s2244_s0 + $0x80] sm:$0xff] }
  0x61   :  { %v362_v41 = vsub.f32 %v2416_v7, %v330_v1  ;;  %839 = vst [vmem:[%s2247_s7 + $0x10] sm:$0xff] %v807_v21  ;;  %840 = vst [vmem:[%s2247_s7 + $0x18] sm:$0xff] %v808_v55  ;;  %v107_v11 = vmul.f32 %v1899_v62, %v68_v50  ;;  %v332_v59 = vmul.f32 0.2, %v2418_v36  ;;  %v70_v16 = vsub.f32 %v31_v12, %v1876_v24  ;;  %v2424_v51 = vld [vmem:[#allocation17_spill] sm:$0xff]  ;;  %v2425_v12 = vld [vmem:[#allocation18_spill] sm:$0xff] }
  0x62   :  { %v363_v3 = vsub.f32 %v2417_v31, %v331_v19  ;;  %841 = vst [vmem:[%s2247_s7 + $0x20] sm:$0xff] %v809_v4  ;;  %v108_v25 = vmul.f32 %v1899_v62, %v69_v27  ;;  %v333_v47 = vmul.f32 0.2, %v2419_v8  ;;  %v71_v48 = vsub.f32 %v32_v30, %v1876_v24  ;;  %v2426_v19 = vld [vmem:[#allocation19_spill] sm:$0xff] }
  0x63   :  { %v810_v17 = vadd.f32 %v362_v41, %v106_v33  ;;  %v364_v34 = vsub.f32 %v2418_v36, %v332_v59  ;;  %v109_v28 = vmul.f32 %v1899_v62, %v70_v16  ;;  %v334_v49 = vmul.f32 0.2, %v2420_v54  ;;  %v40_v4 = vld [vmem:[%s2244_s0 + $0x88] sm:$0xff] }
  0x64   :  { %v811_v10 = vadd.f32 %v363_v3, %v107_v11  ;;  %v365_v32 = vsub.f32 %v2419_v8, %v333_v47  ;;  %v110_v29 = vmul.f32 %v1899_v62, %v71_v48  ;;  %v72_v40 = vsub.f32 %v33_v45, %v1876_v24  ;;  %v41_v3 = vld [vmem:[%s2244_s0 + $0x90] sm:$0xff] }
  0x65   :  { %842 = vst [vmem:[%s2247_s7 + $0x28] sm:$0xff] %v810_v17  ;;  %v335_v18 = vmul.f32 0.2, %v2421_v37  ;;  %v812_v20 = vadd.f32 %v364_v34, %v108_v25  ;;  %v366_v39 = vsub.f32 %v2420_v54, %v334_v49  ;;  %v73_v53 = vsub.f32 %v34_v52, %v1876_v24  ;;  %v2427_v45 = vld [vmem:[#allocation20_spill] sm:$0xff]  ;;  %v42_v25 = vld [vmem:[%s2244_s0 + $0x98] sm:$0xff]  ;;  %v43_v34 = vld [vmem:[%s2244_s0 + $0xa0] sm:$0xff] }
  0x66   :  { %843 = vst [vmem:[%s2247_s7 + $0x30] sm:$0xff] %v811_v10  ;;  %v336_v5 = vmul.f32 0.2, %v2422_v26  ;;  %v813_v14 = vadd.f32 %v365_v32, %v109_v28  ;;  %v111_v46 = vmul.f32 %v1899_v62, %v72_v40  ;;  %v74_v42 = vsub.f32 %v35_v13, %v1876_v24  ;;  %v2428_v52 = vld [vmem:[#allocation21_spill] sm:$0xff]  ;;  %v2429_v13 = vld [vmem:[#allocation22_spill] sm:$0xff] }
  0x67   :  { %v367_v60 = vsub.f32 %v2421_v37, %v335_v18  ;;  %844 = vst [vmem:[%s2247_s7 + $0x38] sm:$0xff] %v812_v20  ;;  %v814_v23 = vadd.f32 %v366_v39, %v110_v29  ;;  %v112_v6 = vmul.f32 %v1899_v62, %v73_v53  ;;  %v337_v63 = vmul.f32 0.2, %v2423_v61  ;;  %v2430_v18 = vld [vmem:[#allocation23_spill] sm:$0xff] }
  0x68   :  { %v368_v22 = vsub.f32 %v2422_v26, %v336_v5  ;;  %845 = vst [vmem:[%s2247_s7 + $0x40] sm:$0xff] %v813_v14  ;;  %v113_v56 = vmul.f32 %v1899_v62, %v74_v42  ;;  %v75_v15 = vsub.f32 %v36_v44, %v1876_v24  ;;  %v338_v2 = vmul.f32 0.2, %v2424_v51  ;;  %v44_v39 = vld [vmem:[%s2244_s0 + $0xa8] sm:$0xff]  ;;  %v45_v14 = vld [vmem:[%s2244_s0 + $0xb0] sm:$0xff] }
  0x69   :  { %v815_v57 = vadd.f32 %v367_v60, %v111_v46  ;;  %846 = vst [vmem:[%s2247_s7 + $0x48] sm:$0xff] %v814_v23  ;;  %v369_v7 = vsub.f32 %v2423_v61, %v337_v63  ;;  %v76_v1 = vsub.f32 %v37_v35, %v1876_v24  ;;  %v339_v21 = vmul.f32 0.2, %v2425_v12  ;;  %v2431_v35 = vld [vmem:[#allocation24_spill] sm:$0xff] }
  0x6a   :  { %v816_v0 = vadd.f32 %v368_v22, %v112_v6  ;;  %v114_v55 = vmul.f32 %v1899_v62, %v75_v15  ;;  %v370_v50 = vsub.f32 %v2424_v51, %v338_v2  ;;  %v77_v31 = vsub.f32 %v38_v58, %v1876_v24  ;;  %v46_v6 = vld [vmem:[%s2244_s0 + $0xb8] sm:$0xff] }
  0x6b   :  { %847 = vst [vmem:[%s2247_s7 + $0x50] sm:$0xff] %v815_v57  ;;  %v340_v30 = vmul.f32 0.2, %v2426_v19  ;;  %v817_v33 = vadd.f32 %v369_v7, %v113_v56  ;;  %v115_v41 = vmul.f32 %v1899_v62, %v76_v1  ;;  %v371_v27 = vsub.f32 %v2425_v12, %v339_v21  ;;  %v2432_v58 = vld [vmem:[#allocation25_spill] sm:$0xff]  ;;  %v47_v56 = vld [vmem:[%s2244_s0 + $0xc0] sm:$0xff]  ;;  %v2434_v21 = vld [vmem:[#allocation27_spill] sm:$0xff] }
  0x6c   :  { %848 = vst [vmem:[%s2247_s7 + $0x58] sm:$0xff] %v816_v0  ;;  %v78_v11 = vsub.f32 %v39_v9, %v1876_v24  ;;  %v818_v36 = vadd.f32 %v370_v50, %v114_v55  ;;  %v116_v59 = vmul.f32 %v1899_v62, %v77_v31  ;;  %v341_v17 = vmul.f32 0.2, %v2427_v45  ;;  %v2433_v9 = vld [vmem:[#allocation26_spill] sm:$0xff]  ;;  %v48_v50 = vld [vmem:[%s2244_s0 + $0xc8] sm:$0xff] }
  0x6d   :  { %v372_v16 = vsub.f32 %v2426_v19, %v340_v30  ;;  %849 = vst [vmem:[%s2247_s7 + $0x60] sm:$0xff] %v817_v33  ;;  %v819_v8 = vadd.f32 %v371_v27, %v115_v41  ;;  %v79_v48 = vsub.f32 %v40_v4, %v1876_v24  ;;  %v342_v10 = vmul.f32 0.2, %v2428_v52  ;;  %v49_v33 = vld [vmem:[%s2244_s0 + $0xd0] sm:$0xff] }
  0x6e   :  { %v117_v47 = vmul.f32 %v1899_v62, %v78_v11  ;;  %850 = vst [vmem:[%s2247_s7 + $0x68] sm:$0xff] %v818_v36  ;;  %v373_v54 = vsub.f32 %v2427_v45, %v341_v17  ;;  %v80_v49 = vsub.f32 %v41_v3, %v1876_v24  ;;  %v343_v32 = vmul.f32 0.2, %v2429_v13  ;;  %v2435_v3 = vld [vmem:[#allocation31_spill] sm:$0xff] }
  0x6f   :  { %v820_v28 = vadd.f32 %v372_v16, %v116_v59  ;;  %851 = vst [vmem:[%s2247_s7 + $0x70] sm:$0xff] %v819_v8  ;;  %v118_v29 = vmul.f32 %v1899_v62, %v79_v48  ;;  %v374_v40 = vsub.f32 %v2428_v52, %v342_v10  ;;  %v81_v37 = vsub.f32 %v42_v25, %v1876_v24  ;;  %v50_v59 = vld [vmem:[%s2244_s0 + $0xd8] sm:$0xff]  ;;  %v2436_v25 = vld [vmem:[#allocation32_spill] sm:$0xff] }
  0x70   :  { %v344_v20 = vmul.f32 0.2, %v2430_v18  ;;  %v821_v53 = vadd.f32 %v373_v54, %v117_v47  ;;  %v119_v26 = vmul.f32 %v1899_v62, %v80_v49  ;;  %v375_v5 = vsub.f32 %v2429_v13, %v343_v32  ;;  %v51_v47 = vld [vmem:[%s2244_s0 + $0xe0] sm:$0xff]  ;;  %v2438_v32 = vld [vmem:[#allocation37_spill] sm:$0xff] }
  0x71   :  { %852 = vst [vmem:[%s2247_s7 + $0x78] sm:$0xff] %v820_v28  ;;  %v82_v44 = vsub.f32 %v43_v34, %v1876_v24  ;;  %v822_v46 = vadd.f32 %v374_v40, %v118_v29  ;;  %v120_v60 = vmul.f32 %v1899_v62, %v81_v37  ;;  %v345_v23 = vmul.f32 0.2, %v2431_v35  ;;  %v2437_v34 = vld [vmem:[#allocation33_spill] sm:$0xff]  ;;  %v52_v40 = vld [vmem:[%s2244_s0 + $0xe8] sm:$0xff] }
  0x72   :  { %v376_v42 = vsub.f32 %v2430_v18, %v344_v20  ;;  %853 = vst [vmem:[%s2247_s7 + $0x80] sm:$0xff] %v821_v53  ;;  %v823_v22 = vadd.f32 %v375_v5, %v119_v26  ;;  %v83_v63 = vsub.f32 %v44_v39, %v1876_v24  ;;  %v346_v57 = vmul.f32 0.2, %v2432_v58  ;;  %v53_v53 = vld [vmem:[%s2244_s0 + $0xf0] sm:$0xff] }
  0x73   :  { %v121_v61 = vmul.f32 %v1899_v62, %v82_v44  ;;  %854 = vst [vmem:[%s2247_s7 + $0x88] sm:$0xff] %v822_v46  ;;  %v377_v51 = vsub.f32 %v2431_v35, %v345_v23  ;;  %v84_v2 = vsub.f32 %v45_v14, %v1876_v24  ;;  %v347_v0 = vmul.f32 0.2, %v2433_v9  ;;  %v2439_v14 = vld [vmem:[#allocation38_spill] sm:$0xff] }
  0x74   :  { %v824_v15 = vadd.f32 %v376_v42, %v120_v60  ;;  %855 = vst [vmem:[%s2247_s7 + $0x90] sm:$0xff] %v823_v22  ;;  %v122_v7 = vmul.f32 %v1899_v62, %v83_v63  ;;  %v378_v1 = vsub.f32 %v2432_v58, %v346_v57  ;;  %v85_v12 = vsub.f32 %v46_v6, %v1876_v24  ;;  %v54_v60 = vld [vmem:[%s2244_s0 + $0xf8] sm:$0xff] }
  0x75   :  { %v348_v55 = vmul.f32 0.2, %v2434_v21  ;;  %v825_v31 = vadd.f32 %v377_v51, %v121_v61  ;;  %v123_v19 = vmul.f32 %v1899_v62, %v84_v2  ;;  %v379_v30 = vsub.f32 %v2433_v9, %v347_v0  ;;  %v2440_v6 = vld [vmem:[#allocation41_spill] sm:$0xff] }
  0x76   :  { %856 = vst [vmem:[%s2247_s7 + $0x98] sm:$0xff] %v824_v15  ;;  %v86_v4 = vsub.f32 %v47_v56, %v1876_v24  ;;  %v826_v41 = vadd.f32 %v378_v1, %v122_v7  ;;  %v124_v27 = vmul.f32 %v1899_v62, %v85_v12  ;;  %v349_v36 = vmul.f32 0.2, %v2435_v3 }
  0x77   :  { %v380_v11 = vsub.f32 %v2434_v21, %v348_v55  ;;  %857 = vst [vmem:[%s2247_s7 + $0xa0] sm:$0xff] %v825_v31  ;;  %v827_v16 = vadd.f32 %v379_v30, %v123_v19  ;;  %v87_v17 = vsub.f32 %v48_v50, %v1876_v24  ;;  %v350_v8 = vmul.f32 0.2, %v2436_v25 }
  0x78   :  { %v125_v45 = vmul.f32 %v1899_v62, %v86_v4  ;;  %858 = vst [vmem:[%s2247_s7 + $0xa8] sm:$0xff] %v826_v41  ;;  %v381_v52 = vsub.f32 %v2435_v3, %v349_v36  ;;  %v88_v10 = vsub.f32 %v49_v33, %v1876_v24  ;;  %v351_v28 = vmul.f32 0.2, %v2437_v34 }
  0x79   :  { %v828_v48 = vadd.f32 %v380_v11, %v124_v27  ;;  %859 = vst [vmem:[%s2247_s7 + $0xb0] sm:$0xff] %v827_v16  ;;  %v126_v54 = vmul.f32 %v1899_v62, %v87_v17  ;;  %v382_v49 = vsub.f32 %v2436_v25, %v350_v8  ;;  %v89_v13 = vsub.f32 %v50_v59, %v1876_v24 }
  0x7a   :  { %v352_v29 = vmul.f32 0.2, %v2438_v32  ;;  %v829_v37 = vadd.f32 %v381_v52, %v125_v45  ;;  %v127_v18 = vmul.f32 %v1899_v62, %v88_v10  ;;  %v383_v20 = vsub.f32 %v2437_v34, %v351_v28 }
  0x7b   :  { %860 = vst [vmem:[%s2247_s7 + $0xb8] sm:$0xff] %v828_v48  ;;  %v90_v39 = vsub.f32 %v51_v47, %v1876_v24  ;;  %v830_v26 = vadd.f32 %v382_v49, %v126_v54  ;;  %v128_v5 = vmul.f32 %v1899_v62, %v89_v13  ;;  %v353_v46 = vmul.f32 0.2, %v2439_v14 }
  0x7c   :  { %v384_v44 = vsub.f32 %v2438_v32, %v352_v29  ;;  %861 = vst [vmem:[%s2247_s7 + $0xc0] sm:$0xff] %v829_v37  ;;  %v831_v42 = vadd.f32 %v383_v20, %v127_v18  ;;  %v91_v23 = vsub.f32 %v52_v40, %v1876_v24  ;;  %v354_v22 = vmul.f32 0.2, %v2440_v6 }
  0x7d   :  { %v129_v35 = vmul.f32 %v1899_v62, %v90_v39  ;;  %862 = vst [vmem:[%s2247_s7 + $0xc8] sm:$0xff] %v830_v26  ;;  %v385_v63 = vsub.f32 %v2439_v14, %v353_v46  ;;  %v92_v58 = vsub.f32 %v53_v53, %v1876_v24  ;;  %v355_v57 = vmul.f32 0.2, %v1618_v38 }
  0x7e   :  { %v832_v61 = vadd.f32 %v384_v44, %v128_v5  ;;  %863 = vst [vmem:[%s2247_s7 + $0xd0] sm:$0xff] %v831_v42  ;;  %v130_v56 = vmul.f32 %v1899_v62, %v91_v23  ;;  %v386_v15 = vsub.f32 %v2440_v6, %v354_v22  ;;  %v93_v51 = vsub.f32 %v54_v60, %v1876_v24 }
  0x7f   :  { %v356_v2 = vmul.f32 0.2, %v1627_v43  ;;  %v833_v9 = vadd.f32 %v385_v63, %v129_v35  ;;  %v131_v0 = vmul.f32 %v1899_v62, %v92_v58  ;;  %v387_v7 = vsub.f32 %v1618_v38, %v355_v57 }
  0x80   :  { %864 = vst [vmem:[%s2247_s7 + $0xd8] sm:$0xff] %v832_v61  ;;  %v834_v1 = vadd.f32 %v386_v15, %v130_v56  ;;  %v132_v12 = vmul.f32 %v1899_v62, %v93_v51 }
  0x81   :  { %v388_v21 = vsub.f32 %v1627_v43, %v356_v2  ;;  %865 = vst [vmem:[%s2247_s7 + $0xe0] sm:$0xff] %v833_v9  ;;  %v835_v24 = vadd.f32 %v387_v7, %v131_v0 }
  0x82   :  { %866 = vst [vmem:[%s2247_s7 + $0xe8] sm:$0xff] %v834_v1 }
  0x83   :  { %v836_v55 = vadd.f32 %v388_v21, %v132_v12  ;;  %867 = vst [vmem:[%s2247_s7 + $0xf0] sm:$0xff] %v835_v24 }
  0x85   :  { %868 = vst [vmem:[%s2247_s7 + $0xf8] sm:$0xff] %v836_v55 }

// kernel: closed_call.417
= control target key start
LH: loop header
LB: loop body
LE: loop exit
PB: predicated region body
PF: predicated region fallthrough
CT: control target
= control target key end

     0   :  { %s608_s0 = inlined_call_operand.vmem [shape: bf16[9,64,128], index: 0, kind: input, shape index: {}]   ;;  %s609_s1 = inlined_call_operand.vmem [shape: bf16[64,128], index: 1, kind: output, shape index: {}]  }
   0x1   :  { %v277_v0 = vld [vmem:[%s608_s0] sm:$0xff]   ;;  %v440_v16 = vld [vmem:[%s608_s0 + $0x8] sm:$0xff]   ;;  %v441_v55 = vld [vmem:[%s608_s0 + $0x10] sm:$0xff]  }
   0x2   :  { %v443_v1 = vld [vmem:[%s608_s0 + $0x20] sm:$0xff]   ;;  %v278_v3 = vunpack.c.l.bf16 %v277_v0  ;;  %v279_v4 = vunpack.c.h.bf16 %v277_v0  ;;  %v444_v17 = vld [vmem:[%s608_s0 + $0x28] sm:$0xff]   ;;  %v282_v27 = vunpack.c.l.bf16 %v440_v16  ;;  %v283_v28 = vunpack.c.h.bf16 %v440_v16  ;;  %v445_v60 = vld [vmem:[%s608_s0 + $0x30] sm:$0xff]  }
   0x3   :  { %v447_v2 = vld [vmem:[%s608_s0 + $0x40] sm:$0xff]   ;;  %v294_v5 = vunpack.c.l.bf16 %v443_v1  ;;  %v295_v6 = vunpack.c.h.bf16 %v443_v1  ;;  %v448_v25 = vld [vmem:[%s608_s0 + $0x48] sm:$0xff]   ;;  %v298_v29 = vunpack.c.l.bf16 %v444_v17  ;;  %v299_v30 = vunpack.c.h.bf16 %v444_v17 }
   0x4   :  { %v451_v7 = vld [vmem:[%s608_s0 + $0x60] sm:$0xff]   ;;  %v310_v8 = vunpack.c.l.bf16 %v447_v2  ;;  %v311_v9 = vunpack.c.h.bf16 %v447_v2  ;;  %v452_v35 = vld [vmem:[%s608_s0 + $0x68] sm:$0xff]   ;;  %v314_v38 = vunpack.c.l.bf16 %v448_v25  ;;  %v315_v39 = vunpack.c.h.bf16 %v448_v25  ;;  %v457_v25 = vld [vmem:[%s608_s0 + $0x90] sm:$0xff]  }
   0x5   :  { %v455_v10 = vld [vmem:[%s608_s0 + $0x80] sm:$0xff]   ;;  %v326_v12 = vunpack.c.l.bf16 %v451_v7  ;;  %v327_v13 = vunpack.c.h.bf16 %v451_v7  ;;  %v152_v14 = vadd.f32 %v294_v5, %v278_v3  ;;  %v160_v15 = vadd.f32 %v295_v6, %v279_v4  ;;  %v456_v40 = vld [vmem:[%s608_s0 + $0x88] sm:$0xff]   ;;  %v449_v6 = vld [vmem:[%s608_s0 + $0x50] sm:$0xff]  }
   0x6   :  { %v459_v11 = vld [vmem:[%s608_s0 + $0xa0] sm:$0xff]   ;;  %v342_v18 = vunpack.c.l.bf16 %v455_v10  ;;  %v343_v20 = vunpack.c.h.bf16 %v455_v10  ;;  %v460_v45 = vld [vmem:[%s608_s0 + $0xa8] sm:$0xff]   ;;  %v330_v46 = vunpack.c.l.bf16 %v452_v35  ;;  %v331_v47 = vunpack.c.h.bf16 %v452_v35  ;;  %v442_v35 = vld [vmem:[%s608_s0 + $0x18] sm:$0xff]  }
   0x7   :  { %v463_v19 = vld [vmem:[%s608_s0 + $0xc0] sm:$0xff]   ;;  %v358_v21 = vunpack.c.l.bf16 %v459_v11  ;;  %v153_v23 = vadd.f32 %v310_v8, %v152_v14  ;;  %v161_v24 = vadd.f32 %v311_v9, %v160_v15  ;;  %v359_v31 = vunpack.c.h.bf16 %v459_v11  ;;  %v464_v48 = vld [vmem:[%s608_s0 + $0xc8] sm:$0xff]   ;;  %v453_v11 = vld [vmem:[%s608_s0 + $0x70] sm:$0xff]  }
   0x8   :  { %v467_v22 = vld [vmem:[%s608_s0 + $0xe0] sm:$0xff]   ;;  %v374_v32 = vunpack.c.l.bf16 %v463_v19  ;;  %v375_v36 = vunpack.c.h.bf16 %v463_v19  ;;  %v168_v49 = vadd.f32 %v298_v29, %v282_v27  ;;  %v176_v50 = vadd.f32 %v299_v30, %v283_v28  ;;  %v468_v1 = vld [vmem:[%s608_s0 + $0xe8] sm:$0xff]   ;;  %v461_v28 = vld [vmem:[%s608_s0 + $0xb0] sm:$0xff]  }
   0x9   :  { %v471_v26 = vld [vmem:[%s608_s0 + $0x100] sm:$0xff]   ;;  %v154_v33 = vadd.f32 %v326_v12, %v153_v23  ;;  %v162_v34 = vadd.f32 %v327_v13, %v161_v24  ;;  %v390_v37 = vunpack.c.l.bf16 %v467_v22  ;;  %v391_v41 = vunpack.c.h.bf16 %v467_v22 }
   0xa   :  { %v406_v42 = vunpack.c.l.bf16 %v471_v26  ;;  %v407_v51 = vunpack.c.h.bf16 %v471_v26  ;;  %v346_v54 = vunpack.c.l.bf16 %v456_v40  ;;  %v347_v56 = vunpack.c.h.bf16 %v456_v40  ;;  %v446_v40 = vld [vmem:[%s608_s0 + $0x38] sm:$0xff]  }
   0xb   :  { %v155_v43 = vadd.f32 %v342_v18, %v154_v33  ;;  %v163_v44 = vadd.f32 %v343_v20, %v162_v34  ;;  %v362_v57 = vunpack.c.l.bf16 %v460_v45  ;;  %v169_v58 = vadd.f32 %v314_v38, %v168_v49  ;;  %v472_v18 = vld [vmem:[%s608_s0 + $0x108] sm:$0xff]  }
   0xc   :  { %v177_v59 = vadd.f32 %v315_v39, %v176_v50  ;;  %v363_v63 = vunpack.c.h.bf16 %v460_v45  ;;  %v378_v0 = vunpack.c.l.bf16 %v464_v48  ;;  %v286_v4 = vunpack.c.l.bf16 %v441_v55  ;;  %v465_v45 = vld [vmem:[%s608_s0 + $0xd0] sm:$0xff]   ;;  %v450_v50 = vld [vmem:[%s608_s0 + $0x58] sm:$0xff]  }
   0xd   :  { %v156_v52 = vadd.f32 %v358_v21, %v155_v43  ;;  %v164_v53 = vadd.f32 %v359_v31, %v163_v44  ;;  %v170_v2 = vadd.f32 %v330_v46, %v169_v58  ;;  %v287_v5 = vunpack.c.h.bf16 %v441_v55 }
   0xe   :  { %v178_v3 = vadd.f32 %v331_v47, %v177_v59  ;;  %v302_v9 = vunpack.c.l.bf16 %v445_v60  ;;  %v303_v10 = vunpack.c.h.bf16 %v445_v60  ;;  %v379_v12 = vunpack.c.h.bf16 %v464_v48  ;;  %v454_v60 = vld [vmem:[%s608_s0 + $0x78] sm:$0xff]  }
   0xf   :  { %v157_v61 = vadd.f32 %v374_v32, %v156_v52  ;;  %v165_v62 = vadd.f32 %v375_v36, %v164_v53  ;;  %v394_v13 = vunpack.c.l.bf16 %v468_v1  ;;  %v171_v14 = vadd.f32 %v346_v54, %v170_v2  ;;  %v469_v53 = vld [vmem:[%s608_s0 + $0xf0] sm:$0xff]  }
  0x10   :  { %v179_v15 = vadd.f32 %v347_v56, %v178_v3  ;;  %v318_v19 = vunpack.c.l.bf16 %v449_v6  ;;  %v319_v20 = vunpack.c.h.bf16 %v449_v6  ;;  %v395_v21 = vunpack.c.h.bf16 %v468_v1 }
  0x11   :  { %v158_v7 = vadd.f32 %v390_v37, %v157_v61  ;;  %v166_v8 = vadd.f32 %v391_v41, %v165_v62  ;;  %v172_v22 = vadd.f32 %v362_v57, %v171_v14  ;;  %v334_v24 = vunpack.c.l.bf16 %v453_v11  ;;  %v473_v62 = vld [vmem:[%s608_s0 + $0x110] sm:$0xff]   ;;  %v462_v14 = vld [vmem:[%s608_s0 + $0xb8] sm:$0xff]  }
  0x12   :  { %v180_v23 = vadd.f32 %v363_v63, %v179_v15  ;;  %v335_v27 = vunpack.c.h.bf16 %v453_v11  ;;  %v184_v29 = vadd.f32 %v302_v9, %v286_v4  ;;  %v192_v30 = vadd.f32 %v303_v10, %v287_v5  ;;  %v458_v5 = vld [vmem:[%s608_s0 + $0x98] sm:$0xff]  }
  0x13   :  { %v159_v16 = vadd.f32 %v406_v42, %v158_v7  ;;  %v167_v17 = vadd.f32 %v407_v51, %v166_v8  ;;  %v410_v31 = vunpack.c.l.bf16 %v472_v18  ;;  %v411_v32 = vunpack.c.h.bf16 %v472_v18 }
  0x14   :  { %v173_v33 = vadd.f32 %v378_v0, %v172_v22  ;;  %v181_v34 = vadd.f32 %v379_v12, %v180_v23  ;;  %v350_v36 = vunpack.c.l.bf16 %v457_v25  ;;  %v351_v37 = vunpack.c.h.bf16 %v457_v25 }
  0x15   :  { %v423_v26 = vpack.c.bf16 %v167_v17, %v159_v16  ;;  %v185_v38 = vadd.f32 %v318_v19, %v184_v29  ;;  %v193_v39 = vadd.f32 %v319_v20, %v192_v30  ;;  %v366_v43 = vunpack.c.l.bf16 %v461_v28 }
  0x16   :  { %v174_v41 = vadd.f32 %v394_v13, %v173_v33  ;;  %v182_v42 = vadd.f32 %v395_v21, %v181_v34  ;;  %v367_v44 = vunpack.c.h.bf16 %v461_v28  ;;  %v290_v48 = vunpack.c.l.bf16 %v442_v35  ;;  %v466_v21 = vld [vmem:[%s608_s0 + $0xd8] sm:$0xff]  }
  0x17   :  { %424 = vst [vmem:[%s609_s1] sm:$0xff] %v423_v26   ;;  %v186_v46 = vadd.f32 %v334_v24, %v185_v38  ;;  %v194_v47 = vadd.f32 %v335_v27, %v193_v39  ;;  %v291_v49 = vunpack.c.h.bf16 %v442_v35  ;;  %v306_v54 = vunpack.c.l.bf16 %v446_v40  ;;  %v470_v28 = vld [vmem:[%s608_s0 + $0xf8] sm:$0xff]  }
  0x18   :  { %v175_v51 = vadd.f32 %v410_v31, %v174_v41  ;;  %v183_v52 = vadd.f32 %v411_v32, %v182_v42  ;;  %v307_v55 = vunpack.c.h.bf16 %v446_v40  ;;  %v382_v56 = vunpack.c.l.bf16 %v465_v45  ;;  %v474_v34 = vld [vmem:[%s608_s0 + $0x118] sm:$0xff]  }
  0x19   :  { %v383_v57 = vunpack.c.h.bf16 %v465_v45  ;;  %v187_v58 = vadd.f32 %v350_v36, %v186_v46  ;;  %v195_v59 = vadd.f32 %v351_v37, %v194_v47  ;;  %v322_v63 = vunpack.c.l.bf16 %v450_v50 }
  0x1a   :  { %v428_v61 = vpack.c.bf16 %v183_v52, %v175_v51  ;;  %v323_v0 = vunpack.c.h.bf16 %v450_v50  ;;  %v398_v1 = vunpack.c.l.bf16 %v469_v53  ;;  %v399_v2 = vunpack.c.h.bf16 %v469_v53 }
  0x1b   :  { %v188_v3 = vadd.f32 %v366_v43, %v187_v58  ;;  %v196_v4 = vadd.f32 %v367_v44, %v195_v59  ;;  %v338_v6 = vunpack.c.l.bf16 %v454_v60  ;;  %v339_v7 = vunpack.c.h.bf16 %v454_v60 }
  0x1c   :  { %475 = vst [vmem:[%s609_s1 + $0x8] sm:$0xff] %v428_v61   ;;  %v200_v8 = vadd.f32 %v306_v54, %v290_v48  ;;  %v208_v9 = vadd.f32 %v307_v55, %v291_v49  ;;  %v414_v10 = vunpack.c.l.bf16 %v473_v62  ;;  %v415_v11 = vunpack.c.h.bf16 %v473_v62 }
  0x1d   :  { %v189_v12 = vadd.f32 %v382_v56, %v188_v3  ;;  %v197_v13 = vadd.f32 %v383_v57, %v196_v4  ;;  %v354_v15 = vunpack.c.l.bf16 %v458_v5  ;;  %v355_v16 = vunpack.c.h.bf16 %v458_v5 }
  0x1e   :  { %v201_v17 = vadd.f32 %v322_v63, %v200_v8  ;;  %v209_v18 = vadd.f32 %v323_v0, %v208_v9  ;;  %v370_v22 = vunpack.c.l.bf16 %v462_v14  ;;  %v371_v23 = vunpack.c.h.bf16 %v462_v14 }
  0x1f   :  { %v190_v19 = vadd.f32 %v398_v1, %v189_v12  ;;  %v198_v20 = vadd.f32 %v399_v2, %v197_v13  ;;  %v386_v29 = vunpack.c.l.bf16 %v466_v21  ;;  %v387_v30 = vunpack.c.h.bf16 %v466_v21 }
  0x20   :  { %v202_v24 = vadd.f32 %v338_v6, %v201_v17  ;;  %v210_v25 = vadd.f32 %v339_v7, %v209_v18  ;;  %v402_v35 = vunpack.c.l.bf16 %v470_v28  ;;  %v403_v36 = vunpack.c.h.bf16 %v470_v28 }
  0x21   :  { %v191_v26 = vadd.f32 %v414_v10, %v190_v19  ;;  %v199_v27 = vadd.f32 %v415_v11, %v198_v20  ;;  %v418_v39 = vunpack.c.l.bf16 %v474_v34  ;;  %v419_v40 = vunpack.c.h.bf16 %v474_v34 }
  0x22   :  { %v203_v31 = vadd.f32 %v354_v15, %v202_v24  ;;  %v211_v32 = vadd.f32 %v355_v16, %v210_v25 }
  0x23   :  { %v433_v33 = vpack.c.bf16 %v199_v27, %v191_v26 }
  0x24   :  { %v204_v37 = vadd.f32 %v370_v22, %v203_v31  ;;  %v212_v38 = vadd.f32 %v371_v23, %v211_v32 }
  0x25   :  { %476 = vst [vmem:[%s609_s1 + $0x10] sm:$0xff] %v433_v33  }
  0x26   :  { %v205_v41 = vadd.f32 %v386_v29, %v204_v37  ;;  %v213_v42 = vadd.f32 %v387_v30, %v212_v38 }
  0x28   :  { %v206_v43 = vadd.f32 %v402_v35, %v205_v41  ;;  %v214_v44 = vadd.f32 %v403_v36, %v213_v42 }
  0x2a   :  { %v207_v45 = vadd.f32 %v418_v39, %v206_v43  ;;  %v215_v46 = vadd.f32 %v419_v40, %v214_v44 }
  0x2c   :  { %v438_v47 = vpack.c.bf16 %v215_v46, %v207_v45 }
  0x2e   :  { %477 = vst [vmem:[%s609_s1 + $0x18] sm:$0xff] %v438_v47  }

// kernel: closed_call.418
= control target key start
LH: loop header
LB: loop body
LE: loop exit
PB: predicated region body
PF: predicated region fallthrough
CT: control target
= control target key end

     0   :  { %s950_s9 = smov 0   ;;  %s952_s10 = smov 0   ;;  %s1151_s0 = inlined_call_operand.vmem [shape: bf16[128,640], index: 0, kind: input, shape index: {}]   ;;  %s1152_s1 = inlined_call_operand.vmem [shape: bf16[640,64], index: 1, kind: input, shape index: {}]   ;;  %s1153_s2 = inlined_call_operand.vmem [shape: f32[128,64], index: 2, kind: output, shape index: {}]  }
   0x1   :  { %s954_s11 = smov 0   ;;  %s956_s12 = smov 0  }
   0x2   :  { %s958_s13 = smov 0  }
   0x3 LB: > { %s24_s14 = sadd.s32 1, %s928_s12  ;;  %p47_p1 = scmp.ne.s32.totalorder %s920_s10, %s916_s9  ;;  %s932_s13 = sphi %s958_s13, %s12_s13   ;;  %s928_s12 = sphi %s956_s12, %s1157_s12   ;;  %s924_s11 = sphi %s954_s11, %s1156_s11   ;;  %s920_s10 = sphi %s952_s10, %s1155_s10   ;;  %s916_s9 = sphi %s950_s9, %s1154_s9  }
   0x4   : > { %p25_p0 = scmp.ge.s32.totalorder %s24_s14, 5  ;;  %p48_p2 = scmp.eq.s32.totalorder %s932_s13, 0 }
   0x5   : > { %s40_s16 = sadd.s32 1, %s920_s10  ;;  %p744_p5 = scmp.ge.s32.totalorder %s932_s13, 5 }
   0x6   : > { %s1159_s14 = smov (%p25_p0, %s24_s14), 0  ;;  %p49_p3 = por %p48_p2, %p47_p1 }
   0x7   : > { %s36_s15 = ssub.s32 %s928_s12, %s1159_s14  ;;  %129 = sbr.rel (%p744_p5) target bundleno = 28 (0x1c), region = 16 }
   0x8   : > { %p38_p4 = scmp.eq.s32.totalorder %s36_s15, 0 }
   0xa   : > { %s985_s17 = scalar_select %p38_p4, %s920_s10, %s40_s16  }
   0xe   : > { %132 = sbr.rel (!%p49_p3) target bundleno = 28 (0x1c), region = 20  ;;  %s134_s18 = sand.u32 (%p49_p3), 1, %s920_s10  }
   0xf   : > { %s746_s19 = sshll.u32 (%p49_p3), %s928_s12, 2  ;;  %s745_s20 = sshll.u32 (%p49_p3), %s134_s18, 6 }
  0x10   : > { %s993_s23 = scalar_lea.vmem (%p49_p3), %s1151_s0, %s746_s19  ;;  %s136_s24 = scalar_lea.vmem (%p49_p3), [#allocation3], %s745_s20 }
  0x11   : > { %v157_v0 = vld [vmem:[%s993_s23] sm:$0xf] (%p49_p3)  ;;  %v159_v1 = vld [vmem:[%s993_s23 + $0x14] sm:$0xf] (%p49_p3)  ;;  %v161_v2 = vld [vmem:[%s993_s23 + $0x28] sm:$0xf] (%p49_p3) }
  0x12   : > { %158 = vst [vmem:[%s136_s24] sm:$0xf] (%p49_p3), %v157_v0  ;;  %160 = vst [vmem:[%s136_s24 + $0x4] sm:$0xf] (%p49_p3), %v159_v1  ;;  %v163_v3 = vld [vmem:[%s993_s23 + $0x3c] sm:$0xf] (%p49_p3) }
  0x13   : > { %v165_v4 = vld [vmem:[%s993_s23 + $0x50] sm:$0xf] (%p49_p3)  ;;  %162 = vst [vmem:[%s136_s24 + $0x8] sm:$0xf] (%p49_p3), %v161_v2  ;;  %164 = vst [vmem:[%s136_s24 + $0xc] sm:$0xf] (%p49_p3), %v163_v3 }
  0x14   : > { %166 = vst [vmem:[%s136_s24 + $0x10] sm:$0xf] (%p49_p3), %v165_v4  ;;  %v167_v5 = vld [vmem:[%s993_s23 + $0x64] sm:$0xf] (%p49_p3)  ;;  %v169_v6 = vld [vmem:[%s993_s23 + $0x78] sm:$0xf] (%p49_p3) }
  0x15   : > { %v171_v7 = vld [vmem:[%s993_s23 + $0x8c] sm:$0xf]  ;;  %168 = vst [vmem:[%s136_s24 + $0x14] sm:$0xf] %v167_v5  ;;  %170 = vst [vmem:[%s136_s24 + $0x18] sm:$0xf] %v169_v6 }
  0x16   : > { %172 = vst [vmem:[%s136_s24 + $0x1c] sm:$0xf] %v171_v7  ;;  %v173_v8 = vld [vmem:[%s993_s23 + $0xa0] sm:$0xf]  ;;  %v175_v9 = vld [vmem:[%s993_s23 + $0xb4] sm:$0xf] }
  0x17   : > { %v177_v10 = vld [vmem:[%s993_s23 + $0xc8] sm:$0xf]  ;;  %174 = vst [vmem:[%s136_s24 + $0x20] sm:$0xf] %v173_v8  ;;  %176 = vst [vmem:[%s136_s24 + $0x24] sm:$0xf] %v175_v9 }
  0x18   : > { %178 = vst [vmem:[%s136_s24 + $0x28] sm:$0xf] %v177_v10  ;;  %v179_v11 = vld [vmem:[%s993_s23 + $0xdc] sm:$0xf]  ;;  %v181_v12 = vld [vmem:[%s993_s23 + $0xf0] sm:$0xf] }
  0x19   : > { %v183_v13 = vld [vmem:[%s993_s23 + $0x104] sm:$0xf]  ;;  %180 = vst [vmem:[%s136_s24 + $0x2c] sm:$0xf] %v179_v11  ;;  %182 = vst [vmem:[%s136_s24 + $0x30] sm:$0xf] %v181_v12 }
  0x1a   : > { %184 = vst [vmem:[%s136_s24 + $0x34] sm:$0xf] %v183_v13  ;;  %v185_v14 = vld [vmem:[%s993_s23 + $0x118] sm:$0xf]  ;;  %v187_v15 = vld [vmem:[%s993_s23 + $0x12c] sm:$0xf] }
  0x1b   : > { %186 = vst [vmem:[%s136_s24 + $0x38] sm:$0xf] %v185_v14  ;;  %188 = vst [vmem:[%s136_s24 + $0x3c] sm:$0xf] %v187_v15 }
  0x1c PF: > { %p747_p6 = scmp.ge.s32.totalorder %s932_s13, 1  ;;  %p254_p7 = scmp.lt.s32.totalorder %s932_s13, 6 }
  0x1e   : > { %p255_p8 = pnand %p747_p6, %p254_p7 }
  0x1f   : > { %s261_s25 = sand.u32 (!%p255_p8), 1, %s916_s9   ;;  %s749_s26 = sshll.u32 (!%p255_p8), %s924_s11, 4 }
  0x20   : > { %258 = sbr.rel (%p255_p8) target bundleno = 317 (0x13d), region = 65  ;;  %s748_s27 = sshll.u32 (!%p255_p8), %s261_s25, 6 }
  0x21   : > { %p295_p9 = scmp.lt.s32.totalorder (!%p255_p8), %s749_s26, 79  ;;  %s1020_s4 = scalar_lea.vmem (!%p255_p8), [#allocation3], %s748_s27 }
  0x22   : > { %p751_p10 = scmp.ne.s32.totalorder (!%p255_p8), %s924_s11, 0 }
  0x27   : > { %s1161_s26 = smov (!%p295_p9, %s749_s26), 79  ;;  %316 = sbr.rel (%p751_p10) target bundleno = 49 (0x31), region = 73 }
  0x28   : > { %s750_s28 = sshll.u32 %s1161_s26, 2  ;;  %vm317_vm0 = vcmask (!%p751_p10), 523264   ;;  %v934_v16 = vmov (!%p751_p10), 0.0  }
  0x29   : > { %s1018_s3 = scalar_lea.vmem %s1152_s1, %s750_s28  ;;  %318 = vst.msk [vmem:[#allocation2] sm:$0xff] (!%p751_p10), %vm317_vm0, %v934_v16  ;;  %319 = vst.msk [vmem:[#allocation2 + $0x8] sm:$0xff] (!%p751_p10), %vm317_vm0, %v934_v16 }
  0x2a   : > { %320 = vst.msk [vmem:[#allocation2 + $0x10] sm:$0xff] (!%p751_p10), %vm317_vm0, %v934_v16  ;;  %321 = vst.msk [vmem:[#allocation2 + $0x18] sm:$0xff] (!%p751_p10), %vm317_vm0, %v934_v16 }
  0x2b   : > { %322 = vst.msk [vmem:[#allocation2 + $0x20] sm:$0xff] (!%p751_p10), %vm317_vm0, %v934_v16  ;;  %323 = vst.msk [vmem:[#allocation2 + $0x28] sm:$0xff] (!%p751_p10), %vm317_vm0, %v934_v16 }
  0x2c   : > { %324 = vst.msk [vmem:[#allocation2 + $0x30] sm:$0xff] (!%p751_p10), %vm317_vm0, %v934_v16  ;;  %325 = vst.msk [vmem:[#allocation2 + $0x38] sm:$0xff] (!%p751_p10), %vm317_vm0, %v934_v16 }
  0x2d   : > { %326 = vst.msk [vmem:[#allocation2 + $0x40] sm:$0xff] (!%p751_p10), %vm317_vm0, %v934_v16  ;;  %327 = vst.msk [vmem:[#allocation2 + $0x48] sm:$0xff] (!%p751_p10), %vm317_vm0, %v934_v16 }
  0x2e   : > { %328 = vst.msk [vmem:[#allocation2 + $0x50] sm:$0xff] %vm317_vm0, %v934_v16  ;;  %329 = vst.msk [vmem:[#allocation2 + $0x58] sm:$0xff] %vm317_vm0, %v934_v16 }
  0x2f   : > { %330 = vst.msk [vmem:[#allocation2 + $0x60] sm:$0xff] %vm317_vm0, %v934_v16  ;;  %331 = vst.msk [vmem:[#allocation2 + $0x68] sm:$0xff] %vm317_vm0, %v934_v16 }
  0x30   : > { %332 = vst.msk [vmem:[#allocation2 + $0x70] sm:$0xff] %vm317_vm0, %v934_v16  ;;  %333 = vst.msk [vmem:[#allocation2 + $0x78] sm:$0xff] %vm317_vm0, %v934_v16 }
  0x31 PF: > { %v878_v17 = vld [vmem:[%s1018_s3] sm:$0xff]   ;;  %v879_v18 = vld [vmem:[%s1018_s3 + $0x8] sm:$0xff]   ;;  %v880_v19 = vld [vmem:[%s1018_s3 + $0x10] sm:$0xff]   ;;  %vm591_vm1 = vcmask 523264   ;;  %p768_p11 = scmp.ne.s32.totalorder %s924_s11, 4 }
  0x32   : > { %789 = vmatprep.subr.bf16.mxu0 %v878_v17  ;;  %821 = vmatprep.subr.bf16.mxu1 %v878_v17  ;;  %v881_v20 = vld [vmem:[%s1018_s3 + $0x18] sm:$0xff]   ;;  %v886_v21 = vld [vmem:[%s1020_s4] sm:$0xff]   ;;  %v883_v24 = vld [vmem:[%s1018_s3 + $0x28] sm:$0xff]  }
  0x33   : > { %790 = vmatpush3.bf16.msra.mxu0 %v878_v17  ;;  %829 = vmatpush3.bf16.msra.mxu1 %v878_v17  ;;  %v887_v22 = vld [vmem:[%s1020_s4 + $0x20] sm:$0xff]   ;;  %v884_v25 = vld [vmem:[%s1018_s3 + $0x30] sm:$0xff]   ;;  %v885_v26 = vld [vmem:[%s1018_s3 + $0x38] sm:$0xff]  }
  0x34   : > { %791 = vmatprep.subr.bf16.mxu0 %v879_v18  ;;  %822 = vmatprep.subr.bf16.mxu1 %v879_v18  ;;  %v882_v23 = vld [vmem:[%s1018_s3 + $0x20] sm:$0xff]   ;;  %v888_v27 = vld [vmem:[%s1020_s4 + $0x8] sm:$0xff]   ;;  %v890_v29 = vld [vmem:[%s1020_s4 + $0x10] sm:$0xff]  }
  0x35   : > { %805 = vmatprep.mubr.bf16.mxu0 %v886_v21  ;;  %813 = vmatprep.mubr.bf16.mxu1 %v887_v22  ;;  %v889_v28 = vld [vmem:[%s1020_s4 + $0x28] sm:$0xff]   ;;  %v891_v30 = vld [vmem:[%s1020_s4 + $0x30] sm:$0xff]   ;;  %v892_v31 = vld [vmem:[%s1020_s4 + $0x18] sm:$0xff]  }
  0x36   : > { %v893_v32 = vld [vmem:[%s1020_s4 + $0x38] sm:$0xff]   ;;  %v336_v33 = vld [vmem:[#allocation2 + $0x10] sm:$0xff]  ;;  %v334_v35 = vld [vmem:[#allocation2] sm:$0xff] }
  0x37   : > { %792 = vmatpush3.bf16.msra.mxu0 %v879_v18  ;;  %830 = vmatpush3.bf16.msra.mxu1 %v879_v18  ;;  %v344_v34 = vld [vmem:[#allocation2 + $0x50] sm:$0xff]  ;;  %v342_v36 = vld [vmem:[#allocation2 + $0x40] sm:$0xff]  ;;  %v337_v39 = vld [vmem:[#allocation2 + $0x18] sm:$0xff] }
  0x38   : > { %793 = vmatprep.subr.bf16.mxu0 %v880_v19  ;;  %823 = vmatprep.subr.bf16.mxu1 %v880_v19  ;;  %v345_v40 = vld [vmem:[#allocation2 + $0x58] sm:$0xff]  ;;  %v335_v45 = vld [vmem:[#allocation2 + $0x8] sm:$0xff]  ;;  %v340_v57 = vld [vmem:[#allocation2 + $0x30] sm:$0xff] }
  0x39   : > { %v343_v46 = vld [vmem:[#allocation2 + $0x48] sm:$0xff]  ;;  %v348_v58 = vld [vmem:[#allocation2 + $0x70] sm:$0xff]  ;;  %v338_v59 = vld [vmem:[#allocation2 + $0x20] sm:$0xff] }
  0x3a   : > { %v346_v60 = vld [vmem:[#allocation2 + $0x60] sm:$0xff]  ;;  %v341_v63 = vld [vmem:[#allocation2 + $0x38] sm:$0xff]  ;;  %v339_v5 = vld [vmem:[#allocation2 + $0x28] sm:$0xff] }
  0x3b   : > { %794 = vmatpush3.bf16.msra.mxu0 %v880_v19  ;;  %831 = vmatpush3.bf16.msra.mxu1 %v880_v19  ;;  %v349_v0 = vld [vmem:[#allocation2 + $0x78] sm:$0xff]  ;;  %v347_v6 = vld [vmem:[#allocation2 + $0x68] sm:$0xff] }
  0x3c   : > { %795 = vmatprep.subr.bf16.mxu0 %v881_v20  ;;  %824 = vmatprep.subr.bf16.mxu1 %v881_v20 }
  0x3f   : > { %796 = vmatpush3.bf16.msra.mxu0 %v881_v20  ;;  %832 = vmatpush3.bf16.msra.mxu1 %v881_v20 }
  0x40   : > { %797 = vmatprep.subr.bf16.mxu0 %v882_v23  ;;  %825 = vmatprep.subr.bf16.mxu1 %v882_v23 }
  0x43   : > { %798 = vmatpush3.bf16.msra.mxu0 %v882_v23  ;;  %833 = vmatpush3.bf16.msra.mxu1 %v882_v23 }
  0x44   : > { %799 = vmatprep.subr.bf16.mxu0 %v883_v24  ;;  %826 = vmatprep.subr.bf16.mxu1 %v883_v24 }
  0x47   : > { %800 = vmatpush3.bf16.msra.mxu0 %v883_v24  ;;  %834 = vmatpush3.bf16.msra.mxu1 %v883_v24 }
  0x48   : > { %801 = vmatprep.subr.bf16.mxu0 %v884_v25  ;;  %827 = vmatprep.subr.bf16.mxu1 %v884_v25 }
  0x4b   : > { %802 = vmatpush3.bf16.msra.mxu0 %v884_v25  ;;  %835 = vmatpush3.bf16.msra.mxu1 %v884_v25 }
  0x4c   : > { %803 = vmatprep.subr.bf16.mxu0 %v885_v26  ;;  %828 = vmatprep.subr.bf16.mxu1 %v885_v26 }
  0x4f   : > { %804 = vmatpush3.bf16.msra.mxu0 %v885_v26  ;;  %836 = vmatpush3.bf16.msra.mxu1 %v885_v26 }
  0x52   : > { %806 = vmatmul.mubr.bf16.vlgmr.msra.gmra.mrb[0].mxu0 %v888_v27  ;;  %814 = vmatmul.mubr.bf16.vlgmr.msra.gmra.mrb[0].mxu1 %v889_v28 }
  0x53   : > { %809 = vmatprep.mubr.bf16.mxu0 %v890_v29  ;;  %817 = vmatprep.mubr.bf16.mxu1 %v891_v30 }
  0x5a   : > { %810 = vmatmul.mubr.bf16.gmra.mrb[4].mxu0 %v892_v31  ;;  %818 = vmatmul.mubr.bf16.gmra.mrb[4].mxu1 %v893_v32 }
 0x125   : > { %v807_v37 = vpop.f32.mrb[0].mxu0  ;;  %v815_v38 = vpop.f32.mrb[0].mxu1 }
 0x126   : > { %v577_v41 = vadd.f32 %v807_v37, %v336_v33  ;;  %v585_v42 = vadd.f32 %v815_v38, %v344_v34  ;;  %v512_v43 = vpop.f32.mrb[1].mxu0  ;;  %v544_v44 = vpop.f32.mrb[1].mxu1 }
 0x127   : > { %v575_v47 = vadd.f32 %v512_v43, %v334_v35  ;;  %v583_v48 = vadd.f32 %v544_v44, %v342_v36  ;;  %v808_v49 = vpop.f32.mrb[2].mxu0  ;;  %v816_v50 = vpop.f32.mrb[2].mxu1 }
 0x128   : > { %594 = vst.msk [vmem:[#allocation2 + $0x10] sm:$0xff] %vm591_vm1, %v577_v41  ;;  %602 = vst.msk [vmem:[#allocation2 + $0x50] sm:$0xff] %vm591_vm1, %v585_v42  ;;  %v578_v51 = vadd.f32 %v808_v49, %v337_v39  ;;  %v586_v52 = vadd.f32 %v816_v50, %v345_v40  ;;  %v515_v53 = vpop.f32.mrb[3].mxu0  ;;  %v547_v54 = vpop.f32.mrb[3].mxu1 }
 0x129   : > { %592 = vst.msk [vmem:[#allocation2] sm:$0xff] %vm591_vm1, %v575_v47  ;;  %600 = vst.msk [vmem:[#allocation2 + $0x40] sm:$0xff] %vm591_vm1, %v583_v48  ;;  %v576_v55 = vadd.f32 %v515_v53, %v335_v45  ;;  %v584_v56 = vadd.f32 %v547_v54, %v343_v46 }
 0x12a   : > { %595 = vst.msk [vmem:[#allocation2 + $0x18] sm:$0xff] %vm591_vm1, %v578_v51  ;;  %603 = vst.msk [vmem:[#allocation2 + $0x58] sm:$0xff] %vm591_vm1, %v586_v52 }
 0x12b   : > { %593 = vst.msk [vmem:[#allocation2 + $0x8] sm:$0xff] %vm591_vm1, %v576_v55  ;;  %601 = vst.msk [vmem:[#allocation2 + $0x48] sm:$0xff] %vm591_vm1, %v584_v56 }
 0x12d   : > { %v811_v61 = vpop.f32.mrb[4].mxu0  ;;  %v819_v62 = vpop.f32.mrb[4].mxu1  ;;  %611 = sbr.rel (%p768_p11) target bundleno = 317 (0x13d), region = 77 }
 0x12e   : > { %v581_v1 = vadd.f32 %v811_v61, %v340_v57  ;;  %v589_v2 = vadd.f32 %v819_v62, %v348_v58  ;;  %v528_v3 = vpop.f32.mrb[5].mxu0  ;;  %v560_v4 = vpop.f32.mrb[5].mxu1 }
 0x12f   : > { %v579_v7 = vadd.f32 %v528_v3, %v338_v59  ;;  %v587_v8 = vadd.f32 %v560_v4, %v346_v60  ;;  %v812_v9 = vpop.f32.mrb[6].mxu0  ;;  %v820_v10 = vpop.f32.mrb[6].mxu1  ;;  %v614_v19 = vld [vmem:[#allocation2 + $0x10] sm:$0xff] (!%p768_p11) }
 0x130   : > { %598 = vst.msk [vmem:[#allocation2 + $0x30] sm:$0xff] %vm591_vm1, %v581_v1  ;;  %606 = vst.msk [vmem:[#allocation2 + $0x70] sm:$0xff] %vm591_vm1, %v589_v2  ;;  %v582_v11 = vadd.f32 %v812_v9, %v341_v63  ;;  %v590_v12 = vadd.f32 %v820_v10, %v349_v0  ;;  %v531_v13 = vpop.f32.mrb[7].mxu0  ;;  %v563_v14 = vpop.f32.mrb[7].mxu1  ;;  %v612_v17 = vld [vmem:[#allocation2] sm:$0xff] (!%p768_p11)  ;;  %v622_v27 = vld [vmem:[#allocation2 + $0x50] sm:$0xff] (!%p768_p11) }
 0x131   : > { %596 = vst.msk [vmem:[#allocation2 + $0x20] sm:$0xff] %vm591_vm1, %v579_v7  ;;  %604 = vst.msk [vmem:[#allocation2 + $0x60] sm:$0xff] %vm591_vm1, %v587_v8  ;;  %v580_v15 = vadd.f32 %v531_v13, %v339_v5  ;;  %v588_v16 = vadd.f32 %v563_v14, %v347_v6  ;;  %v615_v20 = vld [vmem:[#allocation2 + $0x18] sm:$0xff] (!%p768_p11)  ;;  %v620_v25 = vld [vmem:[#allocation2 + $0x40] sm:$0xff] (!%p768_p11) }
 0x132   : > { %599 = vst.msk [vmem:[#allocation2 + $0x38] sm:$0xff] %vm591_vm1, %v582_v11  ;;  %607 = vst.msk [vmem:[#allocation2 + $0x78] sm:$0xff] %vm591_vm1, %v590_v12  ;;  %v613_v18 = vld [vmem:[#allocation2 + $0x8] sm:$0xff] (!%p768_p11)  ;;  %v623_v28 = vld [vmem:[#allocation2 + $0x58] sm:$0xff] (!%p768_p11) }
 0x133   : > { %597 = vst.msk [vmem:[#allocation2 + $0x28] sm:$0xff] %vm591_vm1, %v580_v15  ;;  %605 = vst.msk [vmem:[#allocation2 + $0x68] sm:$0xff] %vm591_vm1, %v588_v16  ;;  %v621_v26 = vld [vmem:[#allocation2 + $0x48] sm:$0xff] (!%p768_p11) }
 0x134   : > { %628 = vst.msk [vmem:[%s1153_s2] sm:$0xff] %vm591_vm1, %v612_v17  ;;  %629 = vst.msk [vmem:[%s1153_s2 + $0x8] sm:$0xff] %vm591_vm1, %v613_v18 }
 0x135   : > { %630 = vst.msk [vmem:[%s1153_s2 + $0x10] sm:$0xff] %vm591_vm1, %v614_v19  ;;  %631 = vst.msk [vmem:[%s1153_s2 + $0x18] sm:$0xff] %vm591_vm1, %v615_v20 }
 0x136   : > { %636 = vst.msk [vmem:[%s1153_s2 + $0x40] sm:$0xff] %vm591_vm1, %v620_v25  ;;  %637 = vst.msk [vmem:[%s1153_s2 + $0x48] sm:$0xff] %vm591_vm1, %v621_v26 }
 0x137   : > { %v618_v23 = vld [vmem:[#allocation2 + $0x30] sm:$0xff]  ;;  %638 = vst.msk [vmem:[%s1153_s2 + $0x50] sm:$0xff] %vm591_vm1, %v622_v27  ;;  %639 = vst.msk [vmem:[%s1153_s2 + $0x58] sm:$0xff] %vm591_vm1, %v623_v28 }
 0x138   : > { %v616_v21 = vld [vmem:[#allocation2 + $0x20] sm:$0xff]  ;;  %634 = vst.msk [vmem:[%s1153_s2 + $0x30] sm:$0xff] %vm591_vm1, %v618_v23  ;;  %v626_v31 = vld [vmem:[#allocation2 + $0x70] sm:$0xff] }
 0x139   : > { %632 = vst.msk [vmem:[%s1153_s2 + $0x20] sm:$0xff] %vm591_vm1, %v616_v21  ;;  %v619_v24 = vld [vmem:[#allocation2 + $0x38] sm:$0xff]  ;;  %v624_v29 = vld [vmem:[#allocation2 + $0x60] sm:$0xff]  ;;  %642 = vst.msk [vmem:[%s1153_s2 + $0x70] sm:$0xff] %vm591_vm1, %v626_v31 }
 0x13a   : > { %v617_v22 = vld [vmem:[#allocation2 + $0x28] sm:$0xff]  ;;  %635 = vst.msk [vmem:[%s1153_s2 + $0x38] sm:$0xff] %vm591_vm1, %v619_v24  ;;  %640 = vst.msk [vmem:[%s1153_s2 + $0x60] sm:$0xff] %vm591_vm1, %v624_v29  ;;  %v627_v32 = vld [vmem:[#allocation2 + $0x78] sm:$0xff] }
 0x13b   : > { %633 = vst.msk [vmem:[%s1153_s2 + $0x28] sm:$0xff] %vm591_vm1, %v617_v22  ;;  %v625_v30 = vld [vmem:[#allocation2 + $0x68] sm:$0xff]  ;;  %643 = vst.msk [vmem:[%s1153_s2 + $0x78] sm:$0xff] %vm591_vm1, %v627_v32 }
 0x13c   : > { %641 = vst.msk [vmem:[%s1153_s2 + $0x68] sm:$0xff] %vm591_vm1, %v625_v30 }
 0x13d PF: > { %s12_s13 = sadd.s32 1, %s932_s13   ;;  %s1154_s9 = smov %s920_s10 }
 0x13e   : > { %p9_p12 = scmp.ge.s32.totalorder %s12_s13, 7   ;;  %s1155_s10 = smov %s985_s17 }
 0x13f   : > { %s1156_s11 = smov %s928_s12  ;;  %s1157_s12 = smov %s1159_s14 }
 0x140   :  { %11 = sbr.rel (!%p9_p12) target bundleno = 3 (0x3), region = 115 }

// kernel: closed_call.419
= control target key start
LH: loop header
LB: loop body
LE: loop exit
PB: predicated region body
PF: predicated region fallthrough
CT: control target
= control target key end

     0   :  { %v73_v0 = vmov 0.0   ;;  %s131_s1 = inlined_call_operand.vmem [shape: f32[1,128], index: 1, kind: output, shape index: {0}]   ;;  %s132_s2 = inlined_call_operand.vmem [shape: f32[1,128], index: 2, kind: output, shape index: {1}]   ;;  %s133_s0 = inlined_call_operand.vmem [shape: f32[64,128], index: 0, kind: input, shape index: {}]  }
   0x1   :  { %14 = vst [vmem:[%s131_s1] sm:$0x1] %v73_v0  ;;  %15 = vst [vmem:[%s132_s2] sm:$0x1] %v73_v0  ;;  %v16_v1 = vld [vmem:[%s133_s0] sm:$0xff]  ;;  %v17_v2 = vld [vmem:[%s133_s0 + $0x8] sm:$0xff] }
   0x2   :  { %v18_v3 = vld [vmem:[%s133_s0 + $0x10] sm:$0xff]  ;;  %v19_v4 = vld [vmem:[%s133_s0 + $0x18] sm:$0xff]  ;;  %v25_v5 = vadd.f32 %v17_v2, %v16_v1  ;;  %v41_v6 = vmul.f32 %v16_v1, %v16_v1  ;;  %v42_v7 = vmul.f32 %v17_v2, %v17_v2  ;;  %v20_v9 = vld [vmem:[%s133_s0 + $0x20] sm:$0xff] }
   0x3   :  { %v43_v8 = vmul.f32 %v18_v3, %v18_v3  ;;  %v44_v11 = vmul.f32 %v19_v4, %v19_v4  ;;  %v21_v13 = vld [vmem:[%s133_s0 + $0x28] sm:$0xff]  ;;  %v45_v15 = vmul.f32 %v20_v9, %v20_v9  ;;  %v22_v17 = vld [vmem:[%s133_s0 + $0x30] sm:$0xff]  ;;  %v23_v21 = vld [vmem:[%s133_s0 + $0x38] sm:$0xff] }
   0x4   :  { %v26_v10 = vadd.f32 %v25_v5, %v18_v3  ;;  %v49_v12 = vadd.f32 %v42_v7, %v41_v6  ;;  %v46_v19 = vmul.f32 %v21_v13, %v21_v13  ;;  %v47_v23 = vmul.f32 %v22_v17, %v22_v17 }
   0x5   :  { %v48_v26 = vmul.f32 %v23_v21, %v23_v21 }
   0x6   :  { %v27_v14 = vadd.f32 %v26_v10, %v19_v4  ;;  %v50_v16 = vadd.f32 %v49_v12, %v43_v8 }
   0x8   :  { %v28_v18 = vadd.f32 %v27_v14, %v20_v9  ;;  %v51_v20 = vadd.f32 %v50_v16, %v44_v11  ;;  %v24_v40 = vld [vmem:[%s131_s1] sm:$0x1] }
   0x9   :  { %v40_v43 = vld [vmem:[%s132_s2] sm:$0x1] }
   0xa   :  { %v29_v22 = vadd.f32 %v28_v18, %v21_v13  ;;  %v52_v24 = vadd.f32 %v51_v20, %v45_v15 }
   0xc   :  { %v30_v25 = vadd.f32 %v29_v22, %v22_v17  ;;  %v53_v27 = vadd.f32 %v52_v24, %v46_v19 }
   0xe   :  { %v31_v28 = vadd.f32 %v30_v25, %v23_v21  ;;  %v54_v29 = vadd.f32 %v53_v27, %v47_v23 }
  0x10   :  { %v32_v30 = vrot.slane %v31_v28, 4  ;;  %v55_v31 = vadd.f32 %v54_v29, %v48_v26 }
  0x12   :  { %v33_v32 = vadd.f32 %v32_v30, %v31_v28  ;;  %v56_v33 = vrot.slane %v55_v31, 4 }
  0x14   :  { %v34_v34 = vrot.slane %v33_v32, 2  ;;  %v57_v35 = vadd.f32 %v56_v33, %v55_v31 }
  0x16   :  { %v35_v36 = vadd.f32 %v34_v34, %v33_v32  ;;  %v58_v37 = vrot.slane %v57_v35, 2 }
  0x18   :  { %v36_v38 = vrot.slane %v35_v36, 1  ;;  %v59_v39 = vadd.f32 %v58_v37, %v57_v35 }
  0x1a   :  { %v37_v41 = vadd.f32 %v36_v38, %v35_v36  ;;  %v60_v42 = vrot.slane %v59_v39, 1 }
  0x1c   :  { %v38_v44 = vadd.f32 %v37_v41, %v24_v40  ;;  %v61_v45 = vadd.f32 %v60_v42, %v59_v39 }
  0x1e   :  { %39 = vst [vmem:[%s131_s1] sm:$0x1] %v38_v44  ;;  %v62_v46 = vadd.f32 %v61_v45, %v40_v43 }
  0x20   :  { %63 = vst [vmem:[%s132_s2] sm:$0x1] %v62_v46 }

// kernel: closed_call.420
= control target key start
LH: loop header
LB: loop body
LE: loop exit
PB: predicated region body
PF: predicated region fallthrough
CT: control target
= control target key end

     0   :  { %v299_v46 = vmov 0.0   ;;  %s534_s3 = inlined_call_operand.vmem [shape: f32[64,128], index: 3, kind: input, shape index: {}, may-alias: {3,6}]   ;;  %s535_s4 = inlined_call_operand.vmem [shape: f32[64,128], index: 4, kind: input, shape index: {}, may-alias: {4,7}]   ;;  %s536_s5 = inlined_call_operand.vmem [shape: bf16[64,128], index: 5, kind: output, shape index: {0}]   ;;  %s537_s6 = inlined_call_operand.vmem [shape: f32[64,128], index: 6, kind: output, shape index: {1}, may-alias: {3,6}]   ;;  %s538_s0 = inlined_call_operand.vmem [shape: f32[64,128], index: 0, kind: input, shape index: {}]   ;;  %s539_s1 = inlined_call_operand.vmem [shape: f32[1,128], index: 1, kind: input, shape index: {}]   ;;  %s540_s2 = inlined_call_operand.vmem [shape: f32[1,128], index: 2, kind: input, shape index: {}]   ;;  %s541_s7 = inlined_call_operand.vmem [shape: f32[64,128], index: 7, kind: output, shape index: {2}, may-alias: {4,7}]  }
   0x1   :  { %v61_v0 = vld [vmem:[%s534_s3] sm:$0xff]  ;;  %v62_v1 = vld [vmem:[%s534_s3 + $0x8] sm:$0xff]  ;;  %v63_v6 = vld [vmem:[%s534_s3 + $0x10] sm:$0xff] }
   0x2   :  { %v349_v2 = vld [vmem:[%s535_s4] sm:$0xff]  ;;  %v354_v3 = vld [vmem:[%s535_s4 + $0x8] sm:$0xff]  ;;  %v77_v4 = vsub.f32 0.0, %v61_v0  ;;  %v78_v5 = vsub.f32 0.0, %v62_v1  ;;  %v64_v7 = vld [vmem:[%s534_s3 + $0x18] sm:$0xff]  ;;  %v79_v10 = vsub.f32 0.0, %v63_v6 }
   0x3   :  { %v365_v8 = vld [vmem:[%s535_s4 + $0x10] sm:$0xff]  ;;  %v370_v9 = vld [vmem:[%s535_s4 + $0x18] sm:$0xff]  ;;  %v80_v11 = vsub.f32 0.0, %v64_v7  ;;  %v65_v12 = vld [vmem:[%s534_s3 + $0x20] sm:$0xff]  ;;  %v391_v19 = vmul.f32 0.2, %v349_v2 }
   0x4   :  { %v85_v13 = vadd.f32 %v77_v4, %v349_v2  ;;  %v86_v14 = vadd.f32 %v78_v5, %v354_v3  ;;  %v66_v15 = vld [vmem:[%s534_s3 + $0x28] sm:$0xff]  ;;  %v383_v16 = vld [vmem:[%s535_s4 + $0x20] sm:$0xff]  ;;  %v81_v18 = vsub.f32 0.0, %v65_v12  ;;  %v87_v20 = vadd.f32 %v79_v10, %v365_v8  ;;  %v67_v23 = vld [vmem:[%s534_s3 + $0x30] sm:$0xff] }
   0x5   :  { %v388_v17 = vld [vmem:[%s535_s4 + $0x28] sm:$0xff]  ;;  %v88_v21 = vadd.f32 %v80_v11, %v370_v9  ;;  %v82_v22 = vsub.f32 0.0, %v66_v15  ;;  %v68_v24 = vld [vmem:[%s534_s3 + $0x38] sm:$0xff]  ;;  %v404_v25 = vld [vmem:[%s535_s4 + $0x30] sm:$0xff]  ;;  %v407_v26 = vmul.f32 0.2, %v354_v3 }
   0x6   :  { %v93_v27 = vmul.f32 0.1, %v85_v13  ;;  %v94_v28 = vmul.f32 0.1, %v86_v14  ;;  %v89_v29 = vadd.f32 %v81_v18, %v383_v16  ;;  %v413_v30 = vld [vmem:[%s535_s4 + $0x38] sm:$0xff]  ;;  %v83_v31 = vsub.f32 0.0, %v67_v23 }
   0x7   :  { %v95_v32 = vmul.f32 0.1, %v87_v20  ;;  %v96_v33 = vmul.f32 0.1, %v88_v21  ;;  %v90_v34 = vadd.f32 %v82_v22, %v388_v17  ;;  %v84_v35 = vsub.f32 0.0, %v68_v24 }
   0x8   :  { %v101_v36 = vadd.f32 %v93_v27, %v61_v0  ;;  %v102_v37 = vadd.f32 %v94_v28, %v62_v1  ;;  %v97_v38 = vmul.f32 0.1, %v89_v29  ;;  %v91_v39 = vadd.f32 %v83_v31, %v404_v25  ;;  %v436_v27 = vld [vmem:[%s539_s1] ss:$0 sm:$0xff] }
   0x9   :  { %v103_v40 = vadd.f32 %v95_v32, %v63_v6  ;;  %v104_v41 = vadd.f32 %v96_v33, %v64_v7  ;;  %v98_v42 = vmul.f32 0.1, %v90_v34  ;;  %v92_v43 = vadd.f32 %v84_v35, %v413_v30  ;;  %v24_v33 = vld [vmem:[%s538_s0 + $0x8] sm:$0xff] }
   0xa   :  { %vm125_vm0 = vcmp.gt.f32.partialorder %v101_v36, 1.0  ;;  %vm126_vm1 = vcmp.gt.f32.partialorder %v102_v37, 1.0  ;;  %v105_v44 = vadd.f32 %v97_v38, %v65_v12  ;;  %v99_v45 = vmul.f32 0.1, %v91_v39  ;;  %v258_v38 = vld [vmem:[%s540_s2] ss:$0 sm:$0xff] }
   0xb   :  { %v259_v47 = vsel %vm125_vm0, 1.0, %v299_v46  ;;  %v260_v48 = vsel %vm126_vm1, 1.0, %v299_v46  ;;  %vm127_vm2 = vcmp.gt.f32.partialorder %v103_v40, 1.0  ;;  %vm128_vm3 = vcmp.gt.f32.partialorder %v104_v41, 1.0  ;;  %v25_v39 = vld [vmem:[%s538_s0 + $0x10] sm:$0xff] }
   0xc   :  { %v284_v49 = vpack.c.bf16 %v260_v48, %v259_v47  ;;  %v189_v50 = vsub.f32 1.0, %v259_v47  ;;  %v190_v51 = vsub.f32 1.0, %v260_v48  ;;  %v261_v52 = vsel %vm127_vm2, 1.0, %v299_v46 }
   0xd   :  { %v262_v53 = vsel %vm128_vm3, 1.0, %v299_v46  ;;  %v191_v54 = vsub.f32 1.0, %v261_v52  ;;  %v106_v55 = vadd.f32 %v98_v42, %v66_v15  ;;  %vm129_vm4 = vcmp.gt.f32.partialorder %v105_v44, 1.0 }
   0xe   :  { %285 = vst [vmem:[%s536_s5] sm:$0xff] %v284_v49   ;;  %v287_v56 = vpack.c.bf16 %v262_v53, %v261_v52  ;;  %v192_v57 = vsub.f32 1.0, %v262_v53  ;;  %v263_v58 = vsel %vm129_vm4, 1.0, %v299_v46  ;;  %v100_v59 = vmul.f32 0.1, %v92_v43  ;;  %v27_v49 = vld [vmem:[%s538_s0 + $0x20] sm:$0xff] }
   0xf   :  { %vm130_vm5 = vcmp.gt.f32.partialorder %v106_v55, 1.0  ;;  %v193_v60 = vsub.f32 1.0, %v263_v58  ;;  %v107_v61 = vadd.f32 %v99_v45, %v67_v23  ;;  %v197_v62 = vmul.f32 %v189_v50, %v101_v36 }
  0x10   :  { %295 = vst [vmem:[%s536_s5 + $0x8] sm:$0xff] %v287_v56   ;;  %v264_v63 = vsel %vm130_vm5, 1.0, %v299_v46  ;;  %v108_v0 = vadd.f32 %v100_v59, %v68_v24  ;;  %v205_v1 = vmul.f32 0.0, %v259_v47  ;;  %v198_v4 = vmul.f32 %v190_v51, %v102_v37  ;;  %v23_v24 = vld [vmem:[%s538_s0] sm:$0xff]  ;;  %v29_v59 = vld [vmem:[%s538_s0 + $0x30] sm:$0xff] }
  0x11   :  { %v290_v5 = vpack.c.bf16 %v264_v63, %v263_v58  ;;  %v194_v6 = vsub.f32 1.0, %v264_v63  ;;  %vm131_vm6 = vcmp.gt.f32.partialorder %v107_v61, 1.0  ;;  %v206_v7 = vmul.f32 0.0, %v260_v48 }
  0x12   :  { %vm132_vm7 = vcmp.gt.f32.partialorder %v108_v0, 1.0  ;;  %v265_v10 = vsel %vm131_vm6, 1.0, %v299_v46  ;;  %v213_v11 = vadd.f32 %v205_v1, %v197_v62  ;;  %v199_v12 = vmul.f32 %v191_v54, %v103_v40 }
  0x13   :  { %296 = vst [vmem:[%s536_s5 + $0x10] sm:$0xff] %v290_v5   ;;  %v266_v13 = vsel %vm132_vm7, 1.0, %v299_v46  ;;  %v195_v14 = vsub.f32 1.0, %v265_v10  ;;  %v214_v15 = vadd.f32 %v206_v7, %v198_v4  ;;  %v207_v18 = vmul.f32 0.0, %v261_v52 }
  0x14   :  { %v293_v20 = vpack.c.bf16 %v266_v13, %v265_v10  ;;  %v196_v21 = vsub.f32 1.0, %v266_v13  ;;  %221 = vst [vmem:[%s537_s6] sm:$0xff] %v213_v11  ;;  %v200_v22 = vmul.f32 %v192_v57, %v104_v41  ;;  %v208_v23 = vmul.f32 0.0, %v262_v53 }
  0x15   :  { %222 = vst [vmem:[%s537_s6 + $0x8] sm:$0xff] %v214_v15  ;;  %v215_v28 = vadd.f32 %v207_v18, %v199_v12  ;;  %v201_v29 = vmul.f32 %v193_v60, %v105_v44  ;;  %v209_v31 = vmul.f32 0.0, %v263_v58  ;;  %v202_v32 = vmul.f32 %v194_v6, %v106_v55  ;;  %v26_v44 = vld [vmem:[%s538_s0 + $0x18] sm:$0xff] }
  0x16   :  { %297 = vst [vmem:[%s536_s5 + $0x18] sm:$0xff] %v293_v20   ;;  %v216_v34 = vadd.f32 %v208_v23, %v200_v22  ;;  %v210_v35 = vmul.f32 0.0, %v264_v63  ;;  %v203_v36 = vmul.f32 %v195_v14, %v107_v61  ;;  %v211_v37 = vmul.f32 0.0, %v265_v10 }
  0x17   :  { %223 = vst [vmem:[%s537_s6 + $0x10] sm:$0xff] %v215_v28  ;;  %v217_v40 = vadd.f32 %v209_v31, %v201_v29  ;;  %v204_v41 = vmul.f32 %v196_v21, %v108_v0  ;;  %v212_v42 = vmul.f32 0.0, %v266_v13  ;;  %v38_v43 = vsub.f32 %v23_v24, %v436_v27  ;;  %v30_v0 = vld [vmem:[%s538_s0 + $0x38] sm:$0xff] }
  0x18   :  { %224 = vst [vmem:[%s537_s6 + $0x18] sm:$0xff] %v216_v34  ;;  %v218_v45 = vadd.f32 %v210_v35, %v202_v32  ;;  %v219_v46 = vadd.f32 %v211_v37, %v203_v36  ;;  %v117_v47 = vsub.f32 %v349_v2, %v391_v19  ;;  %v39_v48 = vsub.f32 %v24_v33, %v436_v27 }
  0x19   :  { %225 = vst [vmem:[%s537_s6 + $0x20] sm:$0xff] %v217_v40  ;;  %v220_v50 = vadd.f32 %v212_v42, %v204_v41  ;;  %v53_v51 = vmul.f32 %v258_v38, %v38_v43  ;;  %v118_v52 = vsub.f32 %v354_v3, %v407_v26  ;;  %v40_v53 = vsub.f32 %v25_v39, %v436_v27  ;;  %v28_v3 = vld [vmem:[%s538_s0 + $0x28] sm:$0xff] }
  0x1a   :  { %226 = vst [vmem:[%s537_s6 + $0x28] sm:$0xff] %v218_v45  ;;  %227 = vst [vmem:[%s537_s6 + $0x30] sm:$0xff] %v219_v46  ;;  %v54_v2 = vmul.f32 %v258_v38, %v39_v48  ;;  %v111_v19 = vmul.f32 0.2, %v365_v8  ;;  %v41_v54 = vsub.f32 %v26_v44, %v436_v27  ;;  %v112_v55 = vmul.f32 0.2, %v370_v9 }
  0x1b   :  { %228 = vst [vmem:[%s537_s6 + $0x38] sm:$0xff] %v220_v50  ;;  %v229_v26 = vadd.f32 %v117_v47, %v53_v51  ;;  %v55_v56 = vmul.f32 %v258_v38, %v40_v53  ;;  %v42_v57 = vsub.f32 %v27_v49, %v436_v27  ;;  %v113_v58 = vmul.f32 0.2, %v383_v16 }
  0x1c   :  { %v230_v60 = vadd.f32 %v118_v52, %v54_v2  ;;  %v119_v61 = vsub.f32 %v365_v8, %v111_v19  ;;  %v56_v62 = vmul.f32 %v258_v38, %v41_v54  ;;  %v120_v63 = vsub.f32 %v370_v9, %v112_v55 }
  0x1d   :  { %237 = vst [vmem:[%s541_s7] sm:$0xff] %v229_v26  ;;  %v57_v1 = vmul.f32 %v258_v38, %v42_v57  ;;  %v121_v4 = vsub.f32 %v383_v16, %v113_v58  ;;  %v43_v5 = vsub.f32 %v28_v3, %v436_v27  ;;  %v114_v6 = vmul.f32 0.2, %v388_v17 }
  0x1e   :  { %238 = vst [vmem:[%s541_s7 + $0x8] sm:$0xff] %v230_v60  ;;  %v231_v8 = vadd.f32 %v119_v61, %v55_v56  ;;  %v232_v9 = vadd.f32 %v120_v63, %v56_v62  ;;  %v44_v7 = vsub.f32 %v29_v59, %v436_v27  ;;  %v115_v10 = vmul.f32 0.2, %v404_v25 }
  0x1f   :  { %v233_v11 = vadd.f32 %v121_v4, %v57_v1  ;;  %v58_v12 = vmul.f32 %v258_v38, %v43_v5  ;;  %v122_v13 = vsub.f32 %v388_v17, %v114_v6  ;;  %v45_v16 = vsub.f32 %v30_v0, %v436_v27 }
  0x20   :  { %239 = vst [vmem:[%s541_s7 + $0x10] sm:$0xff] %v231_v8  ;;  %240 = vst [vmem:[%s541_s7 + $0x18] sm:$0xff] %v232_v9  ;;  %v59_v14 = vmul.f32 %v258_v38, %v44_v7  ;;  %v123_v15 = vsub.f32 %v404_v25, %v115_v10  ;;  %v116_v18 = vmul.f32 0.2, %v413_v30 }
  0x21   :  { %241 = vst [vmem:[%s541_s7 + $0x20] sm:$0xff] %v233_v11  ;;  %v234_v17 = vadd.f32 %v122_v13, %v58_v12  ;;  %v60_v20 = vmul.f32 %v258_v38, %v45_v16 }
  0x22   :  { %v235_v21 = vadd.f32 %v123_v15, %v59_v14  ;;  %v124_v22 = vsub.f32 %v413_v30, %v116_v18 }
  0x23   :  { %242 = vst [vmem:[%s541_s7 + $0x28] sm:$0xff] %v234_v17 }
  0x24   :  { %243 = vst [vmem:[%s541_s7 + $0x30] sm:$0xff] %v235_v21  ;;  %v236_v25 = vadd.f32 %v124_v22, %v60_v20 }
  0x26   :  { %244 = vst [vmem:[%s541_s7 + $0x38] sm:$0xff] %v236_v25 }

// kernel: closed_call.423
= control target key start
LH: loop header
LB: loop body
LE: loop exit
PB: predicated region body
PF: predicated region fallthrough
CT: control target
= control target key end

     0   :  { %v345_v46 = vmov 0.0   ;;  %s607_s4 = inlined_call_operand.vmem [shape: f32[64,128], index: 4, kind: input, shape index: {}, may-alias: {4,7}]   ;;  %s608_s5 = inlined_call_operand.vmem [shape: f32[64,128], index: 5, kind: input, shape index: {}, may-alias: {5,8}]   ;;  %s609_s6 = inlined_call_operand.vmem [shape: bf16[64,128], index: 6, kind: output, shape index: {0}]   ;;  %s610_s7 = inlined_call_operand.vmem [shape: f32[64,128], index: 7, kind: output, shape index: {1}, may-alias: {4,7}]   ;;  %s611_s0 = inlined_call_operand.vmem [shape: f32[64,128], index: 0, kind: input, shape index: {}]   ;;  %s612_s2 = inlined_call_operand.vmem [shape: f32[1,128], index: 2, kind: input, shape index: {}]   ;;  %s613_s1 = inlined_call_operand.vmem [shape: bf16[64,128], index: 1, kind: input, shape index: {}]   ;;  %s614_s3 = inlined_call_operand.vmem [shape: f32[1,128], index: 3, kind: input, shape index: {}]   ;;  %s615_s8 = inlined_call_operand.vmem [shape: f32[64,128], index: 8, kind: output, shape index: {2}, may-alias: {5,8}]  }
   0x1   :  { %v88_v0 = vld [vmem:[%s607_s4] sm:$0xff]  ;;  %v89_v1 = vld [vmem:[%s607_s4 + $0x8] sm:$0xff]  ;;  %v90_v6 = vld [vmem:[%s607_s4 + $0x10] sm:$0xff] }
   0x2   :  { %v400_v2 = vld [vmem:[%s608_s5] sm:$0xff]  ;;  %v405_v3 = vld [vmem:[%s608_s5 + $0x8] sm:$0xff]  ;;  %v104_v4 = vsub.f32 0.0, %v88_v0  ;;  %v105_v5 = vsub.f32 0.0, %v89_v1  ;;  %v91_v7 = vld [vmem:[%s607_s4 + $0x18] sm:$0xff]  ;;  %v106_v10 = vsub.f32 0.0, %v90_v6 }
   0x3   :  { %v416_v8 = vld [vmem:[%s608_s5 + $0x10] sm:$0xff]  ;;  %v421_v9 = vld [vmem:[%s608_s5 + $0x18] sm:$0xff]  ;;  %v107_v11 = vsub.f32 0.0, %v91_v7  ;;  %v92_v12 = vld [vmem:[%s607_s4 + $0x20] sm:$0xff]  ;;  %v442_v19 = vmul.f32 0.2, %v400_v2 }
   0x4   :  { %v112_v13 = vadd.f32 %v104_v4, %v400_v2  ;;  %v113_v14 = vadd.f32 %v105_v5, %v405_v3  ;;  %v93_v15 = vld [vmem:[%s607_s4 + $0x28] sm:$0xff]  ;;  %v434_v16 = vld [vmem:[%s608_s5 + $0x20] sm:$0xff]  ;;  %v108_v18 = vsub.f32 0.0, %v92_v12  ;;  %v114_v20 = vadd.f32 %v106_v10, %v416_v8  ;;  %v94_v23 = vld [vmem:[%s607_s4 + $0x30] sm:$0xff] }
   0x5   :  { %v439_v17 = vld [vmem:[%s608_s5 + $0x28] sm:$0xff]  ;;  %v115_v21 = vadd.f32 %v107_v11, %v421_v9  ;;  %v109_v22 = vsub.f32 0.0, %v93_v15  ;;  %v95_v24 = vld [vmem:[%s607_s4 + $0x38] sm:$0xff]  ;;  %v455_v25 = vld [vmem:[%s608_s5 + $0x30] sm:$0xff]  ;;  %v458_v26 = vmul.f32 0.2, %v405_v3 }
   0x6   :  { %v120_v27 = vmul.f32 0.1, %v112_v13  ;;  %v121_v28 = vmul.f32 0.1, %v113_v14  ;;  %v116_v29 = vadd.f32 %v108_v18, %v434_v16  ;;  %v464_v30 = vld [vmem:[%s608_s5 + $0x38] sm:$0xff]  ;;  %v110_v31 = vsub.f32 0.0, %v94_v23 }
   0x7   :  { %v122_v32 = vmul.f32 0.1, %v114_v20  ;;  %v123_v33 = vmul.f32 0.1, %v115_v21  ;;  %v117_v34 = vadd.f32 %v109_v22, %v439_v17  ;;  %v111_v35 = vsub.f32 0.0, %v95_v24 }
   0x8   :  { %v128_v36 = vadd.f32 %v120_v27, %v88_v0  ;;  %v129_v37 = vadd.f32 %v121_v28, %v89_v1  ;;  %v124_v38 = vmul.f32 0.1, %v116_v29  ;;  %v118_v39 = vadd.f32 %v110_v31, %v455_v25  ;;  %v487_v27 = vld [vmem:[%s612_s2] ss:$0 sm:$0xff] }
   0x9   :  { %v130_v40 = vadd.f32 %v122_v32, %v90_v6  ;;  %v131_v41 = vadd.f32 %v123_v33, %v91_v7  ;;  %v125_v42 = vmul.f32 0.1, %v117_v34  ;;  %v119_v43 = vadd.f32 %v111_v35, %v464_v30  ;;  %v311_v33 = vld [vmem:[%s613_s1] sm:$0xff]  }
   0xa   :  { %vm152_vm0 = vcmp.gt.f32.partialorder %v128_v36, 1.0  ;;  %vm153_vm1 = vcmp.gt.f32.partialorder %v129_v37, 1.0  ;;  %v132_v44 = vadd.f32 %v124_v38, %v92_v12  ;;  %v126_v45 = vmul.f32 0.1, %v118_v39  ;;  %v501_v38 = vld [vmem:[%s614_s3] ss:$0 sm:$0xff] }
   0xb   :  { %v286_v47 = vsel %vm152_vm0, 1.0, %v345_v46  ;;  %v287_v48 = vsel %vm153_vm1, 1.0, %v345_v46  ;;  %vm154_vm2 = vcmp.gt.f32.partialorder %v130_v40, 1.0  ;;  %vm155_vm3 = vcmp.gt.f32.partialorder %v131_v41, 1.0  ;;  %v27_v39 = vld [vmem:[%s611_s0 + $0x8] sm:$0xff] }
   0xc   :  { %v327_v49 = vpack.c.bf16 %v287_v48, %v286_v47  ;;  %v216_v50 = vsub.f32 1.0, %v286_v47  ;;  %v217_v51 = vsub.f32 1.0, %v287_v48  ;;  %v288_v52 = vsel %vm154_vm2, 1.0, %v345_v46 }
   0xd   :  { %v289_v53 = vsel %vm155_vm3, 1.0, %v345_v46  ;;  %v218_v54 = vsub.f32 1.0, %v288_v52  ;;  %v133_v55 = vadd.f32 %v125_v42, %v93_v15  ;;  %vm156_vm4 = vcmp.gt.f32.partialorder %v132_v44, 1.0 }
   0xe   :  { %328 = vst [vmem:[%s609_s6] sm:$0xff] %v327_v49   ;;  %v330_v56 = vpack.c.bf16 %v289_v53, %v288_v52  ;;  %v219_v57 = vsub.f32 1.0, %v289_v53  ;;  %v290_v58 = vsel %vm156_vm4, 1.0, %v345_v46  ;;  %v127_v59 = vmul.f32 0.1, %v119_v43 }
   0xf   :  { %vm157_vm5 = vcmp.gt.f32.partialorder %v133_v55, 1.0  ;;  %v220_v60 = vsub.f32 1.0, %v290_v58  ;;  %v134_v61 = vadd.f32 %v126_v45, %v94_v23  ;;  %v224_v62 = vmul.f32 %v216_v50, %v128_v36  ;;  %v338_v45 = vld [vmem:[%s613_s1 + $0x8] sm:$0xff]   ;;  %v29_v50 = vld [vmem:[%s611_s0 + $0x18] sm:$0xff] }
  0x10   :  { %341 = vst [vmem:[%s609_s6 + $0x8] sm:$0xff] %v330_v56   ;;  %v291_v63 = vsel %vm157_vm5, 1.0, %v345_v46  ;;  %v135_v0 = vadd.f32 %v127_v59, %v95_v24  ;;  %v232_v1 = vmul.f32 0.0, %v286_v47  ;;  %v225_v4 = vmul.f32 %v217_v51, %v129_v37  ;;  %v26_v24 = vld [vmem:[%s611_s0] sm:$0xff] }
  0x11   :  { %v333_v5 = vpack.c.bf16 %v291_v63, %v290_v58  ;;  %v221_v6 = vsub.f32 1.0, %v291_v63  ;;  %vm158_vm6 = vcmp.gt.f32.partialorder %v134_v61, 1.0  ;;  %v233_v7 = vmul.f32 0.0, %v287_v48 }
  0x12   :  { %vm159_vm7 = vcmp.gt.f32.partialorder %v135_v0, 1.0  ;;  %v292_v10 = vsel %vm158_vm6, 1.0, %v345_v46  ;;  %v240_v11 = vadd.f32 %v232_v1, %v224_v62  ;;  %v226_v12 = vmul.f32 %v218_v54, %v130_v40  ;;  %v31_v1 = vld [vmem:[%s611_s0 + $0x28] sm:$0xff] }
  0x13   :  { %342 = vst [vmem:[%s609_s6 + $0x10] sm:$0xff] %v333_v5   ;;  %v293_v13 = vsel %vm159_vm7, 1.0, %v345_v46  ;;  %v222_v14 = vsub.f32 1.0, %v292_v10  ;;  %v241_v15 = vadd.f32 %v233_v7, %v225_v4  ;;  %v234_v18 = vmul.f32 0.0, %v288_v52 }
  0x14   :  { %v336_v20 = vpack.c.bf16 %v293_v13, %v292_v10  ;;  %v223_v21 = vsub.f32 1.0, %v293_v13  ;;  %248 = vst [vmem:[%s610_s7] sm:$0xff] %v240_v11  ;;  %v227_v22 = vmul.f32 %v219_v57, %v131_v41  ;;  %v235_v23 = vmul.f32 0.0, %v289_v53 }
  0x15   :  { %249 = vst [vmem:[%s610_s7 + $0x8] sm:$0xff] %v241_v15  ;;  %v242_v28 = vadd.f32 %v234_v18, %v226_v12  ;;  %v228_v29 = vmul.f32 %v220_v60, %v132_v44  ;;  %v236_v31 = vmul.f32 0.0, %v290_v58  ;;  %v229_v32 = vmul.f32 %v221_v6, %v133_v55  ;;  %v28_v44 = vld [vmem:[%s611_s0 + $0x10] sm:$0xff]  ;;  %v30_v55 = vld [vmem:[%s611_s0 + $0x20] sm:$0xff] }
  0x16   :  { %343 = vst [vmem:[%s609_s6 + $0x18] sm:$0xff] %v336_v20   ;;  %v243_v34 = vadd.f32 %v235_v23, %v227_v22  ;;  %v237_v35 = vmul.f32 0.0, %v291_v63  ;;  %v230_v36 = vmul.f32 %v222_v14, %v134_v61  ;;  %v238_v37 = vmul.f32 0.0, %v292_v10  ;;  %v339_v58 = vld [vmem:[%s613_s1 + $0x10] sm:$0xff]   ;;  %v340_v14 = vld [vmem:[%s613_s1 + $0x18] sm:$0xff]  }
  0x17   :  { %250 = vst [vmem:[%s610_s7 + $0x10] sm:$0xff] %v242_v28  ;;  %v244_v40 = vadd.f32 %v236_v31, %v228_v29  ;;  %v231_v41 = vmul.f32 %v223_v21, %v135_v0  ;;  %v239_v42 = vmul.f32 0.0, %v293_v13  ;;  %v41_v43 = vsub.f32 %v26_v24, %v487_v27  ;;  %v32_v13 = vld [vmem:[%s611_s0 + $0x30] sm:$0xff]  ;;  %v33_v21 = vld [vmem:[%s611_s0 + $0x38] sm:$0xff] }
  0x18   :  { %251 = vst [vmem:[%s610_s7 + $0x18] sm:$0xff] %v243_v34  ;;  %v245_v46 = vadd.f32 %v237_v35, %v229_v32  ;;  %v246_v47 = vadd.f32 %v238_v37, %v230_v36  ;;  %v312_v48 = vunpack.c.l.bf16 %v311_v33  ;;  %v144_v49 = vsub.f32 %v400_v2, %v442_v19 }
  0x19   :  { %252 = vst [vmem:[%s610_s7 + $0x20] sm:$0xff] %v244_v40  ;;  %v247_v51 = vadd.f32 %v239_v42, %v231_v41  ;;  %v56_v52 = vmul.f32 %v501_v38, %v41_v43  ;;  %v42_v53 = vsub.f32 %v27_v39, %v487_v27  ;;  %v313_v54 = vunpack.c.h.bf16 %v311_v33 }
  0x1a   :  { %253 = vst [vmem:[%s610_s7 + $0x28] sm:$0xff] %v245_v46  ;;  %254 = vst [vmem:[%s610_s7 + $0x30] sm:$0xff] %v246_v47  ;;  %v145_v2 = vsub.f32 %v405_v3, %v458_v26  ;;  %v43_v19 = vsub.f32 %v28_v44, %v487_v27  ;;  %v316_v56 = vunpack.c.l.bf16 %v338_v45  ;;  %v138_v57 = vmul.f32 0.2, %v416_v8 }
  0x1b   :  { %255 = vst [vmem:[%s610_s7 + $0x38] sm:$0xff] %v247_v51  ;;  %v80_v59 = vadd.f32 %v312_v48, %v56_v52  ;;  %v57_v60 = vmul.f32 %v501_v38, %v42_v53  ;;  %v44_v61 = vsub.f32 %v29_v50, %v487_v27  ;;  %v317_v62 = vunpack.c.h.bf16 %v338_v45 }
  0x1c   :  { %v58_v3 = vmul.f32 %v501_v38, %v43_v19  ;;  %v146_v26 = vsub.f32 %v416_v8, %v138_v57  ;;  %v139_v63 = vmul.f32 0.2, %v421_v9  ;;  %v45_v0 = vsub.f32 %v30_v55, %v487_v27 }
  0x1d   :  { %v256_v4 = vadd.f32 %v144_v49, %v80_v59  ;;  %v81_v5 = vadd.f32 %v313_v54, %v57_v60  ;;  %v59_v6 = vmul.f32 %v501_v38, %v44_v61  ;;  %v320_v7 = vunpack.c.l.bf16 %v339_v58 }
  0x1e   :  { %v82_v10 = vadd.f32 %v316_v56, %v58_v3  ;;  %v147_v11 = vsub.f32 %v421_v9, %v139_v63  ;;  %v60_v12 = vmul.f32 %v501_v38, %v45_v0  ;;  %v140_v8 = vmul.f32 0.2, %v434_v16 }
  0x1f   :  { %264 = vst [vmem:[%s615_s8] sm:$0xff] %v256_v4  ;;  %v257_v15 = vadd.f32 %v145_v2, %v81_v5  ;;  %v83_v18 = vadd.f32 %v317_v62, %v59_v6  ;;  %v46_v9 = vsub.f32 %v31_v1, %v487_v27  ;;  %v321_v20 = vunpack.c.h.bf16 %v339_v58 }
  0x20   :  { %v258_v22 = vadd.f32 %v146_v26, %v82_v10  ;;  %v84_v23 = vadd.f32 %v320_v7, %v60_v12  ;;  %v148_v24 = vsub.f32 %v434_v16, %v140_v8  ;;  %v141_v28 = vmul.f32 0.2, %v439_v17 }
  0x21   :  { %265 = vst [vmem:[%s615_s8 + $0x8] sm:$0xff] %v257_v15  ;;  %v259_v29 = vadd.f32 %v147_v11, %v83_v18  ;;  %v61_v31 = vmul.f32 %v501_v38, %v46_v9  ;;  %v47_v32 = vsub.f32 %v32_v13, %v487_v27  ;;  %v324_v33 = vunpack.c.l.bf16 %v340_v14 }
  0x22   :  { %266 = vst [vmem:[%s615_s8 + $0x10] sm:$0xff] %v258_v22  ;;  %v260_v34 = vadd.f32 %v148_v24, %v84_v23  ;;  %v149_v35 = vsub.f32 %v439_v17, %v141_v28  ;;  %v142_v16 = vmul.f32 0.2, %v455_v25  ;;  %v48_v36 = vsub.f32 %v33_v21, %v487_v27 }
  0x23   :  { %267 = vst [vmem:[%s615_s8 + $0x18] sm:$0xff] %v259_v29  ;;  %v85_v37 = vadd.f32 %v321_v20, %v61_v31  ;;  %v62_v39 = vmul.f32 %v501_v38, %v47_v32  ;;  %v325_v40 = vunpack.c.h.bf16 %v340_v14  ;;  %v143_v41 = vmul.f32 0.2, %v464_v30 }
  0x24   :  { %268 = vst [vmem:[%s615_s8 + $0x20] sm:$0xff] %v260_v34  ;;  %v150_v17 = vsub.f32 %v455_v25, %v142_v16  ;;  %v63_v42 = vmul.f32 %v501_v38, %v48_v36 }
  0x25   :  { %v261_v43 = vadd.f32 %v149_v35, %v85_v37  ;;  %v86_v27 = vadd.f32 %v324_v33, %v62_v39  ;;  %v151_v44 = vsub.f32 %v464_v30, %v143_v41 }
  0x26   :  { %v87_v45 = vadd.f32 %v325_v40, %v63_v42 }
  0x27   :  { %269 = vst [vmem:[%s615_s8 + $0x28] sm:$0xff] %v261_v43  ;;  %v262_v46 = vadd.f32 %v150_v17, %v86_v27 }
  0x28   :  { %v263_v47 = vadd.f32 %v151_v44, %v87_v45 }
  0x29   :  { %270 = vst [vmem:[%s615_s8 + $0x30] sm:$0xff] %v262_v46 }
  0x2a   :  { %271 = vst [vmem:[%s615_s8 + $0x38] sm:$0xff] %v263_v47 }

// kernel: closed_call.431
= control target key start
LH: loop header
LB: loop body
LE: loop exit
PB: predicated region body
PF: predicated region fallthrough
CT: control target
= control target key end

     0   :  { %v57_v0 = vmov 0.0   ;;  %s103_s1 = inlined_call_operand.vmem [shape: f32[1,128], index: 1, kind: output, shape index: {0}]   ;;  %s104_s2 = inlined_call_operand.vmem [shape: f32[1,128], index: 2, kind: output, shape index: {1}]   ;;  %s105_s0 = inlined_call_operand.vmem [shape: f32[32,128], index: 0, kind: input, shape index: {}]  }
   0x1   :  { %14 = vst [vmem:[%s103_s1] sm:$0x1] %v57_v0  ;;  %15 = vst [vmem:[%s104_s2] sm:$0x1] %v57_v0  ;;  %v16_v1 = vld [vmem:[%s105_s0] sm:$0xff]  ;;  %v17_v2 = vld [vmem:[%s105_s0 + $0x8] sm:$0xff] }
   0x2   :  { %v18_v3 = vld [vmem:[%s105_s0 + $0x10] sm:$0xff]  ;;  %v19_v4 = vld [vmem:[%s105_s0 + $0x18] sm:$0xff]  ;;  %v21_v5 = vadd.f32 %v17_v2, %v16_v1  ;;  %v33_v6 = vmul.f32 %v16_v1, %v16_v1  ;;  %v34_v7 = vmul.f32 %v17_v2, %v17_v2 }
   0x3   :  { %v35_v8 = vmul.f32 %v18_v3, %v18_v3  ;;  %v36_v10 = vmul.f32 %v19_v4, %v19_v4 }
   0x4   :  { %v22_v9 = vadd.f32 %v21_v5, %v18_v3  ;;  %v37_v11 = vadd.f32 %v34_v7, %v33_v6 }
   0x6   :  { %v23_v12 = vadd.f32 %v22_v9, %v19_v4  ;;  %v38_v13 = vadd.f32 %v37_v11, %v35_v8 }
   0x8   :  { %v24_v14 = vrot.slane %v23_v12, 4  ;;  %v39_v15 = vadd.f32 %v38_v13, %v36_v10  ;;  %v20_v24 = vld [vmem:[%s103_s1] sm:$0x1] }
   0x9   :  { %v32_v27 = vld [vmem:[%s104_s2] sm:$0x1] }
   0xa   :  { %v25_v16 = vadd.f32 %v24_v14, %v23_v12  ;;  %v40_v17 = vrot.slane %v39_v15, 4 }
   0xc   :  { %v26_v18 = vrot.slane %v25_v16, 2  ;;  %v41_v19 = vadd.f32 %v40_v17, %v39_v15 }
   0xe   :  { %v27_v20 = vadd.f32 %v26_v18, %v25_v16  ;;  %v42_v21 = vrot.slane %v41_v19, 2 }
  0x10   :  { %v28_v22 = vrot.slane %v27_v20, 1  ;;  %v43_v23 = vadd.f32 %v42_v21, %v41_v19 }
  0x12   :  { %v29_v25 = vadd.f32 %v28_v22, %v27_v20  ;;  %v44_v26 = vrot.slane %v43_v23, 1 }
  0x14   :  { %v30_v28 = vadd.f32 %v29_v25, %v20_v24  ;;  %v45_v29 = vadd.f32 %v44_v26, %v43_v23 }
  0x16   :  { %31 = vst [vmem:[%s103_s1] sm:$0x1] %v30_v28  ;;  %v46_v30 = vadd.f32 %v45_v29, %v32_v27 }
  0x18   :  { %47 = vst [vmem:[%s104_s2] sm:$0x1] %v46_v30 }

// kernel: closed_call.430
= control target key start
LH: loop header
LB: loop body
LE: loop exit
PB: predicated region body
PF: predicated region fallthrough
CT: control target
= control target key end

     0   :  { %s686_s9 = smov 0   ;;  %s688_s10 = smov 0   ;;  %s782_s0 = inlined_call_operand.vmem [shape: bf16[32,640], index: 0, kind: input, shape index: {}]   ;;  %s783_s1 = inlined_call_operand.vmem [shape: bf16[640,128], index: 1, kind: input, shape index: {}]   ;;  %s784_s2 = inlined_call_operand.vmem [shape: f32[32,128], index: 2, kind: output, shape index: {}]  }
   0x1   :  { %s690_s11 = smov 0   ;;  %s692_s12 = smov 0  }
   0x2   :  { %s694_s13 = smov 0  }
   0x3 LB: > { %s24_s14 = sadd.s32 1, %s664_s12  ;;  %p47_p1 = scmp.ne.s32.totalorder %s656_s10, %s652_s9  ;;  %s668_s13 = sphi %s694_s13, %s12_s13   ;;  %s664_s12 = sphi %s692_s12, %s788_s12   ;;  %s660_s11 = sphi %s690_s11, %s787_s11   ;;  %s656_s10 = sphi %s688_s10, %s786_s10   ;;  %s652_s9 = sphi %s686_s9, %s785_s9  }
   0x4   : > { %p25_p0 = scmp.ge.s32.totalorder %s24_s14, 5  ;;  %p48_p2 = scmp.eq.s32.totalorder %s668_s13, 0 }
   0x5   : > { %s40_s16 = sadd.s32 1, %s656_s10  ;;  %p526_p5 = scmp.ge.s32.totalorder %s668_s13, 5 }
   0x6   : > { %s790_s14 = smov (%p25_p0, %s24_s14), 0  ;;  %p49_p3 = por %p48_p2, %p47_p1 }
   0x7   : > { %s36_s15 = ssub.s32 %s664_s12, %s790_s14  ;;  %129 = sbr.rel (%p526_p5) target bundleno = 21 (0x15), region = 16 }
   0x8   : > { %p38_p4 = scmp.eq.s32.totalorder %s36_s15, 0 }
   0xa   : > { %s721_s17 = scalar_select %p38_p4, %s656_s10, %s40_s16  }
   0xe   : > { %132 = sbr.rel (!%p49_p3) target bundleno = 21 (0x15), region = 20  ;;  %s134_s18 = sand.u32 (%p49_p3), 1, %s656_s10  }
   0xf   : > { %s528_s19 = sshll.u32 (%p49_p3), %s664_s12, 2  ;;  %s527_s20 = sshll.u32 (%p49_p3), %s134_s18, 4 }
  0x10   : > { %s141_s23 = scalar_lea.vmem (%p49_p3), %s782_s0, %s528_s19  ;;  %s136_s24 = scalar_lea.vmem (%p49_p3), [#allocation3], %s527_s20 }
  0x11   : > { %v157_v0 = vld [vmem:[%s141_s23] sm:$0xf] (%p49_p3)  ;;  %v159_v1 = vld [vmem:[%s141_s23 + $0x14] sm:$0xf] (%p49_p3)  ;;  %v161_v2 = vld [vmem:[%s141_s23 + $0x28] sm:$0xf] (%p49_p3) }
  0x12   : > { %158 = vst [vmem:[%s136_s24] sm:$0xf] (%p49_p3), %v157_v0  ;;  %160 = vst [vmem:[%s136_s24 + $0x4] sm:$0xf] (%p49_p3), %v159_v1  ;;  %v163_v3 = vld [vmem:[%s141_s23 + $0x3c] sm:$0xf] (%p49_p3) }
  0x13   : > { %162 = vst [vmem:[%s136_s24 + $0x8] sm:$0xf] (%p49_p3), %v161_v2  ;;  %164 = vst [vmem:[%s136_s24 + $0xc] sm:$0xf] (%p49_p3), %v163_v3 }
  0x15 PF: > { %p529_p6 = scmp.ge.s32.totalorder %s668_s13, 1  ;;  %p206_p7 = scmp.lt.s32.totalorder %s668_s13, 6 }
  0x17   : > { %p207_p8 = pnand %p529_p6, %p206_p7 }
  0x18   : > { %s213_s25 = sand.u32 (!%p207_p8), 1, %s652_s9   ;;  %s531_s26 = sshll.u32 (!%p207_p8), %s660_s11, 4 }
  0x19   : > { %210 = sbr.rel (%p207_p8) target bundleno = 298 (0x12a), region = 65  ;;  %s733_s27 = sshll.u32 (!%p207_p8), %s213_s25, 4 }
  0x1a   : > { %p247_p9 = scmp.lt.s32.totalorder (!%p207_p8), %s531_s26, 79  ;;  %s215_s4 = scalar_lea.vmem (!%p207_p8), [#allocation3], %s733_s27 }
  0x1b   : > { %p533_p10 = scmp.ne.s32.totalorder (!%p207_p8), %s660_s11, 0 }
  0x20   : > { %s792_s26 = smov (!%p247_p9, %s531_s26), 79  ;;  %268 = sbr.rel (%p533_p10) target bundleno = 39 (0x27), region = 73 }
  0x21   : > { %s532_s28 = sshll.u32 %s792_s26, 2  ;;  %v670_v4 = vmov (!%p533_p10), 0.0  }
  0x22   : > { %s738_s3 = scalar_lea.vmem %s783_s1, %s532_s28  ;;  %269 = vst [vmem:[#allocation2] sm:$0xff] (!%p533_p10), %v670_v4  ;;  %270 = vst [vmem:[#allocation2 + $0x8] sm:$0xff] (!%p533_p10), %v670_v4 }
  0x23   : > { %271 = vst [vmem:[#allocation2 + $0x10] sm:$0xff] (!%p533_p10), %v670_v4  ;;  %272 = vst [vmem:[#allocation2 + $0x18] sm:$0xff] (!%p533_p10), %v670_v4 }
  0x27 PF: > { %v620_v5 = vld [vmem:[%s738_s3] sm:$0xff]   ;;  %v621_v6 = vld [vmem:[%s738_s3 + $0x8] sm:$0xff]   ;;  %v622_v7 = vld [vmem:[%s738_s3 + $0x10] sm:$0xff]   ;;  %p544_p11 = scmp.ne.s32.totalorder %s660_s11, 4 }
  0x28   : > { %559 = vmatprep.subr.bf16.mxu0 %v620_v5  ;;  %v623_v8 = vld [vmem:[%s738_s3 + $0x18] sm:$0xff]   ;;  %v628_v9 = vld [vmem:[%s215_s4] sm:$0xff]   ;;  %v625_v11 = vld [vmem:[%s738_s3 + $0x28] sm:$0xff]  }
  0x29   : > { %560 = vmatpush3.bf16.msra.mxu0 %v620_v5  ;;  %575 = vmatprep.mubr.bf16.mxu0 %v628_v9  ;;  %v624_v10 = vld [vmem:[%s738_s3 + $0x20] sm:$0xff]   ;;  %v626_v12 = vld [vmem:[%s738_s3 + $0x30] sm:$0xff]   ;;  %v627_v13 = vld [vmem:[%s738_s3 + $0x38] sm:$0xff]  }
  0x2a   : > { %561 = vmatprep.subr.bf16.mxu0 %v621_v6  ;;  %v629_v14 = vld [vmem:[%s215_s4 + $0x8] sm:$0xff]   ;;  %v275_v15 = vld [vmem:[#allocation2 + $0x10] sm:$0xff]  ;;  %v273_v16 = vld [vmem:[#allocation2] sm:$0xff] }
  0x2b   : > { %v276_v18 = vld [vmem:[#allocation2 + $0x18] sm:$0xff]  ;;  %v274_v21 = vld [vmem:[#allocation2 + $0x8] sm:$0xff] }
  0x2d   : > { %562 = vmatpush3.bf16.msra.mxu0 %v621_v6 }
  0x2e   : > { %563 = vmatprep.subr.bf16.mxu0 %v622_v7 }
  0x31   : > { %564 = vmatpush3.bf16.msra.mxu0 %v622_v7 }
  0x32   : > { %565 = vmatprep.subr.bf16.mxu0 %v623_v8 }
  0x35   : > { %566 = vmatpush3.bf16.msra.mxu0 %v623_v8 }
  0x36   : > { %567 = vmatprep.subr.bf16.mxu0 %v624_v10 }
  0x39   : > { %568 = vmatpush3.bf16.msra.mxu0 %v624_v10 }
  0x3a   : > { %569 = vmatprep.subr.bf16.mxu0 %v625_v11 }
  0x3d   : > { %570 = vmatpush3.bf16.msra.mxu0 %v625_v11 }
  0x3e   : > { %571 = vmatprep.subr.bf16.mxu0 %v626_v12 }
  0x41   : > { %572 = vmatpush3.bf16.msra.mxu0 %v626_v12 }
  0x42   : > { %573 = vmatprep.subr.bf16.mxu0 %v627_v13 }
  0x45   : > { %574 = vmatpush3.bf16.msra.mxu0 %v627_v13 }
  0x48   : > { %576 = vmatmul.mubr.bf16.vlgmr.msra.gmra.mrb[0].mxu0 %v629_v14 }
 0x11b   : > { %v577_v17 = vpop.f32.mrb[0].mxu0  ;;  %417 = sbr.rel (%p544_p11) target bundleno = 298 (0x12a), region = 77 }
 0x11c   : > { %v408_v19 = vadd.f32 %v577_v17, %v275_v15  ;;  %v391_v20 = vpop.f32.mrb[1].mxu0 }
 0x11d   : > { %v406_v22 = vadd.f32 %v391_v20, %v273_v16  ;;  %v578_v23 = vpop.f32.mrb[2].mxu0 }
 0x11e   : > { %412 = vst [vmem:[#allocation2 + $0x10] sm:$0xff] %v408_v19  ;;  %v409_v24 = vadd.f32 %v578_v23, %v276_v18  ;;  %v394_v25 = vpop.f32.mrb[3].mxu0 }
 0x11f   : > { %410 = vst [vmem:[#allocation2] sm:$0xff] %v406_v22  ;;  %v407_v26 = vadd.f32 %v394_v25, %v274_v21 }
 0x120   : > { %413 = vst [vmem:[#allocation2 + $0x18] sm:$0xff] %v409_v24 }
 0x121   : > { %411 = vst [vmem:[#allocation2 + $0x8] sm:$0xff] %v407_v26 }
 0x125   : > { %v420_v29 = vld [vmem:[#allocation2 + $0x10] sm:$0xff] }
 0x126   : > { %v418_v27 = vld [vmem:[#allocation2] sm:$0xff]  ;;  %424 = vst [vmem:[%s784_s2 + $0x10] sm:$0xff] %v420_v29 }
 0x127   : > { %422 = vst [vmem:[%s784_s2] sm:$0xff] %v418_v27  ;;  %v421_v30 = vld [vmem:[#allocation2 + $0x18] sm:$0xff] }
 0x128   : > { %v419_v28 = vld [vmem:[#allocation2 + $0x8] sm:$0xff]  ;;  %425 = vst [vmem:[%s784_s2 + $0x18] sm:$0xff] %v421_v30 }
 0x129   : > { %423 = vst [vmem:[%s784_s2 + $0x8] sm:$0xff] %v419_v28 }
 0x12a PF: > { %s12_s13 = sadd.s32 1, %s668_s13   ;;  %s785_s9 = smov %s656_s10 }
 0x12b   : > { %p9_p12 = scmp.ge.s32.totalorder %s12_s13, 7   ;;  %s786_s10 = smov %s721_s17 }
 0x12c   : > { %s787_s11 = smov %s664_s12  ;;  %s788_s12 = smov %s790_s14 }
 0x12d   :  { %11 = sbr.rel (!%p9_p12) target bundleno = 3 (0x3), region = 115 }

// kernel: closed_call.432
= control target key start
LH: loop header
LB: loop body
LE: loop exit
PB: predicated region body
PF: predicated region fallthrough
CT: control target
= control target key end

     0   :  { %v175_v42 = vmov 0.0   ;;  %s310_s3 = inlined_call_operand.vmem [shape: f32[32,128], index: 3, kind: input, shape index: {}, may-alias: {3,6}]   ;;  %s311_s4 = inlined_call_operand.vmem [shape: f32[32,128], index: 4, kind: input, shape index: {}, may-alias: {4,7}]   ;;  %s312_s0 = inlined_call_operand.vmem [shape: f32[32,128], index: 0, kind: input, shape index: {}]   ;;  %s313_s1 = inlined_call_operand.vmem [shape: f32[1,128], index: 1, kind: input, shape index: {}]   ;;  %s314_s2 = inlined_call_operand.vmem [shape: f32[1,128], index: 2, kind: input, shape index: {}]   ;;  %s315_s7 = inlined_call_operand.vmem [shape: f32[32,128], index: 7, kind: output, shape index: {2}, may-alias: {4,7}]   ;;  %s316_s5 = inlined_call_operand.vmem [shape: bf16[32,128], index: 5, kind: output, shape index: {0}]   ;;  %s317_s6 = inlined_call_operand.vmem [shape: f32[32,128], index: 6, kind: output, shape index: {1}, may-alias: {3,6}]  }
   0x1   :  { %v49_v0 = vld [vmem:[%s310_s3] sm:$0xff]  ;;  %v50_v1 = vld [vmem:[%s310_s3 + $0x8] sm:$0xff]  ;;  %v51_v6 = vld [vmem:[%s310_s3 + $0x10] sm:$0xff] }
   0x2   :  { %v53_v2 = vld [vmem:[%s311_s4] sm:$0xff]  ;;  %v54_v3 = vld [vmem:[%s311_s4 + $0x8] sm:$0xff]  ;;  %v57_v4 = vsub.f32 0.0, %v49_v0  ;;  %v58_v5 = vsub.f32 0.0, %v50_v1  ;;  %v52_v7 = vld [vmem:[%s310_s3 + $0x18] sm:$0xff]  ;;  %v59_v10 = vsub.f32 0.0, %v51_v6 }
   0x3   :  { %v237_v8 = vld [vmem:[%s311_s4 + $0x10] sm:$0xff]  ;;  %v242_v9 = vld [vmem:[%s311_s4 + $0x18] sm:$0xff]  ;;  %v60_v11 = vsub.f32 0.0, %v52_v7  ;;  %v23_v12 = vld [vmem:[%s312_s0] sm:$0xff]  ;;  %v73_v17 = vmul.f32 0.2, %v53_v2 }
   0x4   :  { %v61_v13 = vadd.f32 %v57_v4, %v53_v2  ;;  %v62_v14 = vadd.f32 %v58_v5, %v54_v3  ;;  %v250_v15 = vld [vmem:[%s313_s1] ss:$0 sm:$0xff]  ;;  %v63_v18 = vadd.f32 %v59_v10, %v237_v8  ;;  %v24_v21 = vld [vmem:[%s312_s0 + $0x8] sm:$0xff]  ;;  %v74_v22 = vmul.f32 0.2, %v54_v3  ;;  %v25_v23 = vld [vmem:[%s312_s0 + $0x10] sm:$0xff] }
   0x5   :  { %v255_v16 = vld [vmem:[%s314_s2] ss:$0 sm:$0xff]  ;;  %v64_v19 = vadd.f32 %v60_v11, %v242_v9  ;;  %v34_v20 = vsub.f32 %v23_v12, %v250_v15  ;;  %v77_v26 = vsub.f32 %v53_v2, %v73_v17  ;;  %v35_v27 = vsub.f32 %v24_v21, %v250_v15  ;;  %v26_v53 = vld [vmem:[%s312_s0 + $0x18] sm:$0xff] }
   0x6   :  { %v65_v24 = vmul.f32 0.1, %v61_v13  ;;  %v66_v25 = vmul.f32 0.1, %v62_v14  ;;  %v67_v28 = vmul.f32 0.1, %v63_v18  ;;  %v78_v31 = vsub.f32 %v54_v3, %v74_v22 }
   0x7   :  { %v68_v29 = vmul.f32 0.1, %v64_v19  ;;  %v45_v30 = vmul.f32 %v255_v16, %v34_v20  ;;  %v46_v34 = vmul.f32 %v255_v16, %v35_v27  ;;  %v36_v35 = vsub.f32 %v25_v23, %v250_v15 }
   0x8   :  { %v69_v32 = vadd.f32 %v65_v24, %v49_v0  ;;  %v70_v33 = vadd.f32 %v66_v25, %v50_v1  ;;  %v71_v36 = vadd.f32 %v67_v28, %v51_v6  ;;  %v75_v39 = vmul.f32 0.2, %v237_v8 }
   0x9   :  { %v72_v37 = vadd.f32 %v68_v29, %v52_v7  ;;  %v133_v38 = vadd.f32 %v77_v26, %v45_v30  ;;  %v134_v40 = vadd.f32 %v78_v31, %v46_v34  ;;  %v47_v41 = vmul.f32 %v255_v16, %v36_v35 }
   0xa   :  { %vm81_vm0 = vcmp.gt.f32.partialorder %v69_v32, 1.0  ;;  %vm82_vm1 = vcmp.gt.f32.partialorder %v70_v33, 1.0  ;;  %vm83_vm2 = vcmp.gt.f32.partialorder %v71_v36, 1.0  ;;  %v79_v61 = vsub.f32 %v237_v8, %v75_v39 }
   0xb   :  { %v155_v43 = vsel %vm81_vm0, 1.0, %v175_v42  ;;  %v156_v44 = vsel %vm82_vm1, 1.0, %v175_v42  ;;  %vm84_vm3 = vcmp.gt.f32.partialorder %v72_v37, 1.0  ;;  %137 = vst [vmem:[%s315_s7] sm:$0xff] %v133_v38  ;;  %v157_v48 = vsel %vm83_vm2, 1.0, %v175_v42  ;;  %138 = vst [vmem:[%s315_s7 + $0x8] sm:$0xff] %v134_v40 }
   0xc   :  { %v168_v45 = vpack.c.bf16 %v156_v44, %v155_v43  ;;  %v113_v46 = vsub.f32 1.0, %v155_v43  ;;  %v114_v47 = vsub.f32 1.0, %v156_v44  ;;  %v158_v49 = vsel %vm84_vm3, 1.0, %v175_v42 }
   0xd   :  { %v115_v50 = vsub.f32 1.0, %v157_v48  ;;  %v121_v51 = vmul.f32 0.0, %v155_v43  ;;  %v122_v52 = vmul.f32 0.0, %v156_v44  ;;  %v171_v54 = vpack.c.bf16 %v158_v49, %v157_v48 }
   0xe   :  { %169 = vst [vmem:[%s316_s5] sm:$0xff] %v168_v45   ;;  %v116_v55 = vsub.f32 1.0, %v158_v49  ;;  %v117_v56 = vmul.f32 %v113_v46, %v69_v32  ;;  %v118_v57 = vmul.f32 %v114_v47, %v70_v33  ;;  %v123_v59 = vmul.f32 0.0, %v157_v48 }
   0xf   :  { %v119_v58 = vmul.f32 %v115_v50, %v71_v36  ;;  %v124_v60 = vmul.f32 0.0, %v158_v49  ;;  %173 = vst [vmem:[%s316_s5 + $0x8] sm:$0xff] %v171_v54   ;;  %v37_v1 = vsub.f32 %v26_v53, %v250_v15  ;;  %v135_v3 = vadd.f32 %v79_v61, %v47_v41 }
  0x10   :  { %v125_v62 = vadd.f32 %v121_v51, %v117_v56  ;;  %v126_v63 = vadd.f32 %v122_v52, %v118_v57  ;;  %v120_v0 = vmul.f32 %v116_v55, %v72_v37  ;;  %v76_v4 = vmul.f32 0.2, %v242_v9 }
  0x11   :  { %v127_v2 = vadd.f32 %v123_v59, %v119_v58  ;;  %v48_v6 = vmul.f32 %v255_v16, %v37_v1  ;;  %139 = vst [vmem:[%s315_s7 + $0x10] sm:$0xff] %v135_v3 }
  0x12   :  { %129 = vst [vmem:[%s317_s6] sm:$0xff] %v125_v62  ;;  %130 = vst [vmem:[%s317_s6 + $0x8] sm:$0xff] %v126_v63  ;;  %v128_v5 = vadd.f32 %v124_v60, %v120_v0  ;;  %v80_v7 = vsub.f32 %v242_v9, %v76_v4 }
  0x13   :  { %131 = vst [vmem:[%s317_s6 + $0x10] sm:$0xff] %v127_v2 }
  0x14   :  { %132 = vst [vmem:[%s317_s6 + $0x18] sm:$0xff] %v128_v5  ;;  %v136_v8 = vadd.f32 %v80_v7, %v48_v6 }
  0x16   :  { %140 = vst [vmem:[%s315_s7 + $0x18] sm:$0xff] %v136_v8 }

// kernel: closed_call.433
= control target key start
LH: loop header
LB: loop body
LE: loop exit
PB: predicated region body
PF: predicated region fallthrough
CT: control target
= control target key end

     0   :  { %s686_s9 = smov 0   ;;  %s688_s10 = smov 0   ;;  %s782_s0 = inlined_call_operand.vmem [shape: bf16[32,1152], index: 0, kind: input, shape index: {}]   ;;  %s783_s1 = inlined_call_operand.vmem [shape: bf16[1152,128], index: 1, kind: input, shape index: {}]   ;;  %s784_s2 = inlined_call_operand.vmem [shape: f32[32,128], index: 2, kind: output, shape index: {}]  }
   0x1   :  { %s690_s11 = smov 0   ;;  %s692_s12 = smov 0  }
   0x2   :  { %s694_s13 = smov 0  }
   0x3 LB: > { %s24_s14 = sadd.s32 1, %s664_s12  ;;  %p47_p1 = scmp.ne.s32.totalorder %s656_s10, %s652_s9  ;;  %s668_s13 = sphi %s694_s13, %s12_s13   ;;  %s664_s12 = sphi %s692_s12, %s788_s12   ;;  %s660_s11 = sphi %s690_s11, %s787_s11   ;;  %s656_s10 = sphi %s688_s10, %s786_s10   ;;  %s652_s9 = sphi %s686_s9, %s785_s9  }
   0x4   : > { %p25_p0 = scmp.ge.s32.totalorder %s24_s14, 9  ;;  %p48_p2 = scmp.eq.s32.totalorder %s668_s13, 0 }
   0x5   : > { %s40_s16 = sadd.s32 1, %s656_s10  ;;  %p526_p5 = scmp.ge.s32.totalorder %s668_s13, 9 }
   0x6   : > { %s790_s14 = smov (%p25_p0, %s24_s14), 0  ;;  %p49_p3 = por %p48_p2, %p47_p1 }
   0x7   : > { %s36_s15 = ssub.s32 %s664_s12, %s790_s14  ;;  %129 = sbr.rel (%p526_p5) target bundleno = 21 (0x15), region = 16 }
   0x8   : > { %p38_p4 = scmp.eq.s32.totalorder %s36_s15, 0 }
   0xa   : > { %s721_s17 = scalar_select %p38_p4, %s656_s10, %s40_s16  }
   0xe   : > { %132 = sbr.rel (!%p49_p3) target bundleno = 21 (0x15), region = 20  ;;  %s134_s18 = sand.u32 (%p49_p3), 1, %s656_s10  }
   0xf   : > { %s528_s19 = sshll.u32 (%p49_p3), %s664_s12, 2  ;;  %s527_s20 = sshll.u32 (%p49_p3), %s134_s18, 4 }
  0x10   : > { %s141_s23 = scalar_lea.vmem (%p49_p3), %s782_s0, %s528_s19  ;;  %s136_s24 = scalar_lea.vmem (%p49_p3), [#allocation3], %s527_s20 }
  0x11   : > { %v157_v0 = vld [vmem:[%s141_s23] sm:$0xf] (%p49_p3)  ;;  %v159_v1 = vld [vmem:[%s141_s23 + $0x24] sm:$0xf] (%p49_p3)  ;;  %v161_v2 = vld [vmem:[%s141_s23 + $0x48] sm:$0xf] (%p49_p3) }
  0x12   : > { %158 = vst [vmem:[%s136_s24] sm:$0xf] (%p49_p3), %v157_v0  ;;  %160 = vst [vmem:[%s136_s24 + $0x4] sm:$0xf] (%p49_p3), %v159_v1  ;;  %v163_v3 = vld [vmem:[%s141_s23 + $0x6c] sm:$0xf] (%p49_p3) }
  0x13   : > { %162 = vst [vmem:[%s136_s24 + $0x8] sm:$0xf] (%p49_p3), %v161_v2  ;;  %164 = vst [vmem:[%s136_s24 + $0xc] sm:$0xf] (%p49_p3), %v163_v3 }
  0x15 PF: > { %p529_p6 = scmp.ge.s32.totalorder %s668_s13, 1  ;;  %p206_p7 = scmp.lt.s32.totalorder %s668_s13, 10 }
  0x17   : > { %p207_p8 = pnand %p529_p6, %p206_p7 }
  0x18   : > { %s213_s25 = sand.u32 (!%p207_p8), 1, %s652_s9   ;;  %s531_s26 = sshll.u32 (!%p207_p8), %s660_s11, 4 }
  0x19   : > { %210 = sbr.rel (%p207_p8) target bundleno = 298 (0x12a), region = 65  ;;  %s733_s27 = sshll.u32 (!%p207_p8), %s213_s25, 4 }
  0x1a   : > { %p247_p9 = scmp.lt.s32.totalorder (!%p207_p8), %s531_s26, 143  ;;  %s215_s4 = scalar_lea.vmem (!%p207_p8), [#allocation3], %s733_s27 }
  0x1b   : > { %p533_p10 = scmp.ne.s32.totalorder (!%p207_p8), %s660_s11, 0 }
  0x20   : > { %s792_s26 = smov (!%p247_p9, %s531_s26), 143  ;;  %268 = sbr.rel (%p533_p10) target bundleno = 39 (0x27), region = 73 }
  0x21   : > { %s532_s28 = sshll.u32 %s792_s26, 2  ;;  %v670_v4 = vmov (!%p533_p10), 0.0  }
  0x22   : > { %s738_s3 = scalar_lea.vmem %s783_s1, %s532_s28  ;;  %269 = vst [vmem:[#allocation2] sm:$0xff] (!%p533_p10), %v670_v4  ;;  %270 = vst [vmem:[#allocation2 + $0x8] sm:$0xff] (!%p533_p10), %v670_v4 }
  0x23   : > { %271 = vst [vmem:[#allocation2 + $0x10] sm:$0xff] (!%p533_p10), %v670_v4  ;;  %272 = vst [vmem:[#allocation2 + $0x18] sm:$0xff] (!%p533_p10), %v670_v4 }
  0x27 PF: > { %v620_v5 = vld [vmem:[%s738_s3] sm:$0xff]   ;;  %v621_v6 = vld [vmem:[%s738_s3 + $0x8] sm:$0xff]   ;;  %v622_v7 = vld [vmem:[%s738_s3 + $0x10] sm:$0xff]   ;;  %p544_p11 = scmp.ne.s32.totalorder %s660_s11, 8 }
  0x28   : > { %559 = vmatprep.subr.bf16.mxu0 %v620_v5  ;;  %v623_v8 = vld [vmem:[%s738_s3 + $0x18] sm:$0xff]   ;;  %v628_v9 = vld [vmem:[%s215_s4] sm:$0xff]   ;;  %v625_v11 = vld [vmem:[%s738_s3 + $0x28] sm:$0xff]  }
  0x29   : > { %560 = vmatpush3.bf16.msra.mxu0 %v620_v5  ;;  %575 = vmatprep.mubr.bf16.mxu0 %v628_v9  ;;  %v624_v10 = vld [vmem:[%s738_s3 + $0x20] sm:$0xff]   ;;  %v626_v12 = vld [vmem:[%s738_s3 + $0x30] sm:$0xff]   ;;  %v627_v13 = vld [vmem:[%s738_s3 + $0x38] sm:$0xff]  }
  0x2a   : > { %561 = vmatprep.subr.bf16.mxu0 %v621_v6  ;;  %v629_v14 = vld [vmem:[%s215_s4 + $0x8] sm:$0xff]   ;;  %v275_v15 = vld [vmem:[#allocation2 + $0x10] sm:$0xff]  ;;  %v273_v16 = vld [vmem:[#allocation2] sm:$0xff] }
  0x2b   : > { %v276_v18 = vld [vmem:[#allocation2 + $0x18] sm:$0xff]  ;;  %v274_v21 = vld [vmem:[#allocation2 + $0x8] sm:$0xff] }
  0x2d   : > { %562 = vmatpush3.bf16.msra.mxu0 %v621_v6 }
  0x2e   : > { %563 = vmatprep.subr.bf16.mxu0 %v622_v7 }
  0x31   : > { %564 = vmatpush3.bf16.msra.mxu0 %v622_v7 }
  0x32   : > { %565 = vmatprep.subr.bf16.mxu0 %v623_v8 }
  0x35   : > { %566 = vmatpush3.bf16.msra.mxu0 %v623_v8 }
  0x36   : > { %567 = vmatprep.subr.bf16.mxu0 %v624_v10 }
  0x39   : > { %568 = vmatpush3.bf16.msra.mxu0 %v624_v10 }
  0x3a   : > { %569 = vmatprep.subr.bf16.mxu0 %v625_v11 }
  0x3d   : > { %570 = vmatpush3.bf16.msra.mxu0 %v625_v11 }
  0x3e   : > { %571 = vmatprep.subr.bf16.mxu0 %v626_v12 }
  0x41   : > { %572 = vmatpush3.bf16.msra.mxu0 %v626_v12 }
  0x42   : > { %573 = vmatprep.subr.bf16.mxu0 %v627_v13 }
  0x45   : > { %574 = vmatpush3.bf16.msra.mxu0 %v627_v13 }
  0x48   : > { %576 = vmatmul.mubr.bf16.vlgmr.msra.gmra.mrb[0].mxu0 %v629_v14 }
 0x11b   : > { %v577_v17 = vpop.f32.mrb[0].mxu0  ;;  %417 = sbr.rel (%p544_p11) target bundleno = 298 (0x12a), region = 77 }
 0x11c   : > { %v408_v19 = vadd.f32 %v577_v17, %v275_v15  ;;  %v391_v20 = vpop.f32.mrb[1].mxu0 }
 0x11d   : > { %v406_v22 = vadd.f32 %v391_v20, %v273_v16  ;;  %v578_v23 = vpop.f32.mrb[2].mxu0 }
 0x11e   : > { %412 = vst [vmem:[#allocation2 + $0x10] sm:$0xff] %v408_v19  ;;  %v409_v24 = vadd.f32 %v578_v23, %v276_v18  ;;  %v394_v25 = vpop.f32.mrb[3].mxu0 }
 0x11f   : > { %410 = vst [vmem:[#allocation2] sm:$0xff] %v406_v22  ;;  %v407_v26 = vadd.f32 %v394_v25, %v274_v21 }
 0x120   : > { %413 = vst [vmem:[#allocation2 + $0x18] sm:$0xff] %v409_v24 }
 0x121   : > { %411 = vst [vmem:[#allocation2 + $0x8] sm:$0xff] %v407_v26 }
 0x125   : > { %v420_v29 = vld [vmem:[#allocation2 + $0x10] sm:$0xff] }
 0x126   : > { %v418_v27 = vld [vmem:[#allocation2] sm:$0xff]  ;;  %424 = vst [vmem:[%s784_s2 + $0x10] sm:$0xff] %v420_v29 }
 0x127   : > { %422 = vst [vmem:[%s784_s2] sm:$0xff] %v418_v27  ;;  %v421_v30 = vld [vmem:[#allocation2 + $0x18] sm:$0xff] }
 0x128   : > { %v419_v28 = vld [vmem:[#allocation2 + $0x8] sm:$0xff]  ;;  %425 = vst [vmem:[%s784_s2 + $0x18] sm:$0xff] %v421_v30 }
 0x129   : > { %423 = vst [vmem:[%s784_s2 + $0x8] sm:$0xff] %v419_v28 }
 0x12a PF: > { %s12_s13 = sadd.s32 1, %s668_s13   ;;  %s785_s9 = smov %s656_s10 }
 0x12b   : > { %p9_p12 = scmp.ge.s32.totalorder %s12_s13, 11   ;;  %s786_s10 = smov %s721_s17 }
 0x12c   : > { %s787_s11 = smov %s664_s12  ;;  %s788_s12 = smov %s790_s14 }
 0x12d   :  { %11 = sbr.rel (!%p9_p12) target bundleno = 3 (0x3), region = 115 }

// kernel: closed_call.437
= control target key start
LH: loop header
LB: loop body
LE: loop exit
PB: predicated region body
PF: predicated region fallthrough
CT: control target
= control target key end

     0   :  { %v216_v43 = vmov 0.0   ;;  %s406_s6 = inlined_call_operand.vmem [shape: f32[32,128], index: 6, kind: input, shape index: {}, may-alias: {6,9}]   ;;  %s407_s7 = inlined_call_operand.vmem [shape: f32[32,128], index: 7, kind: input, shape index: {}, may-alias: {7,10}]   ;;  %s408_s0 = inlined_call_operand.vmem [shape: f32[32,128], index: 0, kind: input, shape index: {}]   ;;  %s409_s1 = inlined_call_operand.vmem [shape: f32[32,128], index: 1, kind: input, shape index: {}]   ;;  %s410_s2 = inlined_call_operand.vmem [shape: f32[1,128], index: 2, kind: input, shape index: {}]   ;;  %s411_s3 = inlined_call_operand.vmem [shape: f32[1,128], index: 3, kind: input, shape index: {}]   ;;  %s412_s4 = inlined_call_operand.vmem [shape: f32[1,128], index: 4, kind: input, shape index: {}]   ;;  %s413_s5 = inlined_call_operand.vmem [shape: f32[1,128], index: 5, kind: input, shape index: {}]   ;;  %s414_s8 = inlined_call_operand.vmem [shape: bf16[32,128], index: 8, kind: output, shape index: {0}]   ;;  %s415_s10 = inlined_call_operand.vmem [shape: f32[32,128], index: 10, kind: output, shape index: {2}, may-alias: {7,10}]   ;;  %s416_s9 = inlined_call_operand.vmem [shape: f32[32,128], index: 9, kind: output, shape index: {1}, may-alias: {6,9}]  }
   0x1   :  { %v88_v0 = vld [vmem:[%s406_s6] sm:$0xff]  ;;  %v89_v1 = vld [vmem:[%s406_s6 + $0x8] sm:$0xff]  ;;  %v90_v6 = vld [vmem:[%s406_s6 + $0x10] sm:$0xff] }
   0x2   :  { %v281_v2 = vld [vmem:[%s407_s7] sm:$0xff]  ;;  %v286_v3 = vld [vmem:[%s407_s7 + $0x8] sm:$0xff]  ;;  %v96_v4 = vsub.f32 0.0, %v88_v0  ;;  %v97_v5 = vsub.f32 0.0, %v89_v1  ;;  %v91_v7 = vld [vmem:[%s406_s6 + $0x18] sm:$0xff]  ;;  %v98_v10 = vsub.f32 0.0, %v90_v6 }
   0x3   :  { %v297_v8 = vld [vmem:[%s407_s7 + $0x10] sm:$0xff]  ;;  %v302_v9 = vld [vmem:[%s407_s7 + $0x18] sm:$0xff]  ;;  %v99_v11 = vsub.f32 0.0, %v91_v7  ;;  %v32_v12 = vld [vmem:[%s408_s0] sm:$0xff]  ;;  %v112_v23 = vmul.f32 0.2, %v281_v2 }
   0x4   :  { %v100_v13 = vadd.f32 %v96_v4, %v281_v2  ;;  %v101_v14 = vadd.f32 %v97_v5, %v286_v3  ;;  %v312_v15 = vld [vmem:[%s410_s2] ss:$0 sm:$0xff]  ;;  %v102_v18 = vadd.f32 %v98_v10, %v297_v8  ;;  %v33_v27 = vld [vmem:[%s408_s0 + $0x8] sm:$0xff]  ;;  %v113_v40 = vmul.f32 0.2, %v286_v3  ;;  %v34_v58 = vld [vmem:[%s408_s0 + $0x10] sm:$0xff] }
   0x5   :  { %v317_v16 = vld [vmem:[%s411_s3] ss:$0 sm:$0xff]  ;;  %v103_v19 = vadd.f32 %v99_v11, %v302_v9  ;;  %v43_v20 = vsub.f32 %v32_v12, %v312_v15  ;;  %v59_v28 = vld [vmem:[%s409_s1 + $0x8] sm:$0xff]  ;;  %v116_v32 = vsub.f32 %v281_v2, %v112_v23  ;;  %v44_v36 = vsub.f32 %v33_v27, %v312_v15  ;;  %v60_v59 = vld [vmem:[%s409_s1 + $0x10] sm:$0xff] }
   0x6   :  { %v58_v17 = vld [vmem:[%s409_s1] sm:$0xff]  ;;  %v104_v24 = vmul.f32 0.1, %v100_v13  ;;  %v105_v25 = vmul.f32 0.1, %v101_v14  ;;  %v117_v10 = vsub.f32 %v286_v3, %v113_v40  ;;  %v45_v11 = vsub.f32 %v34_v58, %v312_v15 }
   0x7   :  { %v328_v21 = vld [vmem:[%s412_s4] ss:$0 sm:$0xff]  ;;  %v106_v29 = vmul.f32 0.1, %v102_v18  ;;  %v107_v30 = vmul.f32 0.1, %v103_v19  ;;  %v54_v31 = vmul.f32 %v317_v16, %v43_v20  ;;  %v55_v42 = vmul.f32 %v317_v16, %v44_v36 }
   0x8   :  { %v333_v22 = vld [vmem:[%s413_s5] ss:$0 sm:$0xff]  ;;  %v69_v26 = vsub.f32 %v58_v17, %v328_v21  ;;  %v108_v33 = vadd.f32 %v104_v24, %v88_v0  ;;  %v109_v34 = vadd.f32 %v105_v25, %v89_v1  ;;  %v70_v39 = vsub.f32 %v59_v28, %v328_v21  ;;  %v35_v0 = vld [vmem:[%s408_s0 + $0x18] sm:$0xff] }
   0x9   :  { %v110_v37 = vadd.f32 %v106_v29, %v90_v6  ;;  %v111_v38 = vadd.f32 %v107_v30, %v91_v7  ;;  %v61_v6 = vld [vmem:[%s409_s1 + $0x18] sm:$0xff]  ;;  %v71_v12 = vsub.f32 %v60_v59, %v328_v21  ;;  %v114_v17 = vmul.f32 0.2, %v297_v8 }
   0xa   :  { %v80_v35 = vmul.f32 %v333_v22, %v69_v26  ;;  %vm120_vm0 = vcmp.gt.f32.partialorder %v108_v33, 1.0  ;;  %vm121_vm1 = vcmp.gt.f32.partialorder %v109_v34, 1.0  ;;  %v81_v5 = vmul.f32 %v333_v22, %v70_v39 }
   0xb   :  { %v196_v44 = vsel %vm120_vm0, 1.0, %v216_v43  ;;  %v197_v45 = vsel %vm121_vm1, 1.0, %v216_v43  ;;  %vm122_vm2 = vcmp.gt.f32.partialorder %v110_v37, 1.0  ;;  %vm123_vm3 = vcmp.gt.f32.partialorder %v111_v38, 1.0 }
   0xc   :  { %v84_v41 = vadd.f32 %v80_v35, %v54_v31  ;;  %v209_v46 = vpack.c.bf16 %v197_v45, %v196_v44  ;;  %v152_v47 = vsub.f32 1.0, %v196_v44  ;;  %v153_v48 = vsub.f32 1.0, %v197_v45 }
   0xd   :  { %v198_v49 = vsel %vm122_vm2, 1.0, %v216_v43  ;;  %v199_v50 = vsel %vm123_vm3, 1.0, %v216_v43  ;;  %v160_v52 = vmul.f32 0.0, %v196_v44  ;;  %v161_v53 = vmul.f32 0.0, %v197_v45 }
   0xe   :  { %v154_v51 = vsub.f32 1.0, %v198_v49  ;;  %210 = vst [vmem:[%s414_s8] sm:$0xff] %v209_v46   ;;  %v212_v54 = vpack.c.bf16 %v199_v50, %v198_v49  ;;  %v155_v55 = vsub.f32 1.0, %v199_v50  ;;  %v156_v56 = vmul.f32 %v152_v47, %v108_v33 }
   0xf   :  { %v157_v57 = vmul.f32 %v153_v48, %v109_v34  ;;  %v162_v61 = vmul.f32 0.0, %v198_v49  ;;  %v163_v62 = vmul.f32 0.0, %v199_v50  ;;  %v172_v63 = vadd.f32 %v116_v32, %v84_v41 }
  0x10   :  { %v158_v60 = vmul.f32 %v154_v51, %v110_v37  ;;  %214 = vst [vmem:[%s414_s8 + $0x8] sm:$0xff] %v212_v54   ;;  %v164_v1 = vadd.f32 %v160_v52, %v156_v56  ;;  %v159_v4 = vmul.f32 %v155_v55, %v111_v38  ;;  %v85_v14 = vadd.f32 %v81_v5, %v55_v42 }
  0x11   :  { %v165_v2 = vadd.f32 %v161_v53, %v157_v57  ;;  %176 = vst [vmem:[%s415_s10] sm:$0xff] %v172_v63  ;;  %v46_v18 = vsub.f32 %v35_v0, %v312_v15  ;;  %v56_v3 = vmul.f32 %v317_v16, %v45_v11  ;;  %v82_v19 = vmul.f32 %v333_v22, %v71_v12 }
  0x12   :  { %v166_v7 = vadd.f32 %v162_v61, %v158_v60  ;;  %168 = vst [vmem:[%s416_s9] sm:$0xff] %v164_v1  ;;  %v167_v13 = vadd.f32 %v163_v62, %v159_v4  ;;  %v72_v20 = vsub.f32 %v61_v6, %v328_v21  ;;  %v115_v23 = vmul.f32 0.2, %v302_v9 }
  0x13   :  { %169 = vst [vmem:[%s416_s9 + $0x8] sm:$0xff] %v165_v2  ;;  %v173_v24 = vadd.f32 %v117_v10, %v85_v14  ;;  %v118_v25 = vsub.f32 %v297_v8, %v114_v17  ;;  %v57_v15 = vmul.f32 %v317_v16, %v46_v18  ;;  %v86_v26 = vadd.f32 %v82_v19, %v56_v3 }
  0x14   :  { %170 = vst [vmem:[%s416_s9 + $0x10] sm:$0xff] %v166_v7  ;;  %171 = vst [vmem:[%s416_s9 + $0x18] sm:$0xff] %v167_v13  ;;  %v83_v27 = vmul.f32 %v333_v22, %v72_v20  ;;  %v119_v28 = vsub.f32 %v302_v9, %v115_v23 }
  0x15   :  { %177 = vst [vmem:[%s415_s10 + $0x8] sm:$0xff] %v173_v24  ;;  %v174_v21 = vadd.f32 %v118_v25, %v86_v26 }
  0x16   :  { %v87_v29 = vadd.f32 %v83_v27, %v57_v15 }
  0x17   :  { %178 = vst [vmem:[%s415_s10 + $0x10] sm:$0xff] %v174_v21 }
  0x18   :  { %v175_v30 = vadd.f32 %v119_v28, %v87_v29 }
  0x1a   :  { %179 = vst [vmem:[%s415_s10 + $0x18] sm:$0xff] %v175_v30 }

// kernel: closed_call.434
= control target key start
LH: loop header
LB: loop body
LE: loop exit
PB: predicated region body
PF: predicated region fallthrough
CT: control target
= control target key end

     0   :  { %s283_s1 = inlined_call_operand.vmem [shape: bf16[128,128], index: 1, kind: input, shape index: {}]   ;;  %s284_s0 = inlined_call_operand.vmem [shape: bf16[32,128], index: 0, kind: input, shape index: {}]   ;;  %s285_s2 = inlined_call_operand.vmem [shape: f32[32,128], index: 2, kind: output, shape index: {}]  }
   0x1   :  { %v216_v0 = vld [vmem:[%s283_s1] sm:$0xff]   ;;  %v217_v1 = vld [vmem:[%s283_s1 + $0x8] sm:$0xff]   ;;  %v218_v2 = vld [vmem:[%s283_s1 + $0x10] sm:$0xff]  }
   0x2   :  { %196 = vmatprep.subr.bf16.mxu0 %v216_v0  ;;  %v219_v3 = vld [vmem:[%s283_s1 + $0x18] sm:$0xff]   ;;  %v224_v4 = vld [vmem:[%s284_s0] sm:$0xff]   ;;  %v221_v6 = vld [vmem:[%s283_s1 + $0x28] sm:$0xff]  }
   0x3   :  { %197 = vmatpush3.bf16.msra.mxu0 %v216_v0  ;;  %212 = vmatprep.mubr.bf16.mxu0 %v224_v4  ;;  %v220_v5 = vld [vmem:[%s283_s1 + $0x20] sm:$0xff]   ;;  %v222_v7 = vld [vmem:[%s283_s1 + $0x30] sm:$0xff]   ;;  %v223_v8 = vld [vmem:[%s283_s1 + $0x38] sm:$0xff]  }
   0x4   :  { %198 = vmatprep.subr.bf16.mxu0 %v217_v1  ;;  %v225_v9 = vld [vmem:[%s284_s0 + $0x8] sm:$0xff]  }
   0x7   :  { %199 = vmatpush3.bf16.msra.mxu0 %v217_v1 }
   0x8   :  { %200 = vmatprep.subr.bf16.mxu0 %v218_v2 }
   0xb   :  { %201 = vmatpush3.bf16.msra.mxu0 %v218_v2 }
   0xc   :  { %202 = vmatprep.subr.bf16.mxu0 %v219_v3 }
   0xf   :  { %203 = vmatpush3.bf16.msra.mxu0 %v219_v3 }
  0x10   :  { %204 = vmatprep.subr.bf16.mxu0 %v220_v5 }
  0x13   :  { %205 = vmatpush3.bf16.msra.mxu0 %v220_v5 }
  0x14   :  { %206 = vmatprep.subr.bf16.mxu0 %v221_v6 }
  0x17   :  { %207 = vmatpush3.bf16.msra.mxu0 %v221_v6 }
  0x18   :  { %208 = vmatprep.subr.bf16.mxu0 %v222_v7 }
  0x1b   :  { %209 = vmatpush3.bf16.msra.mxu0 %v222_v7 }
  0x1c   :  { %210 = vmatprep.subr.bf16.mxu0 %v223_v8 }
  0x1f   :  { %211 = vmatpush3.bf16.msra.mxu0 %v223_v8 }
  0x22   :  { %213 = vmatmul.mubr.bf16.vlgmr.msra.gmra.mrb[0].mxu0 %v225_v9 }
  0xf5   :  { %v214_v10 = vpop.f32.mrb[0].mxu0 }
  0xf6   :  { %170 = vst [vmem:[%s285_s2 + $0x10] sm:$0xff] %v214_v10  ;;  %v138_v11 = vpop.f32.mrb[1].mxu0 }
  0xf7   :  { %168 = vst [vmem:[%s285_s2] sm:$0xff] %v138_v11  ;;  %v215_v12 = vpop.f32.mrb[2].mxu0 }
  0xf8   :  { %171 = vst [vmem:[%s285_s2 + $0x18] sm:$0xff] %v215_v12  ;;  %v141_v13 = vpop.f32.mrb[3].mxu0 }
  0xf9   :  { %169 = vst [vmem:[%s285_s2 + $0x8] sm:$0xff] %v141_v13 }

// kernel: closed_call.443
= control target key start
LH: loop header
LB: loop body
LE: loop exit
PB: predicated region body
PF: predicated region fallthrough
CT: control target
= control target key end

     0   :  { %v199_v42 = vmov 0.0   ;;  %s355_s4 = inlined_call_operand.vmem [shape: f32[32,128], index: 4, kind: input, shape index: {}, may-alias: {4,7}]   ;;  %s356_s5 = inlined_call_operand.vmem [shape: f32[32,128], index: 5, kind: input, shape index: {}, may-alias: {5,8}]   ;;  %s357_s0 = inlined_call_operand.vmem [shape: f32[32,128], index: 0, kind: input, shape index: {}]   ;;  %s358_s1 = inlined_call_operand.vmem [shape: bf16[32,128], index: 1, kind: input, shape index: {}]   ;;  %s359_s2 = inlined_call_operand.vmem [shape: f32[1,128], index: 2, kind: input, shape index: {}]   ;;  %s360_s3 = inlined_call_operand.vmem [shape: f32[1,128], index: 3, kind: input, shape index: {}]   ;;  %s361_s6 = inlined_call_operand.vmem [shape: bf16[32,128], index: 6, kind: output, shape index: {0}]   ;;  %s362_s8 = inlined_call_operand.vmem [shape: f32[32,128], index: 8, kind: output, shape index: {2}, may-alias: {5,8}]   ;;  %s363_s7 = inlined_call_operand.vmem [shape: f32[32,128], index: 7, kind: output, shape index: {1}, may-alias: {4,7}]  }
   0x1   :  { %v64_v0 = vld [vmem:[%s355_s4] sm:$0xff]  ;;  %v65_v1 = vld [vmem:[%s355_s4 + $0x8] sm:$0xff]  ;;  %v66_v6 = vld [vmem:[%s355_s4 + $0x10] sm:$0xff] }
   0x2   :  { %v254_v2 = vld [vmem:[%s356_s5] sm:$0xff]  ;;  %v259_v3 = vld [vmem:[%s356_s5 + $0x8] sm:$0xff]  ;;  %v72_v4 = vsub.f32 0.0, %v64_v0  ;;  %v73_v5 = vsub.f32 0.0, %v65_v1  ;;  %v67_v7 = vld [vmem:[%s355_s4 + $0x18] sm:$0xff]  ;;  %v74_v10 = vsub.f32 0.0, %v66_v6 }
   0x3   :  { %v270_v8 = vld [vmem:[%s356_s5 + $0x10] sm:$0xff]  ;;  %v275_v9 = vld [vmem:[%s356_s5 + $0x18] sm:$0xff]  ;;  %v75_v11 = vsub.f32 0.0, %v67_v7  ;;  %v26_v12 = vld [vmem:[%s357_s0] sm:$0xff]  ;;  %v88_v25 = vmul.f32 0.2, %v254_v2 }
   0x4   :  { %v76_v13 = vadd.f32 %v72_v4, %v254_v2  ;;  %v77_v14 = vadd.f32 %v73_v5, %v259_v3  ;;  %v285_v15 = vld [vmem:[%s359_s2] ss:$0 sm:$0xff]  ;;  %v78_v18 = vadd.f32 %v74_v10, %v270_v8  ;;  %v27_v22 = vld [vmem:[%s357_s0 + $0x8] sm:$0xff]  ;;  %v28_v31 = vld [vmem:[%s357_s0 + $0x10] sm:$0xff]  ;;  %v89_v39 = vmul.f32 0.2, %v259_v3 }
   0x5   :  { %v290_v16 = vld [vmem:[%s360_s3] ss:$0 sm:$0xff]  ;;  %v79_v19 = vadd.f32 %v75_v11, %v275_v9  ;;  %v37_v20 = vsub.f32 %v26_v12, %v285_v15  ;;  %v38_v26 = vsub.f32 %v27_v22, %v285_v15  ;;  %v92_v34 = vsub.f32 %v254_v2, %v88_v25  ;;  %v196_v57 = vld [vmem:[%s358_s1 + $0x8] sm:$0xff]   ;;  %v29_v62 = vld [vmem:[%s357_s0 + $0x18] sm:$0xff] }
   0x6   :  { %v183_v17 = vld [vmem:[%s358_s1] sm:$0xff]   ;;  %v80_v23 = vmul.f32 0.1, %v76_v13  ;;  %v81_v24 = vmul.f32 0.1, %v77_v14  ;;  %v39_v41 = vsub.f32 %v28_v31, %v285_v15  ;;  %v93_v2 = vsub.f32 %v259_v3, %v89_v39 }
   0x7   :  { %v184_v21 = vunpack.c.l.bf16 %v183_v17  ;;  %v82_v27 = vmul.f32 0.1, %v78_v18  ;;  %v83_v28 = vmul.f32 0.1, %v79_v19  ;;  %v48_v29 = vmul.f32 %v290_v16, %v37_v20 }
   0x8   :  { %v185_v30 = vunpack.c.h.bf16 %v183_v17  ;;  %v84_v32 = vadd.f32 %v80_v23, %v64_v0  ;;  %v85_v33 = vadd.f32 %v81_v24, %v65_v1  ;;  %v49_v35 = vmul.f32 %v290_v16, %v38_v26 }
   0x9   :  { %v86_v36 = vadd.f32 %v82_v27, %v66_v6  ;;  %v87_v37 = vadd.f32 %v83_v28, %v67_v7  ;;  %v60_v38 = vadd.f32 %v184_v21, %v48_v29  ;;  %v50_v5 = vmul.f32 %v290_v16, %v39_v41 }
   0xa   :  { %vm96_vm0 = vcmp.gt.f32.partialorder %v84_v32, 1.0  ;;  %vm97_vm1 = vcmp.gt.f32.partialorder %v85_v33, 1.0  ;;  %v61_v40 = vadd.f32 %v185_v30, %v49_v35  ;;  %v188_v6 = vunpack.c.l.bf16 %v196_v57 }
   0xb   :  { %v170_v43 = vsel %vm96_vm0, 1.0, %v199_v42  ;;  %v171_v44 = vsel %vm97_vm1, 1.0, %v199_v42  ;;  %vm98_vm2 = vcmp.gt.f32.partialorder %v86_v36, 1.0  ;;  %vm99_vm3 = vcmp.gt.f32.partialorder %v87_v37, 1.0 }
   0xc   :  { %v191_v45 = vpack.c.bf16 %v171_v44, %v170_v43  ;;  %v128_v46 = vsub.f32 1.0, %v170_v43  ;;  %v129_v47 = vsub.f32 1.0, %v171_v44  ;;  %v172_v48 = vsel %vm98_vm2, 1.0, %v199_v42 }
   0xd   :  { %v173_v49 = vsel %vm99_vm3, 1.0, %v199_v42  ;;  %v130_v50 = vsub.f32 1.0, %v172_v48  ;;  %v136_v51 = vmul.f32 0.0, %v170_v43  ;;  %v137_v52 = vmul.f32 0.0, %v171_v44 }
   0xe   :  { %192 = vst [vmem:[%s361_s6] sm:$0xff] %v191_v45   ;;  %v194_v53 = vpack.c.bf16 %v173_v49, %v172_v48  ;;  %v131_v54 = vsub.f32 1.0, %v173_v49  ;;  %v132_v55 = vmul.f32 %v128_v46, %v84_v32  ;;  %v133_v56 = vmul.f32 %v129_v47, %v85_v33 }
   0xf   :  { %v134_v58 = vmul.f32 %v130_v50, %v86_v36  ;;  %v138_v59 = vmul.f32 0.0, %v172_v48  ;;  %v139_v60 = vmul.f32 0.0, %v173_v49  ;;  %v148_v61 = vadd.f32 %v92_v34, %v60_v38 }
  0x10   :  { %197 = vst [vmem:[%s361_s6 + $0x8] sm:$0xff] %v194_v53   ;;  %v140_v63 = vadd.f32 %v136_v51, %v132_v55  ;;  %v141_v0 = vadd.f32 %v137_v52, %v133_v56  ;;  %v135_v1 = vmul.f32 %v131_v54, %v87_v37  ;;  %v90_v7 = vmul.f32 0.2, %v270_v8 }
  0x11   :  { %v142_v4 = vadd.f32 %v138_v59, %v134_v58  ;;  %152 = vst [vmem:[%s362_s8] sm:$0xff] %v148_v61  ;;  %v149_v3 = vadd.f32 %v93_v2, %v61_v40  ;;  %v40_v11 = vsub.f32 %v29_v62, %v285_v15  ;;  %v189_v12 = vunpack.c.h.bf16 %v196_v57 }
  0x12   :  { %144 = vst [vmem:[%s363_s7] sm:$0xff] %v140_v63  ;;  %145 = vst [vmem:[%s363_s7 + $0x8] sm:$0xff] %v141_v0  ;;  %v143_v10 = vadd.f32 %v139_v60, %v135_v1  ;;  %v62_v13 = vadd.f32 %v188_v6, %v50_v5  ;;  %v94_v14 = vsub.f32 %v270_v8, %v90_v7  ;;  %v91_v17 = vmul.f32 0.2, %v275_v9 }
  0x13   :  { %146 = vst [vmem:[%s363_s7 + $0x10] sm:$0xff] %v142_v4  ;;  %153 = vst [vmem:[%s362_s8 + $0x8] sm:$0xff] %v149_v3  ;;  %v51_v15 = vmul.f32 %v290_v16, %v40_v11 }
  0x14   :  { %147 = vst [vmem:[%s363_s7 + $0x18] sm:$0xff] %v143_v10  ;;  %v150_v18 = vadd.f32 %v94_v14, %v62_v13  ;;  %v95_v19 = vsub.f32 %v275_v9, %v91_v17 }
  0x15   :  { %v63_v20 = vadd.f32 %v189_v12, %v51_v15 }
  0x16   :  { %154 = vst [vmem:[%s362_s8 + $0x10] sm:$0xff] %v150_v18 }
  0x17   :  { %v151_v8 = vadd.f32 %v95_v19, %v63_v20 }
  0x19   :  { %155 = vst [vmem:[%s362_s8 + $0x18] sm:$0xff] %v151_v8 }

// kernel: closed_call.448
= control target key start
LH: loop header
LB: loop body
LE: loop exit
PB: predicated region body
PF: predicated region fallthrough
CT: control target
= control target key end

     0   :  { %v237_v1 = vmov 0   ;;  %s316_s1 = inlined_call_operand.vmem [shape: bf16[128,256], index: 1, kind: input, shape index: {}]   ;;  %s317_s0 = inlined_call_operand.vmem [shape: bf16[16,128], index: 0, kind: input, shape index: {}]   ;;  %s318_s2 = inlined_call_operand.vmem [shape: f32[16,256], index: 2, kind: output, shape index: {}]  }
   0x1   :  { %v212_v0 = vld [vmem:[%s316_s1 + $0x4] ss:$8 sps:$4 sm:$0xff]   ;;  %160 = vmatprep.mubr.bf16.mxu0 %v237_v1  ;;  %v214_v2 = vld [vmem:[%s316_s1] ss:$8 sps:$4 sm:$0xff]   ;;  %v215_v3 = vld [vmem:[%s316_s1 + $0x14] ss:$8 sps:$4 sm:$0xff]  }
   0x2   :  { %128 = vmatprep.subr.bf16.mxu0 %v212_v0  ;;  %v217_v4 = vld [vmem:[%s316_s1 + $0x10] ss:$8 sps:$4 sm:$0xff]   ;;  %v218_v5 = vld [vmem:[%s316_s1 + $0x24] ss:$8 sps:$4 sm:$0xff]   ;;  %v220_v6 = vld [vmem:[%s316_s1 + $0x20] ss:$8 sps:$4 sm:$0xff]  }
   0x3   :  { %129 = vmatpush1.bf16.msra.mxu0 %v214_v2  ;;  %v221_v7 = vld [vmem:[%s316_s1 + $0x34] ss:$8 sps:$4 sm:$0xff]   ;;  %v223_v8 = vld [vmem:[%s316_s1 + $0x30] ss:$8 sps:$4 sm:$0xff]   ;;  %v224_v9 = vld [vmem:[%s316_s1 + $0x44] ss:$8 sps:$4 sm:$0xff]  }
   0x4   :  { %130 = vmatprep.subr.bf16.mxu0 %v215_v3  ;;  %v226_v10 = vld [vmem:[%s316_s1 + $0x40] ss:$8 sps:$4 sm:$0xff]   ;;  %v227_v11 = vld [vmem:[%s316_s1 + $0x54] ss:$8 sps:$4 sm:$0xff]   ;;  %v229_v12 = vld [vmem:[%s316_s1 + $0x50] ss:$8 sps:$4 sm:$0xff]  }
   0x5   :  { %v230_v13 = vld [vmem:[%s316_s1 + $0x64] ss:$8 sps:$4 sm:$0xff]   ;;  %v232_v14 = vld [vmem:[%s316_s1 + $0x60] ss:$8 sps:$4 sm:$0xff]   ;;  %v233_v15 = vld [vmem:[%s316_s1 + $0x74] ss:$8 sps:$4 sm:$0xff]  }
   0x6   :  { %v235_v16 = vld [vmem:[%s316_s1 + $0x70] ss:$8 sps:$4 sm:$0xff]   ;;  %v236_v17 = vld [vmem:[%s317_s0] sm:$0xff]  }
   0x7   :  { %131 = vmatpush1.bf16.msra.mxu0 %v217_v4 }
   0x8   :  { %132 = vmatprep.subr.bf16.mxu0 %v218_v5 }
   0xb   :  { %133 = vmatpush1.bf16.msra.mxu0 %v220_v6 }
   0xc   :  { %134 = vmatprep.subr.bf16.mxu0 %v221_v7 }
   0xf   :  { %135 = vmatpush1.bf16.msra.mxu0 %v223_v8 }
  0x10   :  { %136 = vmatprep.subr.bf16.mxu0 %v224_v9 }
  0x13   :  { %137 = vmatpush1.bf16.msra.mxu0 %v226_v10 }
  0x14   :  { %138 = vmatprep.subr.bf16.mxu0 %v227_v11 }
  0x17   :  { %139 = vmatpush1.bf16.msra.mxu0 %v229_v12 }
  0x18   :  { %140 = vmatprep.subr.bf16.mxu0 %v230_v13 }
  0x1b   :  { %141 = vmatpush1.bf16.msra.mxu0 %v232_v14 }
  0x1c   :  { %142 = vmatprep.subr.bf16.mxu0 %v233_v15 }
  0x1f   :  { %143 = vmatpush1.bf16.msra.mxu0 %v235_v16 }
  0x22   :  { %161 = vmatmul.mubr.bf16.vlgmr.msra.gmra.mrb[0].mxu0 %v236_v17 }
  0xf5   :  { %v162_v18 = vpop.f32.mrb[0].mxu0 }
  0xf6   :  { %186 = vst [vmem:[%s318_s2] sm:$0xff] %v162_v18  ;;  %v164_v19 = vpop.f32.mrb[1].mxu0 }
  0xf7   :  { %187 = vst [vmem:[%s318_s2 + $0x8] sm:$0xff] %v164_v19  ;;  %v166_v20 = vpop.f32.mrb[2].mxu0 }
  0xf8   :  { %188 = vst [vmem:[%s318_s2 + $0x10] sm:$0xff] %v166_v20  ;;  %v168_v21 = vpop.f32.mrb[3].mxu0 }
  0xf9   :  { %189 = vst [vmem:[%s318_s2 + $0x18] sm:$0xff] %v168_v21 }

// kernel: closed_call.450
= control target key start
LH: loop header
LB: loop body
LE: loop exit
PB: predicated region body
PF: predicated region fallthrough
CT: control target
= control target key end

     0   :  { %v14_v0 = vlaneseq  ;;  %v104_v6 = vmov 0.0   ;;  %v105_v11 = vmov 1966171168   ;;  %s157_s0 = inlined_call_operand.vmem [shape: f32[8,256], index: 0, kind: input, shape index: {}]   ;;  %s158_s1 = inlined_call_operand.vmem [shape: f32[1,256], index: 1, kind: output, shape index: {0}]   ;;  %s159_s2 = inlined_call_operand.vmem [shape: f32[1,256], index: 2, kind: output, shape index: {1}]  }
   0x1   :  { %v20_v1 = vld [vmem:[%s157_s0] sm:$0xff]  ;;  %v21_v2 = vld [vmem:[%s157_s0 + $0x8] sm:$0xff]  ;;  %v39_v12 = vunpack.c.l.s4 %v105_v11 }
   0x2   :  { %vm127_vm0 = vcmp.lt.s32.totalorder %v14_v0, 256  ;;  %v23_v4 = vrot.slane %v20_v1, 4  ;;  %v29_v5 = vrot.slane %v21_v2, 4  ;;  %v60_v7 = vmul.f32 %v20_v1, %v20_v1 }
   0x3   :  { %18 = vst.msk [vmem:[%s158_s1] sm:$0x3] %vm127_vm0, %v104_v6  ;;  %19 = vst.msk [vmem:[%s159_s2] sm:$0x3] %vm127_vm0, %v104_v6  ;;  %v61_v8 = vmul.f32 %v21_v2, %v21_v2  ;;  %v40_v21 = vunpack.c.0.s8 %v39_v12  ;;  %v42_v22 = vshrl.u32 %v14_v0, 7 }
   0x4   :  { %v24_v9 = vadd.f32 %v23_v4, %v20_v1  ;;  %v30_v10 = vadd.f32 %v29_v5, %v21_v2  ;;  %v62_v13 = vrot.slane %v60_v7, 4 }
   0x5   :  { %v68_v14 = vrot.slane %v61_v8, 4  ;;  %v43_v31 = vsub.s32 %v40_v21, %v42_v22 }
   0x6   :  { %v25_v15 = vrot.slane %v24_v9, 2  ;;  %v31_v16 = vrot.slane %v30_v10, 2  ;;  %v63_v17 = vadd.f32 %v62_v13, %v60_v7 }
   0x7   :  { %v69_v18 = vadd.f32 %v68_v14, %v61_v8 }
   0x8   :  { %v26_v19 = vadd.f32 %v25_v15, %v24_v9  ;;  %v32_v20 = vadd.f32 %v31_v16, %v30_v10  ;;  %v64_v23 = vrot.slane %v63_v17, 2 }
   0x9   :  { %v70_v24 = vrot.slane %v69_v18, 2 }
   0xa   :  { %v27_v25 = vrot.slane %v26_v19, 1  ;;  %v33_v26 = vrot.slane %v32_v20, 1  ;;  %v65_v27 = vadd.f32 %v64_v23, %v63_v17  ;;  %v22_v38 = vld [vmem:[%s158_s1] sm:$0x3] }
   0xb   :  { %v71_v28 = vadd.f32 %v70_v24, %v69_v18  ;;  %v59_v43 = vld [vmem:[%s159_s2] sm:$0x3] }
   0xc   :  { %v28_v29 = vadd.f32 %v27_v25, %v26_v19  ;;  %v34_v30 = vadd.f32 %v33_v26, %v32_v20  ;;  %v66_v32 = vrot.slane %v65_v27, 1 }
   0xd   :  { %v72_v33 = vrot.slane %v71_v28, 1 }
   0xe   :  { %v37_v34 = vcombine.low %v28_v29, %v34_v30  ;;  %v67_v35 = vadd.f32 %v66_v32, %v65_v27 }
   0xf   :  { %v73_v36 = vadd.f32 %v72_v33, %v71_v28 }
  0x10   :  { %v44_v37 = vrot.slane %v37_v34, %v43_v31 }
  0x11   :  { %v76_v39 = vcombine.low %v67_v35, %v73_v36 }
  0x12   :  { %v51_v40 = vrot.slane %v44_v37, %v43_v31 }
  0x13   :  { %v83_v41 = vrot.slane %v76_v39, %v43_v31 }
  0x14   :  { %v53_v42 = vadd.f32 %v51_v40, %v22_v38 }
  0x15   :  { %v90_v44 = vrot.slane %v83_v41, %v43_v31 }
  0x16   :  { %58 = vst.msk [vmem:[%s158_s1] sm:$0x3] %vm127_vm0, %v53_v42 }
  0x17   :  { %v92_v45 = vadd.f32 %v90_v44, %v59_v43 }
  0x19   :  { %93 = vst.msk [vmem:[%s159_s2] sm:$0x3] %vm127_vm0, %v92_v45 }

// kernel: closed_call.444
= control target key start
LH: loop header
LB: loop body
LE: loop exit
PB: predicated region body
PF: predicated region fallthrough
CT: control target
= control target key end

     0   :  { %s717_s9 = smov 0   ;;  %s719_s10 = smov 0   ;;  %s819_s0 = inlined_call_operand.vmem [shape: bf16[16,1152], index: 0, kind: input, shape index: {}]   ;;  %s820_s1 = inlined_call_operand.vmem [shape: bf16[1152,256], index: 1, kind: input, shape index: {}]   ;;  %s821_s2 = inlined_call_operand.vmem [shape: f32[16,256], index: 2, kind: output, shape index: {}]  }
   0x1   :  { %s721_s11 = smov 0   ;;  %s723_s12 = smov 0  }
   0x2   :  { %s725_s13 = smov 0  }
   0x3 LB: > { %s24_s14 = sadd.s32 1, %s694_s12  ;;  %p47_p1 = scmp.ne.s32.totalorder %s686_s10, %s682_s9  ;;  %s698_s13 = sphi %s725_s13, %s12_s13   ;;  %s694_s12 = sphi %s723_s12, %s825_s12   ;;  %s690_s11 = sphi %s721_s11, %s824_s11   ;;  %s686_s10 = sphi %s719_s10, %s823_s10   ;;  %s682_s9 = sphi %s717_s9, %s822_s9  }
   0x4   : > { %p25_p0 = scmp.ge.s32.totalorder %s24_s14, 9  ;;  %p48_p2 = scmp.eq.s32.totalorder %s698_s13, 0 }
   0x5   : > { %s40_s16 = sadd.s32 1, %s686_s10  ;;  %p561_p5 = scmp.ge.s32.totalorder %s698_s13, 9 }
   0x6   : > { %s827_s14 = smov (%p25_p0, %s24_s14), 0  ;;  %p49_p3 = por %p48_p2, %p47_p1 }
   0x7   : > { %s36_s15 = ssub.s32 %s694_s12, %s827_s14  ;;  %129 = sbr.rel (%p561_p5) target bundleno = 21 (0x15), region = 16 }
   0x8   : > { %p38_p4 = scmp.eq.s32.totalorder %s36_s15, 0 }
   0xa   : > { %s752_s17 = scalar_select %p38_p4, %s686_s10, %s40_s16  }
   0xe   : > { %132 = sbr.rel (!%p49_p3) target bundleno = 21 (0x15), region = 20  ;;  %s134_s18 = sand.u32 (%p49_p3), 1, %s686_s10  }
   0xf   : > { %s563_s19 = sshll.u32 (%p49_p3), %s694_s12, 2  ;;  %s562_s20 = sshll.u32 (%p49_p3), %s134_s18, 3 }
  0x10   : > { %s141_s23 = scalar_lea.vmem (%p49_p3), %s819_s0, %s563_s19  ;;  %s136_s24 = scalar_lea.vmem (%p49_p3), [#allocation3], %s562_s20 }
  0x11   : > { %v157_v0 = vld [vmem:[%s141_s23] sm:$0xf] (%p49_p3)  ;;  %v159_v1 = vld [vmem:[%s141_s23 + $0x24] sm:$0xf] (%p49_p3) }
  0x12   : > { %158 = vst [vmem:[%s136_s24] sm:$0xf] (%p49_p3), %v157_v0  ;;  %160 = vst [vmem:[%s136_s24 + $0x4] sm:$0xf] (%p49_p3), %v159_v1 }
  0x15 PF: > { %p564_p6 = scmp.ge.s32.totalorder %s698_s13, 1  ;;  %p201_p7 = scmp.lt.s32.totalorder %s698_s13, 10 }
  0x17   : > { %p202_p8 = pnand %p564_p6, %p201_p7 }
  0x18   : > { %s208_s25 = sand.u32 (!%p202_p8), 1, %s682_s9   ;;  %s566_s26 = sshll.u32 (!%p202_p8), %s690_s11, 4 }
  0x19   : > { %205 = sbr.rel (%p202_p8) target bundleno = 298 (0x12a), region = 65  ;;  %s764_s27 = sshll.u32 (!%p202_p8), %s208_s25, 3 }
  0x1a   : > { %p247_p9 = scmp.lt.s32.totalorder (!%p202_p8), %s566_s26, 143  ;;  %s210_s4 = scalar_lea.vmem (!%p202_p8), [#allocation3], %s764_s27 }
  0x1b   : > { %p569_p10 = scmp.ne.s32.totalorder (!%p202_p8), %s690_s11, 0 }
  0x20   : > { %s829_s26 = smov (!%p247_p9, %s566_s26), 143  ;;  %273 = sbr.rel (%p569_p10) target bundleno = 39 (0x27), region = 73 }
  0x21   : > { %s592_s28 = sshll.u32 %s829_s26, 3  ;;  %v700_v2 = vmov (!%p569_p10), 0.0  }
  0x22   : > { %s769_s3 = scalar_lea.vmem %s820_s1, %s592_s28  ;;  %274 = vst [vmem:[#allocation2] sm:$0xff] (!%p569_p10), %v700_v2  ;;  %275 = vst [vmem:[#allocation2 + $0x8] sm:$0xff] (!%p569_p10), %v700_v2 }
  0x23   : > { %276 = vst [vmem:[#allocation2 + $0x10] sm:$0xff] (!%p569_p10), %v700_v2  ;;  %277 = vst [vmem:[#allocation2 + $0x18] sm:$0xff] (!%p569_p10), %v700_v2 }
  0x27 PF: > { %v635_v3 = vld [vmem:[%s769_s3 + $0x4] ss:$8 sps:$4 sm:$0xff]   ;;  %v637_v4 = vld [vmem:[%s769_s3] ss:$8 sps:$4 sm:$0xff]   ;;  %v701_v5 = vmov 0   ;;  %p587_p11 = scmp.ne.s32.totalorder %s690_s11, 8 }
  0x28   : > { %418 = vmatprep.mubr.bf16.mxu0 %v701_v5  ;;  %386 = vmatprep.subr.bf16.mxu0 %v635_v3  ;;  %v638_v6 = vld [vmem:[%s769_s3 + $0x14] ss:$8 sps:$4 sm:$0xff]   ;;  %v640_v7 = vld [vmem:[%s769_s3 + $0x10] ss:$8 sps:$4 sm:$0xff]   ;;  %v641_v8 = vld [vmem:[%s769_s3 + $0x24] ss:$8 sps:$4 sm:$0xff]  }
  0x29   : > { %387 = vmatpush1.bf16.msra.mxu0 %v637_v4  ;;  %v643_v9 = vld [vmem:[%s769_s3 + $0x20] ss:$8 sps:$4 sm:$0xff]   ;;  %v644_v10 = vld [vmem:[%s769_s3 + $0x34] ss:$8 sps:$4 sm:$0xff]   ;;  %v646_v11 = vld [vmem:[%s769_s3 + $0x30] ss:$8 sps:$4 sm:$0xff]  }
  0x2a   : > { %388 = vmatprep.subr.bf16.mxu0 %v638_v6  ;;  %v647_v12 = vld [vmem:[%s769_s3 + $0x44] ss:$8 sps:$4 sm:$0xff]   ;;  %v649_v13 = vld [vmem:[%s769_s3 + $0x40] ss:$8 sps:$4 sm:$0xff]   ;;  %v650_v14 = vld [vmem:[%s769_s3 + $0x54] ss:$8 sps:$4 sm:$0xff]  }
  0x2b   : > { %v652_v15 = vld [vmem:[%s769_s3 + $0x50] ss:$8 sps:$4 sm:$0xff]   ;;  %v653_v16 = vld [vmem:[%s769_s3 + $0x64] ss:$8 sps:$4 sm:$0xff]   ;;  %v655_v17 = vld [vmem:[%s769_s3 + $0x60] ss:$8 sps:$4 sm:$0xff]  }
  0x2c   : > { %v656_v18 = vld [vmem:[%s769_s3 + $0x74] ss:$8 sps:$4 sm:$0xff]   ;;  %v658_v19 = vld [vmem:[%s769_s3 + $0x70] ss:$8 sps:$4 sm:$0xff]   ;;  %v659_v20 = vld [vmem:[%s210_s4] sm:$0xff]  }
  0x2d   : > { %389 = vmatpush1.bf16.msra.mxu0 %v640_v7  ;;  %v278_v21 = vld [vmem:[#allocation2] sm:$0xff]  ;;  %v279_v22 = vld [vmem:[#allocation2 + $0x8] sm:$0xff]  ;;  %v280_v24 = vld [vmem:[#allocation2 + $0x10] sm:$0xff] }
  0x2e   : > { %390 = vmatprep.subr.bf16.mxu0 %v641_v8  ;;  %v281_v27 = vld [vmem:[#allocation2 + $0x18] sm:$0xff] }
  0x31   : > { %391 = vmatpush1.bf16.msra.mxu0 %v643_v9 }
  0x32   : > { %392 = vmatprep.subr.bf16.mxu0 %v644_v10 }
  0x35   : > { %393 = vmatpush1.bf16.msra.mxu0 %v646_v11 }
  0x36   : > { %394 = vmatprep.subr.bf16.mxu0 %v647_v12 }
  0x39   : > { %395 = vmatpush1.bf16.msra.mxu0 %v649_v13 }
  0x3a   : > { %396 = vmatprep.subr.bf16.mxu0 %v650_v14 }
  0x3d   : > { %397 = vmatpush1.bf16.msra.mxu0 %v652_v15 }
  0x3e   : > { %398 = vmatprep.subr.bf16.mxu0 %v653_v16 }
  0x41   : > { %399 = vmatpush1.bf16.msra.mxu0 %v655_v17 }
  0x42   : > { %400 = vmatprep.subr.bf16.mxu0 %v656_v18 }
  0x45   : > { %401 = vmatpush1.bf16.msra.mxu0 %v658_v19 }
  0x48   : > { %419 = vmatmul.mubr.bf16.vlgmr.msra.gmra.mrb[0].mxu0 %v659_v20 }
 0x11b   : > { %v420_v23 = vpop.f32.mrb[0].mxu0  ;;  %440 = sbr.rel (%p587_p11) target bundleno = 298 (0x12a), region = 77 }
 0x11c   : > { %v429_v25 = vadd.f32 %v420_v23, %v278_v21  ;;  %v422_v26 = vpop.f32.mrb[1].mxu0 }
 0x11d   : > { %v430_v28 = vadd.f32 %v422_v26, %v279_v22  ;;  %v424_v29 = vpop.f32.mrb[2].mxu0 }
 0x11e   : > { %433 = vst [vmem:[#allocation2] sm:$0xff] %v429_v25  ;;  %v431_v30 = vadd.f32 %v424_v29, %v280_v24  ;;  %v426_v31 = vpop.f32.mrb[3].mxu0 }
 0x11f   : > { %434 = vst [vmem:[#allocation2 + $0x8] sm:$0xff] %v430_v28  ;;  %v432_v32 = vadd.f32 %v426_v31, %v281_v27 }
 0x120   : > { %435 = vst [vmem:[#allocation2 + $0x10] sm:$0xff] %v431_v30 }
 0x121   : > { %436 = vst [vmem:[#allocation2 + $0x18] sm:$0xff] %v432_v32 }
 0x125   : > { %v441_v33 = vld [vmem:[#allocation2] sm:$0xff] }
 0x126   : > { %v442_v34 = vld [vmem:[#allocation2 + $0x8] sm:$0xff]  ;;  %445 = vst [vmem:[%s821_s2] sm:$0xff] %v441_v33 }
 0x127   : > { %v443_v35 = vld [vmem:[#allocation2 + $0x10] sm:$0xff]  ;;  %446 = vst [vmem:[%s821_s2 + $0x8] sm:$0xff] %v442_v34 }
 0x128   : > { %447 = vst [vmem:[%s821_s2 + $0x10] sm:$0xff] %v443_v35  ;;  %v444_v36 = vld [vmem:[#allocation2 + $0x18] sm:$0xff] }
 0x129   : > { %448 = vst [vmem:[%s821_s2 + $0x18] sm:$0xff] %v444_v36 }
 0x12a PF: > { %s12_s13 = sadd.s32 1, %s698_s13   ;;  %s822_s9 = smov %s686_s10 }
 0x12b   : > { %p9_p12 = scmp.ge.s32.totalorder %s12_s13, 11   ;;  %s823_s10 = smov %s752_s17 }
 0x12c   : > { %s824_s11 = smov %s694_s12  ;;  %s825_s12 = smov %s827_s14 }
 0x12d   :  { %11 = sbr.rel (!%p9_p12) target bundleno = 3 (0x3), region = 115 }

// kernel: closed_call.446
= control target key start
LH: loop header
LB: loop body
LE: loop exit
PB: predicated region body
PF: predicated region fallthrough
CT: control target
= control target key end

     0   :  { %v27_v0 = vlaneseq  ;;  %v106_v30 = vmov 0.0   ;;  %s189_s3 = inlined_call_operand.vmem [shape: f32[8,256], index: 3, kind: input, shape index: {}, may-alias: {3,6}]   ;;  %s190_s4 = inlined_call_operand.vmem [shape: f32[8,256], index: 4, kind: input, shape index: {}, may-alias: {4,7}]   ;;  %s191_s1 = inlined_call_operand.vmem [shape: f32[1,256], index: 1, kind: input, shape index: {}]   ;;  %s192_s2 = inlined_call_operand.vmem [shape: f32[1,256], index: 2, kind: input, shape index: {}]   ;;  %s193_s0 = inlined_call_operand.vmem [shape: f32[8,256], index: 0, kind: input, shape index: {}]   ;;  %s194_s5 = inlined_call_operand.vmem [shape: f32[8,256], index: 5, kind: output, shape index: {0}]   ;;  %s195_s7 = inlined_call_operand.vmem [shape: f32[8,256], index: 7, kind: output, shape index: {2}, may-alias: {4,7}]   ;;  %s196_s6 = inlined_call_operand.vmem [shape: f32[8,256], index: 6, kind: output, shape index: {1}, may-alias: {3,6}]  }
   0x1   :  { %v53_v1 = vld [vmem:[%s189_s3] sm:$0xff]  ;;  %v54_v3 = vld [vmem:[%s189_s3 + $0x8] sm:$0xff] }
   0x2   :  { %v55_v2 = vld [vmem:[%s190_s4] sm:$0xff]  ;;  %v57_v4 = vsub.f32 0.0, %v53_v1  ;;  %v56_v5 = vld [vmem:[%s190_s4 + $0x8] sm:$0xff]  ;;  %v58_v6 = vsub.f32 0.0, %v54_v3  ;;  %v28_v7 = vshrl.u32 %v27_v0, 7 }
   0x3   :  { %v25_v10 = vld [vmem:[%s191_s1] sm:$0x3]  ;;  %v65_v13 = vmul.f32 0.2, %v55_v2  ;;  %v66_v15 = vmul.f32 0.2, %v56_v5 }
   0x4   :  { %v59_v8 = vadd.f32 %v57_v4, %v55_v2  ;;  %v60_v9 = vadd.f32 %v58_v6, %v56_v5  ;;  %v39_v11 = vld [vmem:[%s192_s2] sm:$0x3]  ;;  %v29_v12 = vsub.s32 0, %v28_v7  ;;  %v33_v14 = vsub.s32 1, %v28_v7  ;;  %v24_v19 = vld [vmem:[%s193_s0 + $0x8] sm:$0xff] }
   0x5   :  { %v23_v18 = vld [vmem:[%s193_s0] sm:$0xff]  ;;  %v67_v27 = vsub.f32 %v55_v2, %v65_v13  ;;  %v68_v29 = vsub.f32 %v56_v5, %v66_v15 }
   0x6   :  { %v61_v16 = vmul.f32 0.1, %v59_v8  ;;  %v62_v17 = vmul.f32 0.1, %v60_v9  ;;  %v30_v20 = vrot.slane %v25_v10, %v29_v12  ;;  %v44_v21 = vrot.slane %v39_v11, %v29_v12 }
   0x7   :  { %v34_v22 = vrot.slane %v25_v10, %v33_v14  ;;  %v48_v23 = vrot.slane %v39_v11, %v33_v14 }
   0x8   :  { %v63_v24 = vadd.f32 %v61_v16, %v53_v1  ;;  %v64_v25 = vadd.f32 %v62_v17, %v54_v3  ;;  %v37_v26 = vsub.f32 %v23_v18, %v30_v20 }
   0x9   :  { %v38_v28 = vsub.f32 %v24_v19, %v34_v22 }
   0xa   :  { %vm69_vm0 = vcmp.gt.f32.partialorder %v63_v24, 1.0  ;;  %vm70_vm1 = vcmp.gt.f32.partialorder %v64_v25, 1.0  ;;  %v51_v33 = vmul.f32 %v44_v21, %v37_v26 }
   0xb   :  { %v103_v31 = vsel %vm69_vm0, 1.0, %v106_v30  ;;  %v104_v32 = vsel %vm70_vm1, 1.0, %v106_v30  ;;  %v52_v34 = vmul.f32 %v48_v23, %v38_v28 }
   0xc   :  { %75 = vst [vmem:[%s194_s5] sm:$0xff] %v103_v31  ;;  %v77_v35 = vsub.f32 1.0, %v103_v31  ;;  %v81_v36 = vmul.f32 0.0, %v103_v31  ;;  %76 = vst [vmem:[%s194_s5 + $0x8] sm:$0xff] %v104_v32  ;;  %v78_v37 = vsub.f32 1.0, %v104_v32  ;;  %v82_v38 = vmul.f32 0.0, %v104_v32 }
   0xd   :  { %v87_v39 = vadd.f32 %v67_v27, %v51_v33  ;;  %v88_v40 = vadd.f32 %v68_v29, %v52_v34 }
   0xe   :  { %v79_v41 = vmul.f32 %v77_v35, %v63_v24  ;;  %v80_v42 = vmul.f32 %v78_v37, %v64_v25 }
   0xf   :  { %89 = vst [vmem:[%s195_s7] sm:$0xff] %v87_v39  ;;  %90 = vst [vmem:[%s195_s7 + $0x8] sm:$0xff] %v88_v40 }
  0x10   :  { %v83_v43 = vadd.f32 %v81_v36, %v79_v41  ;;  %v84_v44 = vadd.f32 %v82_v38, %v80_v42 }
  0x12   :  { %85 = vst [vmem:[%s196_s6] sm:$0xff] %v83_v43  ;;  %86 = vst [vmem:[%s196_s6 + $0x8] sm:$0xff] %v84_v44 }

// kernel: closed_call.451
= control target key start
LH: loop header
LB: loop body
LE: loop exit
PB: predicated region body
PF: predicated region fallthrough
CT: control target
= control target key end

     0   :  { %v36_v0 = vlaneseq  ;;  %v147_v38 = vmov 0.0   ;;  %s262_s6 = inlined_call_operand.vmem [shape: f32[8,256], index: 6, kind: input, shape index: {}, may-alias: {6,9}]   ;;  %s263_s7 = inlined_call_operand.vmem [shape: f32[8,256], index: 7, kind: input, shape index: {}, may-alias: {7,10}]   ;;  %s264_s2 = inlined_call_operand.vmem [shape: f32[1,256], index: 2, kind: input, shape index: {}]   ;;  %s265_s3 = inlined_call_operand.vmem [shape: f32[1,256], index: 3, kind: input, shape index: {}]   ;;  %s266_s4 = inlined_call_operand.vmem [shape: f32[1,256], index: 4, kind: input, shape index: {}]   ;;  %s267_s5 = inlined_call_operand.vmem [shape: f32[1,256], index: 5, kind: input, shape index: {}]   ;;  %s268_s0 = inlined_call_operand.vmem [shape: f32[8,256], index: 0, kind: input, shape index: {}]   ;;  %s269_s1 = inlined_call_operand.vmem [shape: f32[8,256], index: 1, kind: input, shape index: {}]   ;;  %s270_s8 = inlined_call_operand.vmem [shape: f32[8,256], index: 8, kind: output, shape index: {0}]   ;;  %s271_s10 = inlined_call_operand.vmem [shape: f32[8,256], index: 10, kind: output, shape index: {2}, may-alias: {7,10}]   ;;  %s272_s9 = inlined_call_operand.vmem [shape: f32[8,256], index: 9, kind: output, shape index: {1}, may-alias: {6,9}]  }
   0x1   :  { %v94_v1 = vld [vmem:[%s262_s6] sm:$0xff]  ;;  %v95_v3 = vld [vmem:[%s262_s6 + $0x8] sm:$0xff] }
   0x2   :  { %v96_v2 = vld [vmem:[%s263_s7] sm:$0xff]  ;;  %v98_v4 = vsub.f32 0.0, %v94_v1  ;;  %v215_v5 = vld [vmem:[%s263_s7 + $0x8] sm:$0xff]  ;;  %v99_v6 = vsub.f32 0.0, %v95_v3  ;;  %v37_v8 = vshrl.u32 %v36_v0, 7 }
   0x3   :  { %v34_v7 = vld [vmem:[%s264_s2] sm:$0x3]  ;;  %v106_v14 = vmul.f32 0.2, %v96_v2  ;;  %v107_v21 = vmul.f32 0.2, %v215_v5 }
   0x4   :  { %v48_v9 = vld [vmem:[%s265_s3] sm:$0x3]  ;;  %v100_v10 = vadd.f32 %v98_v4, %v96_v2  ;;  %v101_v11 = vadd.f32 %v99_v6, %v215_v5  ;;  %v38_v16 = vsub.s32 0, %v37_v8  ;;  %v42_v18 = vsub.s32 1, %v37_v8  ;;  %v33_v26 = vld [vmem:[%s268_s0 + $0x8] sm:$0xff] }
   0x5   :  { %v64_v12 = vld [vmem:[%s266_s4] sm:$0x3]  ;;  %v108_v29 = vsub.f32 %v96_v2, %v106_v14  ;;  %v63_v36 = vld [vmem:[%s269_s1 + $0x8] sm:$0xff]  ;;  %v109_v54 = vsub.f32 %v215_v5, %v107_v21 }
   0x6   :  { %v78_v13 = vld [vmem:[%s267_s5] sm:$0x3]  ;;  %v102_v19 = vmul.f32 0.1, %v100_v10  ;;  %v103_v20 = vmul.f32 0.1, %v101_v11  ;;  %v39_v22 = vrot.slane %v34_v7, %v38_v16  ;;  %v53_v23 = vrot.slane %v48_v9, %v38_v16 }
   0x7   :  { %v32_v15 = vld [vmem:[%s268_s0] sm:$0xff]  ;;  %v69_v24 = vrot.slane %v64_v12, %v38_v16  ;;  %v83_v25 = vrot.slane %v78_v13, %v38_v16  ;;  %v43_v30 = vrot.slane %v34_v7, %v42_v18  ;;  %v57_v33 = vrot.slane %v48_v9, %v42_v18 }
   0x8   :  { %v62_v17 = vld [vmem:[%s269_s1] sm:$0xff]  ;;  %v104_v27 = vadd.f32 %v102_v19, %v94_v1  ;;  %v105_v28 = vadd.f32 %v103_v20, %v95_v3  ;;  %v46_v31 = vsub.f32 %v32_v15, %v39_v22  ;;  %v73_v34 = vrot.slane %v64_v12, %v42_v18 }
   0x9   :  { %v76_v32 = vsub.f32 %v62_v17, %v69_v24  ;;  %v47_v35 = vsub.f32 %v33_v26, %v43_v30  ;;  %v87_v37 = vrot.slane %v78_v13, %v42_v18 }
   0xa   :  { %vm110_vm0 = vcmp.gt.f32.partialorder %v104_v27, 1.0  ;;  %vm111_vm1 = vcmp.gt.f32.partialorder %v105_v28, 1.0  ;;  %v60_v41 = vmul.f32 %v53_v23, %v46_v31  ;;  %v77_v49 = vsub.f32 %v63_v36, %v73_v34 }
   0xb   :  { %v144_v39 = vsel %vm110_vm0, 1.0, %v147_v38  ;;  %v145_v40 = vsel %vm111_vm1, 1.0, %v147_v38  ;;  %v90_v42 = vmul.f32 %v83_v25, %v76_v32  ;;  %v61_v48 = vmul.f32 %v57_v33, %v47_v35 }
   0xc   :  { %116 = vst [vmem:[%s270_s8] sm:$0xff] %v144_v39  ;;  %v118_v43 = vsub.f32 1.0, %v144_v39  ;;  %v122_v44 = vmul.f32 0.0, %v144_v39  ;;  %117 = vst [vmem:[%s270_s8 + $0x8] sm:$0xff] %v145_v40  ;;  %v119_v45 = vsub.f32 1.0, %v145_v40  ;;  %v123_v46 = vmul.f32 0.0, %v145_v40 }
   0xd   :  { %v92_v47 = vadd.f32 %v90_v42, %v60_v41  ;;  %v91_v53 = vmul.f32 %v87_v37, %v77_v49 }
   0xe   :  { %v120_v50 = vmul.f32 %v118_v43, %v104_v27  ;;  %v121_v51 = vmul.f32 %v119_v45, %v105_v28 }
   0xf   :  { %v128_v52 = vadd.f32 %v108_v29, %v92_v47  ;;  %v93_v57 = vadd.f32 %v91_v53, %v61_v48 }
  0x10   :  { %v124_v55 = vadd.f32 %v122_v44, %v120_v50  ;;  %v125_v56 = vadd.f32 %v123_v46, %v121_v51 }
  0x11   :  { %130 = vst [vmem:[%s271_s10] sm:$0xff] %v128_v52  ;;  %v129_v58 = vadd.f32 %v109_v54, %v93_v57 }
  0x12   :  { %126 = vst [vmem:[%s272_s9] sm:$0xff] %v124_v55  ;;  %127 = vst [vmem:[%s272_s9 + $0x8] sm:$0xff] %v125_v56 }
  0x13   :  { %131 = vst [vmem:[%s271_s10 + $0x8] sm:$0xff] %v129_v58 }

// kernel: closed_call.457
= control target key start
LH: loop header
LB: loop body
LE: loop exit
PB: predicated region body
PF: predicated region fallthrough
CT: control target
= control target key end

     0   :  { %v30_v0 = vlaneseq  ;;  %v113_v32 = vmov 0.0   ;;  %s207_s4 = inlined_call_operand.vmem [shape: f32[8,256], index: 4, kind: input, shape index: {}, may-alias: {4,7}]   ;;  %s208_s5 = inlined_call_operand.vmem [shape: f32[8,256], index: 5, kind: input, shape index: {}, may-alias: {5,8}]   ;;  %s209_s2 = inlined_call_operand.vmem [shape: f32[1,256], index: 2, kind: input, shape index: {}]   ;;  %s210_s3 = inlined_call_operand.vmem [shape: f32[1,256], index: 3, kind: input, shape index: {}]   ;;  %s211_s0 = inlined_call_operand.vmem [shape: f32[8,256], index: 0, kind: input, shape index: {}]   ;;  %s212_s1 = inlined_call_operand.vmem [shape: f32[8,256], index: 1, kind: input, shape index: {}]   ;;  %s213_s6 = inlined_call_operand.vmem [shape: f32[8,256], index: 6, kind: output, shape index: {0}]   ;;  %s214_s8 = inlined_call_operand.vmem [shape: f32[8,256], index: 8, kind: output, shape index: {2}, may-alias: {5,8}]   ;;  %s215_s7 = inlined_call_operand.vmem [shape: f32[8,256], index: 7, kind: output, shape index: {1}, may-alias: {4,7}]  }
   0x1   :  { %v60_v1 = vld [vmem:[%s207_s4] sm:$0xff]  ;;  %v61_v3 = vld [vmem:[%s207_s4 + $0x8] sm:$0xff] }
   0x2   :  { %v62_v2 = vld [vmem:[%s208_s5] sm:$0xff]  ;;  %v64_v4 = vsub.f32 0.0, %v60_v1  ;;  %v63_v5 = vld [vmem:[%s208_s5 + $0x8] sm:$0xff]  ;;  %v65_v6 = vsub.f32 0.0, %v61_v3  ;;  %v31_v7 = vshrl.u32 %v30_v0, 7 }
   0x3   :  { %v28_v10 = vld [vmem:[%s209_s2] sm:$0x3]  ;;  %v72_v14 = vmul.f32 0.2, %v62_v2  ;;  %v27_v15 = vld [vmem:[%s211_s0 + $0x8] sm:$0xff] }
   0x4   :  { %v66_v8 = vadd.f32 %v64_v4, %v62_v2  ;;  %v67_v9 = vadd.f32 %v65_v6, %v63_v5  ;;  %v42_v11 = vld [vmem:[%s210_s3] sm:$0x3]  ;;  %v32_v13 = vsub.s32 0, %v31_v7  ;;  %v36_v16 = vsub.s32 1, %v31_v7  ;;  %v57_v30 = vld [vmem:[%s212_s1 + $0x8] sm:$0xff] }
   0x5   :  { %v26_v12 = vld [vmem:[%s211_s0] sm:$0xff]  ;;  %v73_v19 = vmul.f32 0.2, %v63_v5  ;;  %v74_v29 = vsub.f32 %v62_v2, %v72_v14 }
   0x6   :  { %v68_v17 = vmul.f32 0.1, %v66_v8  ;;  %v69_v18 = vmul.f32 0.1, %v67_v9  ;;  %v33_v20 = vrot.slane %v28_v10, %v32_v13  ;;  %v47_v21 = vrot.slane %v42_v11, %v32_v13  ;;  %v56_v28 = vld [vmem:[%s212_s1] sm:$0xff] }
   0x7   :  { %v37_v22 = vrot.slane %v28_v10, %v36_v16  ;;  %v51_v23 = vrot.slane %v42_v11, %v36_v16  ;;  %v75_v31 = vsub.f32 %v63_v5, %v73_v19 }
   0x8   :  { %v70_v24 = vadd.f32 %v68_v17, %v60_v1  ;;  %v71_v25 = vadd.f32 %v69_v18, %v61_v3  ;;  %v40_v26 = vsub.f32 %v26_v12, %v33_v20 }
   0x9   :  { %v41_v27 = vsub.f32 %v27_v15, %v37_v22 }
   0xa   :  { %vm76_vm0 = vcmp.gt.f32.partialorder %v70_v24, 1.0  ;;  %vm77_vm1 = vcmp.gt.f32.partialorder %v71_v25, 1.0  ;;  %v54_v35 = vmul.f32 %v47_v21, %v40_v26 }
   0xb   :  { %v110_v33 = vsel %vm76_vm0, 1.0, %v113_v32  ;;  %v111_v34 = vsel %vm77_vm1, 1.0, %v113_v32  ;;  %v55_v36 = vmul.f32 %v51_v23, %v41_v27 }
   0xc   :  { %82 = vst [vmem:[%s213_s6] sm:$0xff] %v110_v33  ;;  %v84_v37 = vsub.f32 1.0, %v110_v33  ;;  %v88_v38 = vmul.f32 0.0, %v110_v33  ;;  %83 = vst [vmem:[%s213_s6 + $0x8] sm:$0xff] %v111_v34  ;;  %v85_v39 = vsub.f32 1.0, %v111_v34  ;;  %v89_v40 = vmul.f32 0.0, %v111_v34 }
   0xd   :  { %v58_v41 = vadd.f32 %v56_v28, %v54_v35  ;;  %v59_v42 = vadd.f32 %v57_v30, %v55_v36 }
   0xe   :  { %v86_v43 = vmul.f32 %v84_v37, %v70_v24  ;;  %v87_v44 = vmul.f32 %v85_v39, %v71_v25 }
   0xf   :  { %v94_v45 = vadd.f32 %v74_v29, %v58_v41  ;;  %v95_v46 = vadd.f32 %v75_v31, %v59_v42 }
  0x10   :  { %v90_v47 = vadd.f32 %v88_v38, %v86_v43  ;;  %v91_v48 = vadd.f32 %v89_v40, %v87_v44 }
  0x11   :  { %96 = vst [vmem:[%s214_s8] sm:$0xff] %v94_v45  ;;  %97 = vst [vmem:[%s214_s8 + $0x8] sm:$0xff] %v95_v46 }
  0x12   :  { %92 = vst [vmem:[%s215_s7] sm:$0xff] %v90_v47  ;;  %93 = vst [vmem:[%s215_s7 + $0x8] sm:$0xff] %v91_v48 }

// kernel: closed_call.447
= control target key start
LH: loop header
LB: loop body
LE: loop exit
PB: predicated region body
PF: predicated region fallthrough
CT: control target
= control target key end

     0   :  { %s855_s9 = smov 0   ;;  %s857_s10 = smov 0   ;;  %s975_s0 = inlined_call_operand.vmem [shape: bf16[16,2304], index: 0, kind: input, shape index: {}]   ;;  %s976_s1 = inlined_call_operand.vmem [shape: bf16[2304,256], index: 1, kind: input, shape index: {}]   ;;  %s977_s2 = inlined_call_operand.vmem [shape: f32[16,256], index: 2, kind: output, shape index: {}]  }
   0x1   :  { %s859_s11 = smov 0   ;;  %s861_s12 = smov 0  }
   0x2   :  { %s863_s13 = smov 0  }
   0x3 LB: > { %s24_s14 = sadd.s32 1, %s833_s12  ;;  %p47_p1 = scmp.ne.s32.totalorder %s825_s10, %s821_s9  ;;  %s837_s13 = sphi %s863_s13, %s12_s13   ;;  %s833_s12 = sphi %s861_s12, %s981_s12   ;;  %s829_s11 = sphi %s859_s11, %s980_s11   ;;  %s825_s10 = sphi %s857_s10, %s979_s10   ;;  %s821_s9 = sphi %s855_s9, %s978_s9  }
   0x4   : > { %p25_p0 = scmp.ge.s32.totalorder %s24_s14, 9  ;;  %p48_p2 = scmp.eq.s32.totalorder %s837_s13, 0 }
   0x5   : > { %s40_s16 = sadd.s32 1, %s825_s10  ;;  %p656_p5 = scmp.ge.s32.totalorder %s837_s13, 9 }
   0x6   : > { %s983_s14 = smov (%p25_p0, %s24_s14), 0  ;;  %p49_p3 = por %p48_p2, %p47_p1 }
   0x7   : > { %s36_s15 = ssub.s32 %s833_s12, %s983_s14  ;;  %129 = sbr.rel (%p656_p5) target bundleno = 21 (0x15), region = 16 }
   0x8   : > { %p38_p4 = scmp.eq.s32.totalorder %s36_s15, 0 }
   0xa   : > { %s890_s17 = scalar_select %p38_p4, %s825_s10, %s40_s16  }
   0xe   : > { %132 = sbr.rel (!%p49_p3) target bundleno = 21 (0x15), region = 20  ;;  %s134_s18 = sand.u32 (%p49_p3), 1, %s825_s10  }
   0xf   : > { %s705_s19 = sshll.u32 (%p49_p3), %s833_s12, 3  ;;  %s657_s20 = sshll.u32 (%p49_p3), %s134_s18, 4 }
  0x10   : > { %s142_s23 = scalar_lea.vmem (%p49_p3), %s975_s0, %s705_s19  ;;  %s136_s24 = scalar_lea.vmem (%p49_p3), [#allocation3], %s657_s20 }
  0x11   : > { %v172_v0 = vld [vmem:[%s142_s23] sm:$0xff] (%p49_p3)  ;;  %v174_v1 = vld [vmem:[%s142_s23 + $0x48] sm:$0xff] (%p49_p3) }
  0x12   : > { %173 = vst [vmem:[%s136_s24] sm:$0xff] (%p49_p3), %v172_v0  ;;  %175 = vst [vmem:[%s136_s24 + $0x8] sm:$0xff] (%p49_p3), %v174_v1 }
  0x15 PF: > { %p660_p6 = scmp.ge.s32.totalorder %s837_s13, 1  ;;  %p195_p7 = scmp.lt.s32.totalorder %s837_s13, 10 }
  0x17   : > { %p196_p8 = pnand %p660_p6, %p195_p7 }
  0x18   : > { %s202_s25 = sand.u32 (!%p196_p8), 1, %s821_s9   ;;  %s662_s26 = sshll.u32 (!%p196_p8), %s829_s11, 5 }
  0x19   : > { %199 = sbr.rel (%p196_p8) target bundleno = 330 (0x14a), region = 62  ;;  %s902_s27 = sshll.u32 (!%p196_p8), %s202_s25, 4 }
  0x1a   : > { %p242_p9 = scmp.lt.s32.totalorder (!%p196_p8), %s662_s26, 287  ;;  %s204_s4 = scalar_lea.vmem (!%p196_p8), [#allocation3], %s902_s27 }
  0x1b   : > { %p665_p10 = scmp.ne.s32.totalorder (!%p196_p8), %s829_s11, 0 }
  0x20   : > { %s985_s26 = smov (!%p242_p9, %s662_s26), 287  ;;  %267 = sbr.rel (%p665_p10) target bundleno = 39 (0x27), region = 70 }
  0x21   : > { %s706_s28 = sshll.u32 %s985_s26, 3  ;;  %v839_v2 = vmov (!%p665_p10), 0.0  }
  0x22   : > { %s907_s3 = scalar_lea.vmem %s976_s1, %s706_s28  ;;  %268 = vst [vmem:[#allocation2] sm:$0xff] (!%p665_p10), %v839_v2  ;;  %269 = vst [vmem:[#allocation2 + $0x8] sm:$0xff] (!%p665_p10), %v839_v2 }
  0x23   : > { %270 = vst [vmem:[#allocation2 + $0x10] sm:$0xff] (!%p665_p10), %v839_v2  ;;  %271 = vst [vmem:[#allocation2 + $0x18] sm:$0xff] (!%p665_p10), %v839_v2 }
  0x27 PF: > { %v748_v3 = vld [vmem:[%s907_s3 + $0x4] ss:$8 sps:$4 sm:$0xff]   ;;  %v750_v4 = vld [vmem:[%s907_s3] ss:$8 sps:$4 sm:$0xff]   ;;  %v751_v5 = vld [vmem:[%s907_s3 + $0x14] ss:$8 sps:$4 sm:$0xff]  }
  0x28   : > { %480 = vmatprep.subr.bf16.mxu0 %v748_v3  ;;  %v753_v6 = vld [vmem:[%s907_s3 + $0x10] ss:$8 sps:$4 sm:$0xff]   ;;  %v754_v7 = vld [vmem:[%s907_s3 + $0x24] ss:$8 sps:$4 sm:$0xff]   ;;  %v756_v8 = vld [vmem:[%s907_s3 + $0x20] ss:$8 sps:$4 sm:$0xff]  }
  0x29   : > { %481 = vmatpush1.bf16.msra.mxu0 %v750_v4  ;;  %v757_v9 = vld [vmem:[%s907_s3 + $0x34] ss:$8 sps:$4 sm:$0xff]   ;;  %v759_v10 = vld [vmem:[%s907_s3 + $0x30] ss:$8 sps:$4 sm:$0xff]   ;;  %v760_v11 = vld [vmem:[%s907_s3 + $0x44] ss:$8 sps:$4 sm:$0xff]  }
  0x2a   : > { %482 = vmatprep.subr.bf16.mxu0 %v751_v5  ;;  %v762_v12 = vld [vmem:[%s907_s3 + $0x40] ss:$8 sps:$4 sm:$0xff]   ;;  %v763_v13 = vld [vmem:[%s907_s3 + $0x54] ss:$8 sps:$4 sm:$0xff]   ;;  %v765_v14 = vld [vmem:[%s907_s3 + $0x50] ss:$8 sps:$4 sm:$0xff]  }
  0x2b   : > { %v766_v15 = vld [vmem:[%s907_s3 + $0x64] ss:$8 sps:$4 sm:$0xff]   ;;  %v768_v17 = vld [vmem:[%s907_s3 + $0x60] ss:$8 sps:$4 sm:$0xff]   ;;  %v769_v18 = vld [vmem:[%s907_s3 + $0x74] ss:$8 sps:$4 sm:$0xff]  }
  0x2c   : > { %v798_v16 = vld [vmem:[%s204_s4 + $0x4] ss:$8 sps:$4 sm:$0xff]   ;;  %v771_v19 = vld [vmem:[%s907_s3 + $0x70] ss:$8 sps:$4 sm:$0xff]   ;;  %v774_v21 = vld [vmem:[%s907_s3 + $0x80] ss:$8 sps:$4 sm:$0xff]  }
  0x2d   : > { %483 = vmatpush1.bf16.msra.mxu0 %v753_v6  ;;  %512 = vmatprep.mubr.bf16.mxu0 %v798_v16  ;;  %v772_v20 = vld [vmem:[%s907_s3 + $0x84] ss:$8 sps:$4 sm:$0xff]   ;;  %v775_v22 = vld [vmem:[%s907_s3 + $0x94] ss:$8 sps:$4 sm:$0xff]   ;;  %v777_v23 = vld [vmem:[%s907_s3 + $0x90] ss:$8 sps:$4 sm:$0xff]  }
  0x2e   : > { %484 = vmatprep.subr.bf16.mxu0 %v754_v7  ;;  %v778_v24 = vld [vmem:[%s907_s3 + $0xa4] ss:$8 sps:$4 sm:$0xff]   ;;  %v780_v25 = vld [vmem:[%s907_s3 + $0xa0] ss:$8 sps:$4 sm:$0xff]   ;;  %v781_v26 = vld [vmem:[%s907_s3 + $0xb4] ss:$8 sps:$4 sm:$0xff]  }
  0x2f   : > { %v783_v27 = vld [vmem:[%s907_s3 + $0xb0] ss:$8 sps:$4 sm:$0xff]   ;;  %v784_v28 = vld [vmem:[%s907_s3 + $0xc4] ss:$8 sps:$4 sm:$0xff]   ;;  %v786_v29 = vld [vmem:[%s907_s3 + $0xc0] ss:$8 sps:$4 sm:$0xff]  }
  0x30   : > { %v787_v30 = vld [vmem:[%s907_s3 + $0xd4] ss:$8 sps:$4 sm:$0xff]   ;;  %v789_v31 = vld [vmem:[%s907_s3 + $0xd0] ss:$8 sps:$4 sm:$0xff]   ;;  %v790_v32 = vld [vmem:[%s907_s3 + $0xe4] ss:$8 sps:$4 sm:$0xff]  }
  0x31   : > { %485 = vmatpush1.bf16.msra.mxu0 %v756_v8  ;;  %v792_v33 = vld [vmem:[%s907_s3 + $0xe0] ss:$8 sps:$4 sm:$0xff]   ;;  %v793_v34 = vld [vmem:[%s907_s3 + $0xf4] ss:$8 sps:$4 sm:$0xff]   ;;  %v795_v35 = vld [vmem:[%s907_s3 + $0xf0] ss:$8 sps:$4 sm:$0xff]  }
  0x32   : > { %486 = vmatprep.subr.bf16.mxu0 %v757_v9  ;;  %v796_v36 = vld [vmem:[%s204_s4] ss:$8 sps:$4 sm:$0xff]   ;;  %p700_p11 = scmp.ne.s32.totalorder %s829_s11, 8 }
  0x33   : > { %v272_v37 = vld [vmem:[#allocation2] sm:$0xff]  ;;  %v273_v38 = vld [vmem:[#allocation2 + $0x8] sm:$0xff]  ;;  %v274_v40 = vld [vmem:[#allocation2 + $0x10] sm:$0xff] }
  0x34   : > { %v275_v43 = vld [vmem:[#allocation2 + $0x18] sm:$0xff] }
  0x35   : > { %487 = vmatpush1.bf16.msra.mxu0 %v759_v10 }
  0x36   : > { %488 = vmatprep.subr.bf16.mxu0 %v760_v11 }
  0x39   : > { %489 = vmatpush1.bf16.msra.mxu0 %v762_v12 }
  0x3a   : > { %490 = vmatprep.subr.bf16.mxu0 %v763_v13 }
  0x3d   : > { %491 = vmatpush1.bf16.msra.mxu0 %v765_v14 }
  0x3e   : > { %492 = vmatprep.subr.bf16.mxu0 %v766_v15 }
  0x41   : > { %493 = vmatpush1.bf16.msra.mxu0 %v768_v17 }
  0x42   : > { %494 = vmatprep.subr.bf16.mxu0 %v769_v18 }
  0x45   : > { %495 = vmatpush1.bf16.msra.mxu0 %v771_v19 }
  0x46   : > { %496 = vmatprep.subr.bf16.mxu0 %v772_v20 }
  0x49   : > { %497 = vmatpush1.bf16.msra.mxu0 %v774_v21 }
  0x4a   : > { %498 = vmatprep.subr.bf16.mxu0 %v775_v22 }
  0x4d   : > { %499 = vmatpush1.bf16.msra.mxu0 %v777_v23 }
  0x4e   : > { %500 = vmatprep.subr.bf16.mxu0 %v778_v24 }
  0x51   : > { %501 = vmatpush1.bf16.msra.mxu0 %v780_v25 }
  0x52   : > { %502 = vmatprep.subr.bf16.mxu0 %v781_v26 }
  0x55   : > { %503 = vmatpush1.bf16.msra.mxu0 %v783_v27 }
  0x56   : > { %504 = vmatprep.subr.bf16.mxu0 %v784_v28 }
  0x59   : > { %505 = vmatpush1.bf16.msra.mxu0 %v786_v29 }
  0x5a   : > { %506 = vmatprep.subr.bf16.mxu0 %v787_v30 }
  0x5d   : > { %507 = vmatpush1.bf16.msra.mxu0 %v789_v31 }
  0x5e   : > { %508 = vmatprep.subr.bf16.mxu0 %v790_v32 }
  0x61   : > { %509 = vmatpush1.bf16.msra.mxu0 %v792_v33 }
  0x62   : > { %510 = vmatprep.subr.bf16.mxu0 %v793_v34 }
  0x65   : > { %511 = vmatpush1.bf16.msra.mxu0 %v795_v35 }
  0x68   : > { %513 = vmatmul.mubr.bf16.vlgmr.msra.gmra.mrb[0].mxu0 %v796_v36 }
 0x13b   : > { %v514_v39 = vpop.f32.mrb[0].mxu0  ;;  %534 = sbr.rel (%p700_p11) target bundleno = 330 (0x14a), region = 74 }
 0x13c   : > { %v523_v41 = vadd.f32 %v514_v39, %v272_v37  ;;  %v516_v42 = vpop.f32.mrb[1].mxu0 }
 0x13d   : > { %v524_v44 = vadd.f32 %v516_v42, %v273_v38  ;;  %v518_v45 = vpop.f32.mrb[2].mxu0 }
 0x13e   : > { %527 = vst [vmem:[#allocation2] sm:$0xff] %v523_v41  ;;  %v525_v46 = vadd.f32 %v518_v45, %v274_v40  ;;  %v520_v47 = vpop.f32.mrb[3].mxu0 }
 0x13f   : > { %528 = vst [vmem:[#allocation2 + $0x8] sm:$0xff] %v524_v44  ;;  %v526_v48 = vadd.f32 %v520_v47, %v275_v43 }
 0x140   : > { %529 = vst [vmem:[#allocation2 + $0x10] sm:$0xff] %v525_v46 }
 0x141   : > { %530 = vst [vmem:[#allocation2 + $0x18] sm:$0xff] %v526_v48 }
 0x145   : > { %v535_v49 = vld [vmem:[#allocation2] sm:$0xff] }
 0x146   : > { %v536_v50 = vld [vmem:[#allocation2 + $0x8] sm:$0xff]  ;;  %539 = vst [vmem:[%s977_s2] sm:$0xff] %v535_v49 }
 0x147   : > { %v537_v51 = vld [vmem:[#allocation2 + $0x10] sm:$0xff]  ;;  %540 = vst [vmem:[%s977_s2 + $0x8] sm:$0xff] %v536_v50 }
 0x148   : > { %541 = vst [vmem:[%s977_s2 + $0x10] sm:$0xff] %v537_v51  ;;  %v538_v52 = vld [vmem:[#allocation2 + $0x18] sm:$0xff] }
 0x149   : > { %542 = vst [vmem:[%s977_s2 + $0x18] sm:$0xff] %v538_v52 }
 0x14a PF: > { %s12_s13 = sadd.s32 1, %s837_s13   ;;  %s978_s9 = smov %s825_s10 }
 0x14b   : > { %p9_p12 = scmp.ge.s32.totalorder %s12_s13, 11   ;;  %s979_s10 = smov %s890_s17 }
 0x14c   : > { %s980_s11 = smov %s833_s12  ;;  %s981_s12 = smov %s983_s14 }
 0x14d   :  { %11 = sbr.rel (!%p9_p12) target bundleno = 3 (0x3), region = 112 }

// kernel: closed_call.462
= control target key start
LH: loop header
LB: loop body
LE: loop exit
PB: predicated region body
PF: predicated region fallthrough
CT: control target
= control target key end

     0   :  { %s975_s9 = smov 0   ;;  %s977_s10 = smov 0   ;;  %s1159_s0 = inlined_call_operand.vmem [shape: bf16[16,256], index: 0, kind: input, shape index: {}]   ;;  %s1160_s1 = inlined_call_operand.vmem [shape: bf16[256,512], index: 1, kind: input, shape index: {}]   ;;  %s1161_s2 = inlined_call_operand.vmem [shape: f32[16,512], index: 2, kind: output, shape index: {}]  }
   0x1   :  { %s979_s11 = smov 0   ;;  %s981_s12 = smov 0  }
   0x2   :  { %s983_s13 = smov 0  }
   0x3 LB: > { %s27_s14 = sadd.s32 1, %s954_s12  ;;  %s777_s15 = sadd.s32 4294967295, %s958_s13   ;;  %s958_s13 = sphi %s983_s13, %s12_s13   ;;  %s954_s12 = sphi %s981_s12, %s1166_s12   ;;  %s950_s11 = sphi %s979_s11, %s1165_s11   ;;  %s946_s10 = sphi %s977_s10, %s1164_s10   ;;  %s942_s9 = sphi %s975_s9, %s1163_s9  }
   0x4   : > { %p29_p0 = scmp.ge.s32.totalorder %s27_s14, 2  ;;  %p75_p1 = scmp.ne.s32.totalorder %s946_s10, %s942_s9 }
   0x5   : > { %p76_p2 = scmp.eq.s32.totalorder %s958_s13, 0  ;;  %p107_p4 = scmp.eq.s32.totalorder %s777_s15, 1 }
   0x6   : > { %s1168_s14 = smov (%p29_p0, %s27_s14), 0  ;;  %s68_s17 = sadd.s32 1, %s946_s10 }
   0x7   : > { %p77_p3 = por %p76_p2, %p75_p1  ;;  %s64_s16 = ssub.s32 %s954_s12, %s1168_s14 }
   0x8   : > { %p66_p5 = scmp.eq.s32.totalorder %s64_s16, 0  ;;  %p1010_p6 = por %p107_p4, %p75_p1 }
   0x9   : > { %p781_p7 = scmp.ge.s32.totalorder %s958_s13, 2 }
   0xa   : > { %s1015_s19 = scalar_select %p66_p5, %s946_s10, %s68_s17  }
   0xb   : > { %144 = sbr.rel (%p781_p7) target bundleno = 38 (0x26), region = 20 }
  0x12   : > { %147 = sbr.rel (!%p77_p3) target bundleno = 38 (0x26), region = 24  ;;  %s149_s20 = sand.u32 (%p77_p3), 1, %s946_s10  }
  0x13   : > { %s827_s21 = sshll.u32 (%p77_p3), %s954_s12, 3  ;;  %s782_s22 = sshll.u32 (%p77_p3), %s149_s20, 8 }
  0x14   : > { %s1023_s25 = scalar_lea.vmem (%p77_p3), %s1160_s1, %s827_s21  ;;  %s1028_s26 = scalar_lea.vmem (%p77_p3), [#allocation3], %s782_s22 }
  0x15   : > { %v247_v0 = vld [vmem:[%s1023_s25] sm:$0xff] (%p77_p3)  ;;  %v249_v1 = vld [vmem:[%s1023_s25 + $0x10] sm:$0xff] (%p77_p3) }
  0x16   : > { %v251_v2 = vld [vmem:[%s1023_s25 + $0x20] sm:$0xff] (%p77_p3)  ;;  %248 = vst [vmem:[%s1028_s26] sm:$0xff] (%p77_p3), %v247_v0  ;;  %250 = vst [vmem:[%s1028_s26 + $0x8] sm:$0xff] (%p77_p3), %v249_v1  ;;  %v253_v3 = vld [vmem:[%s1023_s25 + $0x30] sm:$0xff] (%p77_p3) }
  0x17   : > { %252 = vst [vmem:[%s1028_s26 + $0x10] sm:$0xff] (%p77_p3), %v251_v2  ;;  %v255_v4 = vld [vmem:[%s1023_s25 + $0x40] sm:$0xff] (%p77_p3)  ;;  %v257_v5 = vld [vmem:[%s1023_s25 + $0x50] sm:$0xff] (%p77_p3)  ;;  %254 = vst [vmem:[%s1028_s26 + $0x18] sm:$0xff] (%p77_p3), %v253_v3 }
  0x18   : > { %256 = vst [vmem:[%s1028_s26 + $0x20] sm:$0xff] (%p77_p3), %v255_v4  ;;  %258 = vst [vmem:[%s1028_s26 + $0x28] sm:$0xff] (%p77_p3), %v257_v5  ;;  %v259_v6 = vld [vmem:[%s1023_s25 + $0x60] sm:$0xff] (%p77_p3)  ;;  %v261_v7 = vld [vmem:[%s1023_s25 + $0x70] sm:$0xff] (%p77_p3) }
  0x19   : > { %v263_v8 = vld [vmem:[%s1023_s25 + $0x80] sm:$0xff]  ;;  %260 = vst [vmem:[%s1028_s26 + $0x30] sm:$0xff] %v259_v6  ;;  %262 = vst [vmem:[%s1028_s26 + $0x38] sm:$0xff] %v261_v7  ;;  %v265_v9 = vld [vmem:[%s1023_s25 + $0x90] sm:$0xff] }
  0x1a   : > { %264 = vst [vmem:[%s1028_s26 + $0x40] sm:$0xff] %v263_v8  ;;  %v267_v10 = vld [vmem:[%s1023_s25 + $0xa0] sm:$0xff]  ;;  %v269_v11 = vld [vmem:[%s1023_s25 + $0xb0] sm:$0xff]  ;;  %266 = vst [vmem:[%s1028_s26 + $0x48] sm:$0xff] %v265_v9 }
  0x1b   : > { %268 = vst [vmem:[%s1028_s26 + $0x50] sm:$0xff] %v267_v10  ;;  %270 = vst [vmem:[%s1028_s26 + $0x58] sm:$0xff] %v269_v11  ;;  %v271_v12 = vld [vmem:[%s1023_s25 + $0xc0] sm:$0xff]  ;;  %v273_v13 = vld [vmem:[%s1023_s25 + $0xd0] sm:$0xff] }
  0x1c   : > { %v275_v14 = vld [vmem:[%s1023_s25 + $0xe0] sm:$0xff]  ;;  %272 = vst [vmem:[%s1028_s26 + $0x60] sm:$0xff] %v271_v12  ;;  %274 = vst [vmem:[%s1028_s26 + $0x68] sm:$0xff] %v273_v13  ;;  %v277_v15 = vld [vmem:[%s1023_s25 + $0xf0] sm:$0xff] }
  0x1d   : > { %276 = vst [vmem:[%s1028_s26 + $0x70] sm:$0xff] %v275_v14  ;;  %v279_v16 = vld [vmem:[%s1023_s25 + $0x100] sm:$0xff]  ;;  %v281_v17 = vld [vmem:[%s1023_s25 + $0x110] sm:$0xff]  ;;  %278 = vst [vmem:[%s1028_s26 + $0x78] sm:$0xff] %v277_v15 }
  0x1e   : > { %280 = vst [vmem:[%s1028_s26 + $0x80] sm:$0xff] %v279_v16  ;;  %282 = vst [vmem:[%s1028_s26 + $0x88] sm:$0xff] %v281_v17  ;;  %v283_v18 = vld [vmem:[%s1023_s25 + $0x120] sm:$0xff]  ;;  %v285_v19 = vld [vmem:[%s1023_s25 + $0x130] sm:$0xff] }
  0x1f   : > { %v287_v20 = vld [vmem:[%s1023_s25 + $0x140] sm:$0xff]  ;;  %284 = vst [vmem:[%s1028_s26 + $0x90] sm:$0xff] %v283_v18  ;;  %286 = vst [vmem:[%s1028_s26 + $0x98] sm:$0xff] %v285_v19  ;;  %v289_v21 = vld [vmem:[%s1023_s25 + $0x150] sm:$0xff] }
  0x20   : > { %288 = vst [vmem:[%s1028_s26 + $0xa0] sm:$0xff] %v287_v20  ;;  %v291_v22 = vld [vmem:[%s1023_s25 + $0x160] sm:$0xff]  ;;  %v293_v23 = vld [vmem:[%s1023_s25 + $0x170] sm:$0xff]  ;;  %290 = vst [vmem:[%s1028_s26 + $0xa8] sm:$0xff] %v289_v21 }
  0x21   : > { %292 = vst [vmem:[%s1028_s26 + $0xb0] sm:$0xff] %v291_v22  ;;  %294 = vst [vmem:[%s1028_s26 + $0xb8] sm:$0xff] %v293_v23  ;;  %v295_v24 = vld [vmem:[%s1023_s25 + $0x180] sm:$0xff]  ;;  %v297_v25 = vld [vmem:[%s1023_s25 + $0x190] sm:$0xff] }
  0x22   : > { %v299_v26 = vld [vmem:[%s1023_s25 + $0x1a0] sm:$0xff]  ;;  %296 = vst [vmem:[%s1028_s26 + $0xc0] sm:$0xff] %v295_v24  ;;  %298 = vst [vmem:[%s1028_s26 + $0xc8] sm:$0xff] %v297_v25  ;;  %v301_v27 = vld [vmem:[%s1023_s25 + $0x1b0] sm:$0xff] }
  0x23   : > { %300 = vst [vmem:[%s1028_s26 + $0xd0] sm:$0xff] %v299_v26  ;;  %v303_v28 = vld [vmem:[%s1023_s25 + $0x1c0] sm:$0xff]  ;;  %v305_v29 = vld [vmem:[%s1023_s25 + $0x1d0] sm:$0xff]  ;;  %302 = vst [vmem:[%s1028_s26 + $0xd8] sm:$0xff] %v301_v27 }
  0x24   : > { %304 = vst [vmem:[%s1028_s26 + $0xe0] sm:$0xff] %v303_v28  ;;  %306 = vst [vmem:[%s1028_s26 + $0xe8] sm:$0xff] %v305_v29  ;;  %v307_v30 = vld [vmem:[%s1023_s25 + $0x1e0] sm:$0xff]  ;;  %v309_v31 = vld [vmem:[%s1023_s25 + $0x1f0] sm:$0xff] }
  0x25   : > { %308 = vst [vmem:[%s1028_s26 + $0xf0] sm:$0xff] %v307_v30  ;;  %310 = vst [vmem:[%s1028_s26 + $0xf8] sm:$0xff] %v309_v31 }
  0x26 PF: > { %p785_p8 = scmp.ge.s32.totalorder %s958_s13, 1  ;;  %p315_p9 = scmp.lt.s32.totalorder %s958_s13, 3 }
  0x28   : > { %p316_p10 = pnand %p785_p8, %p315_p9 }
  0x29   : > { %s322_s27 = sand.u32 (!%p316_p10), 1, %s942_s9   ;;  %v919_v32 = vld [vmem:[%s1159_s0 + $0x4] ss:$8 sps:$4 sm:$0xff] (!%p316_p10)   ;;  %v917_v1 = vld [vmem:[%s1159_s0] ss:$8 sps:$4 sm:$0xff] (!%p316_p10)  }
  0x2a   : > { %319 = sbr.rel (%p316_p10) target bundleno = 333 (0x14d), region = 62  ;;  %s786_s28 = sshll.u32 (!%p316_p10), %s322_s27, 8  ;;  %616 = vmatprep.mubr.bf16.mxu0 (!%p316_p10), %v919_v32 }
  0x2b   : > { %s1099_s3 = scalar_lea.vmem (!%p316_p10), [#allocation3], %s786_s28  ;;  %s787_s6 = sshll.u32 (!%p316_p10), %s322_s27, 5 }
  0x2c   : > { %v869_v33 = vld [vmem:[%s1099_s3 + $0x4] ss:$8 sps:$4 sm:$0xff] (!%p316_p10)   ;;  %v871_v34 = vld [vmem:[%s1099_s3] ss:$8 sps:$4 sm:$0xff] (!%p316_p10)   ;;  %v872_v35 = vld [vmem:[%s1099_s3 + $0x14] ss:$8 sps:$4 sm:$0xff] (!%p316_p10)  }
  0x2d   : > { %584 = vmatprep.subr.bf16.mxu0 (!%p316_p10), %v869_v33  ;;  %v874_v36 = vld [vmem:[%s1099_s3 + $0x10] ss:$8 sps:$4 sm:$0xff] (!%p316_p10)   ;;  %v875_v37 = vld [vmem:[%s1099_s3 + $0x24] ss:$8 sps:$4 sm:$0xff] (!%p316_p10)   ;;  %v877_v38 = vld [vmem:[%s1099_s3 + $0x20] ss:$8 sps:$4 sm:$0xff] (!%p316_p10)  }
  0x2e   : > { %585 = vmatpush1.bf16.msra.mxu0 (!%p316_p10), %v871_v34  ;;  %v878_v39 = vld [vmem:[%s1099_s3 + $0x34] ss:$8 sps:$4 sm:$0xff] (!%p316_p10)   ;;  %v880_v40 = vld [vmem:[%s1099_s3 + $0x30] ss:$8 sps:$4 sm:$0xff] (!%p316_p10)   ;;  %v881_v41 = vld [vmem:[%s1099_s3 + $0x44] ss:$8 sps:$4 sm:$0xff] (!%p316_p10)  }
  0x2f   : > { %586 = vmatprep.subr.bf16.mxu0 (!%p316_p10), %v872_v35  ;;  %v883_v42 = vld [vmem:[%s1099_s3 + $0x40] ss:$8 sps:$4 sm:$0xff] (!%p316_p10)   ;;  %v884_v43 = vld [vmem:[%s1099_s3 + $0x54] ss:$8 sps:$4 sm:$0xff] (!%p316_p10)   ;;  %v886_v44 = vld [vmem:[%s1099_s3 + $0x50] ss:$8 sps:$4 sm:$0xff] (!%p316_p10)  }
  0x30   : > { %v887_v45 = vld [vmem:[%s1099_s3 + $0x64] ss:$8 sps:$4 sm:$0xff] (!%p316_p10)   ;;  %v889_v46 = vld [vmem:[%s1099_s3 + $0x60] ss:$8 sps:$4 sm:$0xff] (!%p316_p10)   ;;  %v890_v47 = vld [vmem:[%s1099_s3 + $0x74] ss:$8 sps:$4 sm:$0xff] (!%p316_p10)  }
  0x31   : > { %v892_v48 = vld [vmem:[%s1099_s3 + $0x70] ss:$8 sps:$4 sm:$0xff]   ;;  %v893_v49 = vld [vmem:[%s1099_s3 + $0x84] ss:$8 sps:$4 sm:$0xff]   ;;  %v895_v50 = vld [vmem:[%s1099_s3 + $0x80] ss:$8 sps:$4 sm:$0xff]  }
  0x32   : > { %587 = vmatpush1.bf16.msra.mxu0 %v874_v36  ;;  %v896_v51 = vld [vmem:[%s1099_s3 + $0x94] ss:$8 sps:$4 sm:$0xff]   ;;  %v898_v52 = vld [vmem:[%s1099_s3 + $0x90] ss:$8 sps:$4 sm:$0xff]   ;;  %v899_v53 = vld [vmem:[%s1099_s3 + $0xa4] ss:$8 sps:$4 sm:$0xff]  }
  0x33   : > { %588 = vmatprep.subr.bf16.mxu0 %v875_v37  ;;  %v901_v54 = vld [vmem:[%s1099_s3 + $0xa0] ss:$8 sps:$4 sm:$0xff]   ;;  %v902_v55 = vld [vmem:[%s1099_s3 + $0xb4] ss:$8 sps:$4 sm:$0xff]   ;;  %v904_v56 = vld [vmem:[%s1099_s3 + $0xb0] ss:$8 sps:$4 sm:$0xff]  }
  0x34   : > { %v905_v57 = vld [vmem:[%s1099_s3 + $0xc4] ss:$8 sps:$4 sm:$0xff]   ;;  %v907_v58 = vld [vmem:[%s1099_s3 + $0xc0] ss:$8 sps:$4 sm:$0xff]   ;;  %v908_v59 = vld [vmem:[%s1099_s3 + $0xd4] ss:$8 sps:$4 sm:$0xff]  }
  0x35   : > { %v910_v60 = vld [vmem:[%s1099_s3 + $0xd0] ss:$8 sps:$4 sm:$0xff]   ;;  %v911_v61 = vld [vmem:[%s1099_s3 + $0xe4] ss:$8 sps:$4 sm:$0xff]   ;;  %v913_v62 = vld [vmem:[%s1099_s3 + $0xe0] ss:$8 sps:$4 sm:$0xff]  }
  0x36   : > { %589 = vmatpush1.bf16.msra.mxu0 %v877_v38  ;;  %v914_v63 = vld [vmem:[%s1099_s3 + $0xf4] ss:$8 sps:$4 sm:$0xff]   ;;  %v916_v0 = vld [vmem:[%s1099_s3 + $0xf0] ss:$8 sps:$4 sm:$0xff]   ;;  %s351_s7 = scalar_lea.vmem [#allocation4], %s787_s6  ;;  %s828_s8 = sshll.u32 (%p1010_p6), %s950_s11, 4 }
  0x37   : > { %590 = vmatprep.subr.bf16.mxu0 %v878_v39  ;;  %s658_s16 = scalar_lea.vmem (%p1010_p6), %s1161_s2, %s828_s8 }
  0x3a   : > { %591 = vmatpush1.bf16.msra.mxu0 %v880_v40 }
  0x3b   : > { %592 = vmatprep.subr.bf16.mxu0 %v881_v41 }
  0x3e   : > { %593 = vmatpush1.bf16.msra.mxu0 %v883_v42 }
  0x3f   : > { %594 = vmatprep.subr.bf16.mxu0 %v884_v43 }
  0x42   : > { %595 = vmatpush1.bf16.msra.mxu0 %v886_v44 }
  0x43   : > { %596 = vmatprep.subr.bf16.mxu0 %v887_v45 }
  0x46   : > { %597 = vmatpush1.bf16.msra.mxu0 %v889_v46 }
  0x47   : > { %598 = vmatprep.subr.bf16.mxu0 %v890_v47 }
  0x4a   : > { %599 = vmatpush1.bf16.msra.mxu0 %v892_v48 }
  0x4b   : > { %600 = vmatprep.subr.bf16.mxu0 %v893_v49 }
  0x4e   : > { %601 = vmatpush1.bf16.msra.mxu0 %v895_v50 }
  0x4f   : > { %602 = vmatprep.subr.bf16.mxu0 %v896_v51 }
  0x52   : > { %603 = vmatpush1.bf16.msra.mxu0 %v898_v52 }
  0x53   : > { %604 = vmatprep.subr.bf16.mxu0 %v899_v53 }
  0x56   : > { %605 = vmatpush1.bf16.msra.mxu0 %v901_v54 }
  0x57   : > { %606 = vmatprep.subr.bf16.mxu0 %v902_v55 }
  0x5a   : > { %607 = vmatpush1.bf16.msra.mxu0 %v904_v56 }
  0x5b   : > { %608 = vmatprep.subr.bf16.mxu0 %v905_v57 }
  0x5e   : > { %609 = vmatpush1.bf16.msra.mxu0 %v907_v58 }
  0x5f   : > { %610 = vmatprep.subr.bf16.mxu0 %v908_v59 }
  0x62   : > { %611 = vmatpush1.bf16.msra.mxu0 %v910_v60 }
  0x63   : > { %612 = vmatprep.subr.bf16.mxu0 %v911_v61 }
  0x66   : > { %613 = vmatpush1.bf16.msra.mxu0 %v913_v62 }
  0x67   : > { %614 = vmatprep.subr.bf16.mxu0 %v914_v63 }
  0x6a   : > { %615 = vmatpush1.bf16.msra.mxu0 %v916_v0 }
  0x6d   : > { %617 = vmatmul.mubr.bf16.vlgmr.msra.gmra.mrb[0].mxu0 %v917_v1 }
 0x13e   : > { %652 = sbr.rel (!%p1010_p6) target bundleno = 333 (0x14d), region = 78 }
 0x140   : > { %v618_v2 = vpop.f32.mrb[0].mxu0 }
 0x141   : > { %642 = vst [vmem:[%s351_s7] sm:$0xff] %v618_v2  ;;  %v620_v3 = vpop.f32.mrb[1].mxu0 }
 0x142   : > { %643 = vst [vmem:[%s351_s7 + $0x8] sm:$0xff] %v620_v3  ;;  %v622_v4 = vpop.f32.mrb[2].mxu0 }
 0x143   : > { %644 = vst [vmem:[%s351_s7 + $0x10] sm:$0xff] %v622_v4  ;;  %v624_v5 = vpop.f32.mrb[3].mxu0 }
 0x144   : > { %645 = vst [vmem:[%s351_s7 + $0x18] sm:$0xff] %v624_v5 }
 0x148   : > { %v671_v6 = vld [vmem:[%s351_s7] sm:$0xff] }
 0x149   : > { %v673_v7 = vld [vmem:[%s351_s7 + $0x8] sm:$0xff]  ;;  %672 = vst [vmem:[%s658_s16] sm:$0xff] %v671_v6 }
 0x14a   : > { %v675_v8 = vld [vmem:[%s351_s7 + $0x10] sm:$0xff]  ;;  %674 = vst [vmem:[%s658_s16 + $0x8] sm:$0xff] %v673_v7 }
 0x14b   : > { %v677_v9 = vld [vmem:[%s351_s7 + $0x18] sm:$0xff]  ;;  %676 = vst [vmem:[%s658_s16 + $0x20] sm:$0xff] %v675_v8 }
 0x14c   : > { %678 = vst [vmem:[%s658_s16 + $0x28] sm:$0xff] %v677_v9 }
 0x14d PF: > { %s12_s13 = sadd.s32 1, %s958_s13   ;;  %s1163_s9 = smov %s946_s10 }
 0x14e   : > { %p9_p11 = scmp.ge.s32.totalorder %s12_s13, 4   ;;  %s1164_s10 = smov %s1015_s19 }
 0x14f   : > { %s1165_s11 = smov %s954_s12  ;;  %s1166_s12 = smov %s1168_s14 }
 0x150   :  { %11 = sbr.rel (!%p9_p11) target bundleno = 3 (0x3), region = 135 }

// kernel: closed_call.464
= control target key start
LH: loop header
LB: loop body
LE: loop exit
PB: predicated region body
PF: predicated region fallthrough
CT: control target
= control target key end

     0   :  { %v14_v0 = vlaneseq  ;;  %v203_v2 = vmov 1983009808   ;;  %v204_v6 = vmov 0.0   ;;  %v205_v10 = vmov 1966171168   ;;  %s269_s0 = inlined_call_operand.vmem [shape: f32[2,512], index: 0, kind: input, shape index: {}]   ;;  %s270_s1 = inlined_call_operand.vmem [shape: f32[1,512], index: 1, kind: output, shape index: {0}]   ;;  %s271_s2 = inlined_call_operand.vmem [shape: f32[1,512], index: 2, kind: output, shape index: {1}]  }
   0x1   :  { %v20_v1 = vld [vmem:[%s269_s0] sm:$0xff]  ;;  %v25_v3 = vunpack.c.l.s4 %v203_v2  ;;  %v240_v11 = vunpack.c.l.s4 %v205_v10  ;;  %vm44_vm1 = vcmask 1041408  }
   0x2   :  { %vm224_vm0 = vcmp.lt.s32.totalorder %v14_v0, 512  ;;  %v228_v5 = vshrl.u32 %v14_v0, 7  ;;  %v23_v7 = vcombine.high %v20_v1, %v20_v1  ;;  %v109_v9 = vmul.f32 %v20_v1, %v20_v1 }
   0x3   :  { %18 = vst.msk [vmem:[%s270_s1] sm:$0xf] %vm224_vm0, %v204_v6  ;;  %v26_v8 = vunpack.c.0.s8 %v25_v3  ;;  %19 = vst.msk [vmem:[%s271_s2] sm:$0xf] %vm224_vm0, %v204_v6  ;;  %v81_v18 = vunpack.c.0.s8 %v240_v11 }
   0x4   :  { %v111_v13 = vcombine.high %v109_v9, %v109_v9 }
   0x5   :  { %v29_v12 = vsub.s32 %v26_v8, %v228_v5  ;;  %v84_v11 = vsub.s32 %v81_v18, %v228_v5 }
   0x7   :  { %v30_v14 = vrot.slane %v20_v1, %v29_v12  ;;  %v37_v15 = vrot.slane %v23_v7, %v29_v12  ;;  %v118_v16 = vrot.slane %v109_v9, %v29_v12  ;;  %v125_v17 = vrot.slane %v111_v13, %v29_v12 }
   0x9   :  { %v38_v19 = vcombine.high %v30_v14, %v30_v14  ;;  %v39_v20 = vcombine.high %v37_v15, %v37_v15  ;;  %v45_v21 = vsel %vm44_vm1, %v30_v14, 0.0  ;;  %v59_v22 = vsel %vm44_vm1, %v37_v15, 0.0 }
   0xa   :  { %v46_v23 = vrot.slane %v45_v21, 4  ;;  %v60_v24 = vrot.slane %v59_v22, 4  ;;  %v126_v25 = vcombine.high %v118_v16, %v118_v16  ;;  %v127_v26 = vcombine.high %v125_v17, %v125_v17 }
   0xb   :  { %v52_v27 = vsel %vm44_vm1, %v38_v19, 0.0  ;;  %v66_v28 = vsel %vm44_vm1, %v39_v20, 0.0  ;;  %v132_v29 = vsel %vm44_vm1, %v118_v16, 0.0  ;;  %v146_v30 = vsel %vm44_vm1, %v125_v17, 0.0 }
   0xc   :  { %v47_v31 = vadd.f32 %v46_v23, %v45_v21  ;;  %v53_v32 = vrot.slane %v52_v27, 4  ;;  %v61_v33 = vadd.f32 %v60_v24, %v59_v22  ;;  %v67_v34 = vrot.slane %v66_v28, 4 }
   0xd   :  { %v133_v35 = vrot.slane %v132_v29, 4  ;;  %v147_v36 = vrot.slane %v146_v30, 4  ;;  %v139_v37 = vsel %vm44_vm1, %v126_v25, 0.0  ;;  %v153_v38 = vsel %vm44_vm1, %v127_v26, 0.0  ;;  %v21_v26 = vld [vmem:[%s270_s1] sm:$0xf] }
   0xe   :  { %v48_v39 = vrot.slane %v47_v31, 2  ;;  %v54_v40 = vadd.f32 %v53_v32, %v52_v27  ;;  %v62_v41 = vrot.slane %v61_v33, 2  ;;  %v68_v42 = vadd.f32 %v67_v34, %v66_v28 }
   0xf   :  { %v134_v43 = vadd.f32 %v133_v35, %v132_v29  ;;  %v140_v44 = vrot.slane %v139_v37, 4  ;;  %v148_v45 = vadd.f32 %v147_v36, %v146_v30  ;;  %v154_v46 = vrot.slane %v153_v38, 4  ;;  %v108_v30 = vld [vmem:[%s271_s2] sm:$0xf] }
  0x10   :  { %v49_v47 = vadd.f32 %v48_v39, %v47_v31  ;;  %v55_v48 = vrot.slane %v54_v40, 2  ;;  %v63_v49 = vadd.f32 %v62_v41, %v61_v33  ;;  %v69_v50 = vrot.slane %v68_v42, 2 }
  0x11   :  { %v135_v51 = vrot.slane %v134_v43, 2  ;;  %v141_v52 = vadd.f32 %v140_v44, %v139_v37  ;;  %v149_v53 = vrot.slane %v148_v45, 2  ;;  %v155_v54 = vadd.f32 %v154_v46, %v153_v38 }
  0x12   :  { %v50_v55 = vrot.slane %v49_v47, 1  ;;  %v56_v56 = vadd.f32 %v55_v48, %v54_v40  ;;  %v64_v57 = vrot.slane %v63_v49, 1  ;;  %v70_v58 = vadd.f32 %v69_v50, %v68_v42 }
  0x13   :  { %v136_v59 = vadd.f32 %v135_v51, %v134_v43  ;;  %v142_v60 = vrot.slane %v141_v52, 2  ;;  %v150_v61 = vadd.f32 %v149_v53, %v148_v45  ;;  %v156_v62 = vrot.slane %v155_v54, 2 }
  0x14   :  { %v51_v63 = vadd.f32 %v50_v55, %v49_v47  ;;  %v57_v0 = vrot.slane %v56_v56, 1  ;;  %v65_v1 = vadd.f32 %v64_v57, %v63_v49  ;;  %v71_v2 = vrot.slane %v70_v58, 1 }
  0x15   :  { %v137_v3 = vrot.slane %v136_v59, 1  ;;  %v143_v6 = vadd.f32 %v142_v60, %v141_v52  ;;  %v151_v7 = vrot.slane %v150_v61, 1  ;;  %v157_v8 = vadd.f32 %v156_v62, %v155_v54 }
  0x16   :  { %v58_v9 = vadd.f32 %v57_v0, %v56_v56  ;;  %v72_v10 = vadd.f32 %v71_v2, %v70_v58 }
  0x17   :  { %v138_v12 = vadd.f32 %v137_v3, %v136_v59  ;;  %v144_v13 = vrot.slane %v143_v6, 1  ;;  %v152_v14 = vadd.f32 %v151_v7, %v150_v61  ;;  %v158_v15 = vrot.slane %v157_v8, 1 }
  0x18   :  { %v77_v16 = vcombine.low %v51_v63, %v58_v9  ;;  %v78_v17 = vcombine.low %v65_v1, %v72_v10 }
  0x19   :  { %v145_v19 = vadd.f32 %v144_v13, %v143_v6  ;;  %v159_v20 = vadd.f32 %v158_v15, %v157_v8 }
  0x1a   :  { %v85_v21 = vrot.slane %v77_v16, %v84_v11  ;;  %v92_v22 = vrot.slane %v78_v17, %v84_v11 }
  0x1b   :  { %v164_v23 = vcombine.low %v138_v12, %v145_v19  ;;  %v165_v24 = vcombine.low %v152_v14, %v159_v20 }
  0x1c   :  { %v93_v25 = vcombine.low %v85_v21, %v92_v22 }
  0x1d   :  { %v172_v27 = vrot.slane %v164_v23, %v84_v11  ;;  %v179_v28 = vrot.slane %v165_v24, %v84_v11 }
  0x1e   :  { %v100_v5 = vrot.slane %v93_v25, %v84_v11 }
  0x1f   :  { %v180_v18 = vcombine.low %v172_v27, %v179_v28 }
  0x20   :  { %v102_v29 = vadd.f32 %v100_v5, %v21_v26 }
  0x21   :  { %v187_v31 = vrot.slane %v180_v18, %v84_v11 }
  0x22   :  { %107 = vst.msk [vmem:[%s270_s1] sm:$0xf] %vm224_vm0, %v102_v29 }
  0x23   :  { %v189_v32 = vadd.f32 %v187_v31, %v108_v30 }
  0x25   :  { %190 = vst.msk [vmem:[%s271_s2] sm:$0xf] %vm224_vm0, %v189_v32 }

// kernel: closed_call.460
= control target key start
LH: loop header
LB: loop body
LE: loop exit
PB: predicated region body
PF: predicated region fallthrough
CT: control target
= control target key end

     0   :  { %v26_v0 = vlaneseq  ;;  %v132_v3 = vmov 1983009808   ;;  %v133_v31 = vmov 0.0   ;;  %s198_s3 = inlined_call_operand.vmem [shape: f32[2,512], index: 3, kind: input, shape index: {}, may-alias: {3,6}]   ;;  %s199_s4 = inlined_call_operand.vmem [shape: f32[2,512], index: 4, kind: input, shape index: {}, may-alias: {4,7}]   ;;  %s200_s1 = inlined_call_operand.vmem [shape: f32[1,512], index: 1, kind: input, shape index: {}]   ;;  %s201_s2 = inlined_call_operand.vmem [shape: f32[1,512], index: 2, kind: input, shape index: {}]   ;;  %s202_s5 = inlined_call_operand.vmem [shape: f32[2,512], index: 5, kind: output, shape index: {0}]   ;;  %s203_s0 = inlined_call_operand.vmem [shape: f32[2,512], index: 0, kind: input, shape index: {}]   ;;  %s204_s6 = inlined_call_operand.vmem [shape: f32[2,512], index: 6, kind: output, shape index: {1}, may-alias: {3,6}]   ;;  %s205_s7 = inlined_call_operand.vmem [shape: f32[2,512], index: 7, kind: output, shape index: {2}, may-alias: {4,7}]  }
   0x1   :  { %v98_v1 = vld [vmem:[%s198_s3] sm:$0xff]  ;;  %v45_v4 = vunpack.c.l.s4 %v132_v3 }
   0x2   :  { %v99_v2 = vld [vmem:[%s199_s4] sm:$0xff]  ;;  %v100_v5 = vsub.f32 0.0, %v98_v1  ;;  %v27_v6 = vshrl.u32 %v26_v0, 7 }
   0x3   :  { %v24_v7 = vld [vmem:[%s200_s1] sm:$0xf]  ;;  %v46_v8 = vunpack.c.0.s8 %v45_v4  ;;  %v104_v35 = vmul.f32 0.2, %v99_v2 }
   0x4   :  { %v101_v9 = vadd.f32 %v100_v5, %v99_v2  ;;  %v28_v10 = vsub.s32 0, %v27_v6  ;;  %v32_v11 = vsub.s32 1, %v27_v6  ;;  %v36_v12 = vsub.s32 2, %v27_v6  ;;  %v61_v13 = vld [vmem:[%s201_s2] sm:$0xf] }
   0x5   :  { %v40_v14 = vsub.s32 3, %v27_v6  ;;  %v49_v15 = vsub.s32 %v46_v8, %v27_v6  ;;  %v23_v38 = vld [vmem:[%s203_s0] sm:$0xff]  ;;  %v105_v44 = vsub.f32 %v99_v2, %v104_v35 }
   0x6   :  { %v102_v16 = vmul.f32 0.1, %v101_v9  ;;  %v29_v17 = vrot.slane %v24_v7, %v28_v10  ;;  %v33_v18 = vrot.slane %v24_v7, %v32_v11  ;;  %v37_v19 = vrot.slane %v24_v7, %v36_v12 }
   0x7   :  { %v41_v20 = vrot.slane %v24_v7, %v40_v14  ;;  %v66_v21 = vrot.slane %v61_v13, %v28_v10  ;;  %v70_v22 = vrot.slane %v61_v13, %v32_v11  ;;  %v74_v23 = vrot.slane %v61_v13, %v36_v12 }
   0x8   :  { %v103_v24 = vadd.f32 %v102_v16, %v98_v1  ;;  %v42_v25 = vcombine.low %v29_v17, %v33_v18  ;;  %v78_v26 = vrot.slane %v61_v13, %v40_v14 }
   0x9   :  { %v43_v27 = vcombine.low %v37_v19, %v41_v20  ;;  %v79_v28 = vcombine.low %v66_v21, %v70_v22 }
   0xa   :  { %vm106_vm0 = vcmp.gt.f32.partialorder %v103_v24, 1.0  ;;  %v50_v29 = vrot.slane %v42_v25, %v49_v15  ;;  %v80_v30 = vcombine.low %v74_v23, %v78_v26 }
   0xb   :  { %v129_v32 = vsel %vm106_vm0, 1.0, %v133_v31  ;;  %v57_v33 = vrot.slane %v43_v27, %v49_v15  ;;  %v87_v34 = vrot.slane %v79_v28, %v49_v15 }
   0xc   :  { %109 = vst [vmem:[%s202_s5] sm:$0xff] %v129_v32  ;;  %v110_v36 = vsub.f32 1.0, %v129_v32  ;;  %v112_v37 = vmul.f32 0.0, %v129_v32  ;;  %v94_v39 = vrot.slane %v80_v30, %v49_v15 }
   0xd   :  { %v58_v40 = vcombine.low %v50_v29, %v57_v33 }
   0xe   :  { %v111_v41 = vmul.f32 %v110_v36, %v103_v24  ;;  %v95_v42 = vcombine.low %v87_v34, %v94_v39 }
   0xf   :  { %v60_v43 = vsub.f32 %v23_v38, %v58_v40 }
  0x10   :  { %v113_v45 = vadd.f32 %v112_v37, %v111_v41 }
  0x11   :  { %v97_v46 = vmul.f32 %v95_v42, %v60_v43 }
  0x12   :  { %114 = vst [vmem:[%s204_s6] sm:$0xff] %v113_v45 }
  0x13   :  { %v115_v47 = vadd.f32 %v105_v44, %v97_v46 }
  0x15   :  { %116 = vst [vmem:[%s205_s7] sm:$0xff] %v115_v47 }

// kernel: closed_call.458
= control target key start
LH: loop header
LB: loop body
LE: loop exit
PB: predicated region body
PF: predicated region fallthrough
CT: control target
= control target key end

     0   :  { %s1110_s9 = smov 0   ;;  %s1112_s10 = smov 0   ;;  %s1389_s0 = inlined_call_operand.vmem [shape: bf16[16,2304], index: 0, kind: input, shape index: {}]   ;;  %s1390_s1 = inlined_call_operand.vmem [shape: bf16[2304,512], index: 1, kind: input, shape index: {}]   ;;  %s1391_s2 = inlined_call_operand.vmem [shape: f32[16,512], index: 2, kind: output, shape index: {}]  }
   0x1   :  { %s1114_s11 = smov 0   ;;  %s1116_s12 = smov 0  }
   0x2   :  { %s1118_s13 = smov 0   ;;  %s1120_s14 = smov 0  }
   0x3   :  { %s1122_s15 = smov 0   ;;  %s1124_s16 = smov 0  }
   0x4   :  { %s1126_s17 = smov 0   ;;  %s1128_s18 = smov 0  }
   0x5   :  { %s1130_s19 = smov 0  }
   0x6 LB: > { %s806_s20 = sadd.s32 4294967295, %s1092_s19   ;;  %s24_s21 = sadd.s32 1, %s1084_s17  ;;  %s1092_s19 = sphi %s1130_s19, %s12_s19   ;;  %s1088_s18 = sphi %s1128_s18, %s1410_s18   ;;  %s1084_s17 = sphi %s1126_s17, %s1409_s17   ;;  %s1080_s16 = sphi %s1124_s16, %s1408_s16   ;;  %s1076_s15 = sphi %s1122_s15, %s1407_s15   ;;  %s1072_s14 = sphi %s1120_s14, %s1406_s14   ;;  %s1068_s13 = sphi %s1118_s13, %s1405_s13   ;;  %s1064_s12 = sphi %s1116_s12, %s1404_s12   ;;  %s1060_s11 = sphi %s1114_s11, %s1403_s11   ;;  %s1056_s10 = sphi %s1112_s10, %s1402_s10   ;;  %s1052_s9 = sphi %s1110_s9, %s1401_s9  }
   0x7   : > { %p25_p0 = scmp.ge.s32.totalorder %s24_s21, 9  ;;  %s27_s22 = sadd.s32 1, %s1088_s18 }
   0x8   : > { %s40_s23 = sadd.s32 1, %s1072_s14  ;;  %p47_p1 = scmp.ne.s32.totalorder %s1072_s14, %s1068_s13 }
   0x9   : > { %s1412_s21 = smov (%p25_p0, %s24_s21), 0  ;;  %s1414_s22 = smov (!%p25_p0, %s27_s22), %s1088_s18 }
   0xa   : > { %1394 = sst [smem:[#allocation6_spill]] %s1412_s21  ;;  %s36_s24 = ssub.s32 %s1084_s17, %s1412_s21 }
   0xb   : > { %p48_p2 = scmp.eq.s32.totalorder %s1092_s19, 0  ;;  %p29_p3 = scmp.ge.s32.totalorder %s1414_s22, 2 }
   0xc   : > { %p38_p4 = scmp.eq.s32.totalorder %s36_s24, 0  ;;  %s68_s26 = sadd.s32 1, %s1064_s12 }
   0xd   : > { %p1177_p5 = por %p48_p2, %p47_p1  ;;  %s1416_s22 = smov (%p29_p3, %s1414_s22), 0 }
   0xe   : > { %1396 = sst [smem:[#allocation7_spill]] %s1416_s22  ;;  %s64_s28 = ssub.s32 %s1088_s18, %s1416_s22 }
   0xf   : > { %s1185_s27 = scalar_select %p38_p4, %s1072_s14, %s40_s23  }
  0x10   : > { %p75_p6 = scmp.ne.s32.totalorder %s1064_s12, %s1060_s11  ;;  %s65_s29 = sor.u32 %s64_s28, %s36_s24 }
  0x11   : > { %p94_p7 = scmp.eq.s32.totalorder %s64_s28, 0  ;;  %p66_p8 = scmp.eq.s32.totalorder %s65_s29, 0 }
  0x12   : > { %p1191_p9 = por %p75_p6, %p48_p2  ;;  %s96_s3 = sadd.s32 1, %s1056_s10 }
  0x13   : > { %p106_p10 = scmp.ne.s32.totalorder %s1056_s10, %s1052_s9  ;;  %p107_p11 = scmp.eq.s32.totalorder %s806_s20, 17 }
  0x14   : > { %s1199_s4 = scalar_select %p66_p8, %s1064_s12, %s68_s26  }
  0x15   : > { %s1202_s5 = scalar_select %p94_p7, %s1056_s10, %s96_s3  }
  0x16   : > { %p1204_p12 = por %p107_p11, %p106_p10  ;;  %p809_p13 = scmp.ge.s32.totalorder %s1092_s19, 18 }
  0x18   : > { %129 = sbr.rel (%p809_p13) target bundleno = 61 (0x3d), region = 16 }
  0x1f   : > { %132 = sbr.rel (!%p1177_p5) target bundleno = 38 (0x26), region = 20  ;;  %s134_s7 = sand.u32 (%p1177_p5), 1, %s1072_s14  }
  0x20   : > { %s863_s8 = sshll.u32 (%p1177_p5), %s1084_s17, 3  ;;  %s810_s23 = sshll.u32 (%p1177_p5), %s134_s7, 4 }
  0x21   : > { %s142_s28 = scalar_lea.vmem (%p1177_p5), %s1389_s0, %s863_s8  ;;  %s136_s20 = scalar_lea.vmem (%p1177_p5), [#allocation3], %s810_s23 }
  0x22   : > { %v172_v0 = vld [vmem:[%s142_s28] sm:$0xff] (%p1177_p5)  ;;  %v174_v1 = vld [vmem:[%s142_s28 + $0x48] sm:$0xff] (%p1177_p5) }
  0x23   : > { %173 = vst [vmem:[%s136_s20] sm:$0xff] (%p1177_p5), %v172_v0  ;;  %175 = vst [vmem:[%s136_s20 + $0x8] sm:$0xff] (%p1177_p5), %v174_v1 }
  0x26 PF: > { %181 = sbr.rel (!%p1191_p9) target bundleno = 61 (0x3d), region = 58  ;;  %s183_s25 = sand.u32 (%p1191_p9), 1, %s1064_s12  }
  0x27   : > { %s815_s29 = sshll.u32 (%p1191_p9), %s1088_s18, 1  ;;  %s813_s3 = sshll.u32 (%p1191_p9), %s183_s25, 8 }
  0x28   : > { %s864_s7 = sshll.u32 (%p1191_p9), %s1084_s17, 7  ;;  %s1229_s30 = scalar_lea.vmem (%p1191_p9), [#allocation4], %s813_s3 }
  0x29   : > { %s189_s22 = sadd.s32 (%p1191_p9), %s864_s7, %s815_s29 }
  0x2a   : > { %s817_s21 = sshll.u32 (%p1191_p9), %s189_s22, 2 }
  0x2b   : > { %s1224_s26 = scalar_lea.vmem (%p1191_p9), %s1390_s1, %s817_s21 }
  0x2c   : > { %v281_v2 = vld [vmem:[%s1224_s26] sm:$0xff] (%p1191_p9)  ;;  %v283_v3 = vld [vmem:[%s1224_s26 + $0x10] sm:$0xff] (%p1191_p9) }
  0x2d   : > { %v285_v4 = vld [vmem:[%s1224_s26 + $0x20] sm:$0xff]  ;;  %282 = vst [vmem:[%s1229_s30] sm:$0xff] %v281_v2  ;;  %284 = vst [vmem:[%s1229_s30 + $0x8] sm:$0xff] %v283_v3  ;;  %v287_v5 = vld [vmem:[%s1224_s26 + $0x30] sm:$0xff] }
  0x2e   : > { %286 = vst [vmem:[%s1229_s30 + $0x10] sm:$0xff] %v285_v4  ;;  %v289_v6 = vld [vmem:[%s1224_s26 + $0x40] sm:$0xff]  ;;  %v291_v7 = vld [vmem:[%s1224_s26 + $0x50] sm:$0xff]  ;;  %288 = vst [vmem:[%s1229_s30 + $0x18] sm:$0xff] %v287_v5 }
  0x2f   : > { %290 = vst [vmem:[%s1229_s30 + $0x20] sm:$0xff] %v289_v6  ;;  %292 = vst [vmem:[%s1229_s30 + $0x28] sm:$0xff] %v291_v7  ;;  %v293_v8 = vld [vmem:[%s1224_s26 + $0x60] sm:$0xff]  ;;  %v295_v9 = vld [vmem:[%s1224_s26 + $0x70] sm:$0xff] }
  0x30   : > { %v297_v10 = vld [vmem:[%s1224_s26 + $0x80] sm:$0xff]  ;;  %294 = vst [vmem:[%s1229_s30 + $0x30] sm:$0xff] %v293_v8  ;;  %296 = vst [vmem:[%s1229_s30 + $0x38] sm:$0xff] %v295_v9  ;;  %v299_v11 = vld [vmem:[%s1224_s26 + $0x90] sm:$0xff] }
  0x31   : > { %298 = vst [vmem:[%s1229_s30 + $0x40] sm:$0xff] %v297_v10  ;;  %v301_v12 = vld [vmem:[%s1224_s26 + $0xa0] sm:$0xff]  ;;  %v303_v13 = vld [vmem:[%s1224_s26 + $0xb0] sm:$0xff]  ;;  %300 = vst [vmem:[%s1229_s30 + $0x48] sm:$0xff] %v299_v11 }
  0x32   : > { %302 = vst [vmem:[%s1229_s30 + $0x50] sm:$0xff] %v301_v12  ;;  %304 = vst [vmem:[%s1229_s30 + $0x58] sm:$0xff] %v303_v13  ;;  %v305_v14 = vld [vmem:[%s1224_s26 + $0xc0] sm:$0xff]  ;;  %v307_v15 = vld [vmem:[%s1224_s26 + $0xd0] sm:$0xff] }
  0x33   : > { %v309_v16 = vld [vmem:[%s1224_s26 + $0xe0] sm:$0xff]  ;;  %306 = vst [vmem:[%s1229_s30 + $0x60] sm:$0xff] %v305_v14  ;;  %308 = vst [vmem:[%s1229_s30 + $0x68] sm:$0xff] %v307_v15  ;;  %v311_v17 = vld [vmem:[%s1224_s26 + $0xf0] sm:$0xff] }
  0x34   : > { %310 = vst [vmem:[%s1229_s30 + $0x70] sm:$0xff] %v309_v16  ;;  %v313_v18 = vld [vmem:[%s1224_s26 + $0x100] sm:$0xff]  ;;  %v315_v19 = vld [vmem:[%s1224_s26 + $0x110] sm:$0xff]  ;;  %312 = vst [vmem:[%s1229_s30 + $0x78] sm:$0xff] %v311_v17 }
  0x35   : > { %314 = vst [vmem:[%s1229_s30 + $0x80] sm:$0xff] %v313_v18  ;;  %316 = vst [vmem:[%s1229_s30 + $0x88] sm:$0xff] %v315_v19  ;;  %v317_v20 = vld [vmem:[%s1224_s26 + $0x120] sm:$0xff]  ;;  %v319_v21 = vld [vmem:[%s1224_s26 + $0x130] sm:$0xff] }
  0x36   : > { %v321_v22 = vld [vmem:[%s1224_s26 + $0x140] sm:$0xff]  ;;  %318 = vst [vmem:[%s1229_s30 + $0x90] sm:$0xff] %v317_v20  ;;  %320 = vst [vmem:[%s1229_s30 + $0x98] sm:$0xff] %v319_v21  ;;  %v323_v23 = vld [vmem:[%s1224_s26 + $0x150] sm:$0xff] }
  0x37   : > { %322 = vst [vmem:[%s1229_s30 + $0xa0] sm:$0xff] %v321_v22  ;;  %v325_v24 = vld [vmem:[%s1224_s26 + $0x160] sm:$0xff]  ;;  %v327_v25 = vld [vmem:[%s1224_s26 + $0x170] sm:$0xff]  ;;  %324 = vst [vmem:[%s1229_s30 + $0xa8] sm:$0xff] %v323_v23 }
  0x38   : > { %326 = vst [vmem:[%s1229_s30 + $0xb0] sm:$0xff] %v325_v24  ;;  %328 = vst [vmem:[%s1229_s30 + $0xb8] sm:$0xff] %v327_v25  ;;  %v329_v26 = vld [vmem:[%s1224_s26 + $0x180] sm:$0xff]  ;;  %v331_v27 = vld [vmem:[%s1224_s26 + $0x190] sm:$0xff] }
  0x39   : > { %v333_v28 = vld [vmem:[%s1224_s26 + $0x1a0] sm:$0xff]  ;;  %330 = vst [vmem:[%s1229_s30 + $0xc0] sm:$0xff] %v329_v26  ;;  %332 = vst [vmem:[%s1229_s30 + $0xc8] sm:$0xff] %v331_v27  ;;  %v335_v29 = vld [vmem:[%s1224_s26 + $0x1b0] sm:$0xff] }
  0x3a   : > { %334 = vst [vmem:[%s1229_s30 + $0xd0] sm:$0xff] %v333_v28  ;;  %v337_v30 = vld [vmem:[%s1224_s26 + $0x1c0] sm:$0xff]  ;;  %v339_v31 = vld [vmem:[%s1224_s26 + $0x1d0] sm:$0xff]  ;;  %336 = vst [vmem:[%s1229_s30 + $0xd8] sm:$0xff] %v335_v29 }
  0x3b   : > { %338 = vst [vmem:[%s1229_s30 + $0xe0] sm:$0xff] %v337_v30  ;;  %340 = vst [vmem:[%s1229_s30 + $0xe8] sm:$0xff] %v339_v31  ;;  %v341_v32 = vld [vmem:[%s1224_s26 + $0x1e0] sm:$0xff]  ;;  %v343_v33 = vld [vmem:[%s1224_s26 + $0x1f0] sm:$0xff] }
  0x3c   : > { %342 = vst [vmem:[%s1229_s30 + $0xf0] sm:$0xff] %v341_v32  ;;  %344 = vst [vmem:[%s1229_s30 + $0xf8] sm:$0xff] %v343_v33 }
  0x3d PF: > { %p818_p0 = scmp.ge.s32.totalorder %s1092_s19, 1  ;;  %p349_p1 = scmp.lt.s32.totalorder %s1092_s19, 19 }
  0x3f   : > { %p350_p2 = pnand %p818_p0, %p349_p1 }
  0x40   : > { %s356_s21 = sand.u32 (!%p350_p2), 1, %s1068_s13   ;;  %s363_s22 = sand.u32 (!%p350_p2), 1, %s1060_s11  }
  0x41   : > { %353 = sbr.rel (%p350_p2) target bundleno = 378 (0x17a), region = 96  ;;  %s1296_s23 = sshll.u32 (!%p350_p2), %s356_s21, 4 }
  0x42   : > { %s820_s28 = sshll.u32 (!%p350_p2), %s363_s22, 8  ;;  %s384_s20 = sand.u32 (!%p350_p2), 1, %s1052_s9  }
  0x43   : > { %s821_s25 = sshll.u32 (!%p350_p2), %s384_s20, 5  ;;  %s358_s29 = scalar_lea.vmem (!%p350_p2), [#allocation3], %s1296_s23 }
  0x44   : > { %s1300_s3 = scalar_lea.vmem (!%p350_p2), [#allocation4], %s820_s28  ;;  %s1302_s7 = scalar_lea.vmem (!%p350_p2), [#allocation5], %s821_s25 }
  0x45   : > { %p822_p3 = scmp.ne.s32.totalorder (!%p350_p2), %s1076_s15, 0 }
  0x48   : > { %396 = sbr.rel (%p822_p3) target bundleno = 79 (0x4f), region = 108  ;;  %v1094_v34 = vmov (!%p822_p3), 0.0  }
  0x49   : > { %397 = vst [vmem:[#allocation2] sm:$0xff] (!%p822_p3), %v1094_v34  ;;  %398 = vst [vmem:[#allocation2 + $0x8] sm:$0xff] (!%p822_p3), %v1094_v34 }
  0x4a   : > { %399 = vst [vmem:[#allocation2 + $0x10] sm:$0xff] (!%p822_p3), %v1094_v34  ;;  %400 = vst [vmem:[#allocation2 + $0x18] sm:$0xff] (!%p822_p3), %v1094_v34 }
  0x4f PF: > { %v955_v35 = vld [vmem:[%s1300_s3 + $0x4] ss:$8 sps:$4 sm:$0xff]   ;;  %v957_v36 = vld [vmem:[%s1300_s3] ss:$8 sps:$4 sm:$0xff]   ;;  %v958_v37 = vld [vmem:[%s1300_s3 + $0x14] ss:$8 sps:$4 sm:$0xff]  }
  0x50   : > { %609 = vmatprep.subr.bf16.mxu0 %v955_v35  ;;  %v960_v38 = vld [vmem:[%s1300_s3 + $0x10] ss:$8 sps:$4 sm:$0xff]   ;;  %v961_v39 = vld [vmem:[%s1300_s3 + $0x24] ss:$8 sps:$4 sm:$0xff]   ;;  %v963_v40 = vld [vmem:[%s1300_s3 + $0x20] ss:$8 sps:$4 sm:$0xff]  }
  0x51   : > { %610 = vmatpush1.bf16.msra.mxu0 %v957_v36  ;;  %v964_v41 = vld [vmem:[%s1300_s3 + $0x34] ss:$8 sps:$4 sm:$0xff]   ;;  %v966_v42 = vld [vmem:[%s1300_s3 + $0x30] ss:$8 sps:$4 sm:$0xff]   ;;  %v967_v43 = vld [vmem:[%s1300_s3 + $0x44] ss:$8 sps:$4 sm:$0xff]  }
  0x52   : > { %611 = vmatprep.subr.bf16.mxu0 %v958_v37  ;;  %v969_v44 = vld [vmem:[%s1300_s3 + $0x40] ss:$8 sps:$4 sm:$0xff]   ;;  %v970_v45 = vld [vmem:[%s1300_s3 + $0x54] ss:$8 sps:$4 sm:$0xff]   ;;  %v972_v46 = vld [vmem:[%s1300_s3 + $0x50] ss:$8 sps:$4 sm:$0xff]  }
  0x53   : > { %v973_v47 = vld [vmem:[%s1300_s3 + $0x64] ss:$8 sps:$4 sm:$0xff]   ;;  %v975_v49 = vld [vmem:[%s1300_s3 + $0x60] ss:$8 sps:$4 sm:$0xff]   ;;  %v976_v50 = vld [vmem:[%s1300_s3 + $0x74] ss:$8 sps:$4 sm:$0xff]  }
  0x54   : > { %v1005_v48 = vld [vmem:[%s358_s29 + $0x4] ss:$8 sps:$4 sm:$0xff]   ;;  %v978_v51 = vld [vmem:[%s1300_s3 + $0x70] ss:$8 sps:$4 sm:$0xff]   ;;  %v981_v53 = vld [vmem:[%s1300_s3 + $0x80] ss:$8 sps:$4 sm:$0xff]  }
  0x55   : > { %612 = vmatpush1.bf16.msra.mxu0 %v960_v38  ;;  %641 = vmatprep.mubr.bf16.mxu0 %v1005_v48  ;;  %v979_v52 = vld [vmem:[%s1300_s3 + $0x84] ss:$8 sps:$4 sm:$0xff]   ;;  %v982_v54 = vld [vmem:[%s1300_s3 + $0x94] ss:$8 sps:$4 sm:$0xff]   ;;  %v984_v55 = vld [vmem:[%s1300_s3 + $0x90] ss:$8 sps:$4 sm:$0xff]  }
  0x56   : > { %613 = vmatprep.subr.bf16.mxu0 %v961_v39  ;;  %v985_v56 = vld [vmem:[%s1300_s3 + $0xa4] ss:$8 sps:$4 sm:$0xff]   ;;  %v987_v57 = vld [vmem:[%s1300_s3 + $0xa0] ss:$8 sps:$4 sm:$0xff]   ;;  %v988_v58 = vld [vmem:[%s1300_s3 + $0xb4] ss:$8 sps:$4 sm:$0xff]  }
  0x57   : > { %v990_v59 = vld [vmem:[%s1300_s3 + $0xb0] ss:$8 sps:$4 sm:$0xff]   ;;  %v991_v60 = vld [vmem:[%s1300_s3 + $0xc4] ss:$8 sps:$4 sm:$0xff]   ;;  %v993_v61 = vld [vmem:[%s1300_s3 + $0xc0] ss:$8 sps:$4 sm:$0xff]  }
  0x58   : > { %v994_v62 = vld [vmem:[%s1300_s3 + $0xd4] ss:$8 sps:$4 sm:$0xff]   ;;  %v996_v63 = vld [vmem:[%s1300_s3 + $0xd0] ss:$8 sps:$4 sm:$0xff]   ;;  %v997_v0 = vld [vmem:[%s1300_s3 + $0xe4] ss:$8 sps:$4 sm:$0xff]  }
  0x59   : > { %614 = vmatpush1.bf16.msra.mxu0 %v963_v40  ;;  %v999_v1 = vld [vmem:[%s1300_s3 + $0xe0] ss:$8 sps:$4 sm:$0xff]   ;;  %v1000_v2 = vld [vmem:[%s1300_s3 + $0xf4] ss:$8 sps:$4 sm:$0xff]   ;;  %v1002_v3 = vld [vmem:[%s1300_s3 + $0xf0] ss:$8 sps:$4 sm:$0xff]  }
  0x5a   : > { %615 = vmatprep.subr.bf16.mxu0 %v964_v41  ;;  %v1003_v4 = vld [vmem:[%s358_s29] ss:$8 sps:$4 sm:$0xff]   ;;  %p857_p4 = scmp.ne.s32.totalorder %s1076_s15, 8 }
  0x5b   : > { %v401_v5 = vld [vmem:[#allocation2] sm:$0xff]  ;;  %v402_v6 = vld [vmem:[#allocation2 + $0x8] sm:$0xff]  ;;  %v403_v8 = vld [vmem:[#allocation2 + $0x10] sm:$0xff] }
  0x5c   : > { %v404_v11 = vld [vmem:[#allocation2 + $0x18] sm:$0xff] }
  0x5d   : > { %616 = vmatpush1.bf16.msra.mxu0 %v966_v42 }
  0x5e   : > { %617 = vmatprep.subr.bf16.mxu0 %v967_v43 }
  0x61   : > { %618 = vmatpush1.bf16.msra.mxu0 %v969_v44 }
  0x62   : > { %619 = vmatprep.subr.bf16.mxu0 %v970_v45 }
  0x65   : > { %620 = vmatpush1.bf16.msra.mxu0 %v972_v46 }
  0x66   : > { %621 = vmatprep.subr.bf16.mxu0 %v973_v47 }
  0x69   : > { %622 = vmatpush1.bf16.msra.mxu0 %v975_v49 }
  0x6a   : > { %623 = vmatprep.subr.bf16.mxu0 %v976_v50 }
  0x6d   : > { %624 = vmatpush1.bf16.msra.mxu0 %v978_v51 }
  0x6e   : > { %625 = vmatprep.subr.bf16.mxu0 %v979_v52 }
  0x71   : > { %626 = vmatpush1.bf16.msra.mxu0 %v981_v53 }
  0x72   : > { %627 = vmatprep.subr.bf16.mxu0 %v982_v54 }
  0x75   : > { %628 = vmatpush1.bf16.msra.mxu0 %v984_v55 }
  0x76   : > { %629 = vmatprep.subr.bf16.mxu0 %v985_v56 }
  0x79   : > { %630 = vmatpush1.bf16.msra.mxu0 %v987_v57 }
  0x7a   : > { %631 = vmatprep.subr.bf16.mxu0 %v988_v58 }
  0x7d   : > { %632 = vmatpush1.bf16.msra.mxu0 %v990_v59 }
  0x7e   : > { %633 = vmatprep.subr.bf16.mxu0 %v991_v60 }
  0x81   : > { %634 = vmatpush1.bf16.msra.mxu0 %v993_v61 }
  0x82   : > { %635 = vmatprep.subr.bf16.mxu0 %v994_v62 }
  0x85   : > { %636 = vmatpush1.bf16.msra.mxu0 %v996_v63 }
  0x86   : > { %637 = vmatprep.subr.bf16.mxu0 %v997_v0 }
  0x89   : > { %638 = vmatpush1.bf16.msra.mxu0 %v999_v1 }
  0x8a   : > { %639 = vmatprep.subr.bf16.mxu0 %v1000_v2 }
  0x8d   : > { %640 = vmatpush1.bf16.msra.mxu0 %v1002_v3 }
  0x90   : > { %642 = vmatmul.mubr.bf16.vlgmr.msra.gmra.mrb[0].mxu0 %v1003_v4 }
 0x163   : > { %v643_v7 = vpop.f32.mrb[0].mxu0  ;;  %663 = sbr.rel (%p857_p4) target bundleno = 370 (0x172), region = 112 }
 0x164   : > { %v652_v9 = vadd.f32 %v643_v7, %v401_v5  ;;  %v645_v10 = vpop.f32.mrb[1].mxu0 }
 0x165   : > { %v653_v12 = vadd.f32 %v645_v10, %v402_v6  ;;  %v647_v13 = vpop.f32.mrb[2].mxu0 }
 0x166   : > { %656 = vst [vmem:[#allocation2] sm:$0xff] %v652_v9  ;;  %v654_v14 = vadd.f32 %v647_v13, %v403_v8  ;;  %v649_v15 = vpop.f32.mrb[3].mxu0 }
 0x167   : > { %657 = vst [vmem:[#allocation2 + $0x8] sm:$0xff] %v653_v12  ;;  %v655_v16 = vadd.f32 %v649_v15, %v404_v11 }
 0x168   : > { %658 = vst [vmem:[#allocation2 + $0x10] sm:$0xff] %v654_v14 }
 0x169   : > { %659 = vst [vmem:[#allocation2 + $0x18] sm:$0xff] %v655_v16 }
 0x16d   : > { %v664_v17 = vld [vmem:[#allocation2] sm:$0xff] }
 0x16e   : > { %v665_v18 = vld [vmem:[#allocation2 + $0x8] sm:$0xff]  ;;  %668 = vst [vmem:[%s1302_s7] sm:$0xff] %v664_v17 }
 0x16f   : > { %v666_v19 = vld [vmem:[#allocation2 + $0x10] sm:$0xff]  ;;  %669 = vst [vmem:[%s1302_s7 + $0x8] sm:$0xff] %v665_v18 }
 0x170   : > { %670 = vst [vmem:[%s1302_s7 + $0x10] sm:$0xff] %v666_v19  ;;  %v667_v20 = vld [vmem:[#allocation2 + $0x18] sm:$0xff] }
 0x171   : > { %671 = vst [vmem:[%s1302_s7 + $0x18] sm:$0xff] %v667_v20 }
 0x172 PF: > { %678 = sbr.rel (!%p1204_p12) target bundleno = 378 (0x17a), region = 116  ;;  %s865_s9 = sshll.u32 (%p1204_p12), %s1080_s16, 4 }
 0x173   : > { %s684_s15 = scalar_lea.vmem (%p1204_p12), %s1391_s2, %s865_s9 }
 0x175   : > { %v697_v21 = vld [vmem:[%s1302_s7] sm:$0xff] (%p1204_p12) }
 0x176   : > { %v699_v22 = vld [vmem:[%s1302_s7 + $0x8] sm:$0xff] (%p1204_p12)  ;;  %698 = vst [vmem:[%s684_s15] sm:$0xff] (%p1204_p12), %v697_v21 }
 0x177   : > { %v701_v23 = vld [vmem:[%s1302_s7 + $0x10] sm:$0xff] (%p1204_p12)  ;;  %700 = vst [vmem:[%s684_s15 + $0x8] sm:$0xff] (%p1204_p12), %v699_v22 }
 0x178   : > { %v703_v24 = vld [vmem:[%s1302_s7 + $0x18] sm:$0xff] (%p1204_p12)  ;;  %702 = vst [vmem:[%s684_s15 + $0x20] sm:$0xff] (%p1204_p12), %v701_v23 }
 0x179   : > { %704 = vst [vmem:[%s684_s15 + $0x28] sm:$0xff] %v703_v24 }
 0x17a PF: > { %s12_s19 = sadd.s32 1, %s1092_s19   ;;  %s1399_s6 = sld [smem:[#allocation6_spill]] }
 0x17b   : > { %p9_p5 = scmp.ge.s32.totalorder %s12_s19, 20   ;;  %s1400_s24 = sld [smem:[#allocation7_spill]] }
 0x17c   : > { %s1401_s9 = smov %s1056_s10  ;;  %s1402_s10 = smov %s1202_s5 }
 0x17d   : > { %s1403_s11 = smov %s1064_s12  ;;  %s1404_s12 = smov %s1199_s4 }
 0x17e   : > { %s1405_s13 = smov %s1072_s14  ;;  %s1406_s14 = smov %s1185_s27 }
 0x17f   : > { %s1407_s15 = smov %s1084_s17  ;;  %s1408_s16 = smov %s1088_s18 }
 0x180   : > { %s1409_s17 = smov %s1399_s6  ;;  %11 = sbr.rel (!%p9_p5) target bundleno = 6 (0x6), region = 178 }
 0x181   : > { %s1410_s18 = smov %s1400_s24 }

// kernel: closed_call.465
= control target key start
LH: loop header
LB: loop body
LE: loop exit
PB: predicated region body
PF: predicated region fallthrough
CT: control target
= control target key end

     0   :  { %v35_v0 = vlaneseq  ;;  %v217_v3 = vmov 1983009808   ;;  %v218_v37 = vmov 0.0   ;;  %s312_s6 = inlined_call_operand.vmem [shape: f32[2,512], index: 6, kind: input, shape index: {}, may-alias: {6,9}]   ;;  %s313_s7 = inlined_call_operand.vmem [shape: f32[2,512], index: 7, kind: input, shape index: {}, may-alias: {7,10}]   ;;  %s314_s2 = inlined_call_operand.vmem [shape: f32[1,512], index: 2, kind: input, shape index: {}]   ;;  %s315_s3 = inlined_call_operand.vmem [shape: f32[1,512], index: 3, kind: input, shape index: {}]   ;;  %s316_s4 = inlined_call_operand.vmem [shape: f32[1,512], index: 4, kind: input, shape index: {}]   ;;  %s317_s5 = inlined_call_operand.vmem [shape: f32[1,512], index: 5, kind: input, shape index: {}]   ;;  %s318_s8 = inlined_call_operand.vmem [shape: f32[2,512], index: 8, kind: output, shape index: {0}]   ;;  %s319_s0 = inlined_call_operand.vmem [shape: f32[2,512], index: 0, kind: input, shape index: {}]   ;;  %s320_s1 = inlined_call_operand.vmem [shape: f32[2,512], index: 1, kind: input, shape index: {}]   ;;  %s321_s9 = inlined_call_operand.vmem [shape: f32[2,512], index: 9, kind: output, shape index: {1}, may-alias: {6,9}]   ;;  %s322_s10 = inlined_call_operand.vmem [shape: f32[2,512], index: 10, kind: output, shape index: {2}, may-alias: {7,10}]  }
   0x1   :  { %v183_v1 = vld [vmem:[%s312_s6] sm:$0xff]  ;;  %v54_v4 = vunpack.c.l.s4 %v217_v3 }
   0x2   :  { %v280_v2 = vld [vmem:[%s313_s7] sm:$0xff]  ;;  %v185_v5 = vsub.f32 0.0, %v183_v1  ;;  %v36_v6 = vshrl.u32 %v35_v0, 7 }
   0x3   :  { %v33_v7 = vld [vmem:[%s314_s2] sm:$0xf]  ;;  %v55_v8 = vunpack.c.0.s8 %v54_v4 }
   0x4   :  { %v186_v9 = vadd.f32 %v185_v5, %v280_v2  ;;  %v37_v10 = vsub.s32 0, %v36_v6  ;;  %v41_v11 = vsub.s32 1, %v36_v6  ;;  %v45_v12 = vsub.s32 2, %v36_v6  ;;  %v70_v13 = vld [vmem:[%s315_s3] sm:$0xf] }
   0x5   :  { %v49_v14 = vsub.s32 3, %v36_v6  ;;  %v58_v15 = vsub.s32 %v55_v8, %v36_v6  ;;  %v108_v16 = vld [vmem:[%s316_s4] sm:$0xf] }
   0x6   :  { %v187_v17 = vmul.f32 0.1, %v186_v9  ;;  %v38_v18 = vrot.slane %v33_v7, %v37_v10  ;;  %v42_v19 = vrot.slane %v33_v7, %v41_v11  ;;  %v46_v20 = vrot.slane %v33_v7, %v45_v12  ;;  %v145_v36 = vld [vmem:[%s317_s5] sm:$0xf] }
   0x7   :  { %v50_v21 = vrot.slane %v33_v7, %v49_v14  ;;  %v75_v22 = vrot.slane %v70_v13, %v37_v10  ;;  %v79_v23 = vrot.slane %v70_v13, %v41_v11  ;;  %v83_v24 = vrot.slane %v70_v13, %v45_v12  ;;  %v32_v51 = vld [vmem:[%s319_s0] sm:$0xff] }
   0x8   :  { %v188_v25 = vadd.f32 %v187_v17, %v183_v1  ;;  %v51_v26 = vcombine.low %v38_v18, %v42_v19  ;;  %v87_v27 = vrot.slane %v70_v13, %v49_v14  ;;  %v113_v28 = vrot.slane %v108_v16, %v37_v10  ;;  %v107_v57 = vld [vmem:[%s320_s1] sm:$0xff] }
   0x9   :  { %v52_v29 = vcombine.low %v46_v20, %v50_v21  ;;  %v88_v30 = vcombine.low %v75_v22, %v79_v23  ;;  %v117_v31 = vrot.slane %v108_v16, %v41_v11  ;;  %v121_v32 = vrot.slane %v108_v16, %v45_v12 }
   0xa   :  { %vm191_vm0 = vcmp.gt.f32.partialorder %v188_v25, 1.0  ;;  %v59_v33 = vrot.slane %v51_v26, %v58_v15  ;;  %v89_v34 = vcombine.low %v83_v24, %v87_v27  ;;  %v125_v35 = vrot.slane %v108_v16, %v49_v14 }
   0xb   :  { %v214_v38 = vsel %vm191_vm0, 1.0, %v218_v37  ;;  %v66_v39 = vrot.slane %v52_v29, %v58_v15  ;;  %v96_v40 = vrot.slane %v88_v30, %v58_v15  ;;  %v126_v41 = vcombine.low %v113_v28, %v117_v31 }
   0xc   :  { %194 = vst [vmem:[%s318_s8] sm:$0xff] %v214_v38  ;;  %v195_v42 = vsub.f32 1.0, %v214_v38  ;;  %v197_v43 = vmul.f32 0.0, %v214_v38  ;;  %v103_v44 = vrot.slane %v89_v34, %v58_v15  ;;  %v127_v45 = vcombine.low %v121_v32, %v125_v35 }
   0xd   :  { %v67_v46 = vcombine.low %v59_v33, %v66_v39  ;;  %v134_v47 = vrot.slane %v126_v41, %v58_v15  ;;  %v150_v48 = vrot.slane %v145_v36, %v37_v10  ;;  %v154_v49 = vrot.slane %v145_v36, %v41_v11 }
   0xe   :  { %v196_v50 = vmul.f32 %v195_v42, %v188_v25  ;;  %v141_v52 = vrot.slane %v127_v45, %v58_v15  ;;  %v158_v53 = vrot.slane %v145_v36, %v45_v12  ;;  %v162_v54 = vrot.slane %v145_v36, %v49_v14 }
   0xf   :  { %v163_v55 = vcombine.low %v150_v48, %v154_v49  ;;  %v69_v59 = vsub.f32 %v32_v51, %v67_v46  ;;  %v104_v60 = vcombine.low %v96_v40, %v103_v44  ;;  %v189_v1 = vmul.f32 0.2, %v280_v2 }
  0x10   :  { %v198_v56 = vadd.f32 %v197_v43, %v196_v50  ;;  %v142_v58 = vcombine.low %v134_v47, %v141_v52  ;;  %v164_v61 = vcombine.low %v158_v53, %v162_v54 }
  0x11   :  { %v171_v62 = vrot.slane %v163_v55, %v58_v15  ;;  %v106_v3 = vmul.f32 %v104_v60, %v69_v59  ;;  %v190_v6 = vsub.f32 %v280_v2, %v189_v1 }
  0x12   :  { %199 = vst [vmem:[%s321_s9] sm:$0xff] %v198_v56  ;;  %v144_v63 = vsub.f32 %v107_v57, %v142_v58  ;;  %v178_v0 = vrot.slane %v164_v61, %v58_v15 }
  0x14   :  { %v179_v4 = vcombine.low %v171_v62, %v178_v0 }
  0x16   :  { %v181_v5 = vmul.f32 %v179_v4, %v144_v63 }
  0x18   :  { %v182_v7 = vadd.f32 %v181_v5, %v106_v3 }
  0x1a   :  { %v200_v8 = vadd.f32 %v190_v6, %v182_v7 }
  0x1c   :  { %201 = vst [vmem:[%s322_s10] sm:$0xff] %v200_v8 }

// kernel: closed_call.461
= control target key start
LH: loop header
LB: loop body
LE: loop exit
PB: predicated region body
PF: predicated region fallthrough
CT: control target
= control target key end

     0   :  { %s1110_s9 = smov 0   ;;  %s1112_s10 = smov 0   ;;  %s1389_s0 = inlined_call_operand.vmem [shape: bf16[16,4608], index: 0, kind: input, shape index: {}]   ;;  %s1390_s1 = inlined_call_operand.vmem [shape: bf16[4608,512], index: 1, kind: input, shape index: {}]   ;;  %s1391_s2 = inlined_call_operand.vmem [shape: f32[16,512], index: 2, kind: output, shape index: {}]  }
   0x1   :  { %s1114_s11 = smov 0   ;;  %s1116_s12 = smov 0  }
   0x2   :  { %s1118_s13 = smov 0   ;;  %s1120_s14 = smov 0  }
   0x3   :  { %s1122_s15 = smov 0   ;;  %s1124_s16 = smov 0  }
   0x4   :  { %s1126_s17 = smov 0   ;;  %s1128_s18 = smov 0  }
   0x5   :  { %s1130_s19 = smov 0  }
   0x6 LB: > { %s806_s20 = sadd.s32 4294967295, %s1092_s19   ;;  %s24_s21 = sadd.s32 1, %s1084_s17  ;;  %s1092_s19 = sphi %s1130_s19, %s12_s19   ;;  %s1088_s18 = sphi %s1128_s18, %s1410_s18   ;;  %s1084_s17 = sphi %s1126_s17, %s1409_s17   ;;  %s1080_s16 = sphi %s1124_s16, %s1408_s16   ;;  %s1076_s15 = sphi %s1122_s15, %s1407_s15   ;;  %s1072_s14 = sphi %s1120_s14, %s1406_s14   ;;  %s1068_s13 = sphi %s1118_s13, %s1405_s13   ;;  %s1064_s12 = sphi %s1116_s12, %s1404_s12   ;;  %s1060_s11 = sphi %s1114_s11, %s1403_s11   ;;  %s1056_s10 = sphi %s1112_s10, %s1402_s10   ;;  %s1052_s9 = sphi %s1110_s9, %s1401_s9  }
   0x7   : > { %p25_p0 = scmp.ge.s32.totalorder %s24_s21, 18  ;;  %s27_s22 = sadd.s32 1, %s1088_s18 }
   0x8   : > { %s40_s23 = sadd.s32 1, %s1072_s14  ;;  %p47_p1 = scmp.ne.s32.totalorder %s1072_s14, %s1068_s13 }
   0x9   : > { %s1412_s21 = smov (%p25_p0, %s24_s21), 0  ;;  %s1414_s22 = smov (!%p25_p0, %s27_s22), %s1088_s18 }
   0xa   : > { %1394 = sst [smem:[#allocation6_spill]] %s1412_s21  ;;  %s36_s24 = ssub.s32 %s1084_s17, %s1412_s21 }
   0xb   : > { %p48_p2 = scmp.eq.s32.totalorder %s1092_s19, 0  ;;  %p29_p3 = scmp.ge.s32.totalorder %s1414_s22, 2 }
   0xc   : > { %p38_p4 = scmp.eq.s32.totalorder %s36_s24, 0  ;;  %s68_s26 = sadd.s32 1, %s1064_s12 }
   0xd   : > { %p1177_p5 = por %p48_p2, %p47_p1  ;;  %s1416_s22 = smov (%p29_p3, %s1414_s22), 0 }
   0xe   : > { %1396 = sst [smem:[#allocation7_spill]] %s1416_s22  ;;  %s64_s28 = ssub.s32 %s1088_s18, %s1416_s22 }
   0xf   : > { %s1185_s27 = scalar_select %p38_p4, %s1072_s14, %s40_s23  }
  0x10   : > { %p75_p6 = scmp.ne.s32.totalorder %s1064_s12, %s1060_s11  ;;  %s65_s29 = sor.u32 %s64_s28, %s36_s24 }
  0x11   : > { %p94_p7 = scmp.eq.s32.totalorder %s64_s28, 0  ;;  %p66_p8 = scmp.eq.s32.totalorder %s65_s29, 0 }
  0x12   : > { %p1191_p9 = por %p75_p6, %p48_p2  ;;  %s96_s3 = sadd.s32 1, %s1056_s10 }
  0x13   : > { %p106_p10 = scmp.ne.s32.totalorder %s1056_s10, %s1052_s9  ;;  %p107_p11 = scmp.eq.s32.totalorder %s806_s20, 35 }
  0x14   : > { %s1199_s4 = scalar_select %p66_p8, %s1064_s12, %s68_s26  }
  0x15   : > { %s1202_s5 = scalar_select %p94_p7, %s1056_s10, %s96_s3  }
  0x16   : > { %p1204_p12 = por %p107_p11, %p106_p10  ;;  %p809_p13 = scmp.ge.s32.totalorder %s1092_s19, 36 }
  0x18   : > { %129 = sbr.rel (%p809_p13) target bundleno = 61 (0x3d), region = 16 }
  0x1f   : > { %132 = sbr.rel (!%p1177_p5) target bundleno = 38 (0x26), region = 20  ;;  %s134_s7 = sand.u32 (%p1177_p5), 1, %s1072_s14  }
  0x20   : > { %s863_s8 = sshll.u32 (%p1177_p5), %s1084_s17, 3  ;;  %s810_s23 = sshll.u32 (%p1177_p5), %s134_s7, 4 }
  0x21   : > { %s142_s28 = scalar_lea.vmem (%p1177_p5), %s1389_s0, %s863_s8  ;;  %s136_s20 = scalar_lea.vmem (%p1177_p5), [#allocation3], %s810_s23 }
  0x22   : > { %v172_v0 = vld [vmem:[%s142_s28] sm:$0xff] (%p1177_p5)  ;;  %v174_v1 = vld [vmem:[%s142_s28 + $0x90] sm:$0xff] (%p1177_p5) }
  0x23   : > { %173 = vst [vmem:[%s136_s20] sm:$0xff] (%p1177_p5), %v172_v0  ;;  %175 = vst [vmem:[%s136_s20 + $0x8] sm:$0xff] (%p1177_p5), %v174_v1 }
  0x26 PF: > { %181 = sbr.rel (!%p1191_p9) target bundleno = 61 (0x3d), region = 58  ;;  %s183_s25 = sand.u32 (%p1191_p9), 1, %s1064_s12  }
  0x27   : > { %s815_s29 = sshll.u32 (%p1191_p9), %s1088_s18, 1  ;;  %s813_s3 = sshll.u32 (%p1191_p9), %s183_s25, 8 }
  0x28   : > { %s864_s7 = sshll.u32 (%p1191_p9), %s1084_s17, 7  ;;  %s1229_s30 = scalar_lea.vmem (%p1191_p9), [#allocation4], %s813_s3 }
  0x29   : > { %s189_s22 = sadd.s32 (%p1191_p9), %s864_s7, %s815_s29 }
  0x2a   : > { %s817_s21 = sshll.u32 (%p1191_p9), %s189_s22, 2 }
  0x2b   : > { %s1224_s26 = scalar_lea.vmem (%p1191_p9), %s1390_s1, %s817_s21 }
  0x2c   : > { %v281_v2 = vld [vmem:[%s1224_s26] sm:$0xff] (%p1191_p9)  ;;  %v283_v3 = vld [vmem:[%s1224_s26 + $0x10] sm:$0xff] (%p1191_p9) }
  0x2d   : > { %v285_v4 = vld [vmem:[%s1224_s26 + $0x20] sm:$0xff]  ;;  %282 = vst [vmem:[%s1229_s30] sm:$0xff] %v281_v2  ;;  %284 = vst [vmem:[%s1229_s30 + $0x8] sm:$0xff] %v283_v3  ;;  %v287_v5 = vld [vmem:[%s1224_s26 + $0x30] sm:$0xff] }
  0x2e   : > { %286 = vst [vmem:[%s1229_s30 + $0x10] sm:$0xff] %v285_v4  ;;  %v289_v6 = vld [vmem:[%s1224_s26 + $0x40] sm:$0xff]  ;;  %v291_v7 = vld [vmem:[%s1224_s26 + $0x50] sm:$0xff]  ;;  %288 = vst [vmem:[%s1229_s30 + $0x18] sm:$0xff] %v287_v5 }
  0x2f   : > { %290 = vst [vmem:[%s1229_s30 + $0x20] sm:$0xff] %v289_v6  ;;  %292 = vst [vmem:[%s1229_s30 + $0x28] sm:$0xff] %v291_v7  ;;  %v293_v8 = vld [vmem:[%s1224_s26 + $0x60] sm:$0xff]  ;;  %v295_v9 = vld [vmem:[%s1224_s26 + $0x70] sm:$0xff] }
  0x30   : > { %v297_v10 = vld [vmem:[%s1224_s26 + $0x80] sm:$0xff]  ;;  %294 = vst [vmem:[%s1229_s30 + $0x30] sm:$0xff] %v293_v8  ;;  %296 = vst [vmem:[%s1229_s30 + $0x38] sm:$0xff] %v295_v9  ;;  %v299_v11 = vld [vmem:[%s1224_s26 + $0x90] sm:$0xff] }
  0x31   : > { %298 = vst [vmem:[%s1229_s30 + $0x40] sm:$0xff] %v297_v10  ;;  %v301_v12 = vld [vmem:[%s1224_s26 + $0xa0] sm:$0xff]  ;;  %v303_v13 = vld [vmem:[%s1224_s26 + $0xb0] sm:$0xff]  ;;  %300 = vst [vmem:[%s1229_s30 + $0x48] sm:$0xff] %v299_v11 }
  0x32   : > { %302 = vst [vmem:[%s1229_s30 + $0x50] sm:$0xff] %v301_v12  ;;  %304 = vst [vmem:[%s1229_s30 + $0x58] sm:$0xff] %v303_v13  ;;  %v305_v14 = vld [vmem:[%s1224_s26 + $0xc0] sm:$0xff]  ;;  %v307_v15 = vld [vmem:[%s1224_s26 + $0xd0] sm:$0xff] }
  0x33   : > { %v309_v16 = vld [vmem:[%s1224_s26 + $0xe0] sm:$0xff]  ;;  %306 = vst [vmem:[%s1229_s30 + $0x60] sm:$0xff] %v305_v14  ;;  %308 = vst [vmem:[%s1229_s30 + $0x68] sm:$0xff] %v307_v15  ;;  %v311_v17 = vld [vmem:[%s1224_s26 + $0xf0] sm:$0xff] }
  0x34   : > { %310 = vst [vmem:[%s1229_s30 + $0x70] sm:$0xff] %v309_v16  ;;  %v313_v18 = vld [vmem:[%s1224_s26 + $0x100] sm:$0xff]  ;;  %v315_v19 = vld [vmem:[%s1224_s26 + $0x110] sm:$0xff]  ;;  %312 = vst [vmem:[%s1229_s30 + $0x78] sm:$0xff] %v311_v17 }
  0x35   : > { %314 = vst [vmem:[%s1229_s30 + $0x80] sm:$0xff] %v313_v18  ;;  %316 = vst [vmem:[%s1229_s30 + $0x88] sm:$0xff] %v315_v19  ;;  %v317_v20 = vld [vmem:[%s1224_s26 + $0x120] sm:$0xff]  ;;  %v319_v21 = vld [vmem:[%s1224_s26 + $0x130] sm:$0xff] }
  0x36   : > { %v321_v22 = vld [vmem:[%s1224_s26 + $0x140] sm:$0xff]  ;;  %318 = vst [vmem:[%s1229_s30 + $0x90] sm:$0xff] %v317_v20  ;;  %320 = vst [vmem:[%s1229_s30 + $0x98] sm:$0xff] %v319_v21  ;;  %v323_v23 = vld [vmem:[%s1224_s26 + $0x150] sm:$0xff] }
  0x37   : > { %322 = vst [vmem:[%s1229_s30 + $0xa0] sm:$0xff] %v321_v22  ;;  %v325_v24 = vld [vmem:[%s1224_s26 + $0x160] sm:$0xff]  ;;  %v327_v25 = vld [vmem:[%s1224_s26 + $0x170] sm:$0xff]  ;;  %324 = vst [vmem:[%s1229_s30 + $0xa8] sm:$0xff] %v323_v23 }
  0x38   : > { %326 = vst [vmem:[%s1229_s30 + $0xb0] sm:$0xff] %v325_v24  ;;  %328 = vst [vmem:[%s1229_s30 + $0xb8] sm:$0xff] %v327_v25  ;;  %v329_v26 = vld [vmem:[%s1224_s26 + $0x180] sm:$0xff]  ;;  %v331_v27 = vld [vmem:[%s1224_s26 + $0x190] sm:$0xff] }
  0x39   : > { %v333_v28 = vld [vmem:[%s1224_s26 + $0x1a0] sm:$0xff]  ;;  %330 = vst [vmem:[%s1229_s30 + $0xc0] sm:$0xff] %v329_v26  ;;  %332 = vst [vmem:[%s1229_s30 + $0xc8] sm:$0xff] %v331_v27  ;;  %v335_v29 = vld [vmem:[%s1224_s26 + $0x1b0] sm:$0xff] }
  0x3a   : > { %334 = vst [vmem:[%s1229_s30 + $0xd0] sm:$0xff] %v333_v28  ;;  %v337_v30 = vld [vmem:[%s1224_s26 + $0x1c0] sm:$0xff]  ;;  %v339_v31 = vld [vmem:[%s1224_s26 + $0x1d0] sm:$0xff]  ;;  %336 = vst [vmem:[%s1229_s30 + $0xd8] sm:$0xff] %v335_v29 }
  0x3b   : > { %338 = vst [vmem:[%s1229_s30 + $0xe0] sm:$0xff] %v337_v30  ;;  %340 = vst [vmem:[%s1229_s30 + $0xe8] sm:$0xff] %v339_v31  ;;  %v341_v32 = vld [vmem:[%s1224_s26 + $0x1e0] sm:$0xff]  ;;  %v343_v33 = vld [vmem:[%s1224_s26 + $0x1f0] sm:$0xff] }
  0x3c   : > { %342 = vst [vmem:[%s1229_s30 + $0xf0] sm:$0xff] %v341_v32  ;;  %344 = vst [vmem:[%s1229_s30 + $0xf8] sm:$0xff] %v343_v33 }
  0x3d PF: > { %p818_p0 = scmp.ge.s32.totalorder %s1092_s19, 1  ;;  %p349_p1 = scmp.lt.s32.totalorder %s1092_s19, 37 }
  0x3f   : > { %p350_p2 = pnand %p818_p0, %p349_p1 }
  0x40   : > { %s356_s21 = sand.u32 (!%p350_p2), 1, %s1068_s13   ;;  %s363_s22 = sand.u32 (!%p350_p2), 1, %s1060_s11  }
  0x41   : > { %353 = sbr.rel (%p350_p2) target bundleno = 378 (0x17a), region = 96  ;;  %s1296_s23 = sshll.u32 (!%p350_p2), %s356_s21, 4 }
  0x42   : > { %s820_s28 = sshll.u32 (!%p350_p2), %s363_s22, 8  ;;  %s384_s20 = sand.u32 (!%p350_p2), 1, %s1052_s9  }
  0x43   : > { %s821_s25 = sshll.u32 (!%p350_p2), %s384_s20, 5  ;;  %s358_s29 = scalar_lea.vmem (!%p350_p2), [#allocation3], %s1296_s23 }
  0x44   : > { %s1300_s3 = scalar_lea.vmem (!%p350_p2), [#allocation4], %s820_s28  ;;  %s1302_s7 = scalar_lea.vmem (!%p350_p2), [#allocation5], %s821_s25 }
  0x45   : > { %p822_p3 = scmp.ne.s32.totalorder (!%p350_p2), %s1076_s15, 0 }
  0x48   : > { %396 = sbr.rel (%p822_p3) target bundleno = 79 (0x4f), region = 108  ;;  %v1094_v34 = vmov (!%p822_p3), 0.0  }
  0x49   : > { %397 = vst [vmem:[#allocation2] sm:$0xff] (!%p822_p3), %v1094_v34  ;;  %398 = vst [vmem:[#allocation2 + $0x8] sm:$0xff] (!%p822_p3), %v1094_v34 }
  0x4a   : > { %399 = vst [vmem:[#allocation2 + $0x10] sm:$0xff] (!%p822_p3), %v1094_v34  ;;  %400 = vst [vmem:[#allocation2 + $0x18] sm:$0xff] (!%p822_p3), %v1094_v34 }
  0x4f PF: > { %v955_v35 = vld [vmem:[%s1300_s3 + $0x4] ss:$8 sps:$4 sm:$0xff]   ;;  %v957_v36 = vld [vmem:[%s1300_s3] ss:$8 sps:$4 sm:$0xff]   ;;  %v958_v37 = vld [vmem:[%s1300_s3 + $0x14] ss:$8 sps:$4 sm:$0xff]  }
  0x50   : > { %609 = vmatprep.subr.bf16.mxu0 %v955_v35  ;;  %v960_v38 = vld [vmem:[%s1300_s3 + $0x10] ss:$8 sps:$4 sm:$0xff]   ;;  %v961_v39 = vld [vmem:[%s1300_s3 + $0x24] ss:$8 sps:$4 sm:$0xff]   ;;  %v963_v40 = vld [vmem:[%s1300_s3 + $0x20] ss:$8 sps:$4 sm:$0xff]  }
  0x51   : > { %610 = vmatpush1.bf16.msra.mxu0 %v957_v36  ;;  %v964_v41 = vld [vmem:[%s1300_s3 + $0x34] ss:$8 sps:$4 sm:$0xff]   ;;  %v966_v42 = vld [vmem:[%s1300_s3 + $0x30] ss:$8 sps:$4 sm:$0xff]   ;;  %v967_v43 = vld [vmem:[%s1300_s3 + $0x44] ss:$8 sps:$4 sm:$0xff]  }
  0x52   : > { %611 = vmatprep.subr.bf16.mxu0 %v958_v37  ;;  %v969_v44 = vld [vmem:[%s1300_s3 + $0x40] ss:$8 sps:$4 sm:$0xff]   ;;  %v970_v45 = vld [vmem:[%s1300_s3 + $0x54] ss:$8 sps:$4 sm:$0xff]   ;;  %v972_v46 = vld [vmem:[%s1300_s3 + $0x50] ss:$8 sps:$4 sm:$0xff]  }
  0x53   : > { %v973_v47 = vld [vmem:[%s1300_s3 + $0x64] ss:$8 sps:$4 sm:$0xff]   ;;  %v975_v49 = vld [vmem:[%s1300_s3 + $0x60] ss:$8 sps:$4 sm:$0xff]   ;;  %v976_v50 = vld [vmem:[%s1300_s3 + $0x74] ss:$8 sps:$4 sm:$0xff]  }
  0x54   : > { %v1005_v48 = vld [vmem:[%s358_s29 + $0x4] ss:$8 sps:$4 sm:$0xff]   ;;  %v978_v51 = vld [vmem:[%s1300_s3 + $0x70] ss:$8 sps:$4 sm:$0xff]   ;;  %v981_v53 = vld [vmem:[%s1300_s3 + $0x80] ss:$8 sps:$4 sm:$0xff]  }
  0x55   : > { %612 = vmatpush1.bf16.msra.mxu0 %v960_v38  ;;  %641 = vmatprep.mubr.bf16.mxu0 %v1005_v48  ;;  %v979_v52 = vld [vmem:[%s1300_s3 + $0x84] ss:$8 sps:$4 sm:$0xff]   ;;  %v982_v54 = vld [vmem:[%s1300_s3 + $0x94] ss:$8 sps:$4 sm:$0xff]   ;;  %v984_v55 = vld [vmem:[%s1300_s3 + $0x90] ss:$8 sps:$4 sm:$0xff]  }
  0x56   : > { %613 = vmatprep.subr.bf16.mxu0 %v961_v39  ;;  %v985_v56 = vld [vmem:[%s1300_s3 + $0xa4] ss:$8 sps:$4 sm:$0xff]   ;;  %v987_v57 = vld [vmem:[%s1300_s3 + $0xa0] ss:$8 sps:$4 sm:$0xff]   ;;  %v988_v58 = vld [vmem:[%s1300_s3 + $0xb4] ss:$8 sps:$4 sm:$0xff]  }
  0x57   : > { %v990_v59 = vld [vmem:[%s1300_s3 + $0xb0] ss:$8 sps:$4 sm:$0xff]   ;;  %v991_v60 = vld [vmem:[%s1300_s3 + $0xc4] ss:$8 sps:$4 sm:$0xff]   ;;  %v993_v61 = vld [vmem:[%s1300_s3 + $0xc0] ss:$8 sps:$4 sm:$0xff]  }
  0x58   : > { %v994_v62 = vld [vmem:[%s1300_s3 + $0xd4] ss:$8 sps:$4 sm:$0xff]   ;;  %v996_v63 = vld [vmem:[%s1300_s3 + $0xd0] ss:$8 sps:$4 sm:$0xff]   ;;  %v997_v0 = vld [vmem:[%s1300_s3 + $0xe4] ss:$8 sps:$4 sm:$0xff]  }
  0x59   : > { %614 = vmatpush1.bf16.msra.mxu0 %v963_v40  ;;  %v999_v1 = vld [vmem:[%s1300_s3 + $0xe0] ss:$8 sps:$4 sm:$0xff]   ;;  %v1000_v2 = vld [vmem:[%s1300_s3 + $0xf4] ss:$8 sps:$4 sm:$0xff]   ;;  %v1002_v3 = vld [vmem:[%s1300_s3 + $0xf0] ss:$8 sps:$4 sm:$0xff]  }
  0x5a   : > { %615 = vmatprep.subr.bf16.mxu0 %v964_v41  ;;  %v1003_v4 = vld [vmem:[%s358_s29] ss:$8 sps:$4 sm:$0xff]   ;;  %p857_p4 = scmp.ne.s32.totalorder %s1076_s15, 17 }
  0x5b   : > { %v401_v5 = vld [vmem:[#allocation2] sm:$0xff]  ;;  %v402_v6 = vld [vmem:[#allocation2 + $0x8] sm:$0xff]  ;;  %v403_v8 = vld [vmem:[#allocation2 + $0x10] sm:$0xff] }
  0x5c   : > { %v404_v11 = vld [vmem:[#allocation2 + $0x18] sm:$0xff] }
  0x5d   : > { %616 = vmatpush1.bf16.msra.mxu0 %v966_v42 }
  0x5e   : > { %617 = vmatprep.subr.bf16.mxu0 %v967_v43 }
  0x61   : > { %618 = vmatpush1.bf16.msra.mxu0 %v969_v44 }
  0x62   : > { %619 = vmatprep.subr.bf16.mxu0 %v970_v45 }
  0x65   : > { %620 = vmatpush1.bf16.msra.mxu0 %v972_v46 }
  0x66   : > { %621 = vmatprep.subr.bf16.mxu0 %v973_v47 }
  0x69   : > { %622 = vmatpush1.bf16.msra.mxu0 %v975_v49 }
  0x6a   : > { %623 = vmatprep.subr.bf16.mxu0 %v976_v50 }
  0x6d   : > { %624 = vmatpush1.bf16.msra.mxu0 %v978_v51 }
  0x6e   : > { %625 = vmatprep.subr.bf16.mxu0 %v979_v52 }
  0x71   : > { %626 = vmatpush1.bf16.msra.mxu0 %v981_v53 }
  0x72   : > { %627 = vmatprep.subr.bf16.mxu0 %v982_v54 }
  0x75   : > { %628 = vmatpush1.bf16.msra.mxu0 %v984_v55 }
  0x76   : > { %629 = vmatprep.subr.bf16.mxu0 %v985_v56 }
  0x79   : > { %630 = vmatpush1.bf16.msra.mxu0 %v987_v57 }
  0x7a   : > { %631 = vmatprep.subr.bf16.mxu0 %v988_v58 }
  0x7d   : > { %632 = vmatpush1.bf16.msra.mxu0 %v990_v59 }
  0x7e   : > { %633 = vmatprep.subr.bf16.mxu0 %v991_v60 }
  0x81   : > { %634 = vmatpush1.bf16.msra.mxu0 %v993_v61 }
  0x82   : > { %635 = vmatprep.subr.bf16.mxu0 %v994_v62 }
  0x85   : > { %636 = vmatpush1.bf16.msra.mxu0 %v996_v63 }
  0x86   : > { %637 = vmatprep.subr.bf16.mxu0 %v997_v0 }
  0x89   : > { %638 = vmatpush1.bf16.msra.mxu0 %v999_v1 }
  0x8a   : > { %639 = vmatprep.subr.bf16.mxu0 %v1000_v2 }
  0x8d   : > { %640 = vmatpush1.bf16.msra.mxu0 %v1002_v3 }
  0x90   : > { %642 = vmatmul.mubr.bf16.vlgmr.msra.gmra.mrb[0].mxu0 %v1003_v4 }
 0x163   : > { %v643_v7 = vpop.f32.mrb[0].mxu0  ;;  %663 = sbr.rel (%p857_p4) target bundleno = 370 (0x172), region = 112 }
 0x164   : > { %v652_v9 = vadd.f32 %v643_v7, %v401_v5  ;;  %v645_v10 = vpop.f32.mrb[1].mxu0 }
 0x165   : > { %v653_v12 = vadd.f32 %v645_v10, %v402_v6  ;;  %v647_v13 = vpop.f32.mrb[2].mxu0 }
 0x166   : > { %656 = vst [vmem:[#allocation2] sm:$0xff] %v652_v9  ;;  %v654_v14 = vadd.f32 %v647_v13, %v403_v8  ;;  %v649_v15 = vpop.f32.mrb[3].mxu0 }
 0x167   : > { %657 = vst [vmem:[#allocation2 + $0x8] sm:$0xff] %v653_v12  ;;  %v655_v16 = vadd.f32 %v649_v15, %v404_v11 }
 0x168   : > { %658 = vst [vmem:[#allocation2 + $0x10] sm:$0xff] %v654_v14 }
 0x169   : > { %659 = vst [vmem:[#allocation2 + $0x18] sm:$0xff] %v655_v16 }
 0x16d   : > { %v664_v17 = vld [vmem:[#allocation2] sm:$0xff] }
 0x16e   : > { %v665_v18 = vld [vmem:[#allocation2 + $0x8] sm:$0xff]  ;;  %668 = vst [vmem:[%s1302_s7] sm:$0xff] %v664_v17 }
 0x16f   : > { %v666_v19 = vld [vmem:[#allocation2 + $0x10] sm:$0xff]  ;;  %669 = vst [vmem:[%s1302_s7 + $0x8] sm:$0xff] %v665_v18 }
 0x170   : > { %670 = vst [vmem:[%s1302_s7 + $0x10] sm:$0xff] %v666_v19  ;;  %v667_v20 = vld [vmem:[#allocation2 + $0x18] sm:$0xff] }
 0x171   : > { %671 = vst [vmem:[%s1302_s7 + $0x18] sm:$0xff] %v667_v20 }
 0x172 PF: > { %678 = sbr.rel (!%p1204_p12) target bundleno = 378 (0x17a), region = 116  ;;  %s865_s9 = sshll.u32 (%p1204_p12), %s1080_s16, 4 }
 0x173   : > { %s684_s15 = scalar_lea.vmem (%p1204_p12), %s1391_s2, %s865_s9 }
 0x175   : > { %v697_v21 = vld [vmem:[%s1302_s7] sm:$0xff] (%p1204_p12) }
 0x176   : > { %v699_v22 = vld [vmem:[%s1302_s7 + $0x8] sm:$0xff] (%p1204_p12)  ;;  %698 = vst [vmem:[%s684_s15] sm:$0xff] (%p1204_p12), %v697_v21 }
 0x177   : > { %v701_v23 = vld [vmem:[%s1302_s7 + $0x10] sm:$0xff] (%p1204_p12)  ;;  %700 = vst [vmem:[%s684_s15 + $0x8] sm:$0xff] (%p1204_p12), %v699_v22 }
 0x178   : > { %v703_v24 = vld [vmem:[%s1302_s7 + $0x18] sm:$0xff] (%p1204_p12)  ;;  %702 = vst [vmem:[%s684_s15 + $0x20] sm:$0xff] (%p1204_p12), %v701_v23 }
 0x179   : > { %704 = vst [vmem:[%s684_s15 + $0x28] sm:$0xff] %v703_v24 }
 0x17a PF: > { %s12_s19 = sadd.s32 1, %s1092_s19   ;;  %s1399_s6 = sld [smem:[#allocation6_spill]] }
 0x17b   : > { %p9_p5 = scmp.ge.s32.totalorder %s12_s19, 38   ;;  %s1400_s24 = sld [smem:[#allocation7_spill]] }
 0x17c   : > { %s1401_s9 = smov %s1056_s10  ;;  %s1402_s10 = smov %s1202_s5 }
 0x17d   : > { %s1403_s11 = smov %s1064_s12  ;;  %s1404_s12 = smov %s1199_s4 }
 0x17e   : > { %s1405_s13 = smov %s1072_s14  ;;  %s1406_s14 = smov %s1185_s27 }
 0x17f   : > { %s1407_s15 = smov %s1084_s17  ;;  %s1408_s16 = smov %s1088_s18 }
 0x180   : > { %s1409_s17 = smov %s1399_s6  ;;  %11 = sbr.rel (!%p9_p5) target bundleno = 6 (0x6), region = 178 }
 0x181   : > { %s1410_s18 = smov %s1400_s24 }

// kernel: closed_call.471
= control target key start
LH: loop header
LB: loop body
LE: loop exit
PB: predicated region body
PF: predicated region fallthrough
CT: control target
= control target key end

     0   :  { %v29_v0 = vlaneseq  ;;  %v137_v3 = vmov 1983009808   ;;  %v138_v31 = vmov 0.0   ;;  %s211_s4 = inlined_call_operand.vmem [shape: f32[2,512], index: 4, kind: input, shape index: {}, may-alias: {4,7}]   ;;  %s212_s5 = inlined_call_operand.vmem [shape: f32[2,512], index: 5, kind: input, shape index: {}, may-alias: {5,8}]   ;;  %s213_s2 = inlined_call_operand.vmem [shape: f32[1,512], index: 2, kind: input, shape index: {}]   ;;  %s214_s3 = inlined_call_operand.vmem [shape: f32[1,512], index: 3, kind: input, shape index: {}]   ;;  %s215_s6 = inlined_call_operand.vmem [shape: f32[2,512], index: 6, kind: output, shape index: {0}]   ;;  %s216_s0 = inlined_call_operand.vmem [shape: f32[2,512], index: 0, kind: input, shape index: {}]   ;;  %s217_s1 = inlined_call_operand.vmem [shape: f32[2,512], index: 1, kind: input, shape index: {}]   ;;  %s218_s7 = inlined_call_operand.vmem [shape: f32[2,512], index: 7, kind: output, shape index: {1}, may-alias: {4,7}]   ;;  %s219_s8 = inlined_call_operand.vmem [shape: f32[2,512], index: 8, kind: output, shape index: {2}, may-alias: {5,8}]  }
   0x1   :  { %v103_v1 = vld [vmem:[%s211_s4] sm:$0xff]  ;;  %v48_v4 = vunpack.c.l.s4 %v137_v3 }
   0x2   :  { %v104_v2 = vld [vmem:[%s212_s5] sm:$0xff]  ;;  %v105_v5 = vsub.f32 0.0, %v103_v1  ;;  %v30_v6 = vshrl.u32 %v29_v0, 7 }
   0x3   :  { %v27_v7 = vld [vmem:[%s213_s2] sm:$0xf]  ;;  %v49_v8 = vunpack.c.0.s8 %v48_v4  ;;  %v109_v40 = vmul.f32 0.2, %v104_v2 }
   0x4   :  { %v106_v9 = vadd.f32 %v105_v5, %v104_v2  ;;  %v31_v10 = vsub.s32 0, %v30_v6  ;;  %v35_v11 = vsub.s32 1, %v30_v6  ;;  %v39_v12 = vsub.s32 2, %v30_v6  ;;  %v64_v13 = vld [vmem:[%s214_s3] sm:$0xf] }
   0x5   :  { %v43_v14 = vsub.s32 3, %v30_v6  ;;  %v52_v15 = vsub.s32 %v49_v8, %v30_v6  ;;  %v26_v37 = vld [vmem:[%s216_s0] sm:$0xff]  ;;  %v110_v47 = vsub.f32 %v104_v2, %v109_v40 }
   0x6   :  { %v107_v16 = vmul.f32 0.1, %v106_v9  ;;  %v32_v17 = vrot.slane %v27_v7, %v31_v10  ;;  %v36_v18 = vrot.slane %v27_v7, %v35_v11  ;;  %v40_v19 = vrot.slane %v27_v7, %v39_v12  ;;  %v101_v45 = vld [vmem:[%s217_s1] sm:$0xff] }
   0x7   :  { %v44_v20 = vrot.slane %v27_v7, %v43_v14  ;;  %v69_v21 = vrot.slane %v64_v13, %v31_v10  ;;  %v73_v22 = vrot.slane %v64_v13, %v35_v11  ;;  %v77_v23 = vrot.slane %v64_v13, %v39_v12 }
   0x8   :  { %v108_v24 = vadd.f32 %v107_v16, %v103_v1  ;;  %v45_v25 = vcombine.low %v32_v17, %v36_v18  ;;  %v81_v26 = vrot.slane %v64_v13, %v43_v14 }
   0x9   :  { %v46_v27 = vcombine.low %v40_v19, %v44_v20  ;;  %v82_v28 = vcombine.low %v69_v21, %v73_v22 }
   0xa   :  { %vm111_vm0 = vcmp.gt.f32.partialorder %v108_v24, 1.0  ;;  %v53_v29 = vrot.slane %v45_v25, %v52_v15  ;;  %v83_v30 = vcombine.low %v77_v23, %v81_v26 }
   0xb   :  { %v134_v32 = vsel %vm111_vm0, 1.0, %v138_v31  ;;  %v60_v33 = vrot.slane %v46_v27, %v52_v15  ;;  %v90_v34 = vrot.slane %v82_v28, %v52_v15 }
   0xc   :  { %114 = vst [vmem:[%s215_s6] sm:$0xff] %v134_v32  ;;  %v115_v35 = vsub.f32 1.0, %v134_v32  ;;  %v117_v36 = vmul.f32 0.0, %v134_v32  ;;  %v97_v38 = vrot.slane %v83_v30, %v52_v15 }
   0xd   :  { %v61_v39 = vcombine.low %v53_v29, %v60_v33 }
   0xe   :  { %v116_v41 = vmul.f32 %v115_v35, %v108_v24  ;;  %v98_v42 = vcombine.low %v90_v34, %v97_v38 }
   0xf   :  { %v63_v43 = vsub.f32 %v26_v37, %v61_v39 }
  0x10   :  { %v118_v44 = vadd.f32 %v117_v36, %v116_v41 }
  0x11   :  { %v100_v46 = vmul.f32 %v98_v42, %v63_v43 }
  0x12   :  { %119 = vst [vmem:[%s218_s7] sm:$0xff] %v118_v44 }
  0x13   :  { %v102_v48 = vadd.f32 %v101_v45, %v100_v46 }
  0x15   :  { %v120_v49 = vadd.f32 %v110_v47, %v102_v48 }
  0x17   :  { %121 = vst [vmem:[%s219_s8] sm:$0xff] %v120_v49 }

// kernel: closed_call.472
= control target key start
LH: loop header
LB: loop body
LE: loop exit
PB: predicated region body
PF: predicated region fallthrough
CT: control target
= control target key end

     0   :  { %s193_s6 = smov 0   ;;  %s213_s0 = inlined_call_operand.vmem [shape: f32[2,1,512], index: 0, kind: input, shape index: {}]   ;;  %s214_s1 = inlined_call_operand.vmem [shape: f32[2,1,512], index: 1, kind: output, shape index: {}]  }
   0x1 LB: > { %s172_s7 = sadd.s32 4294967295, %s195_s6   ;;  %p176_p0 = scmp.ge.s32.totalorder %s195_s6, 1  ;;  %s195_s6 = sphi %s193_s6, %s11_s6  }
   0x2   : > { %p86_p1 = scmp.lt.s32.totalorder %s195_s6, 3 }
   0x4   : > { %p87_p2 = pnand %p176_p0, %p86_p1 }
   0x5   : > { %p104_p3 = scmp.lt.s32.totalorder (!%p87_p2), %s172_s7, 1  ;;  %v114_v0 = vlaneseq (!%p87_p2) }
   0x6   : > { %90 = sbr.rel (%p87_p2) target bundleno = 18 (0x12), region = 24 }
   0x7   : > { %vm116_vm0 = vcmp.lt.s32.totalorder (!%p87_p2), %v114_v0, 512 }
   0xd   : > { %s216_s7 = smov (!%p104_p3, %s172_s7), 1 }
   0xe   : > { %s177_s8 = sshll.u32 %s216_s7, 2 }
   0xf   : > { %s107_s11 = scalar_lea.vmem %s213_s0, %s177_s8  ;;  %s111_s14 = scalar_lea.vmem %s214_s1, %s177_s8 }
  0x10   : > { %v112_v1 = vld [vmem:[%s107_s11] sm:$0xf] }
  0x11   : > { %118 = vst.msk [vmem:[%s111_s14] sm:$0xf] %vm116_vm0, %v112_v1 }
  0x12 PF: > { %s11_s6 = sadd.s32 1, %s195_s6  }
  0x13   : > { %p8_p4 = scmp.ge.s32.totalorder %s11_s6, 4  }
  0x15   :  { %10 = sbr.rel (!%p8_p4) target bundleno = 1 (0x1), region = 54 }

</bundles_post_ra>
